<compile_context>
chip_gen: v5e
topology: v5e:2x2
jax: 0.10.0
libtpu: 0.0.40
codegen_flags: <defaults>
</compile_context>

<pallas_src>
import functools

import jax
import jax.numpy as jnp
from jax.experimental import pallas as pl
from jax.experimental.pallas import tpu as pltpu  # noqa: F401  (TPU backend assumed)

EMBED_DIM = 32
NUM_FILTERS = 64
CONV_OUT = NUM_FILTERS * 3          # 192  (kernel sizes 2, 3, 4)
HIDDEN = 128
NUM_LAYERS = 2
NUM_CLASSES = 2
BN_EPS = 1e-5
MAX_TAP = 4                         # widest conv kernel


# ----------------------------------------------------------------------------
# Fused kernel: conv+BN -> BiLSTM x2 -> time-max -> MLP -> softmax
# ----------------------------------------------------------------------------
def fused_forward_kernel(xp_ref, wc_ref, cb_ref, bn_ref,
                         wih1_ref, whh1_ref, b1_ref,
                         wih2_ref, whh2_ref, b2_ref,
                         fw1_ref, fb1_ref, fw2_ref, fb2_ref, fw3_ref, fb3_ref,
                         out_ref, *, L, B):
    H = HIDDEN

    # ---------------- Conv (4 tap-matmuls, 192 channels at once) -------------
    # xp_ref: ((L+3)*B, E) time-major flattened, 1 zero-pad row-block left,
    # 2 right.  Tap o contributes xp[(t+o)*B + b] @ Wc[o] to output (t, b).
    xp = xp_ref[...]
    acc = jnp.zeros((L * B, CONV_OUT), jnp.float32)
    for o in range(MAX_TAP):
        acc = acc + jnp.dot(xp[o * B:(o + L) * B, :], wc_ref[o],
                            preferred_element_type=jnp.float32)
    acc = jnp.maximum(acc + cb_ref[...], 0.0)                 # bias + ReLU
    # BatchNorm1d (eval mode, running statistics): rows of bn = g, b, mean, var
    scale = bn_ref[0:1, :] * jax.lax.rsqrt(bn_ref[3:4, :] + BN_EPS)
    shift = bn_ref[1:2, :] - bn_ref[2:3, :] * scale
    feats = acc * scale + shift                               # (L*B, 192)

    # ---------------- one bidirectional LSTM layer ----------------------------
    def bilstm_layer(x_flat, wih_ref, whh_ref, b_ref, collect_seq):
        # x_flat: (L*B, I) f32, time-major flattened.
        # Hoisted input projection for BOTH directions (fwd cols 0:4H, bwd 4H:8H).
        gx = jnp.dot(x_flat.astype(jnp.bfloat16), wih_ref[...],
                     preferred_element_type=jnp.float32) + b_ref[...]   # (L*B, 8H)
        whh_f = whh_ref[0]                                    # (H, 4H) bf16
        whh_b = whh_ref[1]

        h_f = jnp.zeros((B, H), jnp.float32)
        c_f = jnp.zeros((B, H), jnp.float32)
        h_b = jnp.zeros((B, H), jnp.float32)
        c_b = jnp.zeros((B, H), jnp.float32)
        max_f = jnp.full((B, H), -jnp.inf, jnp.float32)
        max_b = jnp.full((B, H), -jnp.inf, jnp.float32)
        fwd_seq = [None] * L
        bwd_seq = [None] * L

        def cell(gates, c):
            # PyTorch gate order: i, f, g, o
            i = jax.nn.sigmoid(gates[:, 0:H])
            f = jax.nn.sigmoid(gates[:, H:2 * H])
            g = jnp.tanh(gates[:, 2 * H:3 * H])
            o = jax.nn.sigmoid(gates[:, 3 * H:4 * H])
            c = f * c + i * g
            h = o * jnp.tanh(c)
            return h, c

        # Fully unrolled (L static); fwd handles time t, bwd handles L-1-t.
        for t in range(L):
            tb = L - 1 - t
            g_f = gx[t * B:(t + 1) * B, 0:4 * H] + jnp.dot(
                h_f.astype(jnp.bfloat16), whh_f, preferred_element_type=jnp.float32)
            g_b = gx[tb * B:(tb + 1) * B, 4 * H:8 * H] + jnp.dot(
                h_b.astype(jnp.bfloat16), whh_b, preferred_element_type=jnp.float32)
            h_f, c_f = cell(g_f, c_f)
            h_b, c_b = cell(g_b, c_b)
            if collect_seq:
                fwd_seq[t] = h_f
                bwd_seq[tb] = h_b
            else:
                max_f = jnp.maximum(max_f, h_f)
                max_b = jnp.maximum(max_b, h_b)

        if collect_seq:
            return jnp.concatenate(
                [jnp.concatenate(fwd_seq, axis=0),
                 jnp.concatenate(bwd_seq, axis=0)], axis=1)   # (L*B, 2H)
        return jnp.concatenate([max_f, max_b], axis=1)        # (B, 2H)

    seq1 = bilstm_layer(feats, wih1_ref, whh1_ref, b1_ref, collect_seq=True)
    # inter-layer LSTM dropout(0.5): identity at inference
    pooled = bilstm_layer(seq1, wih2_ref, whh2_ref, b2_ref, collect_seq=False)

    # ---------------- Head: 3-layer MLP (ReLU) + softmax ----------------------
    h1 = jnp.maximum(jnp.dot(pooled, fw1_ref[...],
                             preferred_element_type=jnp.float32) + fb1_ref[...], 0.0)
    h2 = jnp.maximum(jnp.dot(h1, fw2_ref[...],
                             preferred_element_type=jnp.float32) + fb2_ref[...], 0.0)
    logits = jnp.dot(h2, fw3_ref[...],
                     preferred_element_type=jnp.float32) + fb3_ref[...]
    z = logits - jnp.max(logits, axis=1, keepdims=True)
    e = jnp.exp(z)
    out_ref[...] = e / jnp.sum(e, axis=1, keepdims=True)


# ----------------------------------------------------------------------------
# Wrapper: single pallas_call for the whole forward
# ----------------------------------------------------------------------------
def fused_forward(xp_flat, p, L, B):
    kernel = functools.partial(fused_forward_kernel, L=L, B=B)
    return pl.pallas_call(
        kernel,
        out_shape=jax.ShapeDtypeStruct((B, NUM_CLASSES), jnp.float32),
    )(xp_flat, p['wc'], p['cb'], p['bn'],
      p['lstm'][0]['wih'], p['lstm'][0]['whh'], p['lstm'][0]['b'],
      p['lstm'][1]['wih'], p['lstm'][1]['whh'], p['lstm'][1]['b'],
      p['fc']['w1'], p['fc']['b1'], p['fc']['w2'], p['fc']['b2'],
      p['fc']['w3'], p['fc']['b3'])


@jax.jit
def forward(tokens, params):
    B, L = tokens.shape
    # TODO(synk): embedding gather (frozen-table lookup) stays in XLA glue.
    x_emb = params['emb'][tokens.T]                           # (L, B, E) time-major
    # embedding_dropout(0.5): identity at inference
    xp = jnp.pad(x_emb, ((1, 2), (0, 0), (0, 0)))             # shared zero pad for taps
    xp_flat = xp.reshape(((L + 3) * B, EMBED_DIM))
    # AdaptiveAvgPool1d(max_len): identity because L == max_len
    return fused_forward(xp_flat, params, L, B)


# ----------------------------------------------------------------------------
# Deterministic parameter initialization (shapes follow the nn.Module __init__)
# ----------------------------------------------------------------------------
def init_params(key, vocab_size, embedding_dim):
    ks = iter(jax.random.split(key, 64))

    def nrm(shape, scale=0.1):
        return (scale * jax.random.normal(next(ks), shape)).astype(jnp.float32)

    params = {}
    params['emb'] = nrm((vocab_size, embedding_dim), 0.5)      # frozen embedding

    # Conv1d(E, 64, k, padding='same') weights; torch (64, E, k) stored tap-major
    # channels-last (k, E, 64), merged into a zero-padded (4, E, 192) tensor so
    # the whole 192-channel conv is 4 tap-matmuls.  Tap offsets follow PyTorch
    # 'same' padding:  k=2 -> (0,1), k=3 -> (1,1), k=4 -> (1,2).
    w2 = nrm((2, embedding_dim, NUM_FILTERS))
    w3 = nrm((3, embedding_dim, NUM_FILTERS))
    w4 = nrm((4, embedding_dim, NUM_FILTERS))
    wc = jnp.zeros((MAX_TAP, embedding_dim, CONV_OUT), jnp.float32)
    wc = wc.at[1:3, :, 0:64].set(w2)      # k=2 taps land at offsets 1,2
    wc = wc.at[0:3, :, 64:128].set(w3)    # k=3 taps at offsets 0,1,2
    wc = wc.at[0:4, :, 128:192].set(w4)   # k=4 taps at offsets 0,1,2,3
    params['wc'] = wc
    params['cb'] = jnp.concatenate(
        [nrm((1, NUM_FILTERS)) for _ in range(3)], axis=1)     # (1, 192)

    gamma = 1.0 + nrm((1, CONV_OUT))
    beta = nrm((1, CONV_OUT))
    rmean = nrm((1, CONV_OUT))
    rvar = 0.5 + jax.random.uniform(next(ks), (1, CONV_OUT), dtype=jnp.float32)
    params['bn'] = jnp.concatenate([gamma, beta, rmean, rvar], axis=0)  # (4, 192)

    lstm = []
    for layer in range(NUM_LAYERS):
        in_dim = CONV_OUT if layer == 0 else 2 * HIDDEN
        wih_dirs, whh_dirs, b_dirs = [], [], []
        for _ in range(2):                                     # forward / backward
            wih_dirs.append(nrm((in_dim, 4 * HIDDEN)))         # torch (4H, I) transposed
            whh_dirs.append(nrm((HIDDEN, 4 * HIDDEN)))         # torch (4H, H) transposed
            b_dirs.append(nrm((1, 4 * HIDDEN)) + nrm((1, 4 * HIDDEN)))  # b_ih + b_hh
        lstm.append({
            'wih': jnp.concatenate(wih_dirs, axis=1).astype(jnp.bfloat16),  # (I, 8H)
            'whh': jnp.stack(whh_dirs, axis=0).astype(jnp.bfloat16),        # (2, H, 4H)
            'b':   jnp.concatenate(b_dirs, axis=1),                          # (1, 8H)
        })
    params['lstm'] = lstm

    params['fc'] = {
        'w1': nrm((2 * HIDDEN, 128)), 'b1': nrm((1, 128)),
        'w2': nrm((128, 64)), 'b2': nrm((1, 64)),
        'w3': nrm((64, NUM_CLASSES)), 'b3': nrm((1, NUM_CLASSES)),
    }
    return params


if __name__ == "__main__":
    vocab_size, embedding_dim, max_len, batch = 50, EMBED_DIM, 8, 2
    key = jax.random.PRNGKey(0)
    pkey, xkey = jax.random.split(key)
    params = init_params(pkey, vocab_size, embedding_dim)
    tokens = jax.random.randint(xkey, (batch, max_len), 0, vocab_size, dtype=jnp.int32)

    out = jax.block_until_ready(forward(tokens, params))

    assert out.shape == (batch, NUM_CLASSES), out.shape
    assert bool(jnp.all(jnp.isfinite(out)))
    # softmax rows should sum to ~1
    assert bool(jnp.all(jnp.abs(jnp.sum(out, axis=1) - 1.0) < 1e-4))
    print("KERNEL_OK")
</pallas_src>

<mosaic_0001>
module attributes {stable_mosaic.version = 11 : i64} {
  func.func @fused_forward_kernel(%arg0: memref<22x32xf32, #tpu.memory_space<vmem>>, %arg1: memref<4x32x192xf32, #tpu.memory_space<vmem>>, %arg2: memref<1x192xf32, #tpu.memory_space<vmem>>, %arg3: memref<4x192xf32, #tpu.memory_space<vmem>>, %arg4: memref<192x1024xbf16, #tpu.memory_space<vmem>>, %arg5: memref<2x128x512xbf16, #tpu.memory_space<vmem>>, %arg6: memref<1x1024xf32, #tpu.memory_space<vmem>>, %arg7: memref<256x1024xbf16, #tpu.memory_space<vmem>>, %arg8: memref<2x128x512xbf16, #tpu.memory_space<vmem>>, %arg9: memref<1x1024xf32, #tpu.memory_space<vmem>>, %arg10: memref<256x128xf32, #tpu.memory_space<vmem>>, %arg11: memref<1x128xf32, #tpu.memory_space<vmem>>, %arg12: memref<128x64xf32, #tpu.memory_space<vmem>>, %arg13: memref<1x64xf32, #tpu.memory_space<vmem>>, %arg14: memref<64x2xf32, #tpu.memory_space<vmem>>, %arg15: memref<1x2xf32, #tpu.memory_space<vmem>>, %arg16: memref<2x2xf32, #tpu.memory_space<vmem>>) attributes {dimension_semantics = [], scalar_prefetch = 0 : i64, scratch_operands = 0 : i64, tpu.core_type = #tpu.core_type<tc>} {
    %c0 = arith.constant 0 : index
    %c0_0 = arith.constant 0 : index
    %0 = vector.load %arg0[%c0, %c0_0] : memref<22x32xf32, #tpu.memory_space<vmem>>, vector<22x32xf32>
    %cst = arith.constant 0.000000e+00 : f32
    %1 = vector.broadcast %cst : f32 to vector<16x192xf32>
    %2 = vector.extract_strided_slice %0 {offsets = [0, 0], sizes = [16, 32], strides = [1, 1]} : vector<22x32xf32> to vector<16x32xf32>
    %c0_1 = arith.constant 0 : index
    %c0_2 = arith.constant 0 : index
    %c0_3 = arith.constant 0 : index
    %3 = vector.load %arg1[%c0_1, %c0_2, %c0_3] : memref<4x32x192xf32, #tpu.memory_space<vmem>>, vector<1x32x192xf32>
    %4 = vector.shape_cast %3 : vector<1x32x192xf32> to vector<32x192xf32>
    %cst_4 = arith.constant dense<0.000000e+00> : vector<16x192xf32>
    %5 = tpu.matmul %2, %4, %cst_4 {dimension_numbers = #tpu.dot_dimension_numbers<[1], [0], [0], [1], [0, 0, 1, 1], [], []>} : vector<16x32xf32>, vector<32x192xf32>, vector<16x192xf32> -> vector<16x192xf32>
    %6 = arith.addf %1, %5 : vector<16x192xf32>
    %7 = vector.extract_strided_slice %0 {offsets = [2, 0], sizes = [16, 32], strides = [1, 1]} : vector<22x32xf32> to vector<16x32xf32>
    %c1 = arith.constant 1 : index
    %c0_5 = arith.constant 0 : index
    %c0_6 = arith.constant 0 : index
    %8 = vector.load %arg1[%c1, %c0_5, %c0_6] : memref<4x32x192xf32, #tpu.memory_space<vmem>>, vector<1x32x192xf32>
    %9 = vector.shape_cast %8 : vector<1x32x192xf32> to vector<32x192xf32>
    %cst_7 = arith.constant dense<0.000000e+00> : vector<16x192xf32>
    %10 = tpu.matmul %7, %9, %cst_7 {dimension_numbers = #tpu.dot_dimension_numbers<[1], [0], [0], [1], [0, 0, 1, 1], [], []>} : vector<16x32xf32>, vector<32x192xf32>, vector<16x192xf32> -> vector<16x192xf32>
    %11 = arith.addf %6, %10 : vector<16x192xf32>
    %12 = vector.extract_strided_slice %0 {offsets = [4, 0], sizes = [16, 32], strides = [1, 1]} : vector<22x32xf32> to vector<16x32xf32>
    %c2 = arith.constant 2 : index
    %c0_8 = arith.constant 0 : index
    %c0_9 = arith.constant 0 : index
    %13 = vector.load %arg1[%c2, %c0_8, %c0_9] : memref<4x32x192xf32, #tpu.memory_space<vmem>>, vector<1x32x192xf32>
    %14 = vector.shape_cast %13 : vector<1x32x192xf32> to vector<32x192xf32>
    %cst_10 = arith.constant dense<0.000000e+00> : vector<16x192xf32>
    %15 = tpu.matmul %12, %14, %cst_10 {dimension_numbers = #tpu.dot_dimension_numbers<[1], [0], [0], [1], [0, 0, 1, 1], [], []>} : vector<16x32xf32>, vector<32x192xf32>, vector<16x192xf32> -> vector<16x192xf32>
    %16 = arith.addf %11, %15 : vector<16x192xf32>
    %17 = vector.extract_strided_slice %0 {offsets = [6, 0], sizes = [16, 32], strides = [1, 1]} : vector<22x32xf32> to vector<16x32xf32>
    %c3 = arith.constant 3 : index
    %c0_11 = arith.constant 0 : index
    %c0_12 = arith.constant 0 : index
    %18 = vector.load %arg1[%c3, %c0_11, %c0_12] : memref<4x32x192xf32, #tpu.memory_space<vmem>>, vector<1x32x192xf32>
    %19 = vector.shape_cast %18 : vector<1x32x192xf32> to vector<32x192xf32>
    %cst_13 = arith.constant dense<0.000000e+00> : vector<16x192xf32>
    %20 = tpu.matmul %17, %19, %cst_13 {dimension_numbers = #tpu.dot_dimension_numbers<[1], [0], [0], [1], [0, 0, 1, 1], [], []>} : vector<16x32xf32>, vector<32x192xf32>, vector<16x192xf32> -> vector<16x192xf32>
    %21 = arith.addf %16, %20 : vector<16x192xf32>
    %c0_14 = arith.constant 0 : index
    %c0_15 = arith.constant 0 : index
    %22 = vector.load %arg2[%c0_14, %c0_15] : memref<1x192xf32, #tpu.memory_space<vmem>>, vector<1x192xf32>
    %23 = vector.broadcast %22 : vector<1x192xf32> to vector<16x192xf32>
    %24 = arith.addf %21, %23 : vector<16x192xf32>
    %cst_16 = arith.constant 0.000000e+00 : f32
    %25 = vector.broadcast %cst_16 : f32 to vector<16x192xf32>
    %26 = arith.maximumf %24, %25 : vector<16x192xf32>
    %c0_17 = arith.constant 0 : index
    %c0_18 = arith.constant 0 : index
    %27 = vector.load %arg3[%c0_17, %c0_18] : memref<4x192xf32, #tpu.memory_space<vmem>>, vector<1x192xf32>
    %c3_19 = arith.constant 3 : index
    %c0_20 = arith.constant 0 : index
    %28 = vector.load %arg3[%c3_19, %c0_20] : memref<4x192xf32, #tpu.memory_space<vmem>>, vector<1x192xf32>
    %cst_21 = arith.constant 9.99999974E-6 : f32
    %29 = vector.broadcast %cst_21 : f32 to vector<1x192xf32>
    %30 = arith.addf %28, %29 : vector<1x192xf32>
    %31 = math.rsqrt %30 : vector<1x192xf32>
    %32 = arith.mulf %27, %31 : vector<1x192xf32>
    %c1_22 = arith.constant 1 : index
    %c0_23 = arith.constant 0 : index
    %33 = vector.load %arg3[%c1_22, %c0_23] : memref<4x192xf32, #tpu.memory_space<vmem>>, vector<1x192xf32>
    %c2_24 = arith.constant 2 : index
    %c0_25 = arith.constant 0 : index
    %34 = vector.load %arg3[%c2_24, %c0_25] : memref<4x192xf32, #tpu.memory_space<vmem>>, vector<1x192xf32>
    %35 = arith.mulf %34, %32 : vector<1x192xf32>
    %36 = arith.subf %33, %35 : vector<1x192xf32>
    %37 = vector.broadcast %32 : vector<1x192xf32> to vector<16x192xf32>
    %38 = arith.mulf %26, %37 : vector<16x192xf32>
    %39 = vector.broadcast %36 : vector<1x192xf32> to vector<16x192xf32>
    %40 = arith.addf %38, %39 : vector<16x192xf32>
    %41 = arith.truncf %40 : vector<16x192xf32> to vector<16x192xbf16>
    %c0_26 = arith.constant 0 : index
    %c0_27 = arith.constant 0 : index
    %42 = vector.load %arg4[%c0_26, %c0_27] : memref<192x1024xbf16, #tpu.memory_space<vmem>>, vector<192x1024xbf16>
    %cst_28 = arith.constant dense<0.000000e+00> : vector<16x1024xf32>
    %43 = tpu.matmul %41, %42, %cst_28 {dimension_numbers = #tpu.dot_dimension_numbers<[1], [0], [0], [1], [0, 0, 1, 1], [], []>} : vector<16x192xbf16>, vector<192x1024xbf16>, vector<16x1024xf32> -> vector<16x1024xf32>
    %c0_29 = arith.constant 0 : index
    %c0_30 = arith.constant 0 : index
    %44 = vector.load %arg6[%c0_29, %c0_30] : memref<1x1024xf32, #tpu.memory_space<vmem>>, vector<1x1024xf32>
    %45 = vector.broadcast %44 : vector<1x1024xf32> to vector<16x1024xf32>
    %46 = arith.addf %43, %45 : vector<16x1024xf32>
    %c0_31 = arith.constant 0 : index
    %c0_32 = arith.constant 0 : index
    %c0_33 = arith.constant 0 : index
    %47 = vector.load %arg5[%c0_31, %c0_32, %c0_33] : memref<2x128x512xbf16, #tpu.memory_space<vmem>>, vector<1x128x512xbf16>
    %48 = vector.shape_cast %47 : vector<1x128x512xbf16> to vector<128x512xbf16>
    %c1_34 = arith.constant 1 : index
    %c0_35 = arith.constant 0 : index
    %c0_36 = arith.constant 0 : index
    %49 = vector.load %arg5[%c1_34, %c0_35, %c0_36] : memref<2x128x512xbf16, #tpu.memory_space<vmem>>, vector<1x128x512xbf16>
    %50 = vector.shape_cast %49 : vector<1x128x512xbf16> to vector<128x512xbf16>
    %cst_37 = arith.constant 0.000000e+00 : f32
    %51 = vector.broadcast %cst_37 : f32 to vector<2x128xf32>
    %cst_38 = arith.constant 0.000000e+00 : f32
    %52 = vector.broadcast %cst_38 : f32 to vector<2x128xf32>
    %cst_39 = arith.constant 0.000000e+00 : f32
    %53 = vector.broadcast %cst_39 : f32 to vector<2x128xf32>
    %cst_40 = arith.constant 0.000000e+00 : f32
    %54 = vector.broadcast %cst_40 : f32 to vector<2x128xf32>
    %55 = vector.extract_strided_slice %46 {offsets = [0, 0], sizes = [2, 512], strides = [1, 1]} : vector<16x1024xf32> to vector<2x512xf32>
    %56 = arith.truncf %51 : vector<2x128xf32> to vector<2x128xbf16>
    %cst_41 = arith.constant dense<0.000000e+00> : vector<2x512xf32>
    %57 = tpu.matmul %56, %48, %cst_41 {dimension_numbers = #tpu.dot_dimension_numbers<[1], [0], [0], [1], [0, 0, 1, 1], [], []>} : vector<2x128xbf16>, vector<128x512xbf16>, vector<2x512xf32> -> vector<2x512xf32>
    %58 = arith.addf %55, %57 : vector<2x512xf32>
    %59 = vector.extract_strided_slice %46 {offsets = [14, 512], sizes = [2, 512], strides = [1, 1]} : vector<16x1024xf32> to vector<2x512xf32>
    %60 = arith.truncf %53 : vector<2x128xf32> to vector<2x128xbf16>
    %cst_42 = arith.constant dense<0.000000e+00> : vector<2x512xf32>
    %61 = tpu.matmul %60, %50, %cst_42 {dimension_numbers = #tpu.dot_dimension_numbers<[1], [0], [0], [1], [0, 0, 1, 1], [], []>} : vector<2x128xbf16>, vector<128x512xbf16>, vector<2x512xf32> -> vector<2x512xf32>
    %62 = arith.addf %59, %61 : vector<2x512xf32>
    %63 = vector.extract_strided_slice %58 {offsets = [0, 0], sizes = [2, 128], strides = [1, 1]} : vector<2x512xf32> to vector<2x128xf32>
    %64 = arith.negf %63 : vector<2x128xf32>
    %65 = math.exp %64 : vector<2x128xf32>
    %cst_43 = arith.constant 1.000000e+00 : f32
    %66 = vector.broadcast %cst_43 : f32 to vector<2x128xf32>
    %67 = arith.addf %66, %65 : vector<2x128xf32>
    %68 = arith.divf %66, %67 : vector<2x128xf32>
    %69 = vector.extract_strided_slice %58 {offsets = [0, 128], sizes = [2, 128], strides = [1, 1]} : vector<2x512xf32> to vector<2x128xf32>
    %70 = arith.negf %69 : vector<2x128xf32>
    %71 = math.exp %70 : vector<2x128xf32>
    %cst_44 = arith.constant 1.000000e+00 : f32
    %72 = vector.broadcast %cst_44 : f32 to vector<2x128xf32>
    %73 = arith.addf %72, %71 : vector<2x128xf32>
    %74 = arith.divf %72, %73 : vector<2x128xf32>
    %75 = vector.extract_strided_slice %58 {offsets = [0, 256], sizes = [2, 128], strides = [1, 1]} : vector<2x512xf32> to vector<2x128xf32>
    %76 = math.tanh %75 : vector<2x128xf32>
    %77 = vector.extract_strided_slice %58 {offsets = [0, 384], sizes = [2, 128], strides = [1, 1]} : vector<2x512xf32> to vector<2x128xf32>
    %78 = arith.negf %77 : vector<2x128xf32>
    %79 = math.exp %78 : vector<2x128xf32>
    %cst_45 = arith.constant 1.000000e+00 : f32
    %80 = vector.broadcast %cst_45 : f32 to vector<2x128xf32>
    %81 = arith.addf %80, %79 : vector<2x128xf32>
    %82 = arith.divf %80, %81 : vector<2x128xf32>
    %83 = arith.mulf %74, %52 : vector<2x128xf32>
    %84 = arith.mulf %68, %76 : vector<2x128xf32>
    %85 = arith.addf %83, %84 : vector<2x128xf32>
    %86 = math.tanh %85 : vector<2x128xf32>
    %87 = arith.mulf %82, %86 : vector<2x128xf32>
    %88 = vector.extract_strided_slice %62 {offsets = [0, 0], sizes = [2, 128], strides = [1, 1]} : vector<2x512xf32> to vector<2x128xf32>
    %89 = arith.negf %88 : vector<2x128xf32>
    %90 = math.exp %89 : vector<2x128xf32>
    %cst_46 = arith.constant 1.000000e+00 : f32
    %91 = vector.broadcast %cst_46 : f32 to vector<2x128xf32>
    %92 = arith.addf %91, %90 : vector<2x128xf32>
    %93 = arith.divf %91, %92 : vector<2x128xf32>
    %94 = vector.extract_strided_slice %62 {offsets = [0, 128], sizes = [2, 128], strides = [1, 1]} : vector<2x512xf32> to vector<2x128xf32>
    %95 = arith.negf %94 : vector<2x128xf32>
    %96 = math.exp %95 : vector<2x128xf32>
    %cst_47 = arith.constant 1.000000e+00 : f32
    %97 = vector.broadcast %cst_47 : f32 to vector<2x128xf32>
    %98 = arith.addf %97, %96 : vector<2x128xf32>
    %99 = arith.divf %97, %98 : vector<2x128xf32>
    %100 = vector.extract_strided_slice %62 {offsets = [0, 256], sizes = [2, 128], strides = [1, 1]} : vector<2x512xf32> to vector<2x128xf32>
    %101 = math.tanh %100 : vector<2x128xf32>
    %102 = vector.extract_strided_slice %62 {offsets = [0, 384], sizes = [2, 128], strides = [1, 1]} : vector<2x512xf32> to vector<2x128xf32>
    %103 = arith.negf %102 : vector<2x128xf32>
    %104 = math.exp %103 : vector<2x128xf32>
    %cst_48 = arith.constant 1.000000e+00 : f32
    %105 = vector.broadcast %cst_48 : f32 to vector<2x128xf32>
    %106 = arith.addf %105, %104 : vector<2x128xf32>
    %107 = arith.divf %105, %106 : vector<2x128xf32>
    %108 = arith.mulf %99, %54 : vector<2x128xf32>
    %109 = arith.mulf %93, %101 : vector<2x128xf32>
    %110 = arith.addf %108, %109 : vector<2x128xf32>
    %111 = math.tanh %110 : vector<2x128xf32>
    %112 = arith.mulf %107, %111 : vector<2x128xf32>
    %113 = vector.extract_strided_slice %46 {offsets = [2, 0], sizes = [2, 512], strides = [1, 1]} : vector<16x1024xf32> to vector<2x512xf32>
    %114 = arith.truncf %87 : vector<2x128xf32> to vector<2x128xbf16>
    %cst_49 = arith.constant dense<0.000000e+00> : vector<2x512xf32>
    %115 = tpu.matmul %114, %48, %cst_49 {dimension_numbers = #tpu.dot_dimension_numbers<[1], [0], [0], [1], [0, 0, 1, 1], [], []>} : vector<2x128xbf16>, vector<128x512xbf16>, vector<2x512xf32> -> vector<2x512xf32>
    %116 = arith.addf %113, %115 : vector<2x512xf32>
    %117 = vector.extract_strided_slice %46 {offsets = [12, 512], sizes = [2, 512], strides = [1, 1]} : vector<16x1024xf32> to vector<2x512xf32>
    %118 = arith.truncf %112 : vector<2x128xf32> to vector<2x128xbf16>
    %cst_50 = arith.constant dense<0.000000e+00> : vector<2x512xf32>
    %119 = tpu.matmul %118, %50, %cst_50 {dimension_numbers = #tpu.dot_dimension_numbers<[1], [0], [0], [1], [0, 0, 1, 1], [], []>} : vector<2x128xbf16>, vector<128x512xbf16>, vector<2x512xf32> -> vector<2x512xf32>
    %120 = arith.addf %117, %119 : vector<2x512xf32>
    %121 = vector.extract_strided_slice %116 {offsets = [0, 0], sizes = [2, 128], strides = [1, 1]} : vector<2x512xf32> to vector<2x128xf32>
    %122 = arith.negf %121 : vector<2x128xf32>
    %123 = math.exp %122 : vector<2x128xf32>
    %cst_51 = arith.constant 1.000000e+00 : f32
    %124 = vector.broadcast %cst_51 : f32 to vector<2x128xf32>
    %125 = arith.addf %124, %123 : vector<2x128xf32>
    %126 = arith.divf %124, %125 : vector<2x128xf32>
    %127 = vector.extract_strided_slice %116 {offsets = [0, 128], sizes = [2, 128], strides = [1, 1]} : vector<2x512xf32> to vector<2x128xf32>
    %128 = arith.negf %127 : vector<2x128xf32>
    %129 = math.exp %128 : vector<2x128xf32>
    %cst_52 = arith.constant 1.000000e+00 : f32
    %130 = vector.broadcast %cst_52 : f32 to vector<2x128xf32>
    %131 = arith.addf %130, %129 : vector<2x128xf32>
    %132 = arith.divf %130, %131 : vector<2x128xf32>
    %133 = vector.extract_strided_slice %116 {offsets = [0, 256], sizes = [2, 128], strides = [1, 1]} : vector<2x512xf32> to vector<2x128xf32>
    %134 = math.tanh %133 : vector<2x128xf32>
    %135 = vector.extract_strided_slice %116 {offsets = [0, 384], sizes = [2, 128], strides = [1, 1]} : vector<2x512xf32> to vector<2x128xf32>
    %136 = arith.negf %135 : vector<2x128xf32>
    %137 = math.exp %136 : vector<2x128xf32>
    %cst_53 = arith.constant 1.000000e+00 : f32
    %138 = vector.broadcast %cst_53 : f32 to vector<2x128xf32>
    %139 = arith.addf %138, %137 : vector<2x128xf32>
    %140 = arith.divf %138, %139 : vector<2x128xf32>
    %141 = arith.mulf %132, %85 : vector<2x128xf32>
    %142 = arith.mulf %126, %134 : vector<2x128xf32>
    %143 = arith.addf %141, %142 : vector<2x128xf32>
    %144 = math.tanh %143 : vector<2x128xf32>
    %145 = arith.mulf %140, %144 : vector<2x128xf32>
    %146 = vector.extract_strided_slice %120 {offsets = [0, 0], sizes = [2, 128], strides = [1, 1]} : vector<2x512xf32> to vector<2x128xf32>
    %147 = arith.negf %146 : vector<2x128xf32>
    %148 = math.exp %147 : vector<2x128xf32>
    %cst_54 = arith.constant 1.000000e+00 : f32
    %149 = vector.broadcast %cst_54 : f32 to vector<2x128xf32>
    %150 = arith.addf %149, %148 : vector<2x128xf32>
    %151 = arith.divf %149, %150 : vector<2x128xf32>
    %152 = vector.extract_strided_slice %120 {offsets = [0, 128], sizes = [2, 128], strides = [1, 1]} : vector<2x512xf32> to vector<2x128xf32>
    %153 = arith.negf %152 : vector<2x128xf32>
    %154 = math.exp %153 : vector<2x128xf32>
    %cst_55 = arith.constant 1.000000e+00 : f32
    %155 = vector.broadcast %cst_55 : f32 to vector<2x128xf32>
    %156 = arith.addf %155, %154 : vector<2x128xf32>
    %157 = arith.divf %155, %156 : vector<2x128xf32>
    %158 = vector.extract_strided_slice %120 {offsets = [0, 256], sizes = [2, 128], strides = [1, 1]} : vector<2x512xf32> to vector<2x128xf32>
    %159 = math.tanh %158 : vector<2x128xf32>
    %160 = vector.extract_strided_slice %120 {offsets = [0, 384], sizes = [2, 128], strides = [1, 1]} : vector<2x512xf32> to vector<2x128xf32>
    %161 = arith.negf %160 : vector<2x128xf32>
    %162 = math.exp %161 : vector<2x128xf32>
    %cst_56 = arith.constant 1.000000e+00 : f32
    %163 = vector.broadcast %cst_56 : f32 to vector<2x128xf32>
    %164 = arith.addf %163, %162 : vector<2x128xf32>
    %165 = arith.divf %163, %164 : vector<2x128xf32>
    %166 = arith.mulf %157, %110 : vector<2x128xf32>
    %167 = arith.mulf %151, %159 : vector<2x128xf32>
    %168 = arith.addf %166, %167 : vector<2x128xf32>
    %169 = math.tanh %168 : vector<2x128xf32>
    %170 = arith.mulf %165, %169 : vector<2x128xf32>
    %171 = vector.extract_strided_slice %46 {offsets = [4, 0], sizes = [2, 512], strides = [1, 1]} : vector<16x1024xf32> to vector<2x512xf32>
    %172 = arith.truncf %145 : vector<2x128xf32> to vector<2x128xbf16>
    %cst_57 = arith.constant dense<0.000000e+00> : vector<2x512xf32>
    %173 = tpu.matmul %172, %48, %cst_57 {dimension_numbers = #tpu.dot_dimension_numbers<[1], [0], [0], [1], [0, 0, 1, 1], [], []>} : vector<2x128xbf16>, vector<128x512xbf16>, vector<2x512xf32> -> vector<2x512xf32>
    %174 = arith.addf %171, %173 : vector<2x512xf32>
    %175 = vector.extract_strided_slice %46 {offsets = [10, 512], sizes = [2, 512], strides = [1, 1]} : vector<16x1024xf32> to vector<2x512xf32>
    %176 = arith.truncf %170 : vector<2x128xf32> to vector<2x128xbf16>
    %cst_58 = arith.constant dense<0.000000e+00> : vector<2x512xf32>
    %177 = tpu.matmul %176, %50, %cst_58 {dimension_numbers = #tpu.dot_dimension_numbers<[1], [0], [0], [1], [0, 0, 1, 1], [], []>} : vector<2x128xbf16>, vector<128x512xbf16>, vector<2x512xf32> -> vector<2x512xf32>
    %178 = arith.addf %175, %177 : vector<2x512xf32>
    %179 = vector.extract_strided_slice %174 {offsets = [0, 0], sizes = [2, 128], strides = [1, 1]} : vector<2x512xf32> to vector<2x128xf32>
    %180 = arith.negf %179 : vector<2x128xf32>
    %181 = math.exp %180 : vector<2x128xf32>
    %cst_59 = arith.constant 1.000000e+00 : f32
    %182 = vector.broadcast %cst_59 : f32 to vector<2x128xf32>
    %183 = arith.addf %182, %181 : vector<2x128xf32>
    %184 = arith.divf %182, %183 : vector<2x128xf32>
    %185 = vector.extract_strided_slice %174 {offsets = [0, 128], sizes = [2, 128], strides = [1, 1]} : vector<2x512xf32> to vector<2x128xf32>
    %186 = arith.negf %185 : vector<2x128xf32>
    %187 = math.exp %186 : vector<2x128xf32>
    %cst_60 = arith.constant 1.000000e+00 : f32
    %188 = vector.broadcast %cst_60 : f32 to vector<2x128xf32>
    %189 = arith.addf %188, %187 : vector<2x128xf32>
    %190 = arith.divf %188, %189 : vector<2x128xf32>
    %191 = vector.extract_strided_slice %174 {offsets = [0, 256], sizes = [2, 128], strides = [1, 1]} : vector<2x512xf32> to vector<2x128xf32>
    %192 = math.tanh %191 : vector<2x128xf32>
    %193 = vector.extract_strided_slice %174 {offsets = [0, 384], sizes = [2, 128], strides = [1, 1]} : vector<2x512xf32> to vector<2x128xf32>
    %194 = arith.negf %193 : vector<2x128xf32>
    %195 = math.exp %194 : vector<2x128xf32>
    %cst_61 = arith.constant 1.000000e+00 : f32
    %196 = vector.broadcast %cst_61 : f32 to vector<2x128xf32>
    %197 = arith.addf %196, %195 : vector<2x128xf32>
    %198 = arith.divf %196, %197 : vector<2x128xf32>
    %199 = arith.mulf %190, %143 : vector<2x128xf32>
    %200 = arith.mulf %184, %192 : vector<2x128xf32>
    %201 = arith.addf %199, %200 : vector<2x128xf32>
    %202 = math.tanh %201 : vector<2x128xf32>
    %203 = arith.mulf %198, %202 : vector<2x128xf32>
    %204 = vector.extract_strided_slice %178 {offsets = [0, 0], sizes = [2, 128], strides = [1, 1]} : vector<2x512xf32> to vector<2x128xf32>
    %205 = arith.negf %204 : vector<2x128xf32>
    %206 = math.exp %205 : vector<2x128xf32>
    %cst_62 = arith.constant 1.000000e+00 : f32
    %207 = vector.broadcast %cst_62 : f32 to vector<2x128xf32>
    %208 = arith.addf %207, %206 : vector<2x128xf32>
    %209 = arith.divf %207, %208 : vector<2x128xf32>
    %210 = vector.extract_strided_slice %178 {offsets = [0, 128], sizes = [2, 128], strides = [1, 1]} : vector<2x512xf32> to vector<2x128xf32>
    %211 = arith.negf %210 : vector<2x128xf32>
    %212 = math.exp %211 : vector<2x128xf32>
    %cst_63 = arith.constant 1.000000e+00 : f32
    %213 = vector.broadcast %cst_63 : f32 to vector<2x128xf32>
    %214 = arith.addf %213, %212 : vector<2x128xf32>
    %215 = arith.divf %213, %214 : vector<2x128xf32>
    %216 = vector.extract_strided_slice %178 {offsets = [0, 256], sizes = [2, 128], strides = [1, 1]} : vector<2x512xf32> to vector<2x128xf32>
    %217 = math.tanh %216 : vector<2x128xf32>
    %218 = vector.extract_strided_slice %178 {offsets = [0, 384], sizes = [2, 128], strides = [1, 1]} : vector<2x512xf32> to vector<2x128xf32>
    %219 = arith.negf %218 : vector<2x128xf32>
    %220 = math.exp %219 : vector<2x128xf32>
    %cst_64 = arith.constant 1.000000e+00 : f32
    %221 = vector.broadcast %cst_64 : f32 to vector<2x128xf32>
    %222 = arith.addf %221, %220 : vector<2x128xf32>
    %223 = arith.divf %221, %222 : vector<2x128xf32>
    %224 = arith.mulf %215, %168 : vector<2x128xf32>
    %225 = arith.mulf %209, %217 : vector<2x128xf32>
    %226 = arith.addf %224, %225 : vector<2x128xf32>
    %227 = math.tanh %226 : vector<2x128xf32>
    %228 = arith.mulf %223, %227 : vector<2x128xf32>
    %229 = vector.extract_strided_slice %46 {offsets = [6, 0], sizes = [2, 512], strides = [1, 1]} : vector<16x1024xf32> to vector<2x512xf32>
    %230 = arith.truncf %203 : vector<2x128xf32> to vector<2x128xbf16>
    %cst_65 = arith.constant dense<0.000000e+00> : vector<2x512xf32>
    %231 = tpu.matmul %230, %48, %cst_65 {dimension_numbers = #tpu.dot_dimension_numbers<[1], [0], [0], [1], [0, 0, 1, 1], [], []>} : vector<2x128xbf16>, vector<128x512xbf16>, vector<2x512xf32> -> vector<2x512xf32>
    %232 = arith.addf %229, %231 : vector<2x512xf32>
    %233 = vector.extract_strided_slice %46 {offsets = [8, 512], sizes = [2, 512], strides = [1, 1]} : vector<16x1024xf32> to vector<2x512xf32>
    %234 = arith.truncf %228 : vector<2x128xf32> to vector<2x128xbf16>
    %cst_66 = arith.constant dense<0.000000e+00> : vector<2x512xf32>
    %235 = tpu.matmul %234, %50, %cst_66 {dimension_numbers = #tpu.dot_dimension_numbers<[1], [0], [0], [1], [0, 0, 1, 1], [], []>} : vector<2x128xbf16>, vector<128x512xbf16>, vector<2x512xf32> -> vector<2x512xf32>
    %236 = arith.addf %233, %235 : vector<2x512xf32>
    %237 = vector.extract_strided_slice %232 {offsets = [0, 0], sizes = [2, 128], strides = [1, 1]} : vector<2x512xf32> to vector<2x128xf32>
    %238 = arith.negf %237 : vector<2x128xf32>
    %239 = math.exp %238 : vector<2x128xf32>
    %cst_67 = arith.constant 1.000000e+00 : f32
    %240 = vector.broadcast %cst_67 : f32 to vector<2x128xf32>
    %241 = arith.addf %240, %239 : vector<2x128xf32>
    %242 = arith.divf %240, %241 : vector<2x128xf32>
    %243 = vector.extract_strided_slice %232 {offsets = [0, 128], sizes = [2, 128], strides = [1, 1]} : vector<2x512xf32> to vector<2x128xf32>
    %244 = arith.negf %243 : vector<2x128xf32>
    %245 = math.exp %244 : vector<2x128xf32>
    %cst_68 = arith.constant 1.000000e+00 : f32
    %246 = vector.broadcast %cst_68 : f32 to vector<2x128xf32>
    %247 = arith.addf %246, %245 : vector<2x128xf32>
    %248 = arith.divf %246, %247 : vector<2x128xf32>
    %249 = vector.extract_strided_slice %232 {offsets = [0, 256], sizes = [2, 128], strides = [1, 1]} : vector<2x512xf32> to vector<2x128xf32>
    %250 = math.tanh %249 : vector<2x128xf32>
    %251 = vector.extract_strided_slice %232 {offsets = [0, 384], sizes = [2, 128], strides = [1, 1]} : vector<2x512xf32> to vector<2x128xf32>
    %252 = arith.negf %251 : vector<2x128xf32>
    %253 = math.exp %252 : vector<2x128xf32>
    %cst_69 = arith.constant 1.000000e+00 : f32
    %254 = vector.broadcast %cst_69 : f32 to vector<2x128xf32>
    %255 = arith.addf %254, %253 : vector<2x128xf32>
    %256 = arith.divf %254, %255 : vector<2x128xf32>
    %257 = arith.mulf %248, %201 : vector<2x128xf32>
    %258 = arith.mulf %242, %250 : vector<2x128xf32>
    %259 = arith.addf %257, %258 : vector<2x128xf32>
    %260 = math.tanh %259 : vector<2x128xf32>
    %261 = arith.mulf %256, %260 : vector<2x128xf32>
    %262 = vector.extract_strided_slice %236 {offsets = [0, 0], sizes = [2, 128], strides = [1, 1]} : vector<2x512xf32> to vector<2x128xf32>
    %263 = arith.negf %262 : vector<2x128xf32>
    %264 = math.exp %263 : vector<2x128xf32>
    %cst_70 = arith.constant 1.000000e+00 : f32
    %265 = vector.broadcast %cst_70 : f32 to vector<2x128xf32>
    %266 = arith.addf %265, %264 : vector<2x128xf32>
    %267 = arith.divf %265, %266 : vector<2x128xf32>
    %268 = vector.extract_strided_slice %236 {offsets = [0, 128], sizes = [2, 128], strides = [1, 1]} : vector<2x512xf32> to vector<2x128xf32>
    %269 = arith.negf %268 : vector<2x128xf32>
    %270 = math.exp %269 : vector<2x128xf32>
    %cst_71 = arith.constant 1.000000e+00 : f32
    %271 = vector.broadcast %cst_71 : f32 to vector<2x128xf32>
    %272 = arith.addf %271, %270 : vector<2x128xf32>
    %273 = arith.divf %271, %272 : vector<2x128xf32>
    %274 = vector.extract_strided_slice %236 {offsets = [0, 256], sizes = [2, 128], strides = [1, 1]} : vector<2x512xf32> to vector<2x128xf32>
    %275 = math.tanh %274 : vector<2x128xf32>
    %276 = vector.extract_strided_slice %236 {offsets = [0, 384], sizes = [2, 128], strides = [1, 1]} : vector<2x512xf32> to vector<2x128xf32>
    %277 = arith.negf %276 : vector<2x128xf32>
    %278 = math.exp %277 : vector<2x128xf32>
    %cst_72 = arith.constant 1.000000e+00 : f32
    %279 = vector.broadcast %cst_72 : f32 to vector<2x128xf32>
    %280 = arith.addf %279, %278 : vector<2x128xf32>
    %281 = arith.divf %279, %280 : vector<2x128xf32>
    %282 = arith.mulf %273, %226 : vector<2x128xf32>
    %283 = arith.mulf %267, %275 : vector<2x128xf32>
    %284 = arith.addf %282, %283 : vector<2x128xf32>
    %285 = math.tanh %284 : vector<2x128xf32>
    %286 = arith.mulf %281, %285 : vector<2x128xf32>
    %287 = vector.extract_strided_slice %46 {offsets = [8, 0], sizes = [2, 512], strides = [1, 1]} : vector<16x1024xf32> to vector<2x512xf32>
    %288 = arith.truncf %261 : vector<2x128xf32> to vector<2x128xbf16>
    %cst_73 = arith.constant dense<0.000000e+00> : vector<2x512xf32>
    %289 = tpu.matmul %288, %48, %cst_73 {dimension_numbers = #tpu.dot_dimension_numbers<[1], [0], [0], [1], [0, 0, 1, 1], [], []>} : vector<2x128xbf16>, vector<128x512xbf16>, vector<2x512xf32> -> vector<2x512xf32>
    %290 = arith.addf %287, %289 : vector<2x512xf32>
    %291 = vector.extract_strided_slice %46 {offsets = [6, 512], sizes = [2, 512], strides = [1, 1]} : vector<16x1024xf32> to vector<2x512xf32>
    %292 = arith.truncf %286 : vector<2x128xf32> to vector<2x128xbf16>
    %cst_74 = arith.constant dense<0.000000e+00> : vector<2x512xf32>
    %293 = tpu.matmul %292, %50, %cst_74 {dimension_numbers = #tpu.dot_dimension_numbers<[1], [0], [0], [1], [0, 0, 1, 1], [], []>} : vector<2x128xbf16>, vector<128x512xbf16>, vector<2x512xf32> -> vector<2x512xf32>
    %294 = arith.addf %291, %293 : vector<2x512xf32>
    %295 = vector.extract_strided_slice %290 {offsets = [0, 0], sizes = [2, 128], strides = [1, 1]} : vector<2x512xf32> to vector<2x128xf32>
    %296 = arith.negf %295 : vector<2x128xf32>
    %297 = math.exp %296 : vector<2x128xf32>
    %cst_75 = arith.constant 1.000000e+00 : f32
    %298 = vector.broadcast %cst_75 : f32 to vector<2x128xf32>
    %299 = arith.addf %298, %297 : vector<2x128xf32>
    %300 = arith.divf %298, %299 : vector<2x128xf32>
    %301 = vector.extract_strided_slice %290 {offsets = [0, 128], sizes = [2, 128], strides = [1, 1]} : vector<2x512xf32> to vector<2x128xf32>
    %302 = arith.negf %301 : vector<2x128xf32>
    %303 = math.exp %302 : vector<2x128xf32>
    %cst_76 = arith.constant 1.000000e+00 : f32
    %304 = vector.broadcast %cst_76 : f32 to vector<2x128xf32>
    %305 = arith.addf %304, %303 : vector<2x128xf32>
    %306 = arith.divf %304, %305 : vector<2x128xf32>
    %307 = vector.extract_strided_slice %290 {offsets = [0, 256], sizes = [2, 128], strides = [1, 1]} : vector<2x512xf32> to vector<2x128xf32>
    %308 = math.tanh %307 : vector<2x128xf32>
    %309 = vector.extract_strided_slice %290 {offsets = [0, 384], sizes = [2, 128], strides = [1, 1]} : vector<2x512xf32> to vector<2x128xf32>
    %310 = arith.negf %309 : vector<2x128xf32>
    %311 = math.exp %310 : vector<2x128xf32>
    %cst_77 = arith.constant 1.000000e+00 : f32
    %312 = vector.broadcast %cst_77 : f32 to vector<2x128xf32>
    %313 = arith.addf %312, %311 : vector<2x128xf32>
    %314 = arith.divf %312, %313 : vector<2x128xf32>
    %315 = arith.mulf %306, %259 : vector<2x128xf32>
    %316 = arith.mulf %300, %308 : vector<2x128xf32>
    %317 = arith.addf %315, %316 : vector<2x128xf32>
    %318 = math.tanh %317 : vector<2x128xf32>
    %319 = arith.mulf %314, %318 : vector<2x128xf32>
    %320 = vector.extract_strided_slice %294 {offsets = [0, 0], sizes = [2, 128], strides = [1, 1]} : vector<2x512xf32> to vector<2x128xf32>
    %321 = arith.negf %320 : vector<2x128xf32>
    %322 = math.exp %321 : vector<2x128xf32>
    %cst_78 = arith.constant 1.000000e+00 : f32
    %323 = vector.broadcast %cst_78 : f32 to vector<2x128xf32>
    %324 = arith.addf %323, %322 : vector<2x128xf32>
    %325 = arith.divf %323, %324 : vector<2x128xf32>
    %326 = vector.extract_strided_slice %294 {offsets = [0, 128], sizes = [2, 128], strides = [1, 1]} : vector<2x512xf32> to vector<2x128xf32>
    %327 = arith.negf %326 : vector<2x128xf32>
    %328 = math.exp %327 : vector<2x128xf32>
    %cst_79 = arith.constant 1.000000e+00 : f32
    %329 = vector.broadcast %cst_79 : f32 to vector<2x128xf32>
    %330 = arith.addf %329, %328 : vector<2x128xf32>
    %331 = arith.divf %329, %330 : vector<2x128xf32>
    %332 = vector.extract_strided_slice %294 {offsets = [0, 256], sizes = [2, 128], strides = [1, 1]} : vector<2x512xf32> to vector<2x128xf32>
    %333 = math.tanh %332 : vector<2x128xf32>
    %334 = vector.extract_strided_slice %294 {offsets = [0, 384], sizes = [2, 128], strides = [1, 1]} : vector<2x512xf32> to vector<2x128xf32>
    %335 = arith.negf %334 : vector<2x128xf32>
    %336 = math.exp %335 : vector<2x128xf32>
    %cst_80 = arith.constant 1.000000e+00 : f32
    %337 = vector.broadcast %cst_80 : f32 to vector<2x128xf32>
    %338 = arith.addf %337, %336 : vector<2x128xf32>
    %339 = arith.divf %337, %338 : vector<2x128xf32>
    %340 = arith.mulf %331, %284 : vector<2x128xf32>
    %341 = arith.mulf %325, %333 : vector<2x128xf32>
    %342 = arith.addf %340, %341 : vector<2x128xf32>
    %343 = math.tanh %342 : vector<2x128xf32>
    %344 = arith.mulf %339, %343 : vector<2x128xf32>
    %345 = vector.extract_strided_slice %46 {offsets = [10, 0], sizes = [2, 512], strides = [1, 1]} : vector<16x1024xf32> to vector<2x512xf32>
    %346 = arith.truncf %319 : vector<2x128xf32> to vector<2x128xbf16>
    %cst_81 = arith.constant dense<0.000000e+00> : vector<2x512xf32>
    %347 = tpu.matmul %346, %48, %cst_81 {dimension_numbers = #tpu.dot_dimension_numbers<[1], [0], [0], [1], [0, 0, 1, 1], [], []>} : vector<2x128xbf16>, vector<128x512xbf16>, vector<2x512xf32> -> vector<2x512xf32>
    %348 = arith.addf %345, %347 : vector<2x512xf32>
    %349 = vector.extract_strided_slice %46 {offsets = [4, 512], sizes = [2, 512], strides = [1, 1]} : vector<16x1024xf32> to vector<2x512xf32>
    %350 = arith.truncf %344 : vector<2x128xf32> to vector<2x128xbf16>
    %cst_82 = arith.constant dense<0.000000e+00> : vector<2x512xf32>
    %351 = tpu.matmul %350, %50, %cst_82 {dimension_numbers = #tpu.dot_dimension_numbers<[1], [0], [0], [1], [0, 0, 1, 1], [], []>} : vector<2x128xbf16>, vector<128x512xbf16>, vector<2x512xf32> -> vector<2x512xf32>
    %352 = arith.addf %349, %351 : vector<2x512xf32>
    %353 = vector.extract_strided_slice %348 {offsets = [0, 0], sizes = [2, 128], strides = [1, 1]} : vector<2x512xf32> to vector<2x128xf32>
    %354 = arith.negf %353 : vector<2x128xf32>
    %355 = math.exp %354 : vector<2x128xf32>
    %cst_83 = arith.constant 1.000000e+00 : f32
    %356 = vector.broadcast %cst_83 : f32 to vector<2x128xf32>
    %357 = arith.addf %356, %355 : vector<2x128xf32>
    %358 = arith.divf %356, %357 : vector<2x128xf32>
    %359 = vector.extract_strided_slice %348 {offsets = [0, 128], sizes = [2, 128], strides = [1, 1]} : vector<2x512xf32> to vector<2x128xf32>
    %360 = arith.negf %359 : vector<2x128xf32>
    %361 = math.exp %360 : vector<2x128xf32>
    %cst_84 = arith.constant 1.000000e+00 : f32
    %362 = vector.broadcast %cst_84 : f32 to vector<2x128xf32>
    %363 = arith.addf %362, %361 : vector<2x128xf32>
    %364 = arith.divf %362, %363 : vector<2x128xf32>
    %365 = vector.extract_strided_slice %348 {offsets = [0, 256], sizes = [2, 128], strides = [1, 1]} : vector<2x512xf32> to vector<2x128xf32>
    %366 = math.tanh %365 : vector<2x128xf32>
    %367 = vector.extract_strided_slice %348 {offsets = [0, 384], sizes = [2, 128], strides = [1, 1]} : vector<2x512xf32> to vector<2x128xf32>
    %368 = arith.negf %367 : vector<2x128xf32>
    %369 = math.exp %368 : vector<2x128xf32>
    %cst_85 = arith.constant 1.000000e+00 : f32
    %370 = vector.broadcast %cst_85 : f32 to vector<2x128xf32>
    %371 = arith.addf %370, %369 : vector<2x128xf32>
    %372 = arith.divf %370, %371 : vector<2x128xf32>
    %373 = arith.mulf %364, %317 : vector<2x128xf32>
    %374 = arith.mulf %358, %366 : vector<2x128xf32>
    %375 = arith.addf %373, %374 : vector<2x128xf32>
    %376 = math.tanh %375 : vector<2x128xf32>
    %377 = arith.mulf %372, %376 : vector<2x128xf32>
    %378 = vector.extract_strided_slice %352 {offsets = [0, 0], sizes = [2, 128], strides = [1, 1]} : vector<2x512xf32> to vector<2x128xf32>
    %379 = arith.negf %378 : vector<2x128xf32>
    %380 = math.exp %379 : vector<2x128xf32>
    %cst_86 = arith.constant 1.000000e+00 : f32
    %381 = vector.broadcast %cst_86 : f32 to vector<2x128xf32>
    %382 = arith.addf %381, %380 : vector<2x128xf32>
    %383 = arith.divf %381, %382 : vector<2x128xf32>
    %384 = vector.extract_strided_slice %352 {offsets = [0, 128], sizes = [2, 128], strides = [1, 1]} : vector<2x512xf32> to vector<2x128xf32>
    %385 = arith.negf %384 : vector<2x128xf32>
    %386 = math.exp %385 : vector<2x128xf32>
    %cst_87 = arith.constant 1.000000e+00 : f32
    %387 = vector.broadcast %cst_87 : f32 to vector<2x128xf32>
    %388 = arith.addf %387, %386 : vector<2x128xf32>
    %389 = arith.divf %387, %388 : vector<2x128xf32>
    %390 = vector.extract_strided_slice %352 {offsets = [0, 256], sizes = [2, 128], strides = [1, 1]} : vector<2x512xf32> to vector<2x128xf32>
    %391 = math.tanh %390 : vector<2x128xf32>
    %392 = vector.extract_strided_slice %352 {offsets = [0, 384], sizes = [2, 128], strides = [1, 1]} : vector<2x512xf32> to vector<2x128xf32>
    %393 = arith.negf %392 : vector<2x128xf32>
    %394 = math.exp %393 : vector<2x128xf32>
    %cst_88 = arith.constant 1.000000e+00 : f32
    %395 = vector.broadcast %cst_88 : f32 to vector<2x128xf32>
    %396 = arith.addf %395, %394 : vector<2x128xf32>
    %397 = arith.divf %395, %396 : vector<2x128xf32>
    %398 = arith.mulf %389, %342 : vector<2x128xf32>
    %399 = arith.mulf %383, %391 : vector<2x128xf32>
    %400 = arith.addf %398, %399 : vector<2x128xf32>
    %401 = math.tanh %400 : vector<2x128xf32>
    %402 = arith.mulf %397, %401 : vector<2x128xf32>
    %403 = vector.extract_strided_slice %46 {offsets = [12, 0], sizes = [2, 512], strides = [1, 1]} : vector<16x1024xf32> to vector<2x512xf32>
    %404 = arith.truncf %377 : vector<2x128xf32> to vector<2x128xbf16>
    %cst_89 = arith.constant dense<0.000000e+00> : vector<2x512xf32>
    %405 = tpu.matmul %404, %48, %cst_89 {dimension_numbers = #tpu.dot_dimension_numbers<[1], [0], [0], [1], [0, 0, 1, 1], [], []>} : vector<2x128xbf16>, vector<128x512xbf16>, vector<2x512xf32> -> vector<2x512xf32>
    %406 = arith.addf %403, %405 : vector<2x512xf32>
    %407 = vector.extract_strided_slice %46 {offsets = [2, 512], sizes = [2, 512], strides = [1, 1]} : vector<16x1024xf32> to vector<2x512xf32>
    %408 = arith.truncf %402 : vector<2x128xf32> to vector<2x128xbf16>
    %cst_90 = arith.constant dense<0.000000e+00> : vector<2x512xf32>
    %409 = tpu.matmul %408, %50, %cst_90 {dimension_numbers = #tpu.dot_dimension_numbers<[1], [0], [0], [1], [0, 0, 1, 1], [], []>} : vector<2x128xbf16>, vector<128x512xbf16>, vector<2x512xf32> -> vector<2x512xf32>
    %410 = arith.addf %407, %409 : vector<2x512xf32>
    %411 = vector.extract_strided_slice %406 {offsets = [0, 0], sizes = [2, 128], strides = [1, 1]} : vector<2x512xf32> to vector<2x128xf32>
    %412 = arith.negf %411 : vector<2x128xf32>
    %413 = math.exp %412 : vector<2x128xf32>
    %cst_91 = arith.constant 1.000000e+00 : f32
    %414 = vector.broadcast %cst_91 : f32 to vector<2x128xf32>
    %415 = arith.addf %414, %413 : vector<2x128xf32>
    %416 = arith.divf %414, %415 : vector<2x128xf32>
    %417 = vector.extract_strided_slice %406 {offsets = [0, 128], sizes = [2, 128], strides = [1, 1]} : vector<2x512xf32> to vector<2x128xf32>
    %418 = arith.negf %417 : vector<2x128xf32>
    %419 = math.exp %418 : vector<2x128xf32>
    %cst_92 = arith.constant 1.000000e+00 : f32
    %420 = vector.broadcast %cst_92 : f32 to vector<2x128xf32>
    %421 = arith.addf %420, %419 : vector<2x128xf32>
    %422 = arith.divf %420, %421 : vector<2x128xf32>
    %423 = vector.extract_strided_slice %406 {offsets = [0, 256], sizes = [2, 128], strides = [1, 1]} : vector<2x512xf32> to vector<2x128xf32>
    %424 = math.tanh %423 : vector<2x128xf32>
    %425 = vector.extract_strided_slice %406 {offsets = [0, 384], sizes = [2, 128], strides = [1, 1]} : vector<2x512xf32> to vector<2x128xf32>
    %426 = arith.negf %425 : vector<2x128xf32>
    %427 = math.exp %426 : vector<2x128xf32>
    %cst_93 = arith.constant 1.000000e+00 : f32
    %428 = vector.broadcast %cst_93 : f32 to vector<2x128xf32>
    %429 = arith.addf %428, %427 : vector<2x128xf32>
    %430 = arith.divf %428, %429 : vector<2x128xf32>
    %431 = arith.mulf %422, %375 : vector<2x128xf32>
    %432 = arith.mulf %416, %424 : vector<2x128xf32>
    %433 = arith.addf %431, %432 : vector<2x128xf32>
    %434 = math.tanh %433 : vector<2x128xf32>
    %435 = arith.mulf %430, %434 : vector<2x128xf32>
    %436 = vector.extract_strided_slice %410 {offsets = [0, 0], sizes = [2, 128], strides = [1, 1]} : vector<2x512xf32> to vector<2x128xf32>
    %437 = arith.negf %436 : vector<2x128xf32>
    %438 = math.exp %437 : vector<2x128xf32>
    %cst_94 = arith.constant 1.000000e+00 : f32
    %439 = vector.broadcast %cst_94 : f32 to vector<2x128xf32>
    %440 = arith.addf %439, %438 : vector<2x128xf32>
    %441 = arith.divf %439, %440 : vector<2x128xf32>
    %442 = vector.extract_strided_slice %410 {offsets = [0, 128], sizes = [2, 128], strides = [1, 1]} : vector<2x512xf32> to vector<2x128xf32>
    %443 = arith.negf %442 : vector<2x128xf32>
    %444 = math.exp %443 : vector<2x128xf32>
    %cst_95 = arith.constant 1.000000e+00 : f32
    %445 = vector.broadcast %cst_95 : f32 to vector<2x128xf32>
    %446 = arith.addf %445, %444 : vector<2x128xf32>
    %447 = arith.divf %445, %446 : vector<2x128xf32>
    %448 = vector.extract_strided_slice %410 {offsets = [0, 256], sizes = [2, 128], strides = [1, 1]} : vector<2x512xf32> to vector<2x128xf32>
    %449 = math.tanh %448 : vector<2x128xf32>
    %450 = vector.extract_strided_slice %410 {offsets = [0, 384], sizes = [2, 128], strides = [1, 1]} : vector<2x512xf32> to vector<2x128xf32>
    %451 = arith.negf %450 : vector<2x128xf32>
    %452 = math.exp %451 : vector<2x128xf32>
    %cst_96 = arith.constant 1.000000e+00 : f32
    %453 = vector.broadcast %cst_96 : f32 to vector<2x128xf32>
    %454 = arith.addf %453, %452 : vector<2x128xf32>
    %455 = arith.divf %453, %454 : vector<2x128xf32>
    %456 = arith.mulf %447, %400 : vector<2x128xf32>
    %457 = arith.mulf %441, %449 : vector<2x128xf32>
    %458 = arith.addf %456, %457 : vector<2x128xf32>
    %459 = math.tanh %458 : vector<2x128xf32>
    %460 = arith.mulf %455, %459 : vector<2x128xf32>
    %461 = vector.extract_strided_slice %46 {offsets = [14, 0], sizes = [2, 512], strides = [1, 1]} : vector<16x1024xf32> to vector<2x512xf32>
    %462 = arith.truncf %435 : vector<2x128xf32> to vector<2x128xbf16>
    %cst_97 = arith.constant dense<0.000000e+00> : vector<2x512xf32>
    %463 = tpu.matmul %462, %48, %cst_97 {dimension_numbers = #tpu.dot_dimension_numbers<[1], [0], [0], [1], [0, 0, 1, 1], [], []>} : vector<2x128xbf16>, vector<128x512xbf16>, vector<2x512xf32> -> vector<2x512xf32>
    %464 = arith.addf %461, %463 : vector<2x512xf32>
    %465 = vector.extract_strided_slice %46 {offsets = [0, 512], sizes = [2, 512], strides = [1, 1]} : vector<16x1024xf32> to vector<2x512xf32>
    %466 = arith.truncf %460 : vector<2x128xf32> to vector<2x128xbf16>
    %cst_98 = arith.constant dense<0.000000e+00> : vector<2x512xf32>
    %467 = tpu.matmul %466, %50, %cst_98 {dimension_numbers = #tpu.dot_dimension_numbers<[1], [0], [0], [1], [0, 0, 1, 1], [], []>} : vector<2x128xbf16>, vector<128x512xbf16>, vector<2x512xf32> -> vector<2x512xf32>
    %468 = arith.addf %465, %467 : vector<2x512xf32>
    %469 = vector.extract_strided_slice %464 {offsets = [0, 0], sizes = [2, 128], strides = [1, 1]} : vector<2x512xf32> to vector<2x128xf32>
    %470 = arith.negf %469 : vector<2x128xf32>
    %471 = math.exp %470 : vector<2x128xf32>
    %cst_99 = arith.constant 1.000000e+00 : f32
    %472 = vector.broadcast %cst_99 : f32 to vector<2x128xf32>
    %473 = arith.addf %472, %471 : vector<2x128xf32>
    %474 = arith.divf %472, %473 : vector<2x128xf32>
    %475 = vector.extract_strided_slice %464 {offsets = [0, 128], sizes = [2, 128], strides = [1, 1]} : vector<2x512xf32> to vector<2x128xf32>
    %476 = arith.negf %475 : vector<2x128xf32>
    %477 = math.exp %476 : vector<2x128xf32>
    %cst_100 = arith.constant 1.000000e+00 : f32
    %478 = vector.broadcast %cst_100 : f32 to vector<2x128xf32>
    %479 = arith.addf %478, %477 : vector<2x128xf32>
    %480 = arith.divf %478, %479 : vector<2x128xf32>
    %481 = vector.extract_strided_slice %464 {offsets = [0, 256], sizes = [2, 128], strides = [1, 1]} : vector<2x512xf32> to vector<2x128xf32>
    %482 = math.tanh %481 : vector<2x128xf32>
    %483 = vector.extract_strided_slice %464 {offsets = [0, 384], sizes = [2, 128], strides = [1, 1]} : vector<2x512xf32> to vector<2x128xf32>
    %484 = arith.negf %483 : vector<2x128xf32>
    %485 = math.exp %484 : vector<2x128xf32>
    %cst_101 = arith.constant 1.000000e+00 : f32
    %486 = vector.broadcast %cst_101 : f32 to vector<2x128xf32>
    %487 = arith.addf %486, %485 : vector<2x128xf32>
    %488 = arith.divf %486, %487 : vector<2x128xf32>
    %489 = arith.mulf %480, %433 : vector<2x128xf32>
    %490 = arith.mulf %474, %482 : vector<2x128xf32>
    %491 = arith.addf %489, %490 : vector<2x128xf32>
    %492 = math.tanh %491 : vector<2x128xf32>
    %493 = arith.mulf %488, %492 : vector<2x128xf32>
    %494 = vector.extract_strided_slice %468 {offsets = [0, 0], sizes = [2, 128], strides = [1, 1]} : vector<2x512xf32> to vector<2x128xf32>
    %495 = arith.negf %494 : vector<2x128xf32>
    %496 = math.exp %495 : vector<2x128xf32>
    %cst_102 = arith.constant 1.000000e+00 : f32
    %497 = vector.broadcast %cst_102 : f32 to vector<2x128xf32>
    %498 = arith.addf %497, %496 : vector<2x128xf32>
    %499 = arith.divf %497, %498 : vector<2x128xf32>
    %500 = vector.extract_strided_slice %468 {offsets = [0, 128], sizes = [2, 128], strides = [1, 1]} : vector<2x512xf32> to vector<2x128xf32>
    %501 = arith.negf %500 : vector<2x128xf32>
    %502 = math.exp %501 : vector<2x128xf32>
    %cst_103 = arith.constant 1.000000e+00 : f32
    %503 = vector.broadcast %cst_103 : f32 to vector<2x128xf32>
    %504 = arith.addf %503, %502 : vector<2x128xf32>
    %505 = arith.divf %503, %504 : vector<2x128xf32>
    %506 = vector.extract_strided_slice %468 {offsets = [0, 256], sizes = [2, 128], strides = [1, 1]} : vector<2x512xf32> to vector<2x128xf32>
    %507 = math.tanh %506 : vector<2x128xf32>
    %508 = vector.extract_strided_slice %468 {offsets = [0, 384], sizes = [2, 128], strides = [1, 1]} : vector<2x512xf32> to vector<2x128xf32>
    %509 = arith.negf %508 : vector<2x128xf32>
    %510 = math.exp %509 : vector<2x128xf32>
    %cst_104 = arith.constant 1.000000e+00 : f32
    %511 = vector.broadcast %cst_104 : f32 to vector<2x128xf32>
    %512 = arith.addf %511, %510 : vector<2x128xf32>
    %513 = arith.divf %511, %512 : vector<2x128xf32>
    %514 = arith.mulf %505, %458 : vector<2x128xf32>
    %515 = arith.mulf %499, %507 : vector<2x128xf32>
    %516 = arith.addf %514, %515 : vector<2x128xf32>
    %517 = math.tanh %516 : vector<2x128xf32>
    %518 = arith.mulf %513, %517 : vector<2x128xf32>
    %519 = tpu.concatenate %87, %145, %203, %261, %319, %377, %435, %493 in 0 : vector<2x128xf32>, vector<2x128xf32>, vector<2x128xf32>, vector<2x128xf32>, vector<2x128xf32>, vector<2x128xf32>, vector<2x128xf32>, vector<2x128xf32> -> vector<16x128xf32>
    %520 = tpu.concatenate %518, %460, %402, %344, %286, %228, %170, %112 in 0 : vector<2x128xf32>, vector<2x128xf32>, vector<2x128xf32>, vector<2x128xf32>, vector<2x128xf32>, vector<2x128xf32>, vector<2x128xf32>, vector<2x128xf32> -> vector<16x128xf32>
    %521 = tpu.concatenate %519, %520 in 1 : vector<16x128xf32>, vector<16x128xf32> -> vector<16x256xf32>
    %522 = arith.truncf %521 : vector<16x256xf32> to vector<16x256xbf16>
    %c0_105 = arith.constant 0 : index
    %c0_106 = arith.constant 0 : index
    %523 = vector.load %arg7[%c0_105, %c0_106] : memref<256x1024xbf16, #tpu.memory_space<vmem>>, vector<256x1024xbf16>
    %cst_107 = arith.constant dense<0.000000e+00> : vector<16x1024xf32>
    %524 = tpu.matmul %522, %523, %cst_107 {dimension_numbers = #tpu.dot_dimension_numbers<[1], [0], [0], [1], [0, 0, 1, 1], [], []>} : vector<16x256xbf16>, vector<256x1024xbf16>, vector<16x1024xf32> -> vector<16x1024xf32>
    %c0_108 = arith.constant 0 : index
    %c0_109 = arith.constant 0 : index
    %525 = vector.load %arg9[%c0_108, %c0_109] : memref<1x1024xf32, #tpu.memory_space<vmem>>, vector<1x1024xf32>
    %526 = vector.broadcast %525 : vector<1x1024xf32> to vector<16x1024xf32>
    %527 = arith.addf %524, %526 : vector<16x1024xf32>
    %c0_110 = arith.constant 0 : index
    %c0_111 = arith.constant 0 : index
    %c0_112 = arith.constant 0 : index
    %528 = vector.load %arg8[%c0_110, %c0_111, %c0_112] : memref<2x128x512xbf16, #tpu.memory_space<vmem>>, vector<1x128x512xbf16>
    %529 = vector.shape_cast %528 : vector<1x128x512xbf16> to vector<128x512xbf16>
    %c1_113 = arith.constant 1 : index
    %c0_114 = arith.constant 0 : index
    %c0_115 = arith.constant 0 : index
    %530 = vector.load %arg8[%c1_113, %c0_114, %c0_115] : memref<2x128x512xbf16, #tpu.memory_space<vmem>>, vector<1x128x512xbf16>
    %531 = vector.shape_cast %530 : vector<1x128x512xbf16> to vector<128x512xbf16>
    %cst_116 = arith.constant 0.000000e+00 : f32
    %532 = vector.broadcast %cst_116 : f32 to vector<2x128xf32>
    %cst_117 = arith.constant 0.000000e+00 : f32
    %533 = vector.broadcast %cst_117 : f32 to vector<2x128xf32>
    %cst_118 = arith.constant 0.000000e+00 : f32
    %534 = vector.broadcast %cst_118 : f32 to vector<2x128xf32>
    %cst_119 = arith.constant 0.000000e+00 : f32
    %535 = vector.broadcast %cst_119 : f32 to vector<2x128xf32>
    %cst_120 = arith.constant 0xFF800000 : f32
    %536 = vector.broadcast %cst_120 : f32 to vector<2x128xf32>
    %cst_121 = arith.constant 0xFF800000 : f32
    %537 = vector.broadcast %cst_121 : f32 to vector<2x128xf32>
    %538 = vector.extract_strided_slice %527 {offsets = [0, 0], sizes = [2, 512], strides = [1, 1]} : vector<16x1024xf32> to vector<2x512xf32>
    %539 = arith.truncf %532 : vector<2x128xf32> to vector<2x128xbf16>
    %cst_122 = arith.constant dense<0.000000e+00> : vector<2x512xf32>
    %540 = tpu.matmul %539, %529, %cst_122 {dimension_numbers = #tpu.dot_dimension_numbers<[1], [0], [0], [1], [0, 0, 1, 1], [], []>} : vector<2x128xbf16>, vector<128x512xbf16>, vector<2x512xf32> -> vector<2x512xf32>
    %541 = arith.addf %538, %540 : vector<2x512xf32>
    %542 = vector.extract_strided_slice %527 {offsets = [14, 512], sizes = [2, 512], strides = [1, 1]} : vector<16x1024xf32> to vector<2x512xf32>
    %543 = arith.truncf %534 : vector<2x128xf32> to vector<2x128xbf16>
    %cst_123 = arith.constant dense<0.000000e+00> : vector<2x512xf32>
    %544 = tpu.matmul %543, %531, %cst_123 {dimension_numbers = #tpu.dot_dimension_numbers<[1], [0], [0], [1], [0, 0, 1, 1], [], []>} : vector<2x128xbf16>, vector<128x512xbf16>, vector<2x512xf32> -> vector<2x512xf32>
    %545 = arith.addf %542, %544 : vector<2x512xf32>
    %546 = vector.extract_strided_slice %541 {offsets = [0, 0], sizes = [2, 128], strides = [1, 1]} : vector<2x512xf32> to vector<2x128xf32>
    %547 = arith.negf %546 : vector<2x128xf32>
    %548 = math.exp %547 : vector<2x128xf32>
    %cst_124 = arith.constant 1.000000e+00 : f32
    %549 = vector.broadcast %cst_124 : f32 to vector<2x128xf32>
    %550 = arith.addf %549, %548 : vector<2x128xf32>
    %551 = arith.divf %549, %550 : vector<2x128xf32>
    %552 = vector.extract_strided_slice %541 {offsets = [0, 128], sizes = [2, 128], strides = [1, 1]} : vector<2x512xf32> to vector<2x128xf32>
    %553 = arith.negf %552 : vector<2x128xf32>
    %554 = math.exp %553 : vector<2x128xf32>
    %cst_125 = arith.constant 1.000000e+00 : f32
    %555 = vector.broadcast %cst_125 : f32 to vector<2x128xf32>
    %556 = arith.addf %555, %554 : vector<2x128xf32>
    %557 = arith.divf %555, %556 : vector<2x128xf32>
    %558 = vector.extract_strided_slice %541 {offsets = [0, 256], sizes = [2, 128], strides = [1, 1]} : vector<2x512xf32> to vector<2x128xf32>
    %559 = math.tanh %558 : vector<2x128xf32>
    %560 = vector.extract_strided_slice %541 {offsets = [0, 384], sizes = [2, 128], strides = [1, 1]} : vector<2x512xf32> to vector<2x128xf32>
    %561 = arith.negf %560 : vector<2x128xf32>
    %562 = math.exp %561 : vector<2x128xf32>
    %cst_126 = arith.constant 1.000000e+00 : f32
    %563 = vector.broadcast %cst_126 : f32 to vector<2x128xf32>
    %564 = arith.addf %563, %562 : vector<2x128xf32>
    %565 = arith.divf %563, %564 : vector<2x128xf32>
    %566 = arith.mulf %557, %533 : vector<2x128xf32>
    %567 = arith.mulf %551, %559 : vector<2x128xf32>
    %568 = arith.addf %566, %567 : vector<2x128xf32>
    %569 = math.tanh %568 : vector<2x128xf32>
    %570 = arith.mulf %565, %569 : vector<2x128xf32>
    %571 = vector.extract_strided_slice %545 {offsets = [0, 0], sizes = [2, 128], strides = [1, 1]} : vector<2x512xf32> to vector<2x128xf32>
    %572 = arith.negf %571 : vector<2x128xf32>
    %573 = math.exp %572 : vector<2x128xf32>
    %cst_127 = arith.constant 1.000000e+00 : f32
    %574 = vector.broadcast %cst_127 : f32 to vector<2x128xf32>
    %575 = arith.addf %574, %573 : vector<2x128xf32>
    %576 = arith.divf %574, %575 : vector<2x128xf32>
    %577 = vector.extract_strided_slice %545 {offsets = [0, 128], sizes = [2, 128], strides = [1, 1]} : vector<2x512xf32> to vector<2x128xf32>
    %578 = arith.negf %577 : vector<2x128xf32>
    %579 = math.exp %578 : vector<2x128xf32>
    %cst_128 = arith.constant 1.000000e+00 : f32
    %580 = vector.broadcast %cst_128 : f32 to vector<2x128xf32>
    %581 = arith.addf %580, %579 : vector<2x128xf32>
    %582 = arith.divf %580, %581 : vector<2x128xf32>
    %583 = vector.extract_strided_slice %545 {offsets = [0, 256], sizes = [2, 128], strides = [1, 1]} : vector<2x512xf32> to vector<2x128xf32>
    %584 = math.tanh %583 : vector<2x128xf32>
    %585 = vector.extract_strided_slice %545 {offsets = [0, 384], sizes = [2, 128], strides = [1, 1]} : vector<2x512xf32> to vector<2x128xf32>
    %586 = arith.negf %585 : vector<2x128xf32>
    %587 = math.exp %586 : vector<2x128xf32>
    %cst_129 = arith.constant 1.000000e+00 : f32
    %588 = vector.broadcast %cst_129 : f32 to vector<2x128xf32>
    %589 = arith.addf %588, %587 : vector<2x128xf32>
    %590 = arith.divf %588, %589 : vector<2x128xf32>
    %591 = arith.mulf %582, %535 : vector<2x128xf32>
    %592 = arith.mulf %576, %584 : vector<2x128xf32>
    %593 = arith.addf %591, %592 : vector<2x128xf32>
    %594 = math.tanh %593 : vector<2x128xf32>
    %595 = arith.mulf %590, %594 : vector<2x128xf32>
    %596 = arith.maximumf %536, %570 : vector<2x128xf32>
    %597 = arith.maximumf %537, %595 : vector<2x128xf32>
    %598 = vector.extract_strided_slice %527 {offsets = [2, 0], sizes = [2, 512], strides = [1, 1]} : vector<16x1024xf32> to vector<2x512xf32>
    %599 = arith.truncf %570 : vector<2x128xf32> to vector<2x128xbf16>
    %cst_130 = arith.constant dense<0.000000e+00> : vector<2x512xf32>
    %600 = tpu.matmul %599, %529, %cst_130 {dimension_numbers = #tpu.dot_dimension_numbers<[1], [0], [0], [1], [0, 0, 1, 1], [], []>} : vector<2x128xbf16>, vector<128x512xbf16>, vector<2x512xf32> -> vector<2x512xf32>
    %601 = arith.addf %598, %600 : vector<2x512xf32>
    %602 = vector.extract_strided_slice %527 {offsets = [12, 512], sizes = [2, 512], strides = [1, 1]} : vector<16x1024xf32> to vector<2x512xf32>
    %603 = arith.truncf %595 : vector<2x128xf32> to vector<2x128xbf16>
    %cst_131 = arith.constant dense<0.000000e+00> : vector<2x512xf32>
    %604 = tpu.matmul %603, %531, %cst_131 {dimension_numbers = #tpu.dot_dimension_numbers<[1], [0], [0], [1], [0, 0, 1, 1], [], []>} : vector<2x128xbf16>, vector<128x512xbf16>, vector<2x512xf32> -> vector<2x512xf32>
    %605 = arith.addf %602, %604 : vector<2x512xf32>
    %606 = vector.extract_strided_slice %601 {offsets = [0, 0], sizes = [2, 128], strides = [1, 1]} : vector<2x512xf32> to vector<2x128xf32>
    %607 = arith.negf %606 : vector<2x128xf32>
    %608 = math.exp %607 : vector<2x128xf32>
    %cst_132 = arith.constant 1.000000e+00 : f32
    %609 = vector.broadcast %cst_132 : f32 to vector<2x128xf32>
    %610 = arith.addf %609, %608 : vector<2x128xf32>
    %611 = arith.divf %609, %610 : vector<2x128xf32>
    %612 = vector.extract_strided_slice %601 {offsets = [0, 128], sizes = [2, 128], strides = [1, 1]} : vector<2x512xf32> to vector<2x128xf32>
    %613 = arith.negf %612 : vector<2x128xf32>
    %614 = math.exp %613 : vector<2x128xf32>
    %cst_133 = arith.constant 1.000000e+00 : f32
    %615 = vector.broadcast %cst_133 : f32 to vector<2x128xf32>
    %616 = arith.addf %615, %614 : vector<2x128xf32>
    %617 = arith.divf %615, %616 : vector<2x128xf32>
    %618 = vector.extract_strided_slice %601 {offsets = [0, 256], sizes = [2, 128], strides = [1, 1]} : vector<2x512xf32> to vector<2x128xf32>
    %619 = math.tanh %618 : vector<2x128xf32>
    %620 = vector.extract_strided_slice %601 {offsets = [0, 384], sizes = [2, 128], strides = [1, 1]} : vector<2x512xf32> to vector<2x128xf32>
    %621 = arith.negf %620 : vector<2x128xf32>
    %622 = math.exp %621 : vector<2x128xf32>
    %cst_134 = arith.constant 1.000000e+00 : f32
    %623 = vector.broadcast %cst_134 : f32 to vector<2x128xf32>
    %624 = arith.addf %623, %622 : vector<2x128xf32>
    %625 = arith.divf %623, %624 : vector<2x128xf32>
    %626 = arith.mulf %617, %568 : vector<2x128xf32>
    %627 = arith.mulf %611, %619 : vector<2x128xf32>
    %628 = arith.addf %626, %627 : vector<2x128xf32>
    %629 = math.tanh %628 : vector<2x128xf32>
    %630 = arith.mulf %625, %629 : vector<2x128xf32>
    %631 = vector.extract_strided_slice %605 {offsets = [0, 0], sizes = [2, 128], strides = [1, 1]} : vector<2x512xf32> to vector<2x128xf32>
    %632 = arith.negf %631 : vector<2x128xf32>
    %633 = math.exp %632 : vector<2x128xf32>
    %cst_135 = arith.constant 1.000000e+00 : f32
    %634 = vector.broadcast %cst_135 : f32 to vector<2x128xf32>
    %635 = arith.addf %634, %633 : vector<2x128xf32>
    %636 = arith.divf %634, %635 : vector<2x128xf32>
    %637 = vector.extract_strided_slice %605 {offsets = [0, 128], sizes = [2, 128], strides = [1, 1]} : vector<2x512xf32> to vector<2x128xf32>
    %638 = arith.negf %637 : vector<2x128xf32>
    %639 = math.exp %638 : vector<2x128xf32>
    %cst_136 = arith.constant 1.000000e+00 : f32
    %640 = vector.broadcast %cst_136 : f32 to vector<2x128xf32>
    %641 = arith.addf %640, %639 : vector<2x128xf32>
    %642 = arith.divf %640, %641 : vector<2x128xf32>
    %643 = vector.extract_strided_slice %605 {offsets = [0, 256], sizes = [2, 128], strides = [1, 1]} : vector<2x512xf32> to vector<2x128xf32>
    %644 = math.tanh %643 : vector<2x128xf32>
    %645 = vector.extract_strided_slice %605 {offsets = [0, 384], sizes = [2, 128], strides = [1, 1]} : vector<2x512xf32> to vector<2x128xf32>
    %646 = arith.negf %645 : vector<2x128xf32>
    %647 = math.exp %646 : vector<2x128xf32>
    %cst_137 = arith.constant 1.000000e+00 : f32
    %648 = vector.broadcast %cst_137 : f32 to vector<2x128xf32>
    %649 = arith.addf %648, %647 : vector<2x128xf32>
    %650 = arith.divf %648, %649 : vector<2x128xf32>
    %651 = arith.mulf %642, %593 : vector<2x128xf32>
    %652 = arith.mulf %636, %644 : vector<2x128xf32>
    %653 = arith.addf %651, %652 : vector<2x128xf32>
    %654 = math.tanh %653 : vector<2x128xf32>
    %655 = arith.mulf %650, %654 : vector<2x128xf32>
    %656 = arith.maximumf %596, %630 : vector<2x128xf32>
    %657 = arith.maximumf %597, %655 : vector<2x128xf32>
    %658 = vector.extract_strided_slice %527 {offsets = [4, 0], sizes = [2, 512], strides = [1, 1]} : vector<16x1024xf32> to vector<2x512xf32>
    %659 = arith.truncf %630 : vector<2x128xf32> to vector<2x128xbf16>
    %cst_138 = arith.constant dense<0.000000e+00> : vector<2x512xf32>
    %660 = tpu.matmul %659, %529, %cst_138 {dimension_numbers = #tpu.dot_dimension_numbers<[1], [0], [0], [1], [0, 0, 1, 1], [], []>} : vector<2x128xbf16>, vector<128x512xbf16>, vector<2x512xf32> -> vector<2x512xf32>
    %661 = arith.addf %658, %660 : vector<2x512xf32>
    %662 = vector.extract_strided_slice %527 {offsets = [10, 512], sizes = [2, 512], strides = [1, 1]} : vector<16x1024xf32> to vector<2x512xf32>
    %663 = arith.truncf %655 : vector<2x128xf32> to vector<2x128xbf16>
    %cst_139 = arith.constant dense<0.000000e+00> : vector<2x512xf32>
    %664 = tpu.matmul %663, %531, %cst_139 {dimension_numbers = #tpu.dot_dimension_numbers<[1], [0], [0], [1], [0, 0, 1, 1], [], []>} : vector<2x128xbf16>, vector<128x512xbf16>, vector<2x512xf32> -> vector<2x512xf32>
    %665 = arith.addf %662, %664 : vector<2x512xf32>
    %666 = vector.extract_strided_slice %661 {offsets = [0, 0], sizes = [2, 128], strides = [1, 1]} : vector<2x512xf32> to vector<2x128xf32>
    %667 = arith.negf %666 : vector<2x128xf32>
    %668 = math.exp %667 : vector<2x128xf32>
    %cst_140 = arith.constant 1.000000e+00 : f32
    %669 = vector.broadcast %cst_140 : f32 to vector<2x128xf32>
    %670 = arith.addf %669, %668 : vector<2x128xf32>
    %671 = arith.divf %669, %670 : vector<2x128xf32>
    %672 = vector.extract_strided_slice %661 {offsets = [0, 128], sizes = [2, 128], strides = [1, 1]} : vector<2x512xf32> to vector<2x128xf32>
    %673 = arith.negf %672 : vector<2x128xf32>
    %674 = math.exp %673 : vector<2x128xf32>
    %cst_141 = arith.constant 1.000000e+00 : f32
    %675 = vector.broadcast %cst_141 : f32 to vector<2x128xf32>
    %676 = arith.addf %675, %674 : vector<2x128xf32>
    %677 = arith.divf %675, %676 : vector<2x128xf32>
    %678 = vector.extract_strided_slice %661 {offsets = [0, 256], sizes = [2, 128], strides = [1, 1]} : vector<2x512xf32> to vector<2x128xf32>
    %679 = math.tanh %678 : vector<2x128xf32>
    %680 = vector.extract_strided_slice %661 {offsets = [0, 384], sizes = [2, 128], strides = [1, 1]} : vector<2x512xf32> to vector<2x128xf32>
    %681 = arith.negf %680 : vector<2x128xf32>
    %682 = math.exp %681 : vector<2x128xf32>
    %cst_142 = arith.constant 1.000000e+00 : f32
    %683 = vector.broadcast %cst_142 : f32 to vector<2x128xf32>
    %684 = arith.addf %683, %682 : vector<2x128xf32>
    %685 = arith.divf %683, %684 : vector<2x128xf32>
    %686 = arith.mulf %677, %628 : vector<2x128xf32>
    %687 = arith.mulf %671, %679 : vector<2x128xf32>
    %688 = arith.addf %686, %687 : vector<2x128xf32>
    %689 = math.tanh %688 : vector<2x128xf32>
    %690 = arith.mulf %685, %689 : vector<2x128xf32>
    %691 = vector.extract_strided_slice %665 {offsets = [0, 0], sizes = [2, 128], strides = [1, 1]} : vector<2x512xf32> to vector<2x128xf32>
    %692 = arith.negf %691 : vector<2x128xf32>
    %693 = math.exp %692 : vector<2x128xf32>
    %cst_143 = arith.constant 1.000000e+00 : f32
    %694 = vector.broadcast %cst_143 : f32 to vector<2x128xf32>
    %695 = arith.addf %694, %693 : vector<2x128xf32>
    %696 = arith.divf %694, %695 : vector<2x128xf32>
    %697 = vector.extract_strided_slice %665 {offsets = [0, 128], sizes = [2, 128], strides = [1, 1]} : vector<2x512xf32> to vector<2x128xf32>
    %698 = arith.negf %697 : vector<2x128xf32>
    %699 = math.exp %698 : vector<2x128xf32>
    %cst_144 = arith.constant 1.000000e+00 : f32
    %700 = vector.broadcast %cst_144 : f32 to vector<2x128xf32>
    %701 = arith.addf %700, %699 : vector<2x128xf32>
    %702 = arith.divf %700, %701 : vector<2x128xf32>
    %703 = vector.extract_strided_slice %665 {offsets = [0, 256], sizes = [2, 128], strides = [1, 1]} : vector<2x512xf32> to vector<2x128xf32>
    %704 = math.tanh %703 : vector<2x128xf32>
    %705 = vector.extract_strided_slice %665 {offsets = [0, 384], sizes = [2, 128], strides = [1, 1]} : vector<2x512xf32> to vector<2x128xf32>
    %706 = arith.negf %705 : vector<2x128xf32>
    %707 = math.exp %706 : vector<2x128xf32>
    %cst_145 = arith.constant 1.000000e+00 : f32
    %708 = vector.broadcast %cst_145 : f32 to vector<2x128xf32>
    %709 = arith.addf %708, %707 : vector<2x128xf32>
    %710 = arith.divf %708, %709 : vector<2x128xf32>
    %711 = arith.mulf %702, %653 : vector<2x128xf32>
    %712 = arith.mulf %696, %704 : vector<2x128xf32>
    %713 = arith.addf %711, %712 : vector<2x128xf32>
    %714 = math.tanh %713 : vector<2x128xf32>
    %715 = arith.mulf %710, %714 : vector<2x128xf32>
    %716 = arith.maximumf %656, %690 : vector<2x128xf32>
    %717 = arith.maximumf %657, %715 : vector<2x128xf32>
    %718 = vector.extract_strided_slice %527 {offsets = [6, 0], sizes = [2, 512], strides = [1, 1]} : vector<16x1024xf32> to vector<2x512xf32>
    %719 = arith.truncf %690 : vector<2x128xf32> to vector<2x128xbf16>
    %cst_146 = arith.constant dense<0.000000e+00> : vector<2x512xf32>
    %720 = tpu.matmul %719, %529, %cst_146 {dimension_numbers = #tpu.dot_dimension_numbers<[1], [0], [0], [1], [0, 0, 1, 1], [], []>} : vector<2x128xbf16>, vector<128x512xbf16>, vector<2x512xf32> -> vector<2x512xf32>
    %721 = arith.addf %718, %720 : vector<2x512xf32>
    %722 = vector.extract_strided_slice %527 {offsets = [8, 512], sizes = [2, 512], strides = [1, 1]} : vector<16x1024xf32> to vector<2x512xf32>
    %723 = arith.truncf %715 : vector<2x128xf32> to vector<2x128xbf16>
    %cst_147 = arith.constant dense<0.000000e+00> : vector<2x512xf32>
    %724 = tpu.matmul %723, %531, %cst_147 {dimension_numbers = #tpu.dot_dimension_numbers<[1], [0], [0], [1], [0, 0, 1, 1], [], []>} : vector<2x128xbf16>, vector<128x512xbf16>, vector<2x512xf32> -> vector<2x512xf32>
    %725 = arith.addf %722, %724 : vector<2x512xf32>
    %726 = vector.extract_strided_slice %721 {offsets = [0, 0], sizes = [2, 128], strides = [1, 1]} : vector<2x512xf32> to vector<2x128xf32>
    %727 = arith.negf %726 : vector<2x128xf32>
    %728 = math.exp %727 : vector<2x128xf32>
    %cst_148 = arith.constant 1.000000e+00 : f32
    %729 = vector.broadcast %cst_148 : f32 to vector<2x128xf32>
    %730 = arith.addf %729, %728 : vector<2x128xf32>
    %731 = arith.divf %729, %730 : vector<2x128xf32>
    %732 = vector.extract_strided_slice %721 {offsets = [0, 128], sizes = [2, 128], strides = [1, 1]} : vector<2x512xf32> to vector<2x128xf32>
    %733 = arith.negf %732 : vector<2x128xf32>
    %734 = math.exp %733 : vector<2x128xf32>
    %cst_149 = arith.constant 1.000000e+00 : f32
    %735 = vector.broadcast %cst_149 : f32 to vector<2x128xf32>
    %736 = arith.addf %735, %734 : vector<2x128xf32>
    %737 = arith.divf %735, %736 : vector<2x128xf32>
    %738 = vector.extract_strided_slice %721 {offsets = [0, 256], sizes = [2, 128], strides = [1, 1]} : vector<2x512xf32> to vector<2x128xf32>
    %739 = math.tanh %738 : vector<2x128xf32>
    %740 = vector.extract_strided_slice %721 {offsets = [0, 384], sizes = [2, 128], strides = [1, 1]} : vector<2x512xf32> to vector<2x128xf32>
    %741 = arith.negf %740 : vector<2x128xf32>
    %742 = math.exp %741 : vector<2x128xf32>
    %cst_150 = arith.constant 1.000000e+00 : f32
    %743 = vector.broadcast %cst_150 : f32 to vector<2x128xf32>
    %744 = arith.addf %743, %742 : vector<2x128xf32>
    %745 = arith.divf %743, %744 : vector<2x128xf32>
    %746 = arith.mulf %737, %688 : vector<2x128xf32>
    %747 = arith.mulf %731, %739 : vector<2x128xf32>
    %748 = arith.addf %746, %747 : vector<2x128xf32>
    %749 = math.tanh %748 : vector<2x128xf32>
    %750 = arith.mulf %745, %749 : vector<2x128xf32>
    %751 = vector.extract_strided_slice %725 {offsets = [0, 0], sizes = [2, 128], strides = [1, 1]} : vector<2x512xf32> to vector<2x128xf32>
    %752 = arith.negf %751 : vector<2x128xf32>
    %753 = math.exp %752 : vector<2x128xf32>
    %cst_151 = arith.constant 1.000000e+00 : f32
    %754 = vector.broadcast %cst_151 : f32 to vector<2x128xf32>
    %755 = arith.addf %754, %753 : vector<2x128xf32>
    %756 = arith.divf %754, %755 : vector<2x128xf32>
    %757 = vector.extract_strided_slice %725 {offsets = [0, 128], sizes = [2, 128], strides = [1, 1]} : vector<2x512xf32> to vector<2x128xf32>
    %758 = arith.negf %757 : vector<2x128xf32>
    %759 = math.exp %758 : vector<2x128xf32>
    %cst_152 = arith.constant 1.000000e+00 : f32
    %760 = vector.broadcast %cst_152 : f32 to vector<2x128xf32>
    %761 = arith.addf %760, %759 : vector<2x128xf32>
    %762 = arith.divf %760, %761 : vector<2x128xf32>
    %763 = vector.extract_strided_slice %725 {offsets = [0, 256], sizes = [2, 128], strides = [1, 1]} : vector<2x512xf32> to vector<2x128xf32>
    %764 = math.tanh %763 : vector<2x128xf32>
    %765 = vector.extract_strided_slice %725 {offsets = [0, 384], sizes = [2, 128], strides = [1, 1]} : vector<2x512xf32> to vector<2x128xf32>
    %766 = arith.negf %765 : vector<2x128xf32>
    %767 = math.exp %766 : vector<2x128xf32>
    %cst_153 = arith.constant 1.000000e+00 : f32
    %768 = vector.broadcast %cst_153 : f32 to vector<2x128xf32>
    %769 = arith.addf %768, %767 : vector<2x128xf32>
    %770 = arith.divf %768, %769 : vector<2x128xf32>
    %771 = arith.mulf %762, %713 : vector<2x128xf32>
    %772 = arith.mulf %756, %764 : vector<2x128xf32>
    %773 = arith.addf %771, %772 : vector<2x128xf32>
    %774 = math.tanh %773 : vector<2x128xf32>
    %775 = arith.mulf %770, %774 : vector<2x128xf32>
    %776 = arith.maximumf %716, %750 : vector<2x128xf32>
    %777 = arith.maximumf %717, %775 : vector<2x128xf32>
    %778 = vector.extract_strided_slice %527 {offsets = [8, 0], sizes = [2, 512], strides = [1, 1]} : vector<16x1024xf32> to vector<2x512xf32>
    %779 = arith.truncf %750 : vector<2x128xf32> to vector<2x128xbf16>
    %cst_154 = arith.constant dense<0.000000e+00> : vector<2x512xf32>
    %780 = tpu.matmul %779, %529, %cst_154 {dimension_numbers = #tpu.dot_dimension_numbers<[1], [0], [0], [1], [0, 0, 1, 1], [], []>} : vector<2x128xbf16>, vector<128x512xbf16>, vector<2x512xf32> -> vector<2x512xf32>
    %781 = arith.addf %778, %780 : vector<2x512xf32>
    %782 = vector.extract_strided_slice %527 {offsets = [6, 512], sizes = [2, 512], strides = [1, 1]} : vector<16x1024xf32> to vector<2x512xf32>
    %783 = arith.truncf %775 : vector<2x128xf32> to vector<2x128xbf16>
    %cst_155 = arith.constant dense<0.000000e+00> : vector<2x512xf32>
    %784 = tpu.matmul %783, %531, %cst_155 {dimension_numbers = #tpu.dot_dimension_numbers<[1], [0], [0], [1], [0, 0, 1, 1], [], []>} : vector<2x128xbf16>, vector<128x512xbf16>, vector<2x512xf32> -> vector<2x512xf32>
    %785 = arith.addf %782, %784 : vector<2x512xf32>
    %786 = vector.extract_strided_slice %781 {offsets = [0, 0], sizes = [2, 128], strides = [1, 1]} : vector<2x512xf32> to vector<2x128xf32>
    %787 = arith.negf %786 : vector<2x128xf32>
    %788 = math.exp %787 : vector<2x128xf32>
    %cst_156 = arith.constant 1.000000e+00 : f32
    %789 = vector.broadcast %cst_156 : f32 to vector<2x128xf32>
    %790 = arith.addf %789, %788 : vector<2x128xf32>
    %791 = arith.divf %789, %790 : vector<2x128xf32>
    %792 = vector.extract_strided_slice %781 {offsets = [0, 128], sizes = [2, 128], strides = [1, 1]} : vector<2x512xf32> to vector<2x128xf32>
    %793 = arith.negf %792 : vector<2x128xf32>
    %794 = math.exp %793 : vector<2x128xf32>
    %cst_157 = arith.constant 1.000000e+00 : f32
    %795 = vector.broadcast %cst_157 : f32 to vector<2x128xf32>
    %796 = arith.addf %795, %794 : vector<2x128xf32>
    %797 = arith.divf %795, %796 : vector<2x128xf32>
    %798 = vector.extract_strided_slice %781 {offsets = [0, 256], sizes = [2, 128], strides = [1, 1]} : vector<2x512xf32> to vector<2x128xf32>
    %799 = math.tanh %798 : vector<2x128xf32>
    %800 = vector.extract_strided_slice %781 {offsets = [0, 384], sizes = [2, 128], strides = [1, 1]} : vector<2x512xf32> to vector<2x128xf32>
    %801 = arith.negf %800 : vector<2x128xf32>
    %802 = math.exp %801 : vector<2x128xf32>
    %cst_158 = arith.constant 1.000000e+00 : f32
    %803 = vector.broadcast %cst_158 : f32 to vector<2x128xf32>
    %804 = arith.addf %803, %802 : vector<2x128xf32>
    %805 = arith.divf %803, %804 : vector<2x128xf32>
    %806 = arith.mulf %797, %748 : vector<2x128xf32>
    %807 = arith.mulf %791, %799 : vector<2x128xf32>
    %808 = arith.addf %806, %807 : vector<2x128xf32>
    %809 = math.tanh %808 : vector<2x128xf32>
    %810 = arith.mulf %805, %809 : vector<2x128xf32>
    %811 = vector.extract_strided_slice %785 {offsets = [0, 0], sizes = [2, 128], strides = [1, 1]} : vector<2x512xf32> to vector<2x128xf32>
    %812 = arith.negf %811 : vector<2x128xf32>
    %813 = math.exp %812 : vector<2x128xf32>
    %cst_159 = arith.constant 1.000000e+00 : f32
    %814 = vector.broadcast %cst_159 : f32 to vector<2x128xf32>
    %815 = arith.addf %814, %813 : vector<2x128xf32>
    %816 = arith.divf %814, %815 : vector<2x128xf32>
    %817 = vector.extract_strided_slice %785 {offsets = [0, 128], sizes = [2, 128], strides = [1, 1]} : vector<2x512xf32> to vector<2x128xf32>
    %818 = arith.negf %817 : vector<2x128xf32>
    %819 = math.exp %818 : vector<2x128xf32>
    %cst_160 = arith.constant 1.000000e+00 : f32
    %820 = vector.broadcast %cst_160 : f32 to vector<2x128xf32>
    %821 = arith.addf %820, %819 : vector<2x128xf32>
    %822 = arith.divf %820, %821 : vector<2x128xf32>
    %823 = vector.extract_strided_slice %785 {offsets = [0, 256], sizes = [2, 128], strides = [1, 1]} : vector<2x512xf32> to vector<2x128xf32>
    %824 = math.tanh %823 : vector<2x128xf32>
    %825 = vector.extract_strided_slice %785 {offsets = [0, 384], sizes = [2, 128], strides = [1, 1]} : vector<2x512xf32> to vector<2x128xf32>
    %826 = arith.negf %825 : vector<2x128xf32>
    %827 = math.exp %826 : vector<2x128xf32>
    %cst_161 = arith.constant 1.000000e+00 : f32
    %828 = vector.broadcast %cst_161 : f32 to vector<2x128xf32>
    %829 = arith.addf %828, %827 : vector<2x128xf32>
    %830 = arith.divf %828, %829 : vector<2x128xf32>
    %831 = arith.mulf %822, %773 : vector<2x128xf32>
    %832 = arith.mulf %816, %824 : vector<2x128xf32>
    %833 = arith.addf %831, %832 : vector<2x128xf32>
    %834 = math.tanh %833 : vector<2x128xf32>
    %835 = arith.mulf %830, %834 : vector<2x128xf32>
    %836 = arith.maximumf %776, %810 : vector<2x128xf32>
    %837 = arith.maximumf %777, %835 : vector<2x128xf32>
    %838 = vector.extract_strided_slice %527 {offsets = [10, 0], sizes = [2, 512], strides = [1, 1]} : vector<16x1024xf32> to vector<2x512xf32>
    %839 = arith.truncf %810 : vector<2x128xf32> to vector<2x128xbf16>
    %cst_162 = arith.constant dense<0.000000e+00> : vector<2x512xf32>
    %840 = tpu.matmul %839, %529, %cst_162 {dimension_numbers = #tpu.dot_dimension_numbers<[1], [0], [0], [1], [0, 0, 1, 1], [], []>} : vector<2x128xbf16>, vector<128x512xbf16>, vector<2x512xf32> -> vector<2x512xf32>
    %841 = arith.addf %838, %840 : vector<2x512xf32>
    %842 = vector.extract_strided_slice %527 {offsets = [4, 512], sizes = [2, 512], strides = [1, 1]} : vector<16x1024xf32> to vector<2x512xf32>
    %843 = arith.truncf %835 : vector<2x128xf32> to vector<2x128xbf16>
    %cst_163 = arith.constant dense<0.000000e+00> : vector<2x512xf32>
    %844 = tpu.matmul %843, %531, %cst_163 {dimension_numbers = #tpu.dot_dimension_numbers<[1], [0], [0], [1], [0, 0, 1, 1], [], []>} : vector<2x128xbf16>, vector<128x512xbf16>, vector<2x512xf32> -> vector<2x512xf32>
    %845 = arith.addf %842, %844 : vector<2x512xf32>
    %846 = vector.extract_strided_slice %841 {offsets = [0, 0], sizes = [2, 128], strides = [1, 1]} : vector<2x512xf32> to vector<2x128xf32>
    %847 = arith.negf %846 : vector<2x128xf32>
    %848 = math.exp %847 : vector<2x128xf32>
    %cst_164 = arith.constant 1.000000e+00 : f32
    %849 = vector.broadcast %cst_164 : f32 to vector<2x128xf32>
    %850 = arith.addf %849, %848 : vector<2x128xf32>
    %851 = arith.divf %849, %850 : vector<2x128xf32>
    %852 = vector.extract_strided_slice %841 {offsets = [0, 128], sizes = [2, 128], strides = [1, 1]} : vector<2x512xf32> to vector<2x128xf32>
    %853 = arith.negf %852 : vector<2x128xf32>
    %854 = math.exp %853 : vector<2x128xf32>
    %cst_165 = arith.constant 1.000000e+00 : f32
    %855 = vector.broadcast %cst_165 : f32 to vector<2x128xf32>
    %856 = arith.addf %855, %854 : vector<2x128xf32>
    %857 = arith.divf %855, %856 : vector<2x128xf32>
    %858 = vector.extract_strided_slice %841 {offsets = [0, 256], sizes = [2, 128], strides = [1, 1]} : vector<2x512xf32> to vector<2x128xf32>
    %859 = math.tanh %858 : vector<2x128xf32>
    %860 = vector.extract_strided_slice %841 {offsets = [0, 384], sizes = [2, 128], strides = [1, 1]} : vector<2x512xf32> to vector<2x128xf32>
    %861 = arith.negf %860 : vector<2x128xf32>
    %862 = math.exp %861 : vector<2x128xf32>
    %cst_166 = arith.constant 1.000000e+00 : f32
    %863 = vector.broadcast %cst_166 : f32 to vector<2x128xf32>
    %864 = arith.addf %863, %862 : vector<2x128xf32>
    %865 = arith.divf %863, %864 : vector<2x128xf32>
    %866 = arith.mulf %857, %808 : vector<2x128xf32>
    %867 = arith.mulf %851, %859 : vector<2x128xf32>
    %868 = arith.addf %866, %867 : vector<2x128xf32>
    %869 = math.tanh %868 : vector<2x128xf32>
    %870 = arith.mulf %865, %869 : vector<2x128xf32>
    %871 = vector.extract_strided_slice %845 {offsets = [0, 0], sizes = [2, 128], strides = [1, 1]} : vector<2x512xf32> to vector<2x128xf32>
    %872 = arith.negf %871 : vector<2x128xf32>
    %873 = math.exp %872 : vector<2x128xf32>
    %cst_167 = arith.constant 1.000000e+00 : f32
    %874 = vector.broadcast %cst_167 : f32 to vector<2x128xf32>
    %875 = arith.addf %874, %873 : vector<2x128xf32>
    %876 = arith.divf %874, %875 : vector<2x128xf32>
    %877 = vector.extract_strided_slice %845 {offsets = [0, 128], sizes = [2, 128], strides = [1, 1]} : vector<2x512xf32> to vector<2x128xf32>
    %878 = arith.negf %877 : vector<2x128xf32>
    %879 = math.exp %878 : vector<2x128xf32>
    %cst_168 = arith.constant 1.000000e+00 : f32
    %880 = vector.broadcast %cst_168 : f32 to vector<2x128xf32>
    %881 = arith.addf %880, %879 : vector<2x128xf32>
    %882 = arith.divf %880, %881 : vector<2x128xf32>
    %883 = vector.extract_strided_slice %845 {offsets = [0, 256], sizes = [2, 128], strides = [1, 1]} : vector<2x512xf32> to vector<2x128xf32>
    %884 = math.tanh %883 : vector<2x128xf32>
    %885 = vector.extract_strided_slice %845 {offsets = [0, 384], sizes = [2, 128], strides = [1, 1]} : vector<2x512xf32> to vector<2x128xf32>
    %886 = arith.negf %885 : vector<2x128xf32>
    %887 = math.exp %886 : vector<2x128xf32>
    %cst_169 = arith.constant 1.000000e+00 : f32
    %888 = vector.broadcast %cst_169 : f32 to vector<2x128xf32>
    %889 = arith.addf %888, %887 : vector<2x128xf32>
    %890 = arith.divf %888, %889 : vector<2x128xf32>
    %891 = arith.mulf %882, %833 : vector<2x128xf32>
    %892 = arith.mulf %876, %884 : vector<2x128xf32>
    %893 = arith.addf %891, %892 : vector<2x128xf32>
    %894 = math.tanh %893 : vector<2x128xf32>
    %895 = arith.mulf %890, %894 : vector<2x128xf32>
    %896 = arith.maximumf %836, %870 : vector<2x128xf32>
    %897 = arith.maximumf %837, %895 : vector<2x128xf32>
    %898 = vector.extract_strided_slice %527 {offsets = [12, 0], sizes = [2, 512], strides = [1, 1]} : vector<16x1024xf32> to vector<2x512xf32>
    %899 = arith.truncf %870 : vector<2x128xf32> to vector<2x128xbf16>
    %cst_170 = arith.constant dense<0.000000e+00> : vector<2x512xf32>
    %900 = tpu.matmul %899, %529, %cst_170 {dimension_numbers = #tpu.dot_dimension_numbers<[1], [0], [0], [1], [0, 0, 1, 1], [], []>} : vector<2x128xbf16>, vector<128x512xbf16>, vector<2x512xf32> -> vector<2x512xf32>
    %901 = arith.addf %898, %900 : vector<2x512xf32>
    %902 = vector.extract_strided_slice %527 {offsets = [2, 512], sizes = [2, 512], strides = [1, 1]} : vector<16x1024xf32> to vector<2x512xf32>
    %903 = arith.truncf %895 : vector<2x128xf32> to vector<2x128xbf16>
    %cst_171 = arith.constant dense<0.000000e+00> : vector<2x512xf32>
    %904 = tpu.matmul %903, %531, %cst_171 {dimension_numbers = #tpu.dot_dimension_numbers<[1], [0], [0], [1], [0, 0, 1, 1], [], []>} : vector<2x128xbf16>, vector<128x512xbf16>, vector<2x512xf32> -> vector<2x512xf32>
    %905 = arith.addf %902, %904 : vector<2x512xf32>
    %906 = vector.extract_strided_slice %901 {offsets = [0, 0], sizes = [2, 128], strides = [1, 1]} : vector<2x512xf32> to vector<2x128xf32>
    %907 = arith.negf %906 : vector<2x128xf32>
    %908 = math.exp %907 : vector<2x128xf32>
    %cst_172 = arith.constant 1.000000e+00 : f32
    %909 = vector.broadcast %cst_172 : f32 to vector<2x128xf32>
    %910 = arith.addf %909, %908 : vector<2x128xf32>
    %911 = arith.divf %909, %910 : vector<2x128xf32>
    %912 = vector.extract_strided_slice %901 {offsets = [0, 128], sizes = [2, 128], strides = [1, 1]} : vector<2x512xf32> to vector<2x128xf32>
    %913 = arith.negf %912 : vector<2x128xf32>
    %914 = math.exp %913 : vector<2x128xf32>
    %cst_173 = arith.constant 1.000000e+00 : f32
    %915 = vector.broadcast %cst_173 : f32 to vector<2x128xf32>
    %916 = arith.addf %915, %914 : vector<2x128xf32>
    %917 = arith.divf %915, %916 : vector<2x128xf32>
    %918 = vector.extract_strided_slice %901 {offsets = [0, 256], sizes = [2, 128], strides = [1, 1]} : vector<2x512xf32> to vector<2x128xf32>
    %919 = math.tanh %918 : vector<2x128xf32>
    %920 = vector.extract_strided_slice %901 {offsets = [0, 384], sizes = [2, 128], strides = [1, 1]} : vector<2x512xf32> to vector<2x128xf32>
    %921 = arith.negf %920 : vector<2x128xf32>
    %922 = math.exp %921 : vector<2x128xf32>
    %cst_174 = arith.constant 1.000000e+00 : f32
    %923 = vector.broadcast %cst_174 : f32 to vector<2x128xf32>
    %924 = arith.addf %923, %922 : vector<2x128xf32>
    %925 = arith.divf %923, %924 : vector<2x128xf32>
    %926 = arith.mulf %917, %868 : vector<2x128xf32>
    %927 = arith.mulf %911, %919 : vector<2x128xf32>
    %928 = arith.addf %926, %927 : vector<2x128xf32>
    %929 = math.tanh %928 : vector<2x128xf32>
    %930 = arith.mulf %925, %929 : vector<2x128xf32>
    %931 = vector.extract_strided_slice %905 {offsets = [0, 0], sizes = [2, 128], strides = [1, 1]} : vector<2x512xf32> to vector<2x128xf32>
    %932 = arith.negf %931 : vector<2x128xf32>
    %933 = math.exp %932 : vector<2x128xf32>
    %cst_175 = arith.constant 1.000000e+00 : f32
    %934 = vector.broadcast %cst_175 : f32 to vector<2x128xf32>
    %935 = arith.addf %934, %933 : vector<2x128xf32>
    %936 = arith.divf %934, %935 : vector<2x128xf32>
    %937 = vector.extract_strided_slice %905 {offsets = [0, 128], sizes = [2, 128], strides = [1, 1]} : vector<2x512xf32> to vector<2x128xf32>
    %938 = arith.negf %937 : vector<2x128xf32>
    %939 = math.exp %938 : vector<2x128xf32>
    %cst_176 = arith.constant 1.000000e+00 : f32
    %940 = vector.broadcast %cst_176 : f32 to vector<2x128xf32>
    %941 = arith.addf %940, %939 : vector<2x128xf32>
    %942 = arith.divf %940, %941 : vector<2x128xf32>
    %943 = vector.extract_strided_slice %905 {offsets = [0, 256], sizes = [2, 128], strides = [1, 1]} : vector<2x512xf32> to vector<2x128xf32>
    %944 = math.tanh %943 : vector<2x128xf32>
    %945 = vector.extract_strided_slice %905 {offsets = [0, 384], sizes = [2, 128], strides = [1, 1]} : vector<2x512xf32> to vector<2x128xf32>
    %946 = arith.negf %945 : vector<2x128xf32>
    %947 = math.exp %946 : vector<2x128xf32>
    %cst_177 = arith.constant 1.000000e+00 : f32
    %948 = vector.broadcast %cst_177 : f32 to vector<2x128xf32>
    %949 = arith.addf %948, %947 : vector<2x128xf32>
    %950 = arith.divf %948, %949 : vector<2x128xf32>
    %951 = arith.mulf %942, %893 : vector<2x128xf32>
    %952 = arith.mulf %936, %944 : vector<2x128xf32>
    %953 = arith.addf %951, %952 : vector<2x128xf32>
    %954 = math.tanh %953 : vector<2x128xf32>
    %955 = arith.mulf %950, %954 : vector<2x128xf32>
    %956 = arith.maximumf %896, %930 : vector<2x128xf32>
    %957 = arith.maximumf %897, %955 : vector<2x128xf32>
    %958 = vector.extract_strided_slice %527 {offsets = [14, 0], sizes = [2, 512], strides = [1, 1]} : vector<16x1024xf32> to vector<2x512xf32>
    %959 = arith.truncf %930 : vector<2x128xf32> to vector<2x128xbf16>
    %cst_178 = arith.constant dense<0.000000e+00> : vector<2x512xf32>
    %960 = tpu.matmul %959, %529, %cst_178 {dimension_numbers = #tpu.dot_dimension_numbers<[1], [0], [0], [1], [0, 0, 1, 1], [], []>} : vector<2x128xbf16>, vector<128x512xbf16>, vector<2x512xf32> -> vector<2x512xf32>
    %961 = arith.addf %958, %960 : vector<2x512xf32>
    %962 = vector.extract_strided_slice %527 {offsets = [0, 512], sizes = [2, 512], strides = [1, 1]} : vector<16x1024xf32> to vector<2x512xf32>
    %963 = arith.truncf %955 : vector<2x128xf32> to vector<2x128xbf16>
    %cst_179 = arith.constant dense<0.000000e+00> : vector<2x512xf32>
    %964 = tpu.matmul %963, %531, %cst_179 {dimension_numbers = #tpu.dot_dimension_numbers<[1], [0], [0], [1], [0, 0, 1, 1], [], []>} : vector<2x128xbf16>, vector<128x512xbf16>, vector<2x512xf32> -> vector<2x512xf32>
    %965 = arith.addf %962, %964 : vector<2x512xf32>
    %966 = vector.extract_strided_slice %961 {offsets = [0, 0], sizes = [2, 128], strides = [1, 1]} : vector<2x512xf32> to vector<2x128xf32>
    %967 = arith.negf %966 : vector<2x128xf32>
    %968 = math.exp %967 : vector<2x128xf32>
    %cst_180 = arith.constant 1.000000e+00 : f32
    %969 = vector.broadcast %cst_180 : f32 to vector<2x128xf32>
    %970 = arith.addf %969, %968 : vector<2x128xf32>
    %971 = arith.divf %969, %970 : vector<2x128xf32>
    %972 = vector.extract_strided_slice %961 {offsets = [0, 128], sizes = [2, 128], strides = [1, 1]} : vector<2x512xf32> to vector<2x128xf32>
    %973 = arith.negf %972 : vector<2x128xf32>
    %974 = math.exp %973 : vector<2x128xf32>
    %cst_181 = arith.constant 1.000000e+00 : f32
    %975 = vector.broadcast %cst_181 : f32 to vector<2x128xf32>
    %976 = arith.addf %975, %974 : vector<2x128xf32>
    %977 = arith.divf %975, %976 : vector<2x128xf32>
    %978 = vector.extract_strided_slice %961 {offsets = [0, 256], sizes = [2, 128], strides = [1, 1]} : vector<2x512xf32> to vector<2x128xf32>
    %979 = math.tanh %978 : vector<2x128xf32>
    %980 = vector.extract_strided_slice %961 {offsets = [0, 384], sizes = [2, 128], strides = [1, 1]} : vector<2x512xf32> to vector<2x128xf32>
    %981 = arith.negf %980 : vector<2x128xf32>
    %982 = math.exp %981 : vector<2x128xf32>
    %cst_182 = arith.constant 1.000000e+00 : f32
    %983 = vector.broadcast %cst_182 : f32 to vector<2x128xf32>
    %984 = arith.addf %983, %982 : vector<2x128xf32>
    %985 = arith.divf %983, %984 : vector<2x128xf32>
    %986 = arith.mulf %977, %928 : vector<2x128xf32>
    %987 = arith.mulf %971, %979 : vector<2x128xf32>
    %988 = arith.addf %986, %987 : vector<2x128xf32>
    %989 = math.tanh %988 : vector<2x128xf32>
    %990 = arith.mulf %985, %989 : vector<2x128xf32>
    %991 = vector.extract_strided_slice %965 {offsets = [0, 0], sizes = [2, 128], strides = [1, 1]} : vector<2x512xf32> to vector<2x128xf32>
    %992 = arith.negf %991 : vector<2x128xf32>
    %993 = math.exp %992 : vector<2x128xf32>
    %cst_183 = arith.constant 1.000000e+00 : f32
    %994 = vector.broadcast %cst_183 : f32 to vector<2x128xf32>
    %995 = arith.addf %994, %993 : vector<2x128xf32>
    %996 = arith.divf %994, %995 : vector<2x128xf32>
    %997 = vector.extract_strided_slice %965 {offsets = [0, 128], sizes = [2, 128], strides = [1, 1]} : vector<2x512xf32> to vector<2x128xf32>
    %998 = arith.negf %997 : vector<2x128xf32>
    %999 = math.exp %998 : vector<2x128xf32>
    %cst_184 = arith.constant 1.000000e+00 : f32
    %1000 = vector.broadcast %cst_184 : f32 to vector<2x128xf32>
    %1001 = arith.addf %1000, %999 : vector<2x128xf32>
    %1002 = arith.divf %1000, %1001 : vector<2x128xf32>
    %1003 = vector.extract_strided_slice %965 {offsets = [0, 256], sizes = [2, 128], strides = [1, 1]} : vector<2x512xf32> to vector<2x128xf32>
    %1004 = math.tanh %1003 : vector<2x128xf32>
    %1005 = vector.extract_strided_slice %965 {offsets = [0, 384], sizes = [2, 128], strides = [1, 1]} : vector<2x512xf32> to vector<2x128xf32>
    %1006 = arith.negf %1005 : vector<2x128xf32>
    %1007 = math.exp %1006 : vector<2x128xf32>
    %cst_185 = arith.constant 1.000000e+00 : f32
    %1008 = vector.broadcast %cst_185 : f32 to vector<2x128xf32>
    %1009 = arith.addf %1008, %1007 : vector<2x128xf32>
    %1010 = arith.divf %1008, %1009 : vector<2x128xf32>
    %1011 = arith.mulf %1002, %953 : vector<2x128xf32>
    %1012 = arith.mulf %996, %1004 : vector<2x128xf32>
    %1013 = arith.addf %1011, %1012 : vector<2x128xf32>
    %1014 = math.tanh %1013 : vector<2x128xf32>
    %1015 = arith.mulf %1010, %1014 : vector<2x128xf32>
    %1016 = arith.maximumf %956, %990 : vector<2x128xf32>
    %1017 = arith.maximumf %957, %1015 : vector<2x128xf32>
    %1018 = tpu.concatenate %1016, %1017 in 1 : vector<2x128xf32>, vector<2x128xf32> -> vector<2x256xf32>
    %c0_186 = arith.constant 0 : index
    %c0_187 = arith.constant 0 : index
    %1019 = vector.load %arg10[%c0_186, %c0_187] : memref<256x128xf32, #tpu.memory_space<vmem>>, vector<256x128xf32>
    %cst_188 = arith.constant dense<0.000000e+00> : vector<2x128xf32>
    %1020 = tpu.matmul %1018, %1019, %cst_188 {dimension_numbers = #tpu.dot_dimension_numbers<[1], [0], [0], [1], [0, 0, 1, 1], [], []>} : vector<2x256xf32>, vector<256x128xf32>, vector<2x128xf32> -> vector<2x128xf32>
    %c0_189 = arith.constant 0 : index
    %c0_190 = arith.constant 0 : index
    %1021 = vector.load %arg11[%c0_189, %c0_190] : memref<1x128xf32, #tpu.memory_space<vmem>>, vector<1x128xf32>
    %1022 = vector.broadcast %1021 : vector<1x128xf32> to vector<2x128xf32>
    %1023 = arith.addf %1020, %1022 : vector<2x128xf32>
    %cst_191 = arith.constant 0.000000e+00 : f32
    %1024 = vector.broadcast %cst_191 : f32 to vector<2x128xf32>
    %1025 = arith.maximumf %1023, %1024 : vector<2x128xf32>
    %c0_192 = arith.constant 0 : index
    %c0_193 = arith.constant 0 : index
    %1026 = vector.load %arg12[%c0_192, %c0_193] : memref<128x64xf32, #tpu.memory_space<vmem>>, vector<128x64xf32>
    %cst_194 = arith.constant dense<0.000000e+00> : vector<2x64xf32>
    %1027 = tpu.matmul %1025, %1026, %cst_194 {dimension_numbers = #tpu.dot_dimension_numbers<[1], [0], [0], [1], [0, 0, 1, 1], [], []>} : vector<2x128xf32>, vector<128x64xf32>, vector<2x64xf32> -> vector<2x64xf32>
    %c0_195 = arith.constant 0 : index
    %c0_196 = arith.constant 0 : index
    %1028 = vector.load %arg13[%c0_195, %c0_196] : memref<1x64xf32, #tpu.memory_space<vmem>>, vector<1x64xf32>
    %1029 = vector.broadcast %1028 : vector<1x64xf32> to vector<2x64xf32>
    %1030 = arith.addf %1027, %1029 : vector<2x64xf32>
    %cst_197 = arith.constant 0.000000e+00 : f32
    %1031 = vector.broadcast %cst_197 : f32 to vector<2x64xf32>
    %1032 = arith.maximumf %1030, %1031 : vector<2x64xf32>
    %c0_198 = arith.constant 0 : index
    %c0_199 = arith.constant 0 : index
    %1033 = vector.load %arg14[%c0_198, %c0_199] : memref<64x2xf32, #tpu.memory_space<vmem>>, vector<64x2xf32>
    %cst_200 = arith.constant dense<0.000000e+00> : vector<2x2xf32>
    %1034 = tpu.matmul %1032, %1033, %cst_200 {dimension_numbers = #tpu.dot_dimension_numbers<[1], [0], [0], [1], [0, 0, 1, 1], [], []>} : vector<2x64xf32>, vector<64x2xf32>, vector<2x2xf32> -> vector<2x2xf32>
    %c0_201 = arith.constant 0 : index
    %c0_202 = arith.constant 0 : index
    %1035 = vector.load %arg15[%c0_201, %c0_202] : memref<1x2xf32, #tpu.memory_space<vmem>>, vector<1x2xf32>
    %1036 = vector.broadcast %1035 : vector<1x2xf32> to vector<2x2xf32>
    %1037 = arith.addf %1034, %1036 : vector<2x2xf32>
    %cst_203 = arith.constant dense<0xFF800000> : vector<2xf32>
    %1038 = vector.multi_reduction <maximumf>, %1037, %cst_203 [1] : vector<2x2xf32> to vector<2xf32>
    %1039 = vector.shape_cast %1038 : vector<2xf32> to vector<2x1xf32>
    %1040 = vector.broadcast %1039 : vector<2x1xf32> to vector<2x2xf32>
    %1041 = arith.subf %1037, %1040 : vector<2x2xf32>
    %1042 = math.exp %1041 : vector<2x2xf32>
    %cst_204 = arith.constant dense<0.000000e+00> : vector<2xf32>
    %1043 = vector.multi_reduction <add>, %1042, %cst_204 [1] : vector<2x2xf32> to vector<2xf32>
    %1044 = vector.shape_cast %1043 : vector<2xf32> to vector<2x1xf32>
    %1045 = vector.broadcast %1044 : vector<2x1xf32> to vector<2x2xf32>
    %1046 = arith.divf %1042, %1045 : vector<2x2xf32>
    %c0_205 = arith.constant 0 : index
    %c0_206 = arith.constant 0 : index
    %1047 = vector.load %arg16[%c0_205, %c0_206] : memref<2x2xf32, #tpu.memory_space<vmem>>, vector<2x2xf32>
    tpu.vector_store %arg16[%c0_205, %c0_206], %1046 {strides = array<i32>} : memref<2x2xf32, #tpu.memory_space<vmem>>, vector<2x2xf32>,
    return
  }
}

</mosaic_0001>

<bundles_post_ra>
// kernel: forward.1
= control target key start
LH: loop header
LB: loop body
LE: loop exit
PB: predicated region body
PF: predicated region fallthrough
CT: control target
= control target key end

     0   :  { %s13275_s0 = inlined_call_operand.vmem [shape: f32[22,32], index: 0, kind: input, shape index: {}]   ;;  %s13276_s1 = inlined_call_operand.vmem [shape: f32[4,32,192], index: 1, kind: input, shape index: {}]   ;;  %s13277_s2 = inlined_call_operand.vmem [shape: f32[1,192], index: 2, kind: input, shape index: {}]   ;;  %s13278_s3 = inlined_call_operand.vmem [shape: f32[4,192], index: 3, kind: input, shape index: {}]   ;;  %s13279_s4 = inlined_call_operand.hbm [shape: bf16[192,1024], index: 4, kind: input, shape index: {}]   ;;  %s13280_s5 = inlined_call_operand.hbm [shape: bf16[2,128,512], index: 5, kind: input, shape index: {}]   ;;  %s13281_s6 = inlined_call_operand.vmem [shape: f32[1,1024], index: 6, kind: input, shape index: {}]   ;;  %s13282_s7 = inlined_call_operand.hbm [shape: bf16[256,1024], index: 7, kind: input, shape index: {}]   ;;  %s13283_s8 = inlined_call_operand.hbm [shape: bf16[2,128,512], index: 8, kind: input, shape index: {}]   ;;  %s13284_s9 = inlined_call_operand.vmem [shape: f32[1,1024], index: 9, kind: input, shape index: {}]   ;;  %s13285_s10 = inlined_call_operand.hbm [shape: f32[256,128], index: 10, kind: input, shape index: {}]   ;;  %s13286_s11 = inlined_call_operand.vmem [shape: f32[1,128], index: 11, kind: input, shape index: {}]   ;;  %s13287_s12 = inlined_call_operand.vmem [shape: f32[128,64], index: 12, kind: input, shape index: {}]   ;;  %s13288_s13 = inlined_call_operand.vmem [shape: f32[1,64], index: 13, kind: input, shape index: {}]   ;;  %s13289_s14 = inlined_call_operand.vmem [shape: f32[64,2], index: 14, kind: input, shape index: {}]   ;;  %s13290_s15 = inlined_call_operand.vmem [shape: f32[1,2], index: 15, kind: input, shape index: {}]   ;;  %s13291_s16 = inlined_call_operand.hbm [shape: f32[2,2], index: 16, kind: output, shape index: {}]  }
   0x1   :  { %13538 = sst [smem:[#allocation82_spill]] %s13275_s0 }
   0x2   :  { %13539 = sst [smem:[#allocation83_spill]] %s13291_s16 }
   0x3   :  { %21 = vsyncpa [#allocation3], 0 }
   0x4   :  { %22 = vsyncpa [#allocation6], 0 }
   0x5   :  { %23 = vsyncpa [#allocation9], 0  ;;  %s50_s23 = sshll.u32 %s13280_s5, 4  ;;  %s51_s23 = int_to_ptr.hbm [resolvable:$true] %s50_s23 }
   0x6   :  { %24 = vsyncpa [#allocation4], 0  ;;  %s10195_s24 = smov [#allocation5]   ;;  %s78_s28 = sshll.u32 %s13283_s8, 4  ;;  %s79_s28 = int_to_ptr.hbm [resolvable:$true] %s78_s28 }
   0x7   :  { %s52_s25 = sshll.u32 %s10195_s24, 4  ;;  %s10196_s29 = smov 256   ;;  %s53_s25 = int_to_ptr.vmem [resolvable:$true] %s52_s25 }
   0x8   :  { %s10197_s30 = smov 16   ;;  %s10198_s0 = smov [#allocation8]  }
   0x9   :  { %58 = dma.hbm_to_vmem [thread:$0]  %s51_s23, 8192, %s53_s25, [#allocation6], %s10196_s29, %s10196_s29, %s10197_s30  }
   0xa   :  { %s80_s17 = sshll.u32 %s10198_s0, 4  ;;  %s37_s20 = sshll.u32 %s13279_s4, 4  ;;  %s81_s17 = int_to_ptr.vmem [resolvable:$true] %s80_s17  ;;  %s38_s20 = int_to_ptr.hbm [resolvable:$true] %s37_s20 }
   0xb   :  { %86 = dma.hbm_to_vmem [thread:$0]  %s79_s28, 8192, %s81_s17, [#allocation9], %s10196_s29, %s10196_s29, %s10197_s30  }
   0xc   :  { %s10199_s5 = smov [#allocation2]   ;;  %s65_s8 = sshll.u32 %s13282_s7, 4  ;;  %s66_s8 = int_to_ptr.hbm [resolvable:$true] %s65_s8 }
   0xd   :  { %s39_s21 = sshll.u32 %s10199_s5, 4  ;;  %s10200_s26 = smov 512   ;;  %s40_s21 = int_to_ptr.vmem [resolvable:$true] %s39_s21 }
   0xe   :  { %s10201_s27 = smov 32   ;;  %s10202_s23 = smov [#allocation7]  }
   0xf   :  { %45 = dma.hbm_to_vmem [thread:$0]  %s38_s20, 12288, %s40_s21, [#allocation3], %s10200_s26, %s10200_s26, %s10201_s27  }
  0x10   :  { %s67_s25 = sshll.u32 %s10202_s23, 4  ;;  %s93_s4 = sshll.u32 %s13285_s10, 4  ;;  %s68_s25 = int_to_ptr.vmem [resolvable:$true] %s67_s25  ;;  %s94_s4 = int_to_ptr.hbm [resolvable:$true] %s93_s4 }
  0x11   :  { %73 = dma.hbm_to_vmem [thread:$0]  %s66_s8, 16384, %s68_s25, [#allocation6], %s10200_s26, %s10200_s26, %s10201_s27  }
  0x12   :  { %s10203_s28 = smov [#allocation10]   ;;  %s10204_s30 = smov 128  }
  0x13   :  { %s95_s29 = sshll.u32 %s10203_s28, 4  ;;  %s10205_s17 = smov 8   ;;  %s96_s29 = int_to_ptr.vmem [resolvable:$true] %s95_s29 }
  0x14   :  { %101 = dma.hbm_to_vmem [thread:$0]  %s94_s4, 4096, %s96_s29, [#allocation9], %s10204_s30, %s10204_s30, %s10205_s17  }
  0x15   :  { %10187 = dma.done.wait [#allocation3], 12288  }
  0x16   :  { %10188 = vsyncadd [#allocation3], 4294955008 }
  0x17   :  { %10189 = dma.done.wait [#allocation6], 24576  }
  0x18   :  { %10190 = vsyncadd [#allocation6], 4294942720 }
  0x19   :  { %10191 = dma.done.wait [#allocation9], 12288  }
  0x1a   :  { %10192 = vsyncadd [#allocation9], 4294955008  ;;  %v7603_v0 = vld [vmem:[%s13276_s1 + $0x70] sm:$0xff]  ;;  %v7604_v1 = vld [vmem:[%s13276_s1 + $0x78] sm:$0xff]  ;;  %s13540_s18 = sld [smem:[#allocation82_spill]]  ;;  %vm156_vm0 = vcmask 1045504  }
  0x1b   :  { %v142_v2 = vld [vmem:[%s13276_s1 + $0x30] sm:$0xff]  ;;  %179 = vmatpush.msra.mxu0 %v7603_v0  ;;  %9505 = vmatpush.msra.mxu3 %v7603_v0  ;;  %v7601_v3 = vld [vmem:[%s13276_s1 + $0x60] sm:$0xff]  ;;  %v7602_v4 = vld [vmem:[%s13276_s1 + $0x68] sm:$0xff]  ;;  %vm162_vm1 = vcmask 261120   ;;  %vm272_vm2 = vcmask 1043456   ;;  %vm341_vm3 = vcmask 1041408  }
  0x1c   :  { %v140_v5 = vld [vmem:[%s13276_s1 + $0x20] sm:$0xff]  ;;  %202 = vmatpush.msra.mxu1 %v7604_v1  ;;  %229 = vmatpush.msra.mxu2 %v142_v2  ;;  %v7599_v6 = vld [vmem:[%s13276_s1 + $0x50] sm:$0xff]  ;;  %v7600_v7 = vld [vmem:[%s13276_s1 + $0x58] sm:$0xff]  ;;  %vm1050_vm7 = vcmask 523264   ;;  %s14255_s29 = sld [smem:[#allocation83_spill]] }
  0x1d   :  { %180 = vmatpush.msra.mxu0 %v7601_v3  ;;  %9506 = vmatpush.msra.mxu3 %v7601_v3  ;;  %v138_v8 = vld [vmem:[%s13276_s1 + $0x10] sm:$0xff]  ;;  %v7597_v9 = vld [vmem:[%s13276_s1 + $0x40] sm:$0xff]  ;;  %v7598_v13 = vld [vmem:[%s13276_s1 + $0x48] sm:$0xff] }
  0x1e   :  { %203 = vmatpush.msra.mxu1 %v7602_v4  ;;  %230 = vmatpush.msra.mxu2 %v140_v5  ;;  %v136_v14 = vld [vmem:[%s13276_s1] sm:$0xff]  ;;  %v143_v20 = vld [vmem:[%s13276_s1 + $0x38] sm:$0xff]  ;;  %v7619_v21 = vld [vmem:[%s13276_s1 + $0xb0] sm:$0xff] }
  0x1f   :  { %181 = vmatpush.msra.mxu0 %v7599_v6  ;;  %9507 = vmatpush.msra.mxu3 %v7599_v6  ;;  %v7620_v22 = vld [vmem:[%s13276_s1 + $0xb8] sm:$0xff]  ;;  %v7631_v23 = vld [vmem:[%s13276_s1 + $0xf0] sm:$0xff]  ;;  %v141_v24 = vld [vmem:[%s13276_s1 + $0x28] sm:$0xff] }
  0x20   :  { %v10341_v10 = vld [vmem:[%s13540_s18] sm:$0xff]  ;;  %v10346_v11 = vld [vmem:[%s13540_s18 + $0x8] sm:$0xff]  ;;  %v10351_v12 = vld [vmem:[%s13540_s18 + $0x10] sm:$0x3f]  ;;  %204 = vmatpush.msra.mxu1 %v7600_v7  ;;  %231 = vmatpush.msra.mxu2 %v138_v8 }
  0x21   :  { %v157_v15 = vrot.slane %v10341_v10, 2  ;;  %v158_v16 = vrot.slane %v10346_v11, 2  ;;  %v160_v17 = vrot.slane %v10351_v12, 2  ;;  %182 = vmatpush.msra.mxu0 %v7597_v9  ;;  %9508 = vmatpush.msra.mxu3 %v7597_v9  ;;  %v7617_v25 = vld [vmem:[%s13276_s1 + $0xa0] sm:$0xff]  ;;  %v139_v26 = vld [vmem:[%s13276_s1 + $0x18] sm:$0xff]  ;;  %v7615_v27 = vld [vmem:[%s13276_s1 + $0x90] sm:$0xff] }
  0x22   :  { %205 = vmatpush.msra.mxu1 %v7598_v13  ;;  %232 = vmatpush.msra.mxu2 %v136_v14  ;;  %v7618_v28 = vld [vmem:[%s13276_s1 + $0xa8] sm:$0xff]  ;;  %v7629_v29 = vld [vmem:[%s13276_s1 + $0xe0] sm:$0xff]  ;;  %v273_v32 = vrot.slane %v10341_v10, 4  ;;  %v274_v33 = vrot.slane %v10346_v11, 4  ;;  %v7616_v34 = vld [vmem:[%s13276_s1 + $0x98] sm:$0xff]  ;;  %v342_v45 = vrot.slane %v10341_v10, 6 }
  0x23   :  { %v159_v18 = vsel %vm156_vm0, %v157_v15, %v158_v16  ;;  %v161_v19 = vsel %vm156_vm0, %v158_v16, %v160_v17  ;;  %7609 = vmatmul.msk.f32.vlgmr.msra.gmra.mxu2 %vm162_vm1, %v10341_v10  ;;  %252 = vmatpush.msrb.mxu3 %v143_v20  ;;  %v137_v30 = vld [vmem:[%s13276_s1 + $0x8] sm:$0xff]  ;;  %v7613_v31 = vld [vmem:[%s13276_s1 + $0x80] sm:$0xff]  ;;  %v7627_v35 = vld [vmem:[%s13276_s1 + $0xd0] sm:$0xff]  ;;  %v343_v46 = vrot.slane %v10346_v11, 6  ;;  %v276_v47 = vrot.slane %v10351_v12, 4  ;;  %s7585_s30 = sshll.u32 %s14255_s29, 4  ;;  %s7586_s30 = int_to_ptr.hbm [resolvable:$true] %s7585_s30 }
  0x24   :  { %7605 = vmatmul.msk.f32.vlgmr.msra.gmra.mxu0 %vm162_vm1, %v159_v18  ;;  %7606 = vmatmul.msk.f32.vlgmr.msra.gmra.mxu3 %vm162_vm1, %v161_v19  ;;  %v7866_v36 = vld [vmem:[#allocation2 + $0x1c0] sm:$0xf]  ;;  %v275_v38 = vsel %vm272_vm2, %v273_v32, %v274_v33  ;;  %v7614_v39 = vld [vmem:[%s13276_s1 + $0x88] sm:$0xff]  ;;  %v7632_v42 = vld [vmem:[%s13276_s1 + $0xf8] sm:$0xff]  ;;  %v345_v57 = vrot.slane %v10351_v12, 6 }
  0x25   :  { %7607 = vmatmul.msk.f32.vlgmr.msra.gmra.mxu1 %vm162_vm1, %v159_v18  ;;  %294 = vmatpush.msrb.mxu0 %v7619_v21  ;;  %v9213_v37 = vld [vmem:[#allocation2 + $0x1dc] sm:$0xf0]  ;;  %v7630_v48 = vld [vmem:[%s13276_s1 + $0xe8] sm:$0xff]  ;;  %v7628_v50 = vld [vmem:[%s13276_s1 + $0xd8] sm:$0xff]  ;;  %v344_v53 = vsel %vm341_vm3, %v342_v45, %v343_v46  ;;  %v277_v54 = vsel %vm272_vm2, %v274_v33, %v276_v47 }
  0x26   :  { %317 = vmatpush.msrb.mxu1 %v7620_v22  ;;  %363 = vmatpush.msrb.mxu2 %v7631_v23  ;;  %v7625_v40 = vld [vmem:[%s13276_s1 + $0xc0] sm:$0xff]  ;;  %v7867_v41 = vor.u32 %v9213_v37, %v7866_v36  ;;  %v7626_v55 = vld [vmem:[%s13276_s1 + $0xc8] sm:$0xff]  ;;  %v346_v58 = vsel %vm341_vm3, %v343_v46, %v345_v57 }
  0x27   :  { %253 = vmatpush.msrb.mxu3 %v141_v24  ;;  %295 = vmatpush.msrb.mxu0 %v7617_v25  ;;  %v7834_v43 = vld [vmem:[#allocation2 + $0x180] sm:$0xf]  ;;  %v9209_v62 = vld [vmem:[#allocation2 + $0x1c4] sm:$0xf]  ;;  %v9210_v33 = vld [vmem:[#allocation2 + $0x1cc] sm:$0xf] }
  0x28   :  { %318 = vmatpush.msrb.mxu1 %v7618_v28  ;;  %364 = vmatpush.msrb.mxu2 %v7629_v29  ;;  %v9205_v44 = vld [vmem:[#allocation2 + $0x19c] sm:$0xf0]  ;;  %v7868_v63 = vld [vmem:[#allocation2 + $0x1e0] sm:$0xf0]  ;;  %v9194_v57 = vld [vmem:[#allocation2 + $0x14c] sm:$0xf] }
  0x29   :  { %254 = vmatpush.msrb.mxu3 %v139_v26  ;;  %296 = vmatpush.msrb.mxu0 %v7615_v27  ;;  %v7835_v49 = vor.u32 %v9205_v44, %v7834_v43  ;;  %v7802_v51 = vld [vmem:[#allocation2 + $0x140] sm:$0xf]  ;;  %v7871_v0 = vor.u32 %v9209_v62, %v7868_v63  ;;  %v9201_v3 = vld [vmem:[#allocation2 + $0x184] sm:$0xf] }
  0x2a   :  { %319 = vmatpush.msrb.mxu1 %v7616_v34  ;;  %365 = vmatpush.msrb.mxu2 %v7627_v35  ;;  %v9197_v52 = vld [vmem:[#allocation2 + $0x15c] sm:$0xf0]  ;;  %v7836_v5 = vld [vmem:[#allocation2 + $0x1a0] sm:$0xf0]  ;;  %v7876_v34 = vld [vmem:[#allocation2 + $0x1e8] sm:$0xf0] }
  0x2b   :  { %255 = vmatpush.msrb.mxu3 %v137_v30  ;;  %297 = vmatpush.msrb.mxu0 %v7613_v31  ;;  %v7803_v56 = vor.u32 %v9197_v52, %v7802_v51  ;;  %v7770_v59 = vld [vmem:[#allocation2 + $0x100] sm:$0xf]  ;;  %v7839_v6 = vor.u32 %v9201_v3, %v7836_v5  ;;  %v9185_v18 = vld [vmem:[#allocation2 + $0x104] sm:$0xf]  ;;  %v7879_v35 = vor.u32 %v9210_v33, %v7876_v34  ;;  %v9206_v5 = vld [vmem:[#allocation2 + $0x1a4] sm:$0xf0] }
  0x2c   :  { %7610 = vmatmul.msk.f32.gmra.mxu2 %vm162_vm1, %v10346_v11  ;;  %7611 = vmatmul.msk.f32.vlgmr.msrb.gmra.mxu3 %vm162_vm1, %v10341_v10  ;;  %v9189_v60 = vld [vmem:[#allocation2 + $0x11c] sm:$0xf0]  ;;  %v9193_v10 = vld [vmem:[#allocation2 + $0x144] sm:$0xf] }
  0x2d   :  { %7608 = vmatmul.msk.f32.gmra.mxu1 %vm162_vm1, %v161_v19  ;;  %7621 = vmatmul.msk.f32.vlgmr.msrb.gmra.mxu0 %vm162_vm1, %v275_v38  ;;  %v7771_v61 = vor.u32 %v9189_v60, %v7770_v59  ;;  %v7738_v1 = vld [vmem:[#allocation2 + $0xc0] sm:$0xf]  ;;  %v7772_v19 = vld [vmem:[#allocation2 + $0x120] sm:$0xf0]  ;;  %v7812_v59 = vld [vmem:[#allocation2 + $0x168] sm:$0xf0] }
  0x2e   :  { %320 = vmatpush.msrb.mxu1 %v7614_v39  ;;  %366 = vmatpush.msrb.mxu2 %v7625_v40  ;;  %v9181_v2 = vld [vmem:[#allocation2 + $0xdc] sm:$0xf0]  ;;  %v7775_v21 = vor.u32 %v9185_v18, %v7772_v19  ;;  %v9177_v29 = vld [vmem:[#allocation2 + $0xc4] sm:$0xf]  ;;  %v7815_v60 = vor.u32 %v9194_v57, %v7812_v59  ;;  %v9198_v18 = vld [vmem:[#allocation2 + $0x164] sm:$0xf0] }
  0x2f   :  { %386 = vmatpush.msra.mxu3 %v7632_v42  ;;  %1054 = vmatpush.bf16.msra.mxu0 %v7867_v41  ;;  %v7739_v4 = vor.u32 %v9181_v2, %v7738_v1  ;;  %v7706_v7 = vld [vmem:[#allocation2 + $0x80] sm:$0xf]  ;;  %v7740_v30 = vld [vmem:[#allocation2 + $0xe0] sm:$0xf0]  ;;  %v9202_v41 = vld [vmem:[#allocation2 + $0x18c] sm:$0xf] }
  0x30   :  { %1082 = vmatpush.bf16.msra.mxu2 %v7871_v0  ;;  %v9173_v8 = vld [vmem:[#allocation2 + $0x9c] sm:$0xf0]  ;;  %v7743_v32 = vor.u32 %v9177_v29, %v7740_v30  ;;  %v7708_v40 = vld [vmem:[#allocation2 + $0xa0] sm:$0xf0]  ;;  %v7844_v42 = vld [vmem:[#allocation2 + $0x1a8] sm:$0xf0] }
  0x31   :  { %387 = vmatpush.msra.mxu3 %v7630_v48  ;;  %v7707_v9 = vor.u32 %v9173_v8, %v7706_v7  ;;  %v7674_v13 = vld [vmem:[#allocation2 + $0x40] sm:$0xf]  ;;  %v7847_v44 = vor.u32 %v9202_v41, %v7844_v42  ;;  %v9161_v48 = vld [vmem:[#allocation2 + $0x44] sm:$0xf]  ;;  %v7780_v8 = vld [vmem:[#allocation2 + $0x128] sm:$0xf0] }
  0x32   :  { %v9165_v14 = vld [vmem:[#allocation2 + $0x5c] sm:$0xf0]  ;;  %v7996_v52 = vld [vmem:[#allocation2 + $0x2e0] sm:$0xf0]  ;;  %v9178_v19 = vld [vmem:[#allocation2 + $0xcc] sm:$0xf] }
  0x33   :  { %388 = vmatpush.msra.mxu3 %v7628_v50  ;;  %1055 = vmatpush.bf16.msra.mxu0 %v7835_v49  ;;  %v7994_v15 = vld [vmem:[#allocation2 + $0x2c0] sm:$0xf]  ;;  %v7675_v16 = vor.u32 %v9165_v14, %v7674_v13  ;;  %v7676_v49 = vld [vmem:[#allocation2 + $0x60] sm:$0xf0]  ;;  %v9246_v42 = vld [vmem:[#allocation2 + $0x2e4] sm:$0xf0] }
  0x34   :  { %7633 = vmatmul.msk.f32.vlgmr.msrb.gmra.mxu2 %vm162_vm1, %v344_v53  ;;  %7612 = vmatmul.msk.f32.gmra.mxu3 %vm162_vm1, %v10346_v11  ;;  %v7804_v11 = vld [vmem:[#allocation2 + $0x160] sm:$0xf0]  ;;  %v9245_v17 = vld [vmem:[#allocation2 + $0x2dc] sm:$0xf0]  ;;  %v7679_v51 = vor.u32 %v9161_v48, %v7676_v49  ;;  %v9162_v49 = vld [vmem:[#allocation2 + $0x4c] sm:$0xf] }
  0x35   :  { %7623 = vmatmul.msk.f32.vlgmr.msrb.gmra.mxu1 %vm162_vm1, %v275_v38  ;;  %7622 = vmatmul.msk.f32.gmra.mxu0 %vm162_vm1, %v277_v54  ;;  %v7807_v12 = vor.u32 %v9193_v10, %v7804_v11  ;;  %v7995_v20 = vor.u32 %v9245_v17, %v7994_v15  ;;  %v7637_v22 = vld [vmem:[%s13278_s3 + $0x3] ss:$4 sm:$0x3]  ;;  %v8004_v10 = vld [vmem:[#allocation2 + $0x2e8] sm:$0xf0] }
  0x36   :  { %389 = vmatpush.msra.mxu3 %v7626_v55  ;;  %1083 = vmatpush.bf16.msra.mxu2 %v7839_v6  ;;  %v10457_v23 = vadd.f32 1e-05, %v7637_v22  ;;  %v7642_v24 = vld [vmem:[#allocation2] sm:$0xf]  ;;  %v9169_v38 = vld [vmem:[#allocation2 + $0x84] sm:$0xf] }
  0x37   :  { %1056 = vmatpush.bf16.msra.mxu0 %v7803_v56  ;;  %1072 = vmatpush.bf16.msra.mxu1 %v7995_v20  ;;  %v9157_v25 = vld [vmem:[#allocation2 + $0x1c] sm:$0xf0]  ;;  %v7711_v43 = vor.u32 %v9169_v38, %v7708_v40  ;;  %v9241_v50 = vld [vmem:[#allocation2 + $0x2c4] sm:$0xf]  ;;  %v9214_v56 = vld [vmem:[#allocation2 + $0x1e4] sm:$0xf0] }
  0x38   :  { %v7962_v26 = vld [vmem:[#allocation2 + $0x280] sm:$0xf]  ;;  %v7643_v27 = vor.u32 %v9157_v25, %v7642_v24  ;;  %9525 = vrsqrt.f32 %v10457_v23  ;;  %v7999_v55 = vor.u32 %v9241_v50, %v7996_v52  ;;  %v9153_v62 = vld [vmem:[#allocation2 + $0x4] sm:$0xf]  ;;  %v9186_v6 = vld [vmem:[#allocation2 + $0x10c] sm:$0xf]  ;;  %vm425_vm4 = vweird.f32 %v10457_v23 }
  0x39   :  { %v9237_v28 = vld [vmem:[#allocation2 + $0x29c] sm:$0xf0]  ;;  %v7644_v63 = vld [vmem:[#allocation2 + $0x20] sm:$0xf0]  ;;  %v7810_v17 = vld [vmem:[#allocation2 + $0x148] sm:$0xf] }
  0x3a   :  { %1084 = vmatpush.bf16.msra.mxu2 %v7807_v12  ;;  %v7963_v31 = vor.u32 %v9237_v28, %v7962_v26  ;;  %v7930_v36 = vld [vmem:[#allocation2 + $0x240] sm:$0xf]  ;;  %1100 = vmatpush.bf16.msrb.mxu3 %v7999_v55  ;;  %v9233_v0 = vld [vmem:[#allocation2 + $0x284] sm:$0xf]  ;;  %v7647_v2 = vor.u32 %v9153_v62, %v7644_v63  ;;  %v7783_v12 = vor.u32 %v9186_v6, %v7780_v8  ;;  %v9234_v22 = vld [vmem:[#allocation2 + $0x28c] sm:$0xf] }
  0x3b   :  { %1057 = vmatpush.bf16.msra.mxu0 %v7771_v61  ;;  %v9229_v37 = vld [vmem:[#allocation2 + $0x25c] sm:$0xf0]  ;;  %v7964_v1 = vld [vmem:[#allocation2 + $0x2a0] sm:$0xf0]  ;;  %v7811_v20 = vor.u32 %v9198_v18, %v7810_v17  ;;  %v7972_v24 = vld [vmem:[#allocation2 + $0x2a8] sm:$0xf0] }
  0x3c   :  { %7634 = vmatmul.msk.f32.gmra.mxu2 %vm162_vm1, %v346_v58  ;;  %7635 = vmatmul.msk.f32.vlgmr.msra.gmra.mxu3 %vm162_vm1, %v344_v53  ;;  %v7931_v39 = vor.u32 %v9229_v37, %v7930_v36  ;;  %v7898_v45 = vld [vmem:[#allocation2 + $0x200] sm:$0xf]  ;;  %v7874_v53 = vld [vmem:[#allocation2 + $0x1c8] sm:$0xf]  ;;  %v7967_v3 = vor.u32 %v9233_v0, %v7964_v1  ;;  %v9225_v14 = vld [vmem:[#allocation2 + $0x244] sm:$0xf]  ;;  %v7975_v26 = vor.u32 %v9234_v22, %v7972_v24 }
  0x3d   :  { %7624 = vmatmul.msk.f32.gmra.mxu1 %vm162_vm1, %v277_v54  ;;  %v9221_v46 = vld [vmem:[#allocation2 + $0x21c] sm:$0xf0]  ;;  %v7932_v15 = vld [vmem:[#allocation2 + $0x260] sm:$0xf0]  ;;  %v9170_v36 = vld [vmem:[#allocation2 + $0x8c] sm:$0xf] }
  0x3e   :  { %1085 = vmatpush.bf16.msra.mxu2 %v7775_v21  ;;  %1073 = vmatpush.bf16.msra.mxu1 %v7963_v31  ;;  %v7899_v47 = vor.u32 %v9221_v46, %v7898_v45  ;;  %v10460_v54 = vpop.eup %9525  ;;  %v7748_v21 = vld [vmem:[#allocation2 + $0xe8] sm:$0xf0]  ;;  %v7900_v28 = vld [vmem:[#allocation2 + $0x220] sm:$0xf0]  ;;  %v7778_v31 = vld [vmem:[#allocation2 + $0x108] sm:$0xf] }
  0x3f   :  { %1058 = vmatpush.bf16.msra.mxu0 %v7739_v4  ;;  %v420_v61 = vmul.f32 %v10460_v54, %v10457_v23  ;;  %v7842_v4 = vld [vmem:[#allocation2 + $0x188] sm:$0xf]  ;;  %1101 = vmatpush.bf16.msrb.mxu3 %v7967_v3  ;;  %v7751_v25 = vor.u32 %v9178_v19, %v7748_v21  ;;  %v7716_v37 = vld [vmem:[#allocation2 + $0xa8] sm:$0xf0]  ;;  %vm426_vm5 = vweird.f32 %v10460_v54  ;;  %v401_v19 = vld [vmem:[%s13277_s2] sm:$0x3] }
  0x40   :  { %v7843_v7 = vor.u32 %v9206_v5, %v7842_v4  ;;  %v8002_v38 = vld [vmem:[#allocation2 + $0x2c8] sm:$0xf]  ;;  %v7719_v41 = vor.u32 %v9170_v36, %v7716_v37  ;;  %v7684_v50 = vld [vmem:[#allocation2 + $0x68] sm:$0xf0]  ;;  %vm10476_vm6 = vmor %vm425_vm4, %vm426_vm5 }
  0x41   :  { %v421_v11 = vmul.f32 %v10460_v54, %v420_v61  ;;  %v8003_v45 = vor.u32 %v9246_v42, %v8002_v38  ;;  %v7746_v46 = vld [vmem:[#allocation2 + $0xc8] sm:$0xf]  ;;  %v9218_v55 = vld [vmem:[#allocation2 + $0x20c] sm:$0xf] }
  0x42   :  { %1086 = vmatpush.bf16.msra.mxu2 %v7743_v32  ;;  %1074 = vmatpush.bf16.msra.mxu1 %v7931_v39  ;;  %v9190_v32 = vld [vmem:[#allocation2 + $0x124] sm:$0xf0]  ;;  %v9154_v63 = vld [vmem:[#allocation2 + $0xc] sm:$0xf] }
  0x43   :  { %1059 = vmatpush.bf16.msra.mxu0 %v7707_v9  ;;  %v9242_v9 = vld [vmem:[#allocation2 + $0x2cc] sm:$0xf]  ;;  %v422_v29 = vmul.f32 0.5, %v421_v11  ;;  %v7714_v61 = vld [vmem:[#allocation2 + $0x88] sm:$0xf] }
  0x44   :  { %7636 = vmatmul.msk.f32.gmra.mxu3 %vm162_vm1, %v346_v58  ;;  %v7875_v58 = vor.u32 %v9214_v56, %v7874_v53  ;;  %v8007_v13 = vor.u32 %v9242_v9, %v8004_v10  ;;  %v9238_v53 = vld [vmem:[#allocation2 + $0x2a4] sm:$0xf0]  ;;  %v7908_v56 = vld [vmem:[#allocation2 + $0x228] sm:$0xf0] }
  0x45   :  { %v423_v57 = vsub.f32 1.5, %v422_v29  ;;  %v9174_v62 = vld [vmem:[#allocation2 + $0xa4] sm:$0xf0]  ;;  %v7652_v0 = vld [vmem:[#allocation2 + $0x28] sm:$0xf0] }
  0x46   :  { %1087 = vmatpush.bf16.msra.mxu2 %v7711_v43  ;;  %1075 = vmatpush.bf16.msra.mxu1 %v7899_v47  ;;  %v9226_v43 = vld [vmem:[#allocation2 + $0x24c] sm:$0xf]  ;;  %v9182_v47 = vld [vmem:[#allocation2 + $0xe4] sm:$0xf0]  ;;  %v7715_v3 = vor.u32 %v9174_v62, %v7714_v61  ;;  %v8012_v61 = vld [vmem:[#allocation2 + $0x2f0] sm:$0xf0] }
  0x47   :  { %1060 = vmatpush.bf16.msra.mxu0 %v7675_v16  ;;  %v7935_v16 = vor.u32 %v9225_v14, %v7932_v15  ;;  %v7747_v52 = vor.u32 %v9182_v47, %v7746_v46  ;;  %v7938_v1 = vld [vmem:[#allocation2 + $0x248] sm:$0xf]  ;;  %v424_v6 = vmul.f32 %v10460_v54, %v423_v57  ;;  %v415_v23 = vld [vmem:[%s13278_s3] ss:$4 sm:$0x3] }
  0x48   :  { %v7906_v15 = vld [vmem:[#allocation2 + $0x208] sm:$0xf]  ;;  %v7639_v29 = vld [vmem:[%s13278_s3 + $0x2] ss:$4 sm:$0x3] }
  0x49   :  { %1102 = vmatpush.bf16.msrb.mxu3 %v7935_v16  ;;  %v9222_v16 = vld [vmem:[#allocation2 + $0x224] sm:$0xf0] }
  0x4a   :  { %1088 = vmatpush.bf16.msra.mxu2 %v7679_v51  ;;  %1110 = vmatpush.bf16.msrb.mxu1 %v7875_v58  ;;  %v7970_v51 = vld [vmem:[#allocation2 + $0x288] sm:$0xf]  ;;  %v7687_v58 = vor.u32 %v9162_v49, %v7684_v50  ;;  %v7907_v18 = vor.u32 %v9222_v16, %v7906_v15 }
  0x4b   :  { %1061 = vmatpush.bf16.msra.mxu0 %v7643_v27  ;;  %v9217_v27 = vld [vmem:[#allocation2 + $0x204] sm:$0xf]  ;;  %v7971_v59 = vor.u32 %v9238_v53, %v7970_v51  ;;  %v7650_v22 = vld [vmem:[#allocation2 + $0x8] sm:$0xf] }
  0x4c   :  { %v7903_v30 = vor.u32 %v9217_v27, %v7900_v28  ;;  %v9158_v24 = vld [vmem:[#allocation2 + $0x24] sm:$0xf0] }
  0x4d   :  { %v7651_v27 = vor.u32 %v9158_v24, %v7650_v22  ;;  %v9247_v22 = vld [vmem:[#allocation2 + $0x2ec] sm:$0xf0]  ;;  %v9227_v24 = vld [vmem:[#allocation2 + $0x254] sm:$0xf] }
  0x4e   :  { %1089 = vmatpush.bf16.msra.mxu2 %v7647_v2  ;;  %1111 = vmatpush.bf16.msrb.mxu1 %v7843_v7  ;;  %v9230_v2 = vld [vmem:[#allocation2 + $0x264] sm:$0xf0]  ;;  %v7655_v7 = vor.u32 %v9154_v63, %v7652_v0 }
  0x4f   :  { %1138 = vmatpush.bf16.msrb.mxu0 %v7879_v35  ;;  %v7779_v35 = vor.u32 %v9190_v32, %v7778_v31  ;;  %1103 = vmatpush.bf16.msrb.mxu3 %v7903_v30  ;;  %v7939_v4 = vor.u32 %v9230_v2, %v7938_v1 }
  0x52   :  { %1156 = vmatpush.bf16.msrb.mxu2 %v8007_v13  ;;  %1112 = vmatpush.bf16.msrb.mxu1 %v7811_v20  ;;  %v9166_v13 = vld [vmem:[#allocation2 + $0x64] sm:$0xf0]  ;;  %v428_v20 = vsel %vm10476_vm6, %v10460_v54, %v424_v6  ;;  %v9203_v6 = vld [vmem:[#allocation2 + $0x194] sm:$0xf] }
  0x53   :  { %1139 = vmatpush.bf16.msrb.mxu0 %v7847_v44  ;;  %v7940_v44 = vld [vmem:[#allocation2 + $0x268] sm:$0xf0]  ;;  %1128 = vmatpush.bf16.msra.mxu3 %v8003_v45 }
  0x54   :  { %v7943_v48 = vor.u32 %v9226_v43, %v7940_v44 }
  0x56   :  { %1157 = vmatpush.bf16.msrb.mxu2 %v7975_v26  ;;  %1113 = vmatpush.bf16.msrb.mxu1 %v7779_v35  ;;  %v10489_v26 = vmul.f32 %v428_v20, %v415_v23  ;;  %v9195_v23 = vld [vmem:[#allocation2 + $0x154] sm:$0xf] }
  0x57   :  { %1140 = vmatpush.bf16.msrb.mxu0 %v7815_v60  ;;  %v7911_v60 = vor.u32 %v9218_v55, %v7908_v56  ;;  %1129 = vmatpush.bf16.msra.mxu3 %v7971_v59  ;;  %v9211_v56 = vld [vmem:[#allocation2 + $0x1d4] sm:$0xf] }
  0x58   :  { %v434_v36 = vmul.f32 %v7639_v29, %v10489_v26  ;;  %v437_v43 = vperm.slane %v10489_v26, 0  ;;  %v7884_v59 = vld [vmem:[#allocation2 + $0x1f0] sm:$0xf0]  ;;  %v438_v0 = vperm.slane %v10489_v26, 1 }
  0x59   :  { %v7820_v20 = vld [vmem:[#allocation2 + $0x170] sm:$0xf0] }
  0x5a   :  { %1158 = vmatpush.bf16.msrb.mxu2 %v7943_v48  ;;  %1114 = vmatpush.bf16.msrb.mxu1 %v7747_v52  ;;  %v404_v48 = vperm.slane %v401_v19, 1  ;;  %v7823_v29 = vor.u32 %v9195_v23, %v7820_v20  ;;  %v9155_v23 = vld [vmem:[#allocation2 + $0x14] sm:$0xf] }
  0x5b   :  { %1141 = vmatpush.bf16.msrb.mxu0 %v7783_v12  ;;  %v7682_v12 = vld [vmem:[#allocation2 + $0x48] sm:$0xf]  ;;  %1130 = vmatpush.bf16.msra.mxu3 %v7939_v4  ;;  %v7887_v4 = vor.u32 %v9211_v56, %v7884_v59  ;;  %v7786_v56 = vld [vmem:[#allocation2 + $0x110] sm:$0xf]  ;;  %v7660_v20 = vld [vmem:[#allocation2 + $0x30] sm:$0xf0] }
  0x5c   :  { %v7683_v17 = vor.u32 %v9166_v13, %v7682_v12 }
  0x5e   :  { %1159 = vmatpush.bf16.msrb.mxu2 %v7911_v60  ;;  %1115 = vmatpush.bf16.msrb.mxu1 %v7715_v3  ;;  %v9243_v60 = vld [vmem:[#allocation2 + $0x2d4] sm:$0xf] }
  0x5f   :  { %1142 = vmatpush.bf16.msrb.mxu0 %v7751_v25  ;;  %v403_v25 = vperm.slane %v401_v19, 0  ;;  %1131 = vmatpush.bf16.msra.mxu3 %v7907_v18  ;;  %v9215_v18 = vld [vmem:[#allocation2 + $0x1ec] sm:$0xf0] }
  0x62   :  { %1116 = vmatpush.bf16.msrb.mxu1 %v7683_v17  ;;  %v7882_v17 = vld [vmem:[#allocation2 + $0x1d0] sm:$0xf] }
  0x63   :  { %1143 = vmatpush.bf16.msrb.mxu0 %v7719_v41 }
  0x66   :  { %1117 = vmatpush.bf16.msrb.mxu1 %v7651_v27 }
  0x67   :  { %1144 = vmatpush.bf16.msrb.mxu0 %v7687_v58 }
  0x6b   :  { %1145 = vmatpush.bf16.msrb.mxu0 %v7655_v7 }
  0xa1   :  { %v184_v39 = vpop.f32.mrf.mxu0 }
  0xa2   :  { %v10465_v33 = vpop.f32.mrf.mxu1 }
  0xa6   :  { %v234_v40 = vpop.f32.mrf.mxu2 }
  0xa7   :  { %v10467_v34 = vpop.f32.mrf.mxu3  ;;  %v235_v8 = vadd.f32 %v234_v40, %v184_v39  ;;  %v7638_v39 = vld [vmem:[%s13278_s3 + $0x1] ss:$4 sm:$0x3] }
  0xa8   :  { %v435_v42 = vsub.f32 %v7638_v39, %v434_v36  ;;  %v9187_v36 = vld [vmem:[#allocation2 + $0x114] sm:$0xf]  ;;  %v9239_v39 = vld [vmem:[#allocation2 + $0x2ac] sm:$0xf0] }
  0xaa   :  { %v210_v9 = vpop.f32.mrf.mxu1  ;;  %v299_v14 = vpop.f32.mrf.mxu0  ;;  %v446_v50 = vperm.slane %v435_v42, 0  ;;  %v447_v12 = vperm.slane %v435_v42, 1 }
  0xab   :  { %v328_v21 = vadd.f32 %v299_v14, %v235_v8  ;;  %v7852_v8 = vld [vmem:[#allocation2 + $0x1b0] sm:$0xf0] }
  0xac   :  { %v7855_v15 = vor.u32 %v9203_v6, %v7852_v8  ;;  %v9163_v8 = vld [vmem:[#allocation2 + $0x54] sm:$0xf] }
  0xaf   :  { %v237_v5 = vpop.f32.mrf.mxu2  ;;  %v257_v10 = vpop.f32.mrf.mxu3 }
  0xb0   :  { %v238_v32 = vadd.f32 %v237_v5, %v10467_v34  ;;  %v258_v37 = vadd.f32 %v257_v10, %v10465_v33  ;;  %v8015_v5 = vor.u32 %v9243_v60, %v8012_v61  ;;  %v7980_v10 = vld [vmem:[#allocation2 + $0x2b0] sm:$0xf0]  ;;  %v9191_v60 = vld [vmem:[#allocation2 + $0x12c] sm:$0xf0] }
  0xb1   :  { %v9171_v61 = vld [vmem:[#allocation2 + $0x94] sm:$0xf] }
  0xb2   :  { %v322_v54 = vpop.f32.mrf.mxu1  ;;  %v302_v38 = vpop.f32.mrf.mxu0 }
  0xb3   :  { %v330_v40 = vadd.f32 %v302_v38, %v238_v32  ;;  %v329_v44 = vadd.f32 %v322_v54, %v258_v37  ;;  %v7788_v37 = vld [vmem:[#allocation2 + $0x130] sm:$0xf0]  ;;  %v7978_v38 = vld [vmem:[#allocation2 + $0x290] sm:$0xf] }
  0xb7   :  { %v368_v28 = vpop.f32.mrf.mxu2  ;;  %v260_v30 = vpop.f32.mrf.mxu3 }
  0xb8   :  { %v397_v31 = vadd.f32 %v368_v28, %v328_v21  ;;  %v261_v33 = vadd.f32 %v260_v30, %v210_v9  ;;  %v9235_v9 = vld [vmem:[#allocation2 + $0x294] sm:$0xf]  ;;  %v8010_v21 = vld [vmem:[#allocation2 + $0x2d0] sm:$0xf]  ;;  %v7883_v28 = vor.u32 %v9215_v18, %v7882_v17 }
  0xb9   :  { %v7983_v16 = vor.u32 %v9235_v9, %v7980_v10  ;;  %v7850_v30 = vld [vmem:[#allocation2 + $0x190] sm:$0xf]  ;;  %v8011_v54 = vor.u32 %v9247_v22, %v8010_v21  ;;  %v7692_v9 = vld [vmem:[#allocation2 + $0x70] sm:$0xf0]  ;;  %v7890_v10 = vld [vmem:[#allocation2 + $0x1d8] sm:$0xf] }
  0xba   :  { %v407_v35 = vadd.f32 %v403_v25, %v397_v31  ;;  %v325_v52 = vpop.f32.mrf.mxu1  ;;  %v9207_v31 = vld [vmem:[#allocation2 + $0x1ac] sm:$0xf0]  ;;  %v7858_v21 = vld [vmem:[#allocation2 + $0x198] sm:$0xf] }
  0xbb   :  { %v331_v62 = vadd.f32 %v325_v52, %v261_v33  ;;  %v7851_v42 = vor.u32 %v9207_v31, %v7850_v30  ;;  %v9231_v33 = vld [vmem:[#allocation2 + $0x26c] sm:$0xf0]  ;;  %v9208_v22 = vld [vmem:[#allocation2 + $0x1b4] sm:$0xf0] }
  0xbc   :  { %v411_v41 = vmax.f32 %v407_v35, 0.0  ;;  %v9175_v17 = vld [vmem:[#allocation2 + $0xac] sm:$0xf0]  ;;  %v7859_v30 = vor.u32 %v9208_v22, %v7858_v21  ;;  %v9276_v21 = vld [vmem:[#allocation5 + $0xd4] sm:$0xf0] }
  0xbe   :  { %v441_v49 = vmul.f32 %v437_v43, %v411_v41  ;;  %v7916_v41 = vld [vmem:[#allocation2 + $0x230] sm:$0xf0] }
  0xbf   :  { %v371_v45 = vpop.f32.mrf.mxu2  ;;  %v391_v46 = vpop.f32.mrf.mxu3 }
  0xc0   :  { %v399_v34 = vadd.f32 %v371_v45, %v330_v40  ;;  %v398_v47 = vadd.f32 %v391_v46, %v329_v44  ;;  %v450_v57 = vadd.f32 %v446_v50, %v441_v49  ;;  %v9219_v40 = vld [vmem:[#allocation2 + $0x214] sm:$0xf]  ;;  %v7818_v44 = vld [vmem:[#allocation2 + $0x150] sm:$0xf]  ;;  %v9212_v45 = vld [vmem:[#allocation2 + $0x1dc] sm:$0xf]  ;;  %v7979_v46 = vor.u32 %v9239_v39, %v7978_v38 }
  0xc1   :  { %v9179_v49 = vld [vmem:[#allocation2 + $0xd4] sm:$0xf]  ;;  %v9200_v38 = vld [vmem:[#allocation2 + $0x174] sm:$0xf0]  ;;  %v9180_v39 = vld [vmem:[#allocation2 + $0xdc] sm:$0xf] }
  0xc2   :  { %v409_v51 = vadd.f32 %v403_v25, %v399_v34  ;;  %v408_v55 = vadd.f32 %v404_v48, %v398_v47  ;;  %v7948_v25 = vld [vmem:[#allocation2 + $0x270] sm:$0xf0]  ;;  %v7892_v34 = vld [vmem:[#allocation2 + $0x1f8] sm:$0xf0]  ;;  %v7919_v47 = vor.u32 %v9219_v40, %v7916_v41 }
  0xc3   :  { %v7951_v35 = vor.u32 %v9227_v24, %v7948_v25  ;;  %v7895_v52 = vor.u32 %v9212_v45, %v7892_v34  ;;  %v9188_v24 = vld [vmem:[#allocation2 + $0x11c] sm:$0xf] }
  0xc4   :  { %v413_v53 = vmax.f32 %v409_v51, 0.0  ;;  %v412_v2 = vmax.f32 %v408_v55, 0.0  ;;  %v7946_v51 = vld [vmem:[#allocation2 + $0x250] sm:$0xf]  ;;  %v7796_v25 = vld [vmem:[#allocation2 + $0x138] sm:$0xf0] }
  0xc5   :  { %v7947_v59 = vor.u32 %v9231_v33, %v7946_v51  ;;  %v7799_v31 = vor.u32 %v9188_v24, %v7796_v25  ;;  %v7764_v40 = vld [vmem:[#allocation2 + $0xf8] sm:$0xf0]  ;;  %v8018_v33 = vld [vmem:[#allocation2 + $0x2d8] sm:$0xf] }
  0xc6   :  { %v443_v58 = vmul.f32 %v437_v43, %v413_v53  ;;  %v442_v13 = vmul.f32 %v438_v0, %v412_v2  ;;  %v7791_v43 = vor.u32 %v9187_v36, %v7788_v37  ;;  %v7787_v2 = vor.u32 %v9191_v60, %v7786_v56  ;;  %v7826_v36 = vld [vmem:[#allocation2 + $0x158] sm:$0xf]  ;;  %v9236_v41 = vld [vmem:[#allocation2 + $0x29c] sm:$0xf] }
  0xc7   :  { %v394_v1 = vpop.f32.mrf.mxu3  ;;  %v7827_v45 = vor.u32 %v9200_v38, %v7826_v36  ;;  %v7767_v34 = vor.u32 %v9180_v39, %v7764_v40  ;;  %v7732_v51 = vld [vmem:[#allocation2 + $0xb8] sm:$0xf0]  ;;  %v9184_v60 = vld [vmem:[#allocation2 + $0xf4] sm:$0xf0]  ;;  %v8146_v36 = vld [vmem:[#allocation5 + $0xe0] sm:$0xf] }
  0xc8   :  { %v452_v63 = vadd.f32 %v446_v50, %v443_v58  ;;  %v400_v3 = vadd.f32 %v394_v1, %v331_v62  ;;  %v451_v26 = vadd.f32 %v447_v12, %v442_v13  ;;  %v7756_v50 = vld [vmem:[#allocation2 + $0xf0] sm:$0xf0]  ;;  %v7860_v58 = vld [vmem:[#allocation2 + $0x1b8] sm:$0xf0]  ;;  %v7698_v25 = vld [vmem:[#allocation2 + $0x58] sm:$0xf] }
  0xc9   :  { %v7759_v55 = vor.u32 %v9179_v49, %v7756_v50  ;;  %v7724_v62 = vld [vmem:[#allocation2 + $0xb0] sm:$0xf0]  ;;  %v7828_v13 = vld [vmem:[#allocation2 + $0x178] sm:$0xf0]  ;;  %v8122_v38 = vld [vmem:[#allocation5 + $0xa8] sm:$0xf] }
  0xca   :  { %v10502_v7 = vpack.c.bf16 %v452_v63, %v450_v57  ;;  %v410_v11 = vadd.f32 %v404_v48, %v400_v3  ;;  %v9199_v48 = vld [vmem:[#allocation2 + $0x16c] sm:$0xf0]  ;;  %v9204_v57 = vld [vmem:[#allocation2 + $0x19c] sm:$0xf]  ;;  %v7727_v3 = vor.u32 %v9171_v61, %v7724_v62  ;;  %v9272_v39 = vld [vmem:[#allocation5 + $0xb4] sm:$0xf0] }
  0xcb   :  { %v7819_v53 = vor.u32 %v9199_v48, %v7818_v44  ;;  %v7914_v63 = vld [vmem:[#allocation2 + $0x210] sm:$0xf]  ;;  %v7863_v1 = vor.u32 %v9204_v57, %v7860_v58  ;;  %v9192_v48 = vld [vmem:[#allocation2 + $0x134] sm:$0xf0]  ;;  %v9172_v50 = vld [vmem:[#allocation2 + $0x9c] sm:$0xf] }
  0xcc   :  { %1062 = vmatmul.bf16.vlgmr.msra.gmra.mxu0 %v10502_v7  ;;  %1090 = vmatmul.bf16.vlgmr.msra.gmra.mxu2 %v10502_v7  ;;  %v414_v14 = vmax.f32 %v410_v11, 0.0  ;;  %v9216_v11 = vld [vmem:[#allocation2 + $0x1f4] sm:$0xf0]  ;;  %v7658_v44 = vld [vmem:[#allocation2 + $0x10] sm:$0xf]  ;;  %v7735_v58 = vor.u32 %v9172_v50, %v7732_v51 }
  0xcd   :  { %1194 = vmatpush.bf16.msra.mxu2 %v7887_v4  ;;  %1212 = vmatpush.bf16.msra.mxu0 %v8015_v5  ;;  %v7754_v4 = vld [vmem:[#allocation2 + $0xd0] sm:$0xf]  ;;  %v7891_v18 = vor.u32 %v9216_v11, %v7890_v10  ;;  %v7730_v10 = vld [vmem:[#allocation2 + $0x98] sm:$0xf]  ;;  %v8130_v50 = vld [vmem:[#allocation5 + $0xc0] sm:$0xf] }
  0xce   :  { %v444_v19 = vmul.f32 %v438_v0, %v414_v14  ;;  %v9223_v0 = vld [vmem:[#allocation2 + $0x22c] sm:$0xf0]  ;;  %v9176_v11 = vld [vmem:[#allocation2 + $0xb4] sm:$0xf0] }
  0xcf   :  { %v9183_v5 = vld [vmem:[#allocation2 + $0xec] sm:$0xf0]  ;;  %v7915_v6 = vor.u32 %v9223_v0, %v7914_v63  ;;  %v9164_v63 = vld [vmem:[#allocation2 + $0x5c] sm:$0xf]  ;;  %v7731_v22 = vor.u32 %v9176_v11, %v7730_v10  ;;  %v9262_v10 = vld [vmem:[#allocation5 + $0x6c] sm:$0xf] }
  0xd0   :  { %v453_v27 = vadd.f32 %v447_v12, %v444_v19  ;;  %v9196_v12 = vld [vmem:[#allocation2 + $0x15c] sm:$0xf]  ;;  %v7755_v14 = vor.u32 %v9183_v5, %v7754_v4  ;;  %v8154_v5 = vld [vmem:[#allocation5 + $0xe8] sm:$0xf]  ;;  %v9275_v51 = vld [vmem:[#allocation5 + $0xcc] sm:$0xf0] }
  0xd1   :  { %1195 = vmatpush.bf16.msra.mxu2 %v7855_v15  ;;  %1213 = vmatpush.bf16.msra.mxu0 %v7983_v16  ;;  %v7695_v15 = vor.u32 %v9163_v8, %v7692_v9  ;;  %v7722_v16 = vld [vmem:[#allocation2 + $0x90] sm:$0xf]  ;;  %v7831_v19 = vor.u32 %v9196_v12, %v7828_v13  ;;  %v7700_v0 = vld [vmem:[#allocation2 + $0x78] sm:$0xf0] }
  0xd2   :  { %v10506_v32 = vpack.c.bf16 %v453_v27, %v451_v26  ;;  %v9244_v26 = vld [vmem:[#allocation2 + $0x2dc] sm:$0xf]  ;;  %v7703_v9 = vor.u32 %v9164_v63, %v7700_v0  ;;  %v8114_v63 = vld [vmem:[#allocation5 + $0xa0] sm:$0xf]  ;;  %v9271_v0 = vld [vmem:[#allocation5 + $0xac] sm:$0xf0] }
  0xd3   :  { %v8020_v27 = vld [vmem:[#allocation2 + $0x2f8] sm:$0xf0] }
  0xd4   :  { %8024 = vmatmul.msk.bf16.vlgmr.msra.gmra.mxu1 %vm1050_vm7, %v10506_v32  ;;  %8025 = vmatmul.msk.bf16.vlgmr.msrb.gmra.mxu3 %vm1050_vm7, %v10506_v32  ;;  %v8023_v37 = vor.u32 %v9244_v26, %v8020_v27  ;;  %v7924_v4 = vld [vmem:[#allocation2 + $0x238] sm:$0xf0] }
  0xd5   :  { %1166 = vmatpush.bf16.msrb.mxu3 %v7883_v28  ;;  %1196 = vmatpush.bf16.msra.mxu2 %v7823_v29  ;;  %v7723_v28 = vor.u32 %v9175_v17, %v7722_v16  ;;  %v7663_v29 = vor.u32 %v9155_v23, %v7660_v20  ;;  %v7954_v16 = vld [vmem:[#allocation2 + $0x258] sm:$0xf]  ;;  %v8156_v23 = vld [vmem:[#allocation5 + $0xf8] sm:$0xf0]  ;;  %v8138_v20 = vld [vmem:[#allocation5 + $0xc8] sm:$0xf] }
  0xd6   :  { %1184 = vmatpush.bf16.msra.mxu1 %v8011_v54  ;;  %1214 = vmatpush.bf16.msra.mxu0 %v7951_v35  ;;  %v7690_v54 = vld [vmem:[#allocation2 + $0x50] sm:$0xf]  ;;  %v8092_v11 = vld [vmem:[#allocation5 + $0x78] sm:$0xf0] }
  0xd7   :  { %v9167_v35 = vld [vmem:[#allocation2 + $0x6c] sm:$0xf0] }
  0xd9   :  { %1167 = vmatpush.bf16.msrb.mxu3 %v7851_v42  ;;  %1197 = vmatpush.bf16.msra.mxu2 %v7791_v43  ;;  %v7988_v42 = vld [vmem:[#allocation2 + $0x2b8] sm:$0xf0]  ;;  %v7691_v43 = vor.u32 %v9167_v35, %v7690_v54  ;;  %v9274_v54 = vld [vmem:[#allocation5 + $0xcc] sm:$0xf] }
  0xda   :  { %1185 = vmatpush.bf16.msra.mxu1 %v7979_v46  ;;  %1215 = vmatpush.bf16.msra.mxu0 %v7919_v47  ;;  %v9159_v46 = vld [vmem:[#allocation2 + $0x2c] sm:$0xf0]  ;;  %v7794_v47 = vld [vmem:[#allocation2 + $0x118] sm:$0xf]  ;;  %v7991_v49 = vor.u32 %v9236_v41, %v7988_v42  ;;  %v8140_v35 = vld [vmem:[#allocation5 + $0xd8] sm:$0xf0] }
  0xdb   :  { %v7659_v56 = vor.u32 %v9159_v46, %v7658_v44  ;;  %v7795_v57 = vor.u32 %v9192_v48, %v7794_v47  ;;  %v7666_v41 = vld [vmem:[#allocation2 + $0x18] sm:$0xf]  ;;  %v10537_v47 = vor.u32 %v9272_v39, %v8122_v38  ;;  %v9270_v48 = vld [vmem:[#allocation5 + $0xac] sm:$0xf]  ;;  %v8060_v38 = vld [vmem:[#allocation5 + $0x38] sm:$0xf0] }
  0xdc   :  { %1146 = vmatmul.bf16.vlgmr.msrb.gmra.mxu0 %v10502_v7  ;;  %8027 = vmatmul.msk.bf16.vlgmr.msrb.gmra.mxu2 %vm1050_vm7, %v10506_v32  ;;  %v9160_v44 = vld [vmem:[#allocation2 + $0x34] sm:$0xf0]  ;;  %v8066_v39 = vld [vmem:[#allocation5 + $0x40] sm:$0xf] }
  0xdd   :  { %1168 = vmatpush.bf16.msrb.mxu3 %v7819_v53  ;;  %1198 = vmatpush.bf16.msra.mxu2 %v7759_v55  ;;  %v9228_v53 = vld [vmem:[#allocation2 + $0x25c] sm:$0xf] }
  0xde   :  { %1250 = vmatpush.bf16.msrb.mxu0 %v7895_v52  ;;  %1186 = vmatpush.bf16.msra.mxu1 %v7947_v59  ;;  %v9248_v52 = vld [vmem:[#allocation2 + $0x2f4] sm:$0xf0]  ;;  %v7956_v55 = vld [vmem:[#allocation2 + $0x278] sm:$0xf0] }
  0xdf   :  { %v7762_v59 = vld [vmem:[#allocation2 + $0xd8] sm:$0xf]  ;;  %v8019_v61 = vor.u32 %v9248_v52, %v8018_v33  ;;  %v7959_v62 = vor.u32 %v9228_v53, %v7956_v55  ;;  %v8106_v33 = vld [vmem:[#allocation5 + $0x88] sm:$0xf]  ;;  %v7667_v53 = vor.u32 %v9160_v44, %v7666_v41 }
  0xe0   :  { %v7763_v8 = vor.u32 %v9184_v60, %v7762_v59  ;;  %v9268_v52 = vld [vmem:[#allocation5 + $0x94] sm:$0xf0]  ;;  %v10549_v59 = vor.u32 %v9275_v51, %v8130_v50  ;;  %v8042_v41 = vld [vmem:[#allocation5 + $0x8] sm:$0xf] }
  0xe1   :  { %1169 = vmatpush.bf16.msrb.mxu3 %v7787_v2  ;;  %1199 = vmatpush.bf16.msra.mxu2 %v7727_v3  ;;  %v9240_v2 = vld [vmem:[#allocation2 + $0x2b4] sm:$0xf0]  ;;  %v9220_v3 = vld [vmem:[#allocation2 + $0x21c] sm:$0xf]  ;;  %v10551_v60 = vor.u32 %v9268_v52, %v8106_v33  ;;  %v8282_v44 = vld [vmem:[#allocation5 + $0x1e8] sm:$0xf] }
  0xe2   :  { %1251 = vmatpush.bf16.msrb.mxu0 %v7863_v1  ;;  %1187 = vmatpush.bf16.msra.mxu1 %v7915_v6  ;;  %v7986_v1 = vld [vmem:[#allocation2 + $0x298] sm:$0xf]  ;;  %v7927_v13 = vor.u32 %v9220_v3, %v7924_v4  ;;  %v8068_v33 = vld [vmem:[#allocation5 + $0x50] sm:$0xf0]  ;;  %v9250_v52 = vld [vmem:[#allocation5 + $0xc] sm:$0xf] }
  0xe3   :  { %v9280_v6 = vld [vmem:[#allocation5 + $0xf4] sm:$0xf0]  ;;  %v7987_v12 = vor.u32 %v9240_v2, %v7986_v1  ;;  %v8090_v1 = vld [vmem:[#allocation5 + $0x68] sm:$0xf] }
  0xe4   :  { %1118 = vmatmul.bf16.vlgmr.msrb.gmra.mxu1 %v10502_v7  ;;  %8026 = vmatmul.msk.bf16.vlgmr.msra.gmra.mxu3 %vm1050_vm7, %v10506_v32  ;;  %v10524_v17 = vor.u32 %v9280_v6, %v8154_v5  ;;  %v9264_v2 = vld [vmem:[#allocation5 + $0x74] sm:$0xf0]  ;;  %v9269_v5 = vld [vmem:[#allocation5 + $0xa4] sm:$0xf]  ;;  %v8116_v6 = vld [vmem:[#allocation5 + $0xb0] sm:$0xf0] }
  0xe5   :  { %1170 = vmatpush.bf16.msrb.mxu3 %v7755_v14  ;;  %1200 = vmatpush.bf16.msra.mxu2 %v7695_v15  ;;  %v9156_v14 = vld [vmem:[#allocation2 + $0x1c] sm:$0xf] }
  0xe6   :  { %1222 = vmatpush.bf16.msrb.mxu1 %v7891_v18  ;;  %1252 = vmatpush.bf16.msrb.mxu0 %v7831_v19  ;;  %v7668_v15 = vld [vmem:[#allocation2 + $0x38] sm:$0xf0]  ;;  %v9232_v18 = vld [vmem:[#allocation2 + $0x274] sm:$0xf0]  ;;  %v9278_v19 = vld [vmem:[#allocation5 + $0xec] sm:$0xf] }
  0xe7   :  { %v7671_v24 = vor.u32 %v9156_v14, %v7668_v15  ;;  %v7955_v26 = vor.u32 %v9232_v18, %v7954_v16  ;;  %v10526_v27 = vor.u32 %v9278_v19, %v8156_v23  ;;  %v8074_v14 = vld [vmem:[#allocation5 + $0x48] sm:$0xf]  ;;  %v9260_v15 = vld [vmem:[#allocation5 + $0x54] sm:$0xf0]  ;;  %v10570_v16 = vor.u32 %v9269_v5, %v8116_v6  ;;  %v9265_v19 = vld [vmem:[#allocation5 + $0x84] sm:$0xf] }
  0xe8   :  { %v10572_v18 = vor.u32 %v9262_v10, %v8092_v11  ;;  %v8100_v23 = vld [vmem:[#allocation5 + $0x90] sm:$0xf0]  ;;  %v9253_v10 = vld [vmem:[#allocation5 + $0x24] sm:$0xf] }
  0xe9   :  { %1171 = vmatpush.bf16.msrb.mxu3 %v7723_v28  ;;  %1201 = vmatpush.bf16.msra.mxu2 %v7663_v29  ;;  %v9168_v28 = vld [vmem:[#allocation2 + $0x74] sm:$0xf0]  ;;  %v8052_v11 = vld [vmem:[#allocation5 + $0x30] sm:$0xf0] }
  0xea   :  { %1223 = vmatpush.bf16.msrb.mxu1 %v7859_v30  ;;  %1253 = vmatpush.bf16.msrb.mxu0 %v7799_v31  ;;  %v7922_v29 = vld [vmem:[#allocation2 + $0x218] sm:$0xf]  ;;  %v10529_v31 = vor.u32 %v9276_v21, %v8138_v20  ;;  %v7699_v40 = vor.u32 %v9168_v28, %v7698_v25  ;;  %v9258_v20 = vld [vmem:[#allocation5 + $0x4c] sm:$0xf]  ;;  %v8076_v21 = vld [vmem:[#allocation5 + $0x58] sm:$0xf0]  ;;  %v10582_v28 = vor.u32 %v9265_v19, %v8100_v23 }
  0xeb   :  { %v9224_v30 = vld [vmem:[#allocation2 + $0x234] sm:$0xf0]  ;;  %v8058_v25 = vld [vmem:[#allocation5 + $0x28] sm:$0xf]  ;;  %v9306_v19 = vld [vmem:[#allocation5 + $0x1cc] sm:$0xf] }
  0xec   :  { %8029 = vmatmul.msk.bf16.vlgmr.msra.gmra.mxu0 %vm1050_vm7, %v10506_v32  ;;  %1202 = vmatmul.bf16.vlgmr.msra.gmra.mxu2 %v10502_v7  ;;  %v7923_v42 = vor.u32 %v9224_v30, %v7922_v29  ;;  %v10584_v29 = vor.u32 %v9258_v20, %v8076_v21  ;;  %v9261_v30 = vld [vmem:[#allocation5 + $0x64] sm:$0xf]  ;;  %v8268_v23 = vld [vmem:[#allocation5 + $0x1d8] sm:$0xf0]  ;;  %v8274_v20 = vld [vmem:[#allocation5 + $0x1e0] sm:$0xf] }
  0xed   :  { %1268 = vmatpush.bf16.msrb.mxu2 %v8023_v37  ;;  %1172 = vmatpush.bf16.msrb.mxu3 %v7691_v43  ;;  %v9279_v37 = vld [vmem:[#allocation5 + $0xec] sm:$0xf0]  ;;  %v10532_v43 = vor.u32 %v9274_v54, %v8140_v35  ;;  %v8084_v54 = vld [vmem:[#allocation5 + $0x70] sm:$0xf0] }
  0xee   :  { %1224 = vmatpush.bf16.msrb.mxu1 %v7827_v45  ;;  %1254 = vmatpush.bf16.msrb.mxu0 %v7767_v34  ;;  %v9277_v45 = vld [vmem:[#allocation5 + $0xe4] sm:$0xf]  ;;  %v8148_v34 = vld [vmem:[#allocation5 + $0xf0] sm:$0xf0]  ;;  %v10535_v46 = vor.u32 %v9279_v37, %v8146_v36  ;;  %v9254_v37 = vld [vmem:[#allocation5 + $0x2c] sm:$0xf] }
  0xef   :  { %v10543_v55 = vor.u32 %v9277_v45, %v8148_v34  ;;  %v9312_v45 = vld [vmem:[#allocation5 + $0x1f4] sm:$0xf0]  ;;  %v10594_v34 = vor.u32 %v9261_v30, %v8084_v54  ;;  %v9311_v21 = vld [vmem:[#allocation5 + $0x1ec] sm:$0xf0]  ;;  %v9249_v54 = vld [vmem:[#allocation5 + $0x4] sm:$0xf] }
  0xf1   :  { %1269 = vmatpush.bf16.msrb.mxu2 %v7991_v49  ;;  %1173 = vmatpush.bf16.msrb.mxu3 %v7659_v56  ;;  %v8124_v49 = vld [vmem:[#allocation5 + $0xb8] sm:$0xf0] }
  0xf2   :  { %1225 = vmatpush.bf16.msrb.mxu1 %v7795_v57  ;;  %1255 = vmatpush.bf16.msrb.mxu0 %v7735_v58  ;;  %v10545_v56 = vor.u32 %v9270_v48, %v8124_v49  ;;  %v9273_v57 = vld [vmem:[#allocation5 + $0xc4] sm:$0xf]  ;;  %v8132_v58 = vld [vmem:[#allocation5 + $0xd0] sm:$0xf0]  ;;  %v10596_v48 = vor.u32 %v9254_v37, %v8060_v38  ;;  %v10631_v38 = vor.u32 %v9306_v19, %v8268_v23  ;;  %v9303_v19 = vld [vmem:[#allocation5 + $0x1ac] sm:$0xf0] }
  0xf3   :  { %v10555_v3 = vor.u32 %v9273_v57, %v8132_v58  ;;  %v9257_v49 = vld [vmem:[#allocation5 + $0x44] sm:$0xf]  ;;  %v10604_v57 = vor.u32 %v9312_v45, %v8282_v44  ;;  %v8050_v58 = vld [vmem:[#allocation5 + $0x20] sm:$0xf]  ;;  %v8036_v37 = vld [vmem:[#allocation5 + $0x10] sm:$0xf0] }
  0xf4   :  { %1174 = vmatmul.bf16.vlgmr.msrb.gmra.mxu3 %v10502_v7  ;;  %8028 = vmatmul.msk.bf16.vlgmr.msra.gmra.mxu1 %vm1050_vm7, %v10506_v32  ;;  %13548 = vst [vmem:[#allocation21_spill] sm:$0xff] %v10631_v38  ;;  %v8252_v45 = vld [vmem:[#allocation5 + $0x1b8] sm:$0xf0]  ;;  %v8218_v23 = vld [vmem:[#allocation5 + $0x168] sm:$0xf] }
  0xf5   :  { %1240 = vmatpush.bf16.msra.mxu3 %v8019_v61  ;;  %1270 = vmatpush.bf16.msrb.mxu2 %v7959_v62  ;;  %v9266_v61 = vld [vmem:[#allocation5 + $0x8c] sm:$0xf]  ;;  %v8108_v62 = vld [vmem:[#allocation5 + $0x98] sm:$0xf0]  ;;  %13544 = vst [vmem:[#allocation17_spill] sm:$0xff] %v10604_v57 }
  0xf6   :  { %1226 = vmatpush.bf16.msrb.mxu1 %v7763_v8  ;;  %1256 = vmatpush.bf16.msrb.mxu0 %v7703_v9  ;;  %v10557_v4 = vor.u32 %v9266_v61, %v8108_v62  ;;  %v10561_v8 = vor.u32 %v9271_v0, %v8114_v63  ;;  %v10563_v9 = vor.u32 %v9264_v2, %v8090_v1  ;;  %v9255_v61 = vld [vmem:[#allocation5 + $0x2c] sm:$0xf0]  ;;  %v9310_v62 = vld [vmem:[#allocation5 + $0x1ec] sm:$0xf]  ;;  %v8284_v63 = vld [vmem:[#allocation5 + $0x1f8] sm:$0xf0] }
  0xf7   :  { %v8266_v0 = vld [vmem:[#allocation5 + $0x1c8] sm:$0xf]  ;;  %v9308_v1 = vld [vmem:[#allocation5 + $0x1d4] sm:$0xf0]  ;;  %v10608_v2 = vor.u32 %v9257_v49, %v8068_v33  ;;  %v10614_v6 = vor.u32 %v9255_v61, %v8050_v58  ;;  %v8258_v49 = vld [vmem:[#allocation5 + $0x1c0] sm:$0xf] }
  0xf8   :  { %v9307_v33 = vld [vmem:[#allocation5 + $0x1cc] sm:$0xf0]  ;;  %v9300_v58 = vld [vmem:[#allocation5 + $0x194] sm:$0xf0] }
  0xf9   :  { %1241 = vmatpush.bf16.msra.mxu3 %v7987_v12  ;;  %1271 = vmatpush.bf16.msrb.mxu2 %v7927_v13  ;;  %v8098_v12 = vld [vmem:[#allocation5 + $0x80] sm:$0xf]  ;;  %v9267_v13 = vld [vmem:[#allocation5 + $0x8c] sm:$0xf0] }
  0xfa   :  { %1227 = vmatpush.bf16.msrb.mxu1 %v7731_v22  ;;  %1257 = vmatpush.bf16.msrb.mxu0 %v7671_v24  ;;  %v8082_v22 = vld [vmem:[#allocation5 + $0x60] sm:$0xf]  ;;  %v9263_v24 = vld [vmem:[#allocation5 + $0x6c] sm:$0xf0] }
  0xfb   :  { %v10588_v35 = vor.u32 %v9263_v24, %v8082_v22  ;;  %v13293_v22 = vmov 0   ;;  %v10623_v24 = vor.u32 %v9253_v10, %v8052_v11  ;;  %v9298_v10 = vld [vmem:[#allocation5 + $0x18c] sm:$0xf] }
  0xfc   :  { %8031 = vmatmul.msk.bf16.vlgmr.msrb.gmra.mxu2 %vm1050_vm7, %v10506_v32 }
  0xfd   :  { %1529 = vmatpush.bf16.msra.mxu2 %v10524_v17  ;;  %1242 = vmatpush.bf16.msra.mxu3 %v7955_v26  ;;  %v9256_v26 = vld [vmem:[#allocation5 + $0x34] sm:$0xf0] }
  0xfe   :  { %1542 = vmatpush.bf16.msra.mxu0 %v10526_v27  ;;  %1228 = vmatpush.bf16.msrb.mxu1 %v7699_v40  ;;  %v10590_v36 = vor.u32 %v9256_v26, %v8058_v25  ;;  %v9259_v40 = vld [vmem:[#allocation5 + $0x4c] sm:$0xf0]  ;;  %v8250_v25 = vld [vmem:[#allocation5 + $0x1a8] sm:$0xf]  ;;  %v9304_v26 = vld [vmem:[#allocation5 + $0x1b4] sm:$0xf0] }
  0xff   :  { %1258 = vmatmul.bf16.vlgmr.msrb.gmra.mxu0 %v10502_v7  ;;  %v10600_v50 = vor.u32 %v9259_v40, %v8066_v39  ;;  %v10633_v39 = vor.u32 %v9311_v21, %v8274_v20  ;;  %v9309_v40 = vld [vmem:[#allocation5 + $0x1e4] sm:$0xf]  ;;  %v10635_v44 = vor.u32 %v9304_v26, %v8250_v25  ;;  %v9296_v20 = vld [vmem:[#allocation5 + $0x174] sm:$0xf0] }
 0x101   :  { %1530 = vmatpush.bf16.msra.mxu2 %v10529_v31  ;;  %1243 = vmatpush.bf16.msra.mxu3 %v7923_v42  ;;  %v9252_v42 = vld [vmem:[#allocation5 + $0x14] sm:$0xf0]  ;;  %13549 = vst [vmem:[#allocation22_spill] sm:$0xff] %v10633_v39 }
 0x102   :  { %1543 = vmatpush.bf16.msra.mxu0 %v10532_v43  ;;  %1229 = vmatpush.bf16.msrb.mxu1 %v7667_v53  ;;  %v10602_v51 = vor.u32 %v9252_v42, %v8042_v41  ;;  %v8044_v53 = vld [vmem:[#allocation5 + $0x18] sm:$0xf0]  ;;  %v8276_v41 = vld [vmem:[#allocation5 + $0x1f0] sm:$0xf0]  ;;  %v9302_v42 = vld [vmem:[#allocation5 + $0x1ac] sm:$0xf] }
 0x103   :  { %v10612_v5 = vor.u32 %v9250_v52, %v8044_v53  ;;  %13550 = vst [vmem:[#allocation23_spill] sm:$0xff] %v10635_v44  ;;  %v10639_v52 = vor.u32 %v9249_v54, %v8036_v37  ;;  %v8234_v53 = vld [vmem:[#allocation5 + $0x188] sm:$0xf]  ;;  %v10642_v61 = vor.u32 %v9309_v40, %v8276_v41  ;;  %v9301_v54 = vld [vmem:[#allocation5 + $0x1a4] sm:$0xf]  ;;  %v10666_v41 = vor.u32 %v9296_v20, %v8218_v23 }
 0x104   :  { %8030 = vmatmul.msk.bf16.vlgmr.msra.gmra.mxu3 %vm1050_vm7, %v10506_v32  ;;  %v10578_v32 = vor.u32 %v9260_v15, %v8074_v14  ;;  %13543 = vst [vmem:[#allocation16_spill] sm:$0xff] %v10602_v51  ;;  %v8034_v14 = vld [vmem:[#allocation5] sm:$0xf]  ;;  %v9251_v15 = vld [vmem:[#allocation5 + $0xc] sm:$0xf0]  ;;  %v10651_v11 = vor.u32 %v9300_v58, %v8234_v53 }
 0x105   :  { %1503 = vmatpush.bf16.msrb.mxu3 %v10535_v46  ;;  %1531 = vmatpush.bf16.msra.mxu2 %v10537_v47  ;;  %13545 = vst [vmem:[#allocation18_spill] sm:$0xff] %v10612_v5  ;;  %v10627_v30 = vor.u32 %v9251_v15, %v8034_v14  ;;  %v8236_v14 = vld [vmem:[#allocation5 + $0x198] sm:$0xf0]  ;;  %v8242_v15 = vld [vmem:[#allocation5 + $0x1a0] sm:$0xf] }
 0x106   :  { %1516 = vmatpush.bf16.msra.mxu1 %v10543_v55  ;;  %1544 = vmatpush.bf16.msra.mxu0 %v10545_v56  ;;  %13551 = vst [vmem:[#allocation24_spill] sm:$0xff] %v10639_v52  ;;  %v10660_v25 = vor.u32 %v9298_v10, %v8236_v14  ;;  %v10662_v26 = vor.u32 %v9303_v19, %v8242_v15  ;;  %v8244_v37 = vld [vmem:[#allocation5 + $0x1b0] sm:$0xf0]  ;;  %v9294_v40 = vld [vmem:[#allocation5 + $0x16c] sm:$0xf] }
 0x107   :  { %1230 = vmatmul.bf16.vlgmr.msrb.gmra.mxu1 %v10502_v7  ;;  %v10576_v7 = vor.u32 %v9267_v13, %v8098_v12  ;;  %v10617_v12 = vor.u32 %v9310_v62, %v8284_v63  ;;  %v10619_v13 = vor.u32 %v9308_v1, %v8266_v0  ;;  %13552 = vst [vmem:[#allocation25_spill] sm:$0xff] %v10642_v61  ;;  %v9305_v0 = vld [vmem:[#allocation5 + $0x1c4] sm:$0xf]  ;;  %v8260_v1 = vld [vmem:[#allocation5 + $0x1d0] sm:$0xf0] }
 0x108   :  { %v10646_v62 = vor.u32 %v9302_v42, %v8252_v45  ;;  %v10648_v63 = vor.u32 %v9307_v33, %v8258_v49  ;;  %13555 = vst [vmem:[#allocation28_spill] sm:$0xff] %v10651_v11  ;;  %v10656_v21 = vor.u32 %v9305_v0, %v8260_v1  ;;  %v8220_v42 = vld [vmem:[#allocation5 + $0x178] sm:$0xf0]  ;;  %v8226_v45 = vld [vmem:[#allocation5 + $0x180] sm:$0xf]  ;;  %v10669_v58 = vor.u32 %v9301_v54, %v8244_v37 }
 0x109   :  { %1504 = vmatpush.bf16.msrb.mxu3 %v10549_v59  ;;  %1532 = vmatpush.bf16.msra.mxu2 %v10551_v60  ;;  %13546 = vst [vmem:[#allocation19_spill] sm:$0xff] %v10617_v12  ;;  %v9299_v49 = vld [vmem:[#allocation5 + $0x18c] sm:$0xf0]  ;;  %v8202_v33 = vld [vmem:[#allocation5 + $0x148] sm:$0xf]  ;;  %v10673_v0 = vor.u32 %v9294_v40, %v8220_v42 }
 0x10a   :  { %1517 = vmatpush.bf16.msra.mxu1 %v10555_v3  ;;  %1545 = vmatpush.bf16.msra.mxu0 %v10557_v4  ;;  %13547 = vst [vmem:[#allocation20_spill] sm:$0xff] %v10619_v13  ;;  %v9292_v53 = vld [vmem:[#allocation5 + $0x154] sm:$0xf0]  ;;  %v10675_v1 = vor.u32 %v9299_v49, %v8226_v45  ;;  %v9297_v10 = vld [vmem:[#allocation5 + $0x184] sm:$0xf] }
 0x10b   :  { %13553 = vst [vmem:[#allocation26_spill] sm:$0xff] %v10646_v62  ;;  %v8228_v14 = vld [vmem:[#allocation5 + $0x190] sm:$0xf0]  ;;  %v9290_v15 = vld [vmem:[#allocation5 + $0x14c] sm:$0xf]  ;;  %v10678_v19 = vor.u32 %v9292_v53, %v8202_v33 }
 0x10c   :  { %13554 = vst [vmem:[#allocation27_spill] sm:$0xff] %v10648_v63  ;;  %v8204_v23 = vld [vmem:[#allocation5 + $0x158] sm:$0xf0]  ;;  %v8210_v20 = vld [vmem:[#allocation5 + $0x160] sm:$0xf] }
 0x10d   :  { %1505 = vmatpush.bf16.msrb.mxu3 %v10561_v8  ;;  %1533 = vmatpush.bf16.msra.mxu2 %v10563_v9  ;;  %13556 = vst [vmem:[#allocation29_spill] sm:$0xff] %v10656_v21  ;;  %v8186_v54 = vld [vmem:[#allocation5 + $0x128] sm:$0xf]  ;;  %v9288_v37 = vld [vmem:[#allocation5 + $0x134] sm:$0xf0]  ;;  %v10685_v40 = vor.u32 %v9290_v15, %v8204_v23 }
 0x10e   :  { %1518 = vmatpush.bf16.msra.mxu1 %v10570_v16  ;;  %1546 = vmatpush.bf16.msra.mxu0 %v10572_v18  ;;  %13557 = vst [vmem:[#allocation30_spill] sm:$0xff] %v10660_v25  ;;  %v9293_v45 = vld [vmem:[#allocation5 + $0x164] sm:$0xf]  ;;  %v8212_v49 = vld [vmem:[#allocation5 + $0x170] sm:$0xf0]  ;;  %v10690_v53 = vor.u32 %v9288_v37, %v8186_v54 }
 0x10f   :  { %13558 = vst [vmem:[#allocation31_spill] sm:$0xff] %v10662_v26  ;;  %v9286_v33 = vld [vmem:[#allocation5 + $0x12c] sm:$0xf]  ;;  %v9289_v23 = vld [vmem:[#allocation5 + $0x144] sm:$0xf] }
 0x110   :  { %13559 = vst [vmem:[#allocation32_spill] sm:$0xff] %v10666_v41  ;;  %v9282_v37 = vld [vmem:[#allocation5 + $0x10c] sm:$0xf] }
 0x111   :  { %1506 = vmatpush.bf16.msrb.mxu3 %v10576_v7  ;;  %1534 = vmatpush.bf16.msra.mxu2 %v10578_v32  ;;  %13560 = vst [vmem:[#allocation33_spill] sm:$0xff] %v10669_v58 }
 0x112   :  { %1519 = vmatpush.bf16.msra.mxu1 %v10582_v28  ;;  %1547 = vmatpush.bf16.msra.mxu0 %v10584_v29  ;;  %13561 = vst [vmem:[#allocation34_spill] sm:$0xff] %v10673_v0 }
 0x113   :  { %13562 = vst [vmem:[#allocation35_spill] sm:$0xff] %v10675_v1 }
 0x114   :  { %13563 = vst [vmem:[#allocation36_spill] sm:$0xff] %v10678_v19 }
 0x115   :  { %1507 = vmatpush.bf16.msrb.mxu3 %v10588_v35  ;;  %1535 = vmatpush.bf16.msra.mxu2 %v10590_v36  ;;  %13565 = vst [vmem:[#allocation38_spill] sm:$0xff] %v10685_v40 }
 0x116   :  { %1520 = vmatpush.bf16.msra.mxu1 %v10594_v34  ;;  %1548 = vmatpush.bf16.msra.mxu0 %v10596_v48  ;;  %13567 = vst [vmem:[#allocation40_spill] sm:$0xff] %v10690_v53 }
 0x119   :  { %1508 = vmatpush.bf16.msrb.mxu3 %v10600_v50  ;;  %1536 = vmatpush.bf16.msra.mxu2 %v10602_v51 }
 0x11a   :  { %1521 = vmatpush.bf16.msra.mxu1 %v10608_v2  ;;  %1549 = vmatpush.bf16.msra.mxu0 %v10612_v5 }
 0x11c   :  { %1537 = vmatmul.bf16.vlgmr.msra.gmra.mxu2 %v13293_v22 }
 0x11d   :  { %1745 = vmatpush.bf16.msrb.mxu2 %v10604_v57  ;;  %1509 = vmatpush.bf16.msrb.mxu3 %v10614_v6 }
 0x11e   :  { %1758 = vmatpush.bf16.msrb.mxu0 %v10617_v12  ;;  %1522 = vmatpush.bf16.msra.mxu1 %v10623_v24 }
 0x11f   :  { %1550 = vmatmul.bf16.vlgmr.msra.gmra.mxu0 %v13293_v22 }
 0x121   :  { %1746 = vmatpush.bf16.msrb.mxu2 %v10619_v13  ;;  %1510 = vmatpush.bf16.msrb.mxu3 %v10627_v30 }
 0x122   :  { %1759 = vmatpush.bf16.msrb.mxu0 %v10631_v38  ;;  %1523 = vmatpush.bf16.msra.mxu1 %v10639_v52 }
 0x124   :  { %1511 = vmatmul.bf16.vlgmr.msrb.gmra.mxu3 %v13293_v22 }
 0x125   :  { %1719 = vmatpush.bf16.msra.mxu3 %v10633_v39  ;;  %1747 = vmatpush.bf16.msrb.mxu2 %v10635_v44 }
 0x126   :  { %1732 = vmatpush.bf16.msrb.mxu1 %v10642_v61  ;;  %1760 = vmatpush.bf16.msrb.mxu0 %v10646_v62 }
 0x127   :  { %1524 = vmatmul.bf16.vlgmr.msra.gmra.mxu1 %v13293_v22  ;;  %v9295_v22 = vld [vmem:[#allocation5 + $0x16c] sm:$0xf0] }
 0x128   :  { %v10687_v42 = vor.u32 %v9295_v22, %v8210_v20  ;;  %v8196_v20 = vld [vmem:[#allocation5 + $0x150] sm:$0xf0] }
 0x129   :  { %1720 = vmatpush.bf16.msra.mxu3 %v10648_v63  ;;  %1748 = vmatpush.bf16.msrb.mxu2 %v10651_v11 }
 0x12a   :  { %1733 = vmatpush.bf16.msrb.mxu1 %v10656_v21  ;;  %1761 = vmatpush.bf16.msrb.mxu0 %v10660_v25  ;;  %v10681_v25 = vor.u32 %v9297_v10, %v8228_v14  ;;  %13566 = vst [vmem:[#allocation39_spill] sm:$0xff] %v10687_v42  ;;  %v8170_v10 = vld [vmem:[#allocation5 + $0x108] sm:$0xf]  ;;  %v9284_v14 = vld [vmem:[#allocation5 + $0x114] sm:$0xf0] }
 0x12b   :  { %v10702_v54 = vor.u32 %v9284_v14, %v8170_v10  ;;  %v9283_v10 = vld [vmem:[#allocation5 + $0x10c] sm:$0xf0] }
 0x12c   :  { %13564 = vst [vmem:[#allocation37_spill] sm:$0xff] %v10681_v25 }
 0x12d   :  { %1721 = vmatpush.bf16.msra.mxu3 %v10662_v26  ;;  %1749 = vmatpush.bf16.msrb.mxu2 %v10666_v41  ;;  %v8188_v41 = vld [vmem:[#allocation5 + $0x138] sm:$0xf0]  ;;  %v8194_v26 = vld [vmem:[#allocation5 + $0x140] sm:$0xf]  ;;  %13571 = vst [vmem:[#allocation44_spill] sm:$0xff] %v10702_v54 }
 0x12e   :  { %1734 = vmatpush.bf16.msrb.mxu1 %v10669_v58  ;;  %1762 = vmatpush.bf16.msrb.mxu0 %v10673_v0  ;;  %v9291_v58 = vld [vmem:[#allocation5 + $0x14c] sm:$0xf0]  ;;  %v10693_v0 = vor.u32 %v9293_v45, %v8212_v49  ;;  %v10697_v22 = vor.u32 %v9286_v33, %v8188_v41  ;;  %v10705_v45 = vor.u32 %v9289_v23, %v8196_v20  ;;  %v9285_v41 = vld [vmem:[#allocation5 + $0x124] sm:$0xf]  ;;  %v8162_v33 = vld [vmem:[#allocation5 + $0x100] sm:$0xf] }
 0x12f   :  { %v10699_v15 = vor.u32 %v9291_v58, %v8194_v26  ;;  %v8180_v58 = vld [vmem:[#allocation5 + $0x130] sm:$0xf0]  ;;  %v13576_v23 = vmov 0  }
 0x130   :  { %13568 = vst [vmem:[#allocation41_spill] sm:$0xff] %v10693_v0  ;;  %v10716_v14 = vor.u32 %v9285_v41, %v8180_v58  ;;  %v8164_v20 = vld [vmem:[#allocation5 + $0x110] sm:$0xf0]  ;;  %v10751_v41 = vld [vmem:[%s13281_s6] sm:$0xff] }
 0x131   :  { %1722 = vmatpush.bf16.msra.mxu3 %v10675_v1  ;;  %1750 = vmatpush.bf16.msrb.mxu2 %v10678_v19  ;;  %13569 = vst [vmem:[#allocation42_spill] sm:$0xff] %v10697_v22  ;;  %v8172_v19 = vld [vmem:[#allocation5 + $0x118] sm:$0xf0]  ;;  %v8178_v1 = vld [vmem:[#allocation5 + $0x120] sm:$0xf]  ;;  %v13312_v58 = vperm.slane %v10751_v41, 0 }
 0x132   :  { %1735 = vmatpush.bf16.msrb.mxu1 %v10681_v25  ;;  %1763 = vmatpush.bf16.msrb.mxu0 %v10685_v40  ;;  %13570 = vst [vmem:[#allocation43_spill] sm:$0xff] %v10699_v15  ;;  %v9287_v25 = vld [vmem:[#allocation5 + $0x12c] sm:$0xf0]  ;;  %v10709_v26 = vor.u32 %v9282_v37, %v8172_v19  ;;  %v9281_v19 = vld [vmem:[#allocation5 + $0x104] sm:$0xf]  ;;  %v10721_v37 = vor.u32 %v9283_v10, %v8162_v33 }
 0x133   :  { %13572 = vst [vmem:[#allocation45_spill] sm:$0xff] %v10705_v45  ;;  %v10712_v49 = vor.u32 %v9287_v25, %v8178_v1  ;;  %v10727_v25 = vor.u32 %v9281_v19, %v8164_v20 }
 0x134   :  { %13573 = vst [vmem:[#allocation46_spill] sm:$0xff] %v10709_v26 }
 0x135   :  { %1723 = vmatpush.bf16.msra.mxu3 %v10687_v42  ;;  %1751 = vmatpush.bf16.msrb.mxu2 %v10690_v53  ;;  %13574 = vst [vmem:[#allocation47_spill] sm:$0xff] %v10712_v49 }
 0x136   :  { %1736 = vmatpush.bf16.msrb.mxu1 %v10693_v0  ;;  %1764 = vmatpush.bf16.msrb.mxu0 %v10697_v22  ;;  %13575 = vst [vmem:[#allocation48_spill] sm:$0xff] %v10716_v14 }
 0x137   :  { %13577 = vst [vmem:[#allocation49_spill] sm:$0xff] %v10721_v37 }
 0x138   :  { %13578 = vst [vmem:[#allocation50_spill] sm:$0xff] %v10727_v25 }
 0x139   :  { %1724 = vmatpush.bf16.msra.mxu3 %v10699_v15  ;;  %1752 = vmatpush.bf16.msrb.mxu2 %v10702_v54  ;;  %13579 = vst [vmem:[#allocation51_spill] sm:$0xff] %v10751_v41 }
 0x13a   :  { %1737 = vmatpush.bf16.msrb.mxu1 %v10705_v45  ;;  %1765 = vmatpush.bf16.msrb.mxu0 %v10709_v26 }
 0x13c   :  { %1753 = vmatmul.bf16.vlgmr.msrb.gmra.mxu2 %v13576_v23 }
 0x13d   :  { %1940 = vmatpush.bf16.msra.mxu2 %v10524_v17  ;;  %1725 = vmatpush.bf16.msra.mxu3 %v10712_v49 }
 0x13e   :  { %1953 = vmatpush.bf16.msra.mxu0 %v10526_v27  ;;  %1738 = vmatpush.bf16.msrb.mxu1 %v10716_v14 }
 0x13f   :  { %1766 = vmatmul.bf16.vlgmr.msrb.gmra.mxu0 %v13576_v23 }
 0x141   :  { %1941 = vmatpush.bf16.msra.mxu2 %v10529_v31  ;;  %1726 = vmatpush.bf16.msra.mxu3 %v10721_v37 }
 0x142   :  { %1954 = vmatpush.bf16.msra.mxu0 %v10532_v43  ;;  %1739 = vmatpush.bf16.msrb.mxu1 %v10727_v25 }
 0x144   :  { %1727 = vmatmul.bf16.vlgmr.msra.gmra.mxu3 %v13576_v23 }
 0x145   :  { %1914 = vmatpush.bf16.msrb.mxu3 %v10535_v46  ;;  %1942 = vmatpush.bf16.msra.mxu2 %v10537_v47 }
 0x146   :  { %1927 = vmatpush.bf16.msra.mxu1 %v10543_v55  ;;  %1955 = vmatpush.bf16.msra.mxu0 %v10545_v56 }
 0x147   :  { %1740 = vmatmul.bf16.vlgmr.msrb.gmra.mxu1 %v13576_v23 }
 0x149   :  { %1915 = vmatpush.bf16.msrb.mxu3 %v10549_v59  ;;  %1943 = vmatpush.bf16.msra.mxu2 %v10551_v60  ;;  %v1063_v1 = vpop.f32.mrf.mxu0 }
 0x14a   :  { %1928 = vmatpush.bf16.msra.mxu1 %v10555_v3  ;;  %1956 = vmatpush.bf16.msra.mxu0 %v10557_v4  ;;  %v1064_v10 = vadd.f32 %v1063_v1, %v13312_v58 }
 0x14d   :  { %1916 = vmatpush.bf16.msrb.mxu3 %v10561_v8  ;;  %1944 = vmatpush.bf16.msra.mxu2 %v10563_v9 }
 0x14e   :  { %1929 = vmatpush.bf16.msra.mxu1 %v10570_v16  ;;  %1957 = vmatpush.bf16.msra.mxu0 %v10572_v18 }
 0x14f   :  { %v10759_v33 = vpop.f32.mrf.mxu2 }
 0x151   :  { %1917 = vmatpush.bf16.msrb.mxu3 %v10576_v7  ;;  %1945 = vmatpush.bf16.msra.mxu2 %v10578_v32  ;;  %v10765_v19 = vpop.f32.mrf.mxu0  ;;  %v1077_v20 = vpop.f32.mrf.mxu1 }
 0x152   :  { %1930 = vmatpush.bf16.msra.mxu1 %v10582_v28  ;;  %1958 = vmatpush.bf16.msra.mxu0 %v10584_v29  ;;  %13580 = vst [vmem:[#allocation52_spill] sm:$0xff] %v10765_v19  ;;  %v10770_v23 = vadd.f32 %v1077_v20, %v1064_v10  ;;  %v13327_v19 = vperm.slane %v10751_v41, 3 }
 0x154   :  { %13581 = vst [vmem:[#allocation53_spill] sm:$0xff] %v10770_v23 }
 0x155   :  { %1918 = vmatpush.bf16.msrb.mxu3 %v10588_v35  ;;  %1946 = vmatpush.bf16.msra.mxu2 %v10590_v36 }
 0x156   :  { %1931 = vmatpush.bf16.msra.mxu1 %v10594_v34  ;;  %1959 = vmatpush.bf16.msra.mxu0 %v10596_v48 }
 0x157   :  { %v10777_v1 = vpop.f32.mrf.mxu2  ;;  %v10779_v58 = vpop.f32.mrf.mxu3 }
 0x158   :  { %13582 = vst [vmem:[#allocation54_spill] sm:$0xff] %v10777_v1 }
 0x159   :  { %1919 = vmatpush.bf16.msrb.mxu3 %v10600_v50  ;;  %1947 = vmatpush.bf16.msra.mxu2 %v10602_v51  ;;  %v1147_v10 = vpop.f32.mrf.mxu0  ;;  %v10784_v20 = vpop.f32.mrf.mxu1 }
 0x15a   :  { %1932 = vmatpush.bf16.msra.mxu1 %v10608_v2  ;;  %1960 = vmatpush.bf16.msra.mxu0 %v10612_v5  ;;  %13583 = vst [vmem:[#allocation55_spill] sm:$0xff] %v10784_v20  ;;  %v1148_v1 = vadd.f32 %v1147_v10, %v13327_v19  ;;  %v13332_v10 = vperm.slane %v10751_v41, 2  ;;  %v13590_v19 = vld [vmem:[#allocation33_spill] sm:$0xff] }
 0x15d   :  { %2012 = vmatpush.bf16.msrb.mxu2 %v10604_v57  ;;  %1920 = vmatpush.bf16.msrb.mxu3 %v10614_v6  ;;  %v13588_v57 = vld [vmem:[#allocation31_spill] sm:$0xff] }
 0x15e   :  { %2025 = vmatpush.bf16.msrb.mxu0 %v10617_v12  ;;  %1933 = vmatpush.bf16.msra.mxu1 %v10623_v24  ;;  %v13586_v12 = vld [vmem:[#allocation30_spill] sm:$0xff] }
 0x15f   :  { %v10796_v20 = vpop.f32.mrf.mxu3 }
 0x160   :  { %13584 = vst [vmem:[#allocation56_spill] sm:$0xff] %v10796_v20  ;;  %v13593_v20 = vld [vmem:[#allocation36_spill] sm:$0xff] }
 0x161   :  { %2013 = vmatpush.bf16.msrb.mxu2 %v10619_v13  ;;  %1921 = vmatpush.bf16.msrb.mxu3 %v10627_v30 }
 0x162   :  { %2026 = vmatpush.bf16.msrb.mxu0 %v10631_v38  ;;  %1934 = vmatpush.bf16.msra.mxu1 %v10639_v52  ;;  %v1161_v38 = vpop.f32.mrf.mxu2 }
 0x163   :  { %v10798_v13 = vadd.f32 %v1161_v38, %v1148_v1 }
 0x165   :  { %1986 = vmatpush.bf16.msra.mxu3 %v10633_v39  ;;  %2014 = vmatpush.bf16.msrb.mxu2 %v10635_v44  ;;  %13585 = vst [vmem:[#allocation57_spill] sm:$0xff] %v10798_v13  ;;  %v10801_v44 = vpop.f32.mrf.mxu0 }
 0x166   :  { %1999 = vmatpush.bf16.msrb.mxu1 %v10642_v61  ;;  %2027 = vmatpush.bf16.msrb.mxu0 %v10646_v62  ;;  %13587 = vst [vmem:[#allocation58_spill] sm:$0xff] %v10801_v44  ;;  %v1119_v62 = vpop.f32.mrf.mxu1  ;;  %v13595_v44 = vld [vmem:[#allocation37_spill] sm:$0xff] }
 0x167   :  { %v1120_v38 = vadd.f32 %v1119_v62, %v13332_v10  ;;  %v13341_v62 = vperm.slane %v10751_v41, 5 }
 0x169   :  { %1987 = vmatpush.bf16.msra.mxu3 %v10648_v63  ;;  %2015 = vmatpush.bf16.msrb.mxu2 %v10651_v11  ;;  %v13589_v63 = vld [vmem:[#allocation32_spill] sm:$0xff]  ;;  %v13591_v11 = vld [vmem:[#allocation34_spill] sm:$0xff] }
 0x16a   :  { %2000 = vmatpush.bf16.msrb.mxu1 %v10656_v21  ;;  %2028 = vmatpush.bf16.msrb.mxu0 %v13586_v12  ;;  %v13592_v21 = vld [vmem:[#allocation35_spill] sm:$0xff]  ;;  %v10812_v1 = vpop.f32.mrf.mxu2  ;;  %v1133_v12 = vpop.f32.mrf.mxu3 }
 0x16b   :  { %13594 = vst [vmem:[#allocation59_spill] sm:$0xff] %v10812_v1 }
 0x16d   :  { %1988 = vmatpush.bf16.msra.mxu3 %v13588_v57  ;;  %2016 = vmatpush.bf16.msrb.mxu2 %v13589_v63  ;;  %v10816_v63 = vadd.f32 %v1133_v12, %v1120_v38  ;;  %v1217_v57 = vpop.f32.mrf.mxu0 }
 0x16e   :  { %2001 = vmatpush.bf16.msrb.mxu1 %v13590_v19  ;;  %2029 = vmatpush.bf16.msrb.mxu0 %v13591_v11  ;;  %v10819_v11 = vpop.f32.mrf.mxu1 }
 0x16f   :  { %13596 = vst [vmem:[#allocation60_spill] sm:$0xff] %v10816_v63 }
 0x170   :  { %13597 = vst [vmem:[#allocation61_spill] sm:$0xff] %v10819_v11 }
 0x171   :  { %1989 = vmatpush.bf16.msra.mxu3 %v13592_v21  ;;  %2017 = vmatpush.bf16.msrb.mxu2 %v13593_v20 }
 0x172   :  { %2002 = vmatpush.bf16.msrb.mxu1 %v13595_v44  ;;  %2030 = vmatpush.bf16.msrb.mxu0 %v10685_v40  ;;  %v10828_v12 = vpop.f32.mrf.mxu3  ;;  %v1203_v38 = vpop.f32.mrf.mxu2 }
 0x173   :  { %13598 = vst [vmem:[#allocation62_spill] sm:$0xff] %v10828_v12  ;;  %v1204_v10 = vadd.f32 %v1203_v38, %v13341_v62 }
 0x175   :  { %1990 = vmatpush.bf16.msra.mxu3 %v10687_v42  ;;  %2018 = vmatpush.bf16.msrb.mxu2 %v10690_v53  ;;  %v10833_v11 = vpop.f32.mrf.mxu0  ;;  %v561_v53 = vperm.slane %v10751_v41, 7 }
 0x176   :  { %2003 = vmatpush.bf16.msrb.mxu1 %v10693_v0  ;;  %2031 = vmatpush.bf16.msrb.mxu0 %v10697_v22  ;;  %v1189_v1 = vpop.f32.mrf.mxu1  ;;  %v10836_v22 = vadd.f32 %v1217_v57, %v1204_v10 }
 0x178   :  { %13599 = vst [vmem:[#allocation63_spill] sm:$0xff] %v10836_v22 }
 0x179   :  { %1991 = vmatpush.bf16.msra.mxu3 %v10699_v15  ;;  %2019 = vmatpush.bf16.msrb.mxu2 %v10702_v54  ;;  %v13357_v54 = vperm.slane %v10751_v41, 4 }
 0x17a   :  { %2004 = vmatpush.bf16.msrb.mxu1 %v10705_v45  ;;  %2032 = vmatpush.bf16.msrb.mxu0 %v10709_v26  ;;  %v1175_v12 = vpop.f32.mrf.mxu3  ;;  %v1205_v26 = vpop.f32.mrf.mxu2 }
 0x17b   :  { %v1176_v38 = vadd.f32 %v1175_v12, %v13357_v54 }
 0x17d   :  { %1992 = vmatpush.bf16.msra.mxu3 %v10712_v49  ;;  %v10847_v49 = vadd.f32 %v1189_v1, %v1176_v38  ;;  %v1259_v57 = vpop.f32.mrf.mxu0  ;;  %v13368_v38 = vperm.slane %v10751_v41, 1 }
 0x17e   :  { %2005 = vmatpush.bf16.msrb.mxu1 %v10716_v14  ;;  %v10845_v62 = vpop.f32.mrf.mxu1  ;;  %v1260_v10 = vadd.f32 %v1259_v57, %v561_v53  ;;  %v13361_v14 = vperm.slane %v10751_v41, 6 }
 0x17f   :  { %13600 = vst [vmem:[#allocation64_spill] sm:$0xff] %v10847_v49 }
 0x181   :  { %1993 = vmatpush.bf16.msra.mxu3 %v10721_v37 }
 0x182   :  { %2006 = vmatpush.bf16.msrb.mxu1 %v10727_v25  ;;  %v10849_v22 = vpop.f32.mrf.mxu3  ;;  %v1273_v37 = vpop.f32.mrf.mxu2 }
 0x183   :  { %v10852_v40 = vadd.f32 %v1273_v37, %v1260_v10  ;;  %v1092_v10 = vadd.f32 %v10759_v33, %v13368_v38 }
 0x185   :  { %13601 = vst [vmem:[#allocation65_spill] sm:$0xff] %v10852_v40  ;;  %v1261_v12 = vpop.f32.mrf.mxu0 }
 0x186   :  { %v1231_v25 = vpop.f32.mrf.mxu1 }
 0x187   :  { %v1232_v20 = vadd.f32 %v1231_v25, %v13361_v14  ;;  %v10868_v25 = vadd.f32 %v10779_v58, %v1092_v10 }
 0x189   :  { %13603 = vst [vmem:[#allocation67_spill] sm:$0xff] %v10868_v25 }
 0x18a   :  { %v1245_v45 = vpop.f32.mrf.mxu3  ;;  %v1275_v54 = vpop.f32.mrf.mxu2 }
 0x18b   :  { %v10856_v15 = vadd.f32 %v1245_v45, %v1232_v20 }
 0x18d   :  { %13602 = vst [vmem:[#allocation66_spill] sm:$0xff] %v10856_v15 }
 0x18e   :  { %v10858_v1 = vpop.f32.mrf.mxu1 }
 0x192   :  { %v10861_v49 = vpop.f32.mrf.mxu3 }
 0x19c   :  { %v1551_v57 = vpop.f32.mrf.mxu0 }
 0x19d   :  { %v1558_v0 = vadd.f32 %v1551_v57, %v10798_v13 }
 0x19f   :  { %v1538_v37 = vpop.f32.mrf.mxu2  ;;  %v8290_v45 = vmul.f32 -1.442695, %v1558_v0 }
 0x1a1   :  { %9527 = vpow2.f32 %v8290_v45 }
 0x1a4   :  { %v1525_v20 = vpop.f32.mrf.mxu1  ;;  %v1553_v15 = vpop.f32.mrf.mxu0 }
 0x1a5   :  { %v1556_v14 = vadd.f32 %v1525_v20, %v10868_v25 }
 0x1a7   :  { %v8289_v40 = vmul.f32 -1.442695, %v1556_v14  ;;  %v1512_v42 = vpop.f32.mrf.mxu3  ;;  %v1540_v44 = vpop.f32.mrf.mxu2 }
 0x1a8   :  { %v1555_v21 = vadd.f32 %v1512_v42, %v10770_v23  ;;  %v9528_v19 = vpop.eup %9527 }
 0x1a9   :  { %9529 = vpow2.f32 %v8289_v40  ;;  %v10872_v58 = vadd.f32 1.0, %v9528_v19  ;;  %v1262_v40 = vadd.f32 %v1261_v12, %v561_v53  ;;  %v13604_v19 = vperm.slane %v10751_v41, 5 }
 0x1aa   :  { %v8288_v57 = vmul.f32 -1.442695, %v1555_v21  ;;  %v1557_v21 = vadd.f32 %v1538_v37, %v10816_v63 }
 0x1ab   :  { %vm1835_vm4 = vweird.f32 %v10872_v58 }
 0x1ac   :  { %9531 = vpow2.f32 %v8288_v57  ;;  %v1527_v13 = vpop.f32.mrf.mxu1  ;;  %v1206_v57 = vadd.f32 %v1205_v26, %v13604_v19 }
 0x1af   :  { %v9530_v33 = vpop.eup %9529  ;;  %v1514_v38 = vpop.f32.mrf.mxu3 }
 0x1b0   :  { %v1809_v0 = vadd.f32 1.0, %v9530_v33  ;;  %v10880_v33 = vadd.f32 %v1275_v54, %v1262_v40  ;;  %v10888_v54 = vadd.f32 %v10833_v11, %v1206_v57 }
 0x1b2   :  { %v9532_v10 = vpop.eup %9531  ;;  %9533 = vrcp.f32 %v1809_v0  ;;  %13605 = vst [vmem:[#allocation68_spill] sm:$0xff] %v10880_v33  ;;  %v1821_v61 = vand.u32 2147483648, %v1809_v0  ;;  %v1819_v53 = vand.u32 2147483647, %v1809_v0  ;;  %vm1815_vm9 = vweird.f32 %v1809_v0 }
 0x1b3   :  { %v1790_v20 = vadd.f32 1.0, %v9532_v10  ;;  %9535 = vrcp.f32 %v10872_v58 }
 0x1b4   :  { %v1822_v5 = vor.u32 1.1754944e-38, %v1821_v61  ;;  %vm1820_vm12 = vcmp.eq.f32.partialorder %v1819_v53, 8.507059e+37 }
 0x1b5   :  { %9537 = vrcp.f32 %v1790_v20  ;;  %v1800_v40 = vand.u32 2147483647, %v1790_v20  ;;  %vm1796_vm13 = vweird.f32 %v1790_v20 }
 0x1b6   :  { %9539 = vtanh.f32 %v1557_v21 }
 0x1b7   :  { %vm1801_vm15 = vcmp.eq.f32.partialorder %v1800_v40, 8.507059e+37 }
 0x1b8   :  { %v9534_v15 = vpop.eup %9533 }
 0x1b9   :  { %v1811_v44 = vmul.f32 %v9534_v15, %v1809_v0  ;;  %v10875_v14 = vpop.eup %9535  ;;  %vm1816_vm8 = vweird.f32 %v9534_v15 }
 0x1ba   :  { %v1831_v23 = vmul.f32 %v10875_v14, %v10872_v58  ;;  %vm1817_vm10 = vmor %vm1815_vm9, %vm1816_vm8  ;;  %vm1836_vm1 = vweird.f32 %v10875_v14 }
 0x1bb   :  { %v9538_v42 = vpop.eup %9537  ;;  %v1812_v45 = vsub.f32 1.0, %v1811_v44  ;;  %v1802_v44 = vand.u32 2147483648, %v1790_v20  ;;  %vm1837_vm5 = vmor %vm1835_vm4, %vm1836_vm1 }
 0x1bc   :  { %v1767_v13 = vpop.f32.mrf.mxu0  ;;  %v1792_v10 = vmul.f32 %v9538_v42, %v1790_v20  ;;  %vm1797_vm11 = vweird.f32 %v9538_v42  ;;  %v1832_v63 = vsub.f32 1.0, %v1831_v23 }
 0x1bd   :  { %v1778_v38 = vrot.slane %v1767_v13, 2  ;;  %v1813_v25 = vmul.f32 %v9534_v15, %v1812_v45  ;;  %v13606_v45 = vperm.slane %v10751_v41, 4  ;;  %vm1798_vm14 = vmor %vm1796_vm13, %vm1797_vm11  ;;  %v1803_v11 = vor.u32 1.1754944e-38, %v1802_v44 }
 0x1be   :  { %v1793_v12 = vsub.f32 1.0, %v1792_v10  ;;  %v1833_v61 = vmul.f32 %v10875_v14, %v1832_v63 }
 0x1bf   :  { %v10884_v39 = vpop.f32.mrf.mxu2  ;;  %v1814_v37 = vadd.f32 %v9534_v15, %v1813_v25  ;;  %v1786_v13 = vadd.f32 %v1778_v38, %v10880_v33  ;;  %v1178_v19 = vadd.f32 %v10849_v22, %v13606_v45 }
 0x1c0   :  { %v1794_v26 = vmul.f32 %v9538_v42, %v1793_v12  ;;  %v9540_v12 = vpop.eup %9539 }
 0x1c1   :  { %v1818_v21 = vsel %vm1817_vm10, %v9534_v15, %v1814_v37  ;;  %v8293_v57 = vmul.f32 -1.442695, %v1786_v13  ;;  %v10895_v22 = vadd.f32 %v10845_v62, %v1178_v19  ;;  %v1834_v62 = vadd.f32 %v10875_v14, %v1833_v61 }
 0x1c2   :  { %v1795_v25 = vadd.f32 %v9538_v42, %v1794_v26  ;;  %v1823_v33 = vsel %vm1820_vm12, %v1822_v5, %v1818_v21  ;;  %v13608_v61 = vperm.slane %v10751_v41, 6  ;;  %v13640_v41 = vld [vmem:[#allocation48_spill] sm:$0xff] }
 0x1c3   :  { %v1845_v20 = vmul.f32 0.0, %v1823_v33  ;;  %9541 = vpow2.f32 %v8293_v57  ;;  %v1838_v19 = vsel %vm1837_vm5, %v10875_v14, %v1834_v62 }
 0x1c4   :  { %v1741_v10 = vpop.f32.mrf.mxu1  ;;  %v1769_v38 = vpop.f32.mrf.mxu0  ;;  %v1799_v51 = vsel %vm1798_vm14, %v9538_v42, %v1795_v25 }
 0x1c5   :  { %v1776_v0 = vrot.slane %v1741_v10, 2  ;;  %v1804_v23 = vsel %vm1801_vm15, %v1803_v11, %v1799_v51  ;;  %v1841_v51 = vand.u32 2147483648, %v10872_v58 }
 0x1c6   :  { %v1846_v37 = vmul.f32 %v9540_v12, %v1804_v23  ;;  %v1234_v23 = vadd.f32 %v10858_v1, %v13608_v61 }
 0x1c7   :  { %v1784_v52 = vadd.f32 %v1776_v0, %v10888_v54  ;;  %v1728_v15 = vpop.f32.mrf.mxu3  ;;  %v1756_v53 = vpop.f32.mrf.mxu2  ;;  %v1842_v10 = vor.u32 1.1754944e-38, %v1841_v51 }
 0x1c8   :  { %v1775_v5 = vrot.slane %v1728_v15, 2  ;;  %v10899_v42 = vadd.f32 %v1846_v37, %v1845_v20  ;;  %v1777_v15 = vrot.slane %v10884_v39, 2  ;;  %v10922_v20 = vadd.f32 %v10861_v49, %v1234_v23 }
 0x1c9   :  { %v8292_v26 = vmul.f32 -1.442695, %v1784_v52  ;;  %v1839_v52 = vand.u32 2147483647, %v10872_v58  ;;  %v9542_v63 = vpop.eup %9541 }
 0x1ca   :  { %v1783_v44 = vadd.f32 %v1775_v5, %v10895_v22  ;;  %v10908_v25 = vadd.f32 1.0, %v9542_v63  ;;  %v1785_v39 = vadd.f32 %v1777_v15, %v10922_v20 }
 0x1cb   :  { %9543 = vpow2.f32 %v8292_v26  ;;  %vm1840_vm6 = vcmp.eq.f32.partialorder %v1839_v52, 8.507059e+37  ;;  %v13614_v52 = vld [vmem:[#allocation18_spill] sm:$0xff] }
 0x1cc   :  { %v1743_v13 = vpop.f32.mrf.mxu1  ;;  %v8291_v40 = vmul.f32 -1.442695, %v1783_v44  ;;  %9545 = vtanh.f32 %v10899_v42  ;;  %v1843_v38 = vsel %vm1840_vm6, %v1842_v10, %v1838_v19  ;;  %vm1898_vm4 = vweird.f32 %v10908_v25 }
 0x1ce   :  { %9547 = vpow2.f32 %v8291_v40 }
 0x1cf   :  { %v1730_v33 = vpop.f32.mrf.mxu3 }
 0x1d1   :  { %v9544_v45 = vpop.eup %9543 }
 0x1d2   :  { %v1872_v21 = vadd.f32 1.0, %v9544_v45  ;;  %v9546_v0 = vpop.eup %9545 }
 0x1d3   :  { %v10910_v57 = vmul.f32 %v9546_v0, %v1843_v38 }
 0x1d4   :  { %9549 = vrcp.f32 %v1872_v21  ;;  %v9548_v11 = vpop.eup %9547  ;;  %v1884_v13 = vand.u32 2147483648, %v1872_v21  ;;  %vm1878_vm9 = vweird.f32 %v1872_v21  ;;  %v1882_v62 = vand.u32 2147483647, %v1872_v21 }
 0x1d5   :  { %13607 = vst [vmem:[#allocation69_spill] sm:$0xff] %v10910_v57  ;;  %v1853_v12 = vadd.f32 1.0, %v9548_v11  ;;  %9551 = vrcp.f32 %v10908_v25  ;;  %v1913_v58 = vpack.c.bf16 %v10910_v57, %v10910_v57  ;;  %v13641_v57 = vld [vmem:[#allocation40_spill] sm:$0xff] }
 0x1d6   :  { %v1885_v0 = vor.u32 1.1754944e-38, %v1884_v13  ;;  %vm1883_vm12 = vcmp.eq.f32.partialorder %v1882_v62, 8.507059e+37 }
 0x1d7   :  { %9553 = vrcp.f32 %v1853_v12  ;;  %1922 = vmatmul.bf16.vlgmr.msrb.gmra.mxu3 %v1913_v58  ;;  %1935 = vmatmul.bf16.vlgmr.msra.gmra.mxu1 %v1913_v58  ;;  %v1865_v63 = vand.u32 2147483648, %v1853_v12  ;;  %v1863_v19 = vand.u32 2147483647, %v1853_v12  ;;  %vm1859_vm13 = vweird.f32 %v1853_v12 }
 0x1d8   :  { %1948 = vmatmul.bf16.vlgmr.msra.gmra.mxu2 %v1913_v58  ;;  %1961 = vmatmul.bf16.vlgmr.msra.gmra.mxu0 %v1913_v58  ;;  %9555 = vtanh.f32 %v1785_v39  ;;  %v1902_v39 = vand.u32 2147483647, %v10908_v25 }
 0x1d9   :  { %2190 = vmatpush.bf16.msrb.mxu3 %v10535_v46  ;;  %2203 = vmatpush.bf16.msra.mxu1 %v10543_v55  ;;  %v1866_v11 = vor.u32 1.1754944e-38, %v1865_v63  ;;  %vm1864_vm15 = vcmp.eq.f32.partialorder %v1863_v19, 8.507059e+37  ;;  %v13615_v63 = vld [vmem:[#allocation22_spill] sm:$0xff]  ;;  %v13618_v19 = vld [vmem:[#allocation19_spill] sm:$0xff] }
 0x1da   :  { %v9550_v14 = vpop.eup %9549  ;;  %2216 = vmatpush.bf16.msra.mxu2 %v10524_v17  ;;  %2229 = vmatpush.bf16.msra.mxu0 %v10526_v27  ;;  %vm1903_vm6 = vcmp.eq.f32.partialorder %v1902_v39, 8.507059e+37  ;;  %v13632_v39 = vld [vmem:[#allocation41_spill] sm:$0xff] }
 0x1db   :  { %v1874_v53 = vmul.f32 %v9550_v14, %v1872_v21  ;;  %v10926_v37 = vpop.eup %9551  ;;  %vm1879_vm8 = vweird.f32 %v9550_v14 }
 0x1dc   :  { %v1894_v49 = vmul.f32 %v10926_v37, %v10908_v25  ;;  %vm10935_vm10 = vmor %vm1878_vm9, %vm1879_vm8  ;;  %vm1899_vm1 = vweird.f32 %v10926_v37 }
 0x1dd   :  { %v1875_v26 = vsub.f32 1.0, %v1874_v53  ;;  %v9554_v1 = vpop.eup %9553  ;;  %2191 = vmatpush.bf16.msrb.mxu3 %v10549_v59  ;;  %2204 = vmatpush.bf16.msra.mxu1 %v10555_v3  ;;  %vm1900_vm5 = vmor %vm1898_vm4, %vm1899_vm1 }
 0x1de   :  { %v1855_v44 = vmul.f32 %v9554_v1, %v1853_v12  ;;  %2217 = vmatpush.bf16.msra.mxu2 %v10529_v31  ;;  %2230 = vmatpush.bf16.msra.mxu0 %v10532_v43  ;;  %vm1860_vm11 = vweird.f32 %v9554_v1  ;;  %v1895_v10 = vsub.f32 1.0, %v1894_v49 }
 0x1df   :  { %v1876_v5 = vmul.f32 %v9550_v14, %v1875_v26  ;;  %vm1861_vm14 = vmor %vm1859_vm13, %vm1860_vm11 }
 0x1e0   :  { %v1856_v51 = vsub.f32 1.0, %v1855_v44  ;;  %v1896_v23 = vmul.f32 %v10926_v37, %v1895_v10  ;;  %v13619_v10 = vld [vmem:[#allocation27_spill] sm:$0xff] }
 0x1e1   :  { %v1877_v40 = vadd.f32 %v9550_v14, %v1876_v5  ;;  %2192 = vmatpush.bf16.msrb.mxu3 %v10561_v8  ;;  %2205 = vmatpush.bf16.msra.mxu1 %v10570_v16 }
 0x1e2   :  { %v1857_v45 = vmul.f32 %v9554_v1, %v1856_v51  ;;  %2218 = vmatpush.bf16.msra.mxu2 %v10537_v47  ;;  %2231 = vmatpush.bf16.msra.mxu0 %v10545_v56  ;;  %v1897_v26 = vadd.f32 %v10926_v37, %v1896_v23  ;;  %v13613_v51 = vld [vmem:[#allocation16_spill] sm:$0xff]  ;;  %v13627_v23 = vld [vmem:[#allocation35_spill] sm:$0xff] }
 0x1e3   :  { %v1881_v33 = vsel %vm10935_vm10, %v9550_v14, %v1877_v40  ;;  %v9556_v14 = vpop.eup %9555  ;;  %v13612_v40 = vld [vmem:[#allocation24_spill] sm:$0xff] }
 0x1e4   :  { %v1858_v21 = vadd.f32 %v9554_v1, %v1857_v45  ;;  %v1886_v38 = vsel %vm1883_vm12, %v1885_v0, %v1881_v33  ;;  %v1901_v5 = vsel %vm1900_vm5, %v10926_v37, %v1897_v26  ;;  %v13616_v33 = vld [vmem:[#allocation25_spill] sm:$0xff]  ;;  %v13630_v26 = vld [vmem:[#allocation30_spill] sm:$0xff] }
 0x1e5   :  { %2193 = vmatpush.bf16.msrb.mxu3 %v10576_v7  ;;  %2206 = vmatpush.bf16.msra.mxu1 %v10582_v28  ;;  %v1908_v15 = vmul.f32 0.0, %v1886_v38  ;;  %v13617_v45 = vld [vmem:[#allocation17_spill] sm:$0xff] }
 0x1e6   :  { %v1862_v58 = vsel %vm1861_vm14, %v9554_v1, %v1858_v21  ;;  %2219 = vmatpush.bf16.msra.mxu2 %v10551_v60  ;;  %2232 = vmatpush.bf16.msra.mxu0 %v10557_v4  ;;  %v1904_v1 = vand.u32 2147483648, %v10908_v25  ;;  %v13620_v0 = vld [vmem:[#allocation29_spill] sm:$0xff]  ;;  %v13621_v21 = vld [vmem:[#allocation20_spill] sm:$0xff] }
 0x1e7   :  { %v1867_v61 = vsel %vm1864_vm15, %v1866_v11, %v1862_v58  ;;  %v13622_v38 = vld [vmem:[#allocation21_spill] sm:$0xff]  ;;  %v13623_v11 = vld [vmem:[#allocation31_spill] sm:$0xff] }
 0x1e8   :  { %v1909_v53 = vmul.f32 %v9556_v14, %v1867_v61  ;;  %v1905_v44 = vor.u32 1.1754944e-38, %v1904_v1  ;;  %v13624_v58 = vld [vmem:[#allocation33_spill] sm:$0xff]  ;;  %v13625_v14 = vld [vmem:[#allocation23_spill] sm:$0xff]  ;;  %v13626_v61 = vld [vmem:[#allocation26_spill] sm:$0xff] }
 0x1e9   :  { %2194 = vmatpush.bf16.msrb.mxu3 %v10588_v35  ;;  %2207 = vmatpush.bf16.msra.mxu1 %v10594_v34  ;;  %v13631_v1 = vld [vmem:[#allocation39_spill] sm:$0xff] }
 0x1ea   :  { %v10950_v12 = vadd.f32 %v1909_v53, %v1908_v15  ;;  %2220 = vmatpush.bf16.msra.mxu2 %v10563_v9  ;;  %2233 = vmatpush.bf16.msra.mxu0 %v10572_v18  ;;  %v1906_v13 = vsel %vm1903_vm6, %v1905_v44, %v1901_v5  ;;  %v13628_v15 = vld [vmem:[#allocation37_spill] sm:$0xff]  ;;  %v13629_v53 = vld [vmem:[#allocation28_spill] sm:$0xff]  ;;  %v13634_v44 = vld [vmem:[#allocation34_spill] sm:$0xff] }
 0x1eb   :  { %v13633_v5 = vld [vmem:[#allocation32_spill] sm:$0xff] }
 0x1ec   :  { %9557 = vtanh.f32 %v10950_v12 }
 0x1ed   :  { %2195 = vmatpush.bf16.msrb.mxu3 %v10600_v50  ;;  %2208 = vmatpush.bf16.msra.mxu1 %v10608_v2 }
 0x1ee   :  { %2221 = vmatpush.bf16.msra.mxu2 %v10578_v32  ;;  %2234 = vmatpush.bf16.msra.mxu0 %v10584_v29 }
 0x1f1   :  { %2196 = vmatpush.bf16.msrb.mxu3 %v10614_v6  ;;  %2209 = vmatpush.bf16.msra.mxu1 %v10623_v24 }
 0x1f2   :  { %v9558_v49 = vpop.eup %9557  ;;  %2222 = vmatpush.bf16.msra.mxu2 %v10590_v36  ;;  %2235 = vmatpush.bf16.msra.mxu0 %v10596_v48 }
 0x1f3   :  { %v10969_v25 = vmul.f32 %v9558_v49, %v1906_v13  ;;  %v13635_v49 = vld [vmem:[#allocation43_spill] sm:$0xff]  ;;  %v13636_v13 = vld [vmem:[#allocation45_spill] sm:$0xff] }
 0x1f5   :  { %13611 = vst [vmem:[#allocation70_spill] sm:$0xff] %v10969_v25  ;;  %v1982_v37 = vpack.c.bf16 %v10969_v25, %v10969_v25  ;;  %2197 = vmatpush.bf16.msrb.mxu3 %v10627_v30  ;;  %2210 = vmatpush.bf16.msra.mxu1 %v13612_v40  ;;  %v13639_v25 = vld [vmem:[#allocation47_spill] sm:$0xff] }
 0x1f6   :  { %2223 = vmatpush.bf16.msra.mxu2 %v13613_v51  ;;  %2236 = vmatpush.bf16.msra.mxu0 %v13614_v52 }
 0x1f7   :  { %v1984_v62 = vrot.slane %v1982_v37, 3  ;;  %v13637_v37 = vld [vmem:[#allocation36_spill] sm:$0xff] }
 0x1f9   :  { %1994 = vmatmul.bf16.vlgmr.msra.gmra.mxu3 %v1984_v62  ;;  %2007 = vmatmul.bf16.vlgmr.msrb.gmra.mxu1 %v1984_v62 }
 0x1fa   :  { %2020 = vmatmul.bf16.vlgmr.msrb.gmra.mxu2 %v1984_v62  ;;  %2033 = vmatmul.bf16.vlgmr.msrb.gmra.mxu0 %v1984_v62  ;;  %v13638_v62 = vld [vmem:[#allocation38_spill] sm:$0xff] }
 0x1fb   :  { %2262 = vmatpush.bf16.msra.mxu3 %v13615_v63  ;;  %2275 = vmatpush.bf16.msrb.mxu1 %v13616_v33  ;;  %v2113_v33 = vrot.slane %v10899_v42, 6 }
 0x1fc   :  { %2288 = vmatpush.bf16.msrb.mxu2 %v13617_v45  ;;  %2301 = vmatpush.bf16.msrb.mxu0 %v13618_v19 }
 0x1ff   :  { %2263 = vmatpush.bf16.msra.mxu3 %v13619_v10  ;;  %2276 = vmatpush.bf16.msrb.mxu1 %v13620_v0 }
 0x200   :  { %2289 = vmatpush.bf16.msrb.mxu2 %v13621_v21  ;;  %2302 = vmatpush.bf16.msrb.mxu0 %v13622_v38 }
 0x203   :  { %2264 = vmatpush.bf16.msra.mxu3 %v13623_v11  ;;  %2277 = vmatpush.bf16.msrb.mxu1 %v13624_v58 }
 0x204   :  { %2290 = vmatpush.bf16.msrb.mxu2 %v13625_v14  ;;  %2303 = vmatpush.bf16.msrb.mxu0 %v13626_v61  ;;  %v13649_v14 = vld [vmem:[#allocation53_spill] sm:$0xff] }
 0x207   :  { %2265 = vmatpush.bf16.msra.mxu3 %v13627_v23  ;;  %2278 = vmatpush.bf16.msrb.mxu1 %v13628_v15  ;;  %v13648_v15 = vld [vmem:[#allocation57_spill] sm:$0xff] }
 0x208   :  { %2291 = vmatpush.bf16.msrb.mxu2 %v13629_v53  ;;  %2304 = vmatpush.bf16.msrb.mxu0 %v13630_v26  ;;  %v13647_v53 = vld [vmem:[#allocation67_spill] sm:$0xff] }
 0x20b   :  { %2266 = vmatpush.bf16.msra.mxu3 %v13631_v1  ;;  %2279 = vmatpush.bf16.msrb.mxu1 %v13632_v39  ;;  %v13642_v1 = vld [vmem:[#allocation42_spill] sm:$0xff]  ;;  %v13643_v39 = vld [vmem:[#allocation49_spill] sm:$0xff] }
 0x20c   :  { %2292 = vmatpush.bf16.msrb.mxu2 %v13633_v5  ;;  %2305 = vmatpush.bf16.msrb.mxu0 %v13634_v44  ;;  %v13644_v5 = vld [vmem:[#allocation50_spill] sm:$0xff]  ;;  %v13645_v44 = vld [vmem:[#allocation44_spill] sm:$0xff] }
 0x20f   :  { %2267 = vmatpush.bf16.msra.mxu3 %v13635_v49  ;;  %2280 = vmatpush.bf16.msrb.mxu1 %v13636_v13  ;;  %v13646_v49 = vld [vmem:[#allocation46_spill] sm:$0xff] }
 0x210   :  { %2293 = vmatpush.bf16.msrb.mxu2 %v13637_v37  ;;  %2306 = vmatpush.bf16.msrb.mxu0 %v13638_v62 }
 0x213   :  { %2268 = vmatpush.bf16.msra.mxu3 %v13639_v25  ;;  %2281 = vmatpush.bf16.msrb.mxu1 %v13640_v41 }
 0x214   :  { %2294 = vmatpush.bf16.msrb.mxu2 %v13641_v57  ;;  %2307 = vmatpush.bf16.msrb.mxu0 %v13642_v1 }
 0x217   :  { %2269 = vmatpush.bf16.msra.mxu3 %v13643_v39  ;;  %2282 = vmatpush.bf16.msrb.mxu1 %v13644_v5 }
 0x218   :  { %2295 = vmatpush.bf16.msrb.mxu2 %v13645_v44  ;;  %2308 = vmatpush.bf16.msrb.mxu0 %v13646_v49 }
 0x254   :  { %v1936_v13 = vpop.f32.mrf.mxu1 }
 0x255   :  { %v1971_v37 = vrot.slane %v1936_v13, 6  ;;  %v1962_v26 = vpop.f32.mrf.mxu0 }
 0x256   :  { %v1973_v62 = vrot.slane %v1962_v26, 6 }
 0x257   :  { %v1979_v25 = vadd.f32 %v1971_v37, %v13647_v53  ;;  %v13653_v53 = vld [vmem:[#allocation68_spill] sm:$0xff] }
 0x258   :  { %v1981_v41 = vadd.f32 %v1973_v62, %v13648_v15 }
 0x259   :  { %v8295_v23 = vmul.f32 -1.442695, %v1979_v25 }
 0x25a   :  { %v8296_v57 = vmul.f32 -1.442695, %v1981_v41  ;;  %v1923_v61 = vpop.f32.mrf.mxu3 }
 0x25b   :  { %9559 = vpow2.f32 %v8295_v23  ;;  %v1970_v1 = vrot.slane %v1923_v61, 6  ;;  %v1949_v39 = vpop.f32.mrf.mxu2 }
 0x25c   :  { %9561 = vpow2.f32 %v8296_v57  ;;  %v1938_v5 = vpop.f32.mrf.mxu1  ;;  %v1972_v23 = vrot.slane %v1949_v39, 6 }
 0x25d   :  { %v1978_v44 = vadd.f32 %v1970_v1, %v13649_v14  ;;  %v1964_v58 = vpop.f32.mrf.mxu0 }
 0x25f   :  { %v8294_v49 = vmul.f32 -1.442695, %v1978_v44 }
 0x261   :  { %v9560_v11 = vpop.eup %9559  ;;  %9563 = vpow2.f32 %v8294_v49  ;;  %v13650_v49 = vld [vmem:[#allocation60_spill] sm:$0xff] }
 0x262   :  { %v9562_v13 = vpop.eup %9561  ;;  %v2076_v26 = vadd.f32 1.0, %v9560_v11  ;;  %v1925_v38 = vpop.f32.mrf.mxu3  ;;  %v1980_v11 = vadd.f32 %v1972_v23, %v13650_v49 }
 0x263   :  { %v1951_v37 = vpop.f32.mrf.mxu2  ;;  %v11014_v62 = vadd.f32 1.0, %v9562_v13 }
 0x264   :  { %9565 = vrcp.f32 %v2076_v26  ;;  %v2088_v13 = vand.u32 2147483648, %v2076_v26  ;;  %v2086_v14 = vand.u32 2147483647, %v2076_v26  ;;  %vm2082_vm9 = vweird.f32 %v2076_v26 }
 0x265   :  { %9567 = vrcp.f32 %v11014_v62  ;;  %vm2102_vm4 = vweird.f32 %v11014_v62 }
 0x266   :  { %v2089_v49 = vor.u32 1.1754944e-38, %v2088_v13  ;;  %vm2087_vm12 = vcmp.eq.f32.partialorder %v2086_v14, 8.507059e+37 }
 0x267   :  { %v9564_v41 = vpop.eup %9563 }
 0x268   :  { %v2057_v25 = vadd.f32 1.0, %v9564_v41 }
 0x26a   :  { %v9566_v61 = vpop.eup %9565  ;;  %9569 = vrcp.f32 %v2057_v25  ;;  %v2069_v39 = vand.u32 2147483648, %v2057_v25  ;;  %vm2063_vm13 = vweird.f32 %v2057_v25 }
 0x26b   :  { %v2078_v57 = vmul.f32 %v9566_v61, %v2076_v26  ;;  %v11017_v58 = vpop.eup %9567  ;;  %vm2083_vm8 = vweird.f32 %v9566_v61  ;;  %9571 = vtanh.f32 %v1980_v11 }
 0x26c   :  { %v2098_v41 = vmul.f32 %v11017_v58, %v11014_v62  ;;  %vm11022_vm10 = vmor %vm2082_vm9, %vm2083_vm8  ;;  %v2070_v19 = vor.u32 1.1754944e-38, %v2069_v39  ;;  %vm2103_vm1 = vweird.f32 %v11017_v58 }
 0x26d   :  { %v2079_v1 = vsub.f32 1.0, %v2078_v57  ;;  %vm2104_vm5 = vmor %vm2102_vm4, %vm2103_vm1 }
 0x26e   :  { %v2099_v0 = vsub.f32 1.0, %v2098_v41 }
 0x26f   :  { %v2080_v5 = vmul.f32 %v9566_v61, %v2079_v1  ;;  %v2067_v1 = vand.u32 2147483647, %v2057_v25 }
 0x270   :  { %v9570_v44 = vpop.eup %9569 }
 0x271   :  { %v2059_v38 = vmul.f32 %v9570_v44, %v2057_v25  ;;  %v2081_v37 = vadd.f32 %v9566_v61, %v2080_v5  ;;  %vm2064_vm11 = vweird.f32 %v9570_v44  ;;  %vm2068_vm15 = vcmp.eq.f32.partialorder %v2067_v1, 8.507059e+37 }
 0x272   :  { %vm2065_vm14 = vmor %vm2063_vm13, %vm2064_vm11 }
 0x273   :  { %v2060_v15 = vsub.f32 1.0, %v2059_v38  ;;  %v2085_v23 = vsel %vm11022_vm10, %v9566_v61, %v2081_v37  ;;  %v9572_v37 = vpop.eup %9571 }
 0x274   :  { %v2090_v45 = vsel %vm2087_vm12, %v2089_v49, %v2085_v23 }
 0x275   :  { %v2061_v57 = vmul.f32 %v9570_v44, %v2060_v15 }
 0x276   :  { %v2008_v5 = vpop.f32.mrf.mxu1 }
 0x277   :  { %v2043_v26 = vrot.slane %v2008_v5, 4  ;;  %v2034_v21 = vpop.f32.mrf.mxu0  ;;  %v2062_v10 = vadd.f32 %v9570_v44, %v2061_v57  ;;  %v2115_v5 = vmul.f32 %v2113_v33, %v2090_v45  ;;  %v2108_v45 = vand.u32 2147483648, %v11014_v62 }
 0x278   :  { %v2045_v38 = vrot.slane %v2034_v21, 4  ;;  %v2100_v21 = vmul.f32 %v11017_v58, %v2099_v0  ;;  %v2106_v0 = vand.u32 2147483647, %v11014_v62 }
 0x279   :  { %v2051_v11 = vadd.f32 %v2043_v26, %v10888_v54  ;;  %v2066_v15 = vsel %vm2065_vm14, %v9570_v44, %v2062_v10 }
 0x27a   :  { %v2053_v61 = vadd.f32 %v2045_v38, %v13653_v53  ;;  %v2071_v13 = vsel %vm2068_vm15, %v2070_v19, %v2066_v15  ;;  %v2101_v19 = vadd.f32 %v11017_v58, %v2100_v21  ;;  %v2109_v15 = vor.u32 1.1754944e-38, %v2108_v45 }
 0x27b   :  { %v8298_v14 = vmul.f32 -1.442695, %v2051_v11  ;;  %v2116_v63 = vmul.f32 %v9572_v37, %v2071_v13  ;;  %vm2107_vm6 = vcmp.eq.f32.partialorder %v2106_v0, 8.507059e+37 }
 0x27c   :  { %v8299_v41 = vmul.f32 -1.442695, %v2053_v61  ;;  %v1995_v57 = vpop.f32.mrf.mxu3  ;;  %v2105_v38 = vsel %vm2104_vm5, %v11017_v58, %v2101_v19 }
 0x27d   :  { %9573 = vpow2.f32 %v8298_v14  ;;  %v2042_v25 = vrot.slane %v1995_v57, 4  ;;  %v2021_v49 = vpop.f32.mrf.mxu2  ;;  %v11032_v39 = vadd.f32 %v2116_v63, %v2115_v5  ;;  %v2110_v13 = vsel %vm2107_vm6, %v2109_v15, %v2105_v38 }
 0x27e   :  { %9575 = vpow2.f32 %v8299_v41  ;;  %v2010_v10 = vpop.f32.mrf.mxu1 }
 0x27f   :  { %v2050_v42 = vadd.f32 %v2042_v25, %v10895_v22  ;;  %v2036_v44 = vpop.f32.mrf.mxu0  ;;  %9577 = vtanh.f32 %v11032_v39  ;;  %v2044_v25 = vrot.slane %v2021_v49, 4 }
 0x281   :  { %v8297_v33 = vmul.f32 -1.442695, %v2050_v42 }
 0x283   :  { %v9574_v63 = vpop.eup %9573  ;;  %9579 = vpow2.f32 %v8297_v33  ;;  %v2052_v33 = vadd.f32 %v2044_v25, %v10922_v20 }
 0x284   :  { %v9576_v1 = vpop.eup %9575  ;;  %v2142_v23 = vadd.f32 1.0, %v9574_v63  ;;  %v1997_v26 = vpop.f32.mrf.mxu3 }
 0x285   :  { %v2023_v11 = vpop.f32.mrf.mxu2  ;;  %v9578_v61 = vpop.eup %9577  ;;  %v11042_v37 = vadd.f32 1.0, %v9576_v1 }
 0x286   :  { %9581 = vrcp.f32 %v2142_v23  ;;  %v11044_v14 = vmul.f32 %v9578_v61, %v2110_v13  ;;  %v2154_v0 = vand.u32 2147483648, %v2142_v23  ;;  %vm2148_vm9 = vweird.f32 %v2142_v23 }
 0x287   :  { %9583 = vrcp.f32 %v11042_v37  ;;  %v2152_v26 = vand.u32 2147483647, %v2142_v23  ;;  %vm2168_vm4 = vweird.f32 %v11042_v37 }
 0x288   :  { %v2186_v41 = vpack.c.bf16 %v11044_v14, %v11044_v14  ;;  %v2155_v13 = vor.u32 1.1754944e-38, %v2154_v0  ;;  %v2172_v0 = vand.u32 2147483647, %v11042_v37 }
 0x289   :  { %v9580_v5 = vpop.eup %9579  ;;  %vm2153_vm13 = vcmp.eq.f32.partialorder %v2152_v26, 8.507059e+37 }
 0x28a   :  { %v2123_v62 = vadd.f32 1.0, %v9580_v5  ;;  %v2188_v21 = vrot.slane %v2186_v41, 1  ;;  %vm2173_vm6 = vcmp.eq.f32.partialorder %v2172_v0, 8.507059e+37  ;;  %v13674_v0 = vld [vmem:[#allocation41_spill] sm:$0xff] }
 0x28c   :  { %v9582_v57 = vpop.eup %9581  ;;  %9585 = vrcp.f32 %v2123_v62  ;;  %2198 = vmatmul.bf16.vlgmr.msrb.gmra.mxu3 %v2188_v21  ;;  %2211 = vmatmul.bf16.vlgmr.msra.gmra.mxu1 %v2188_v21  ;;  %v2135_v11 = vand.u32 2147483648, %v2123_v62  ;;  %v2133_v61 = vand.u32 2147483647, %v2123_v62  ;;  %vm2129_vm12 = vweird.f32 %v2123_v62 }
 0x28d   :  { %v2144_v58 = vmul.f32 %v9582_v57, %v2142_v23  ;;  %2224 = vmatmul.bf16.vlgmr.msra.gmra.mxu2 %v2188_v21  ;;  %2237 = vmatmul.bf16.vlgmr.msra.gmra.mxu0 %v2188_v21  ;;  %v11049_v42 = vpop.eup %9583  ;;  %vm2149_vm8 = vweird.f32 %v9582_v57  ;;  %9587 = vtanh.f32 %v2052_v33 }
 0x28e   :  { %2466 = vmatpush.bf16.msrb.mxu3 %v10535_v46  ;;  %2479 = vmatpush.bf16.msra.mxu1 %v10543_v55  ;;  %v2164_v63 = vmul.f32 %v11049_v42, %v11042_v37  ;;  %vm11060_vm10 = vmor %vm2148_vm9, %vm2149_vm8  ;;  %vm2134_vm15 = vcmp.eq.f32.partialorder %v2133_v61, 8.507059e+37  ;;  %vm2169_vm1 = vweird.f32 %v11049_v42  ;;  %v13658_v61 = vld [vmem:[#allocation25_spill] sm:$0xff] }
 0x28f   :  { %v2145_v10 = vsub.f32 1.0, %v2144_v58  ;;  %2492 = vmatpush.bf16.msra.mxu2 %v10524_v17  ;;  %2505 = vmatpush.bf16.msra.mxu0 %v10526_v27  ;;  %v2136_v58 = vor.u32 1.1754944e-38, %v2135_v11  ;;  %vm2170_vm5 = vmor %vm2168_vm4, %vm2169_vm1 }
 0x290   :  { %v2165_v5 = vsub.f32 1.0, %v2164_v63 }
 0x291   :  { %v2146_v44 = vmul.f32 %v9582_v57, %v2145_v10 }
 0x292   :  { %v9586_v19 = vpop.eup %9585  ;;  %2467 = vmatpush.bf16.msrb.mxu3 %v10549_v59  ;;  %2480 = vmatpush.bf16.msra.mxu1 %v10555_v3 }
 0x293   :  { %v2125_v49 = vmul.f32 %v9586_v19, %v2123_v62  ;;  %v2147_v45 = vadd.f32 %v9582_v57, %v2146_v44  ;;  %2493 = vmatpush.bf16.msra.mxu2 %v10529_v31  ;;  %2506 = vmatpush.bf16.msra.mxu0 %v10532_v43  ;;  %vm2130_vm11 = vweird.f32 %v9586_v19  ;;  %v9588_v10 = vpop.eup %9587  ;;  %v2166_v44 = vmul.f32 %v11049_v42, %v2165_v5  ;;  %v13661_v5 = vld [vmem:[#allocation27_spill] sm:$0xff] }
 0x294   :  { %vm2131_vm14 = vmor %vm2129_vm12, %vm2130_vm11 }
 0x295   :  { %v2126_v1 = vsub.f32 1.0, %v2125_v49  ;;  %v2151_v23 = vsel %vm11060_vm10, %v9582_v57, %v2147_v45  ;;  %v2179_v57 = vrot.slane %v10950_v12, 2  ;;  %v2167_v12 = vadd.f32 %v11049_v42, %v2166_v44  ;;  %v13668_v44 = vld [vmem:[#allocation26_spill] sm:$0xff] }
 0x296   :  { %2468 = vmatpush.bf16.msrb.mxu3 %v10561_v8  ;;  %2481 = vmatpush.bf16.msra.mxu1 %v10570_v16  ;;  %v2156_v21 = vsel %vm2153_vm13, %v2155_v13, %v2151_v23  ;;  %v13659_v23 = vld [vmem:[#allocation17_spill] sm:$0xff]  ;;  %v13660_v13 = vld [vmem:[#allocation19_spill] sm:$0xff] }
 0x297   :  { %v2127_v15 = vmul.f32 %v9586_v19, %v2126_v1  ;;  %2494 = vmatpush.bf16.msra.mxu2 %v10537_v47  ;;  %2507 = vmatpush.bf16.msra.mxu0 %v10545_v56  ;;  %v2181_v33 = vmul.f32 %v2179_v57, %v2156_v21  ;;  %v2171_v63 = vsel %vm2170_vm5, %v11049_v42, %v2167_v12  ;;  %v13664_v21 = vld [vmem:[#allocation21_spill] sm:$0xff]  ;;  %v13672_v12 = vld [vmem:[#allocation30_spill] sm:$0xff] }
 0x298   :  { %v13666_v57 = vld [vmem:[#allocation33_spill] sm:$0xff] }
 0x299   :  { %v2128_v41 = vadd.f32 %v9586_v19, %v2127_v15  ;;  %v13657_v15 = vld [vmem:[#allocation22_spill] sm:$0xff] }
 0x29a   :  { %2469 = vmatpush.bf16.msrb.mxu3 %v10576_v7  ;;  %2482 = vmatpush.bf16.msra.mxu1 %v10582_v28 }
 0x29b   :  { %v2132_v25 = vsel %vm2131_vm14, %v9586_v19, %v2128_v41  ;;  %2495 = vmatpush.bf16.msra.mxu2 %v10551_v60  ;;  %2508 = vmatpush.bf16.msra.mxu0 %v10557_v4  ;;  %v2174_v19 = vand.u32 2147483648, %v11042_v37  ;;  %v13662_v41 = vld [vmem:[#allocation29_spill] sm:$0xff] }
 0x29c   :  { %v2137_v62 = vsel %vm2134_vm15, %v2136_v58, %v2132_v25  ;;  %v13663_v58 = vld [vmem:[#allocation20_spill] sm:$0xff]  ;;  %v13665_v25 = vld [vmem:[#allocation31_spill] sm:$0xff] }
 0x29d   :  { %v2182_v49 = vmul.f32 %v9588_v10, %v2137_v62  ;;  %v2175_v1 = vor.u32 1.1754944e-38, %v2174_v19  ;;  %v13667_v10 = vld [vmem:[#allocation23_spill] sm:$0xff] }
 0x29e   :  { %2470 = vmatpush.bf16.msrb.mxu3 %v10588_v35  ;;  %2483 = vmatpush.bf16.msra.mxu1 %v10594_v34  ;;  %v13669_v62 = vld [vmem:[#allocation35_spill] sm:$0xff] }
 0x29f   :  { %v11078_v45 = vadd.f32 %v2182_v49, %v2181_v33  ;;  %2496 = vmatpush.bf16.msra.mxu2 %v10563_v9  ;;  %2509 = vmatpush.bf16.msra.mxu0 %v10572_v18  ;;  %v2176_v38 = vsel %vm2173_vm6, %v2175_v1, %v2171_v63  ;;  %v13670_v33 = vld [vmem:[#allocation37_spill] sm:$0xff]  ;;  %v13671_v49 = vld [vmem:[#allocation28_spill] sm:$0xff]  ;;  %v13673_v19 = vld [vmem:[#allocation39_spill] sm:$0xff] }
 0x2a0   :  { %v13675_v63 = vld [vmem:[#allocation32_spill] sm:$0xff]  ;;  %v13676_v1 = vld [vmem:[#allocation34_spill] sm:$0xff] }
 0x2a1   :  { %9589 = vtanh.f32 %v11078_v45 }
 0x2a2   :  { %2471 = vmatpush.bf16.msrb.mxu3 %v10600_v50  ;;  %2484 = vmatpush.bf16.msra.mxu1 %v10608_v2 }
 0x2a3   :  { %2497 = vmatpush.bf16.msra.mxu2 %v10578_v32  ;;  %2510 = vmatpush.bf16.msra.mxu0 %v10584_v29 }
 0x2a6   :  { %2472 = vmatpush.bf16.msrb.mxu3 %v10614_v6  ;;  %2485 = vmatpush.bf16.msra.mxu1 %v10623_v24 }
 0x2a7   :  { %v9590_v26 = vpop.eup %9589  ;;  %2498 = vmatpush.bf16.msra.mxu2 %v10590_v36  ;;  %2511 = vmatpush.bf16.msra.mxu0 %v10596_v48 }
 0x2a8   :  { %v11095_v37 = vmul.f32 %v9590_v26, %v2176_v38  ;;  %v13677_v26 = vld [vmem:[#allocation43_spill] sm:$0xff]  ;;  %v13678_v38 = vld [vmem:[#allocation45_spill] sm:$0xff] }
 0x2aa   :  { %13656 = vst [vmem:[#allocation24_spill] sm:$0xff] %v11095_v37  ;;  %v2258_v42 = vpack.c.bf16 %v11095_v37, %v11095_v37  ;;  %2473 = vmatpush.bf16.msrb.mxu3 %v10627_v30  ;;  %2486 = vmatpush.bf16.msra.mxu1 %v13612_v40  ;;  %v13681_v37 = vld [vmem:[#allocation47_spill] sm:$0xff] }
 0x2ab   :  { %2499 = vmatpush.bf16.msra.mxu2 %v13613_v51  ;;  %2512 = vmatpush.bf16.msra.mxu0 %v13614_v52 }
 0x2ac   :  { %v2260_v11 = vrot.slane %v2258_v42, 2  ;;  %v13679_v42 = vld [vmem:[#allocation36_spill] sm:$0xff] }
 0x2ae   :  { %2270 = vmatmul.bf16.vlgmr.msra.gmra.mxu3 %v2260_v11  ;;  %2283 = vmatmul.bf16.vlgmr.msrb.gmra.mxu1 %v2260_v11 }
 0x2af   :  { %2296 = vmatmul.bf16.vlgmr.msrb.gmra.mxu2 %v2260_v11  ;;  %2309 = vmatmul.bf16.vlgmr.msrb.gmra.mxu0 %v2260_v11  ;;  %v13680_v11 = vld [vmem:[#allocation38_spill] sm:$0xff] }
 0x2b0   :  { %2538 = vmatpush.bf16.msra.mxu3 %v13657_v15  ;;  %2551 = vmatpush.bf16.msrb.mxu1 %v13658_v61 }
 0x2b1   :  { %2564 = vmatpush.bf16.msrb.mxu2 %v13659_v23  ;;  %2577 = vmatpush.bf16.msrb.mxu0 %v13660_v13 }
 0x2b4   :  { %2539 = vmatpush.bf16.msra.mxu3 %v13661_v5  ;;  %2552 = vmatpush.bf16.msrb.mxu1 %v13662_v41 }
 0x2b5   :  { %2565 = vmatpush.bf16.msrb.mxu2 %v13663_v58  ;;  %2578 = vmatpush.bf16.msrb.mxu0 %v13664_v21 }
 0x2b8   :  { %2540 = vmatpush.bf16.msra.mxu3 %v13665_v25  ;;  %2553 = vmatpush.bf16.msrb.mxu1 %v13666_v57  ;;  %v13691_v25 = vld [vmem:[#allocation53_spill] sm:$0xff] }
 0x2b9   :  { %2566 = vmatpush.bf16.msrb.mxu2 %v13667_v10  ;;  %2579 = vmatpush.bf16.msrb.mxu0 %v13668_v44  ;;  %v13690_v44 = vld [vmem:[#allocation57_spill] sm:$0xff] }
 0x2bc   :  { %2541 = vmatpush.bf16.msra.mxu3 %v13669_v62  ;;  %2554 = vmatpush.bf16.msrb.mxu1 %v13670_v33  ;;  %v13689_v62 = vld [vmem:[#allocation67_spill] sm:$0xff] }
 0x2bd   :  { %2567 = vmatpush.bf16.msrb.mxu2 %v13671_v49  ;;  %2580 = vmatpush.bf16.msrb.mxu0 %v13672_v12  ;;  %v13682_v49 = vld [vmem:[#allocation48_spill] sm:$0xff] }
 0x2be   :  { %v13683_v12 = vld [vmem:[#allocation40_spill] sm:$0xff] }
 0x2c0   :  { %2542 = vmatpush.bf16.msra.mxu3 %v13673_v19  ;;  %2555 = vmatpush.bf16.msrb.mxu1 %v13674_v0  ;;  %v13684_v19 = vld [vmem:[#allocation42_spill] sm:$0xff]  ;;  %v13685_v0 = vld [vmem:[#allocation49_spill] sm:$0xff] }
 0x2c1   :  { %2568 = vmatpush.bf16.msrb.mxu2 %v13675_v63  ;;  %2581 = vmatpush.bf16.msrb.mxu0 %v13676_v1  ;;  %v13686_v63 = vld [vmem:[#allocation50_spill] sm:$0xff]  ;;  %v13687_v1 = vld [vmem:[#allocation44_spill] sm:$0xff] }
 0x2c4   :  { %2543 = vmatpush.bf16.msra.mxu3 %v13677_v26  ;;  %2556 = vmatpush.bf16.msrb.mxu1 %v13678_v38  ;;  %v13688_v26 = vld [vmem:[#allocation46_spill] sm:$0xff] }
 0x2c5   :  { %2569 = vmatpush.bf16.msrb.mxu2 %v13679_v42  ;;  %2582 = vmatpush.bf16.msrb.mxu0 %v13680_v11 }
 0x2c8   :  { %2544 = vmatpush.bf16.msra.mxu3 %v13681_v37  ;;  %2557 = vmatpush.bf16.msrb.mxu1 %v13682_v49 }
 0x2c9   :  { %2570 = vmatpush.bf16.msrb.mxu2 %v13683_v12  ;;  %2583 = vmatpush.bf16.msrb.mxu0 %v13684_v19 }
 0x2cc   :  { %2545 = vmatpush.bf16.msra.mxu3 %v13685_v0  ;;  %2558 = vmatpush.bf16.msrb.mxu1 %v13686_v63 }
 0x2cd   :  { %2571 = vmatpush.bf16.msrb.mxu2 %v13687_v1  ;;  %2584 = vmatpush.bf16.msrb.mxu0 %v13688_v26 }
 0x309   :  { %v2212_v38 = vpop.f32.mrf.mxu1 }
 0x30a   :  { %v2247_v42 = vrot.slane %v2212_v38, 4  ;;  %v2238_v33 = vpop.f32.mrf.mxu0 }
 0x30b   :  { %v2249_v11 = vrot.slane %v2238_v33, 4 }
 0x30c   :  { %v2255_v37 = vadd.f32 %v2247_v42, %v13689_v62 }
 0x30d   :  { %v2257_v49 = vadd.f32 %v2249_v11, %v13690_v44 }
 0x30e   :  { %v8301_v10 = vmul.f32 -1.442695, %v2255_v37 }
 0x30f   :  { %v8302_v12 = vmul.f32 -1.442695, %v2257_v49  ;;  %v2199_v57 = vpop.f32.mrf.mxu3 }
 0x310   :  { %9591 = vpow2.f32 %v8301_v10  ;;  %v2246_v19 = vrot.slane %v2199_v57, 4  ;;  %v2225_v0 = vpop.f32.mrf.mxu2 }
 0x311   :  { %9593 = vpow2.f32 %v8302_v12  ;;  %v2214_v63 = vpop.f32.mrf.mxu1  ;;  %v2248_v12 = vrot.slane %v2225_v0, 4 }
 0x312   :  { %v2254_v1 = vadd.f32 %v2246_v19, %v13691_v25  ;;  %v2240_v21 = vpop.f32.mrf.mxu0 }
 0x314   :  { %v8300_v26 = vmul.f32 -1.442695, %v2254_v1 }
 0x316   :  { %v9592_v58 = vpop.eup %9591  ;;  %9595 = vpow2.f32 %v8300_v26  ;;  %v13692_v26 = vld [vmem:[#allocation60_spill] sm:$0xff] }
 0x317   :  { %v9594_v38 = vpop.eup %9593  ;;  %v2352_v33 = vadd.f32 1.0, %v9592_v58  ;;  %v2201_v41 = vpop.f32.mrf.mxu3  ;;  %v2256_v58 = vadd.f32 %v2248_v12, %v13692_v26 }
 0x318   :  { %v2227_v42 = vpop.f32.mrf.mxu2  ;;  %v11142_v11 = vadd.f32 1.0, %v9594_v38 }
 0x319   :  { %9597 = vrcp.f32 %v2352_v33  ;;  %v2364_v38 = vand.u32 2147483648, %v2352_v33  ;;  %vm2358_vm9 = vweird.f32 %v2352_v33  ;;  %v2362_v44 = vand.u32 2147483647, %v2352_v33 }
 0x31a   :  { %9599 = vrcp.f32 %v11142_v11  ;;  %vm2378_vm4 = vweird.f32 %v11142_v11 }
 0x31b   :  { %v2365_v23 = vor.u32 1.1754944e-38, %v2364_v38  ;;  %vm2363_vm13 = vcmp.eq.f32.partialorder %v2362_v44, 8.507059e+37 }
 0x31c   :  { %v9596_v37 = vpop.eup %9595 }
 0x31d   :  { %v2333_v49 = vadd.f32 1.0, %v9596_v37 }
 0x31f   :  { %v9598_v57 = vpop.eup %9597  ;;  %9601 = vrcp.f32 %v2333_v49  ;;  %vm2339_vm12 = vweird.f32 %v2333_v49 }
 0x320   :  { %v2354_v10 = vmul.f32 %v9598_v57, %v2352_v33  ;;  %v11145_v21 = vpop.eup %9599  ;;  %vm2359_vm8 = vweird.f32 %v9598_v57  ;;  %9603 = vtanh.f32 %v2256_v58 }
 0x321   :  { %v2374_v37 = vmul.f32 %v11145_v21, %v11142_v11  ;;  %vm11150_vm10 = vmor %vm2358_vm9, %vm2359_vm8  ;;  %vm2379_vm1 = vweird.f32 %v11145_v21 }
 0x322   :  { %v2355_v19 = vsub.f32 1.0, %v2354_v10  ;;  %v2343_v10 = vand.u32 2147483647, %v2333_v49  ;;  %vm2380_vm5 = vmor %vm2378_vm4, %vm2379_vm1 }
 0x323   :  { %v2375_v61 = vsub.f32 1.0, %v2374_v37 }
 0x324   :  { %v2356_v63 = vmul.f32 %v9598_v57, %v2355_v19  ;;  %v2345_v19 = vand.u32 2147483648, %v2333_v49  ;;  %vm2344_vm15 = vcmp.eq.f32.partialorder %v2343_v10, 8.507059e+37 }
 0x325   :  { %v9602_v1 = vpop.eup %9601  ;;  %v2376_v38 = vmul.f32 %v11145_v21, %v2375_v61  ;;  %v2384_v61 = vand.u32 2147483648, %v11142_v11 }
 0x326   :  { %v2335_v41 = vmul.f32 %v9602_v1, %v2333_v49  ;;  %v2357_v42 = vadd.f32 %v9598_v57, %v2356_v63  ;;  %vm2340_vm11 = vweird.f32 %v9602_v1  ;;  %v2346_v52 = vor.u32 1.1754944e-38, %v2345_v19 }
 0x327   :  { %vm2341_vm14 = vmor %vm2339_vm12, %vm2340_vm11 }
 0x328   :  { %v2336_v25 = vsub.f32 1.0, %v2335_v41  ;;  %v2361_v63 = vsel %vm11150_vm10, %v9598_v57, %v2357_v42  ;;  %v9604_v42 = vpop.eup %9603 }
 0x329   :  { %v2366_v58 = vsel %vm2363_vm13, %v2365_v23, %v2361_v63 }
 0x32a   :  { %v2337_v26 = vmul.f32 %v9602_v1, %v2336_v25  ;;  %v2389_v25 = vrot.slane %v11032_v39, 6 }
 0x32b   :  { %v2284_v62 = vpop.f32.mrf.mxu1 }
 0x32c   :  { %v2319_v5 = vrot.slane %v2284_v62, 6  ;;  %v2310_v12 = vpop.f32.mrf.mxu0  ;;  %v2338_v41 = vadd.f32 %v9602_v1, %v2337_v26  ;;  %v2391_v44 = vmul.f32 %v2389_v25, %v2366_v58  ;;  %v2385_v58 = vor.u32 1.1754944e-38, %v2384_v61 }
 0x32d   :  { %v2321_v13 = vrot.slane %v2310_v12, 6 }
 0x32e   :  { %v2327_v33 = vadd.f32 %v2319_v5, %v10888_v54  ;;  %v2342_v51 = vsel %vm2341_vm14, %v9602_v1, %v2338_v41 }
 0x32f   :  { %v2329_v15 = vadd.f32 %v2321_v13, %v13653_v53  ;;  %v2347_v37 = vsel %vm2344_vm15, %v2346_v52, %v2342_v51  ;;  %v2382_v52 = vand.u32 2147483647, %v11142_v11 }
 0x330   :  { %v8304_v62 = vmul.f32 -1.442695, %v2327_v33  ;;  %v2392_v26 = vmul.f32 %v9604_v42, %v2347_v37 }
 0x331   :  { %v8305_v0 = vmul.f32 -1.442695, %v2329_v15  ;;  %v2271_v57 = vpop.f32.mrf.mxu3  ;;  %v2377_v15 = vadd.f32 %v11145_v21, %v2376_v38  ;;  %vm2383_vm6 = vcmp.eq.f32.partialorder %v2382_v52, 8.507059e+37  ;;  %v13695_v38 = vld [vmem:[#allocation69_spill] sm:$0xff] }
 0x332   :  { %9605 = vpow2.f32 %v8304_v62  ;;  %v2318_v5 = vrot.slane %v2271_v57, 6  ;;  %v2297_v49 = vpop.f32.mrf.mxu2  ;;  %v11161_v12 = vadd.f32 %v2392_v26, %v2391_v44  ;;  %v3800_v11 = vsel %vm341_vm3, %v13695_v38, %v11044_v14 }
 0x333   :  { %9607 = vpow2.f32 %v8305_v0  ;;  %v2286_v13 = vpop.f32.mrf.mxu1  ;;  %v2381_v41 = vsel %vm2380_vm5, %v11145_v21, %v2377_v15 }
 0x334   :  { %v2326_v23 = vadd.f32 %v2318_v5, %v10895_v22  ;;  %v2312_v19 = vpop.f32.mrf.mxu0  ;;  %9609 = vtanh.f32 %v11161_v12  ;;  %v2386_v0 = vsel %vm2383_vm6, %v2385_v58, %v2381_v41  ;;  %v13699_v41 = vld [vmem:[#allocation16_spill] sm:$0xff] }
 0x336   :  { %v8303_v39 = vmul.f32 -1.442695, %v2326_v23  ;;  %v2320_v23 = vrot.slane %v2297_v49, 6 }
 0x338   :  { %v9606_v51 = vpop.eup %9605  ;;  %9611 = vpow2.f32 %v8303_v39  ;;  %v2328_v61 = vadd.f32 %v2320_v23, %v10922_v20 }
 0x339   :  { %v9608_v1 = vpop.eup %9607  ;;  %v2418_v10 = vadd.f32 1.0, %v9606_v51  ;;  %v2273_v63 = vpop.f32.mrf.mxu3 }
 0x33a   :  { %v2299_v33 = vpop.f32.mrf.mxu2  ;;  %v11170_v62 = vadd.f32 1.0, %v9608_v1  ;;  %v9610_v25 = vpop.eup %9609 }
 0x33b   :  { %9613 = vrcp.f32 %v2418_v10  ;;  %v2395_v42 = vmul.f32 %v9610_v25, %v2386_v0  ;;  %v2430_v52 = vand.u32 2147483648, %v2418_v10  ;;  %vm2424_vm9 = vweird.f32 %v2418_v10 }
 0x33c   :  { %9615 = vrcp.f32 %v11170_v62  ;;  %v2428_v33 = vand.u32 2147483647, %v2418_v10  ;;  %vm2444_vm4 = vweird.f32 %v11170_v62 }
 0x33d   :  { %v2462_v5 = vpack.c.bf16 %v2395_v42, %v2395_v42  ;;  %v11177_v44 = vsel %vm272_vm2, %v3800_v11, %v2395_v42 }
 0x33e   :  { %v9612_v57 = vpop.eup %9611  ;;  %vm2429_vm13 = vcmp.eq.f32.partialorder %v2428_v33, 8.507059e+37 }
 0x33f   :  { %v2399_v37 = vadd.f32 1.0, %v9612_v57  ;;  %v2464_v13 = vrot.slane %v2462_v5, 2  ;;  %v2431_v57 = vor.u32 1.1754944e-38, %v2430_v52 }
 0x341   :  { %v9614_v21 = vpop.eup %9613  ;;  %9617 = vrcp.f32 %v2399_v37  ;;  %2474 = vmatmul.bf16.vlgmr.msrb.gmra.mxu3 %v2464_v13  ;;  %2487 = vmatmul.bf16.vlgmr.msra.gmra.mxu1 %v2464_v13  ;;  %v2411_v58 = vand.u32 2147483648, %v2399_v37  ;;  %v2409_v0 = vand.u32 2147483647, %v2399_v37  ;;  %vm2405_vm12 = vweird.f32 %v2399_v37 }
 0x342   :  { %v2420_v26 = vmul.f32 %v9614_v21, %v2418_v10  ;;  %2500 = vmatmul.bf16.vlgmr.msra.gmra.mxu2 %v2464_v13  ;;  %2513 = vmatmul.bf16.vlgmr.msra.gmra.mxu0 %v2464_v13  ;;  %v11179_v39 = vpop.eup %9615  ;;  %vm2425_vm8 = vweird.f32 %v9614_v21  ;;  %9619 = vtanh.f32 %v2328_v61 }
 0x343   :  { %2730 = vmatpush.bf16.msrb.mxu3 %v10535_v46  ;;  %2743 = vmatpush.bf16.msra.mxu1 %v10543_v55  ;;  %v2440_v1 = vmul.f32 %v11179_v39, %v11170_v62  ;;  %vm11190_vm10 = vmor %vm2424_vm9, %vm2425_vm8  ;;  %v2412_v11 = vor.u32 1.1754944e-38, %v2411_v58  ;;  %vm2410_vm15 = vcmp.eq.f32.partialorder %v2409_v0, 8.507059e+37  ;;  %vm2445_vm1 = vweird.f32 %v11179_v39  ;;  %v13700_v58 = vld [vmem:[#allocation18_spill] sm:$0xff]  ;;  %v13702_v0 = vld [vmem:[#allocation25_spill] sm:$0xff] }
 0x344   :  { %v2421_v19 = vsub.f32 1.0, %v2420_v26  ;;  %2756 = vmatpush.bf16.msra.mxu2 %v10524_v17  ;;  %2769 = vmatpush.bf16.msra.mxu0 %v10526_v27  ;;  %v2455_v26 = vrot.slane %v11078_v45, 2  ;;  %vm2446_vm5 = vmor %vm2444_vm4, %vm2445_vm1 }
 0x345   :  { %v2441_v42 = vsub.f32 1.0, %v2440_v1 }
 0x346   :  { %v2422_v14 = vmul.f32 %v9614_v21, %v2421_v19 }
 0x347   :  { %v9618_v15 = vpop.eup %9617  ;;  %2731 = vmatpush.bf16.msrb.mxu3 %v10549_v59  ;;  %2744 = vmatpush.bf16.msra.mxu1 %v10555_v3  ;;  %v2442_v23 = vmul.f32 %v11179_v39, %v2441_v42  ;;  %v13705_v42 = vld [vmem:[#allocation27_spill] sm:$0xff] }
 0x348   :  { %v2401_v49 = vmul.f32 %v9618_v15, %v2399_v37  ;;  %v2423_v51 = vadd.f32 %v9614_v21, %v2422_v14  ;;  %2757 = vmatpush.bf16.msra.mxu2 %v10529_v31  ;;  %2770 = vmatpush.bf16.msra.mxu0 %v10532_v43  ;;  %vm2406_vm11 = vweird.f32 %v9618_v15 }
 0x349   :  { %vm2407_vm14 = vmor %vm2405_vm12, %vm2406_vm11  ;;  %v2443_v45 = vadd.f32 %v11179_v39, %v2442_v23  ;;  %v13712_v23 = vld [vmem:[#allocation26_spill] sm:$0xff] }
 0x34a   :  { %v2402_v63 = vsub.f32 1.0, %v2401_v49  ;;  %v2427_v10 = vsel %vm11190_vm10, %v9614_v21, %v2423_v51  ;;  %v9620_v21 = vpop.eup %9619  ;;  %v2448_v49 = vand.u32 2147483647, %v11170_v62 }
 0x34b   :  { %2732 = vmatpush.bf16.msrb.mxu3 %v10561_v8  ;;  %2745 = vmatpush.bf16.msra.mxu1 %v10570_v16  ;;  %v2432_v5 = vsel %vm2429_vm13, %v2431_v57, %v2427_v10  ;;  %v2447_v51 = vsel %vm2446_vm5, %v11179_v39, %v2443_v45  ;;  %v13703_v10 = vld [vmem:[#allocation17_spill] sm:$0xff]  ;;  %v13704_v57 = vld [vmem:[#allocation19_spill] sm:$0xff]  ;;  %v13716_v45 = vld [vmem:[#allocation30_spill] sm:$0xff] }
 0x34c   :  { %v2403_v25 = vmul.f32 %v9618_v15, %v2402_v63  ;;  %2758 = vmatpush.bf16.msra.mxu2 %v10537_v47  ;;  %2771 = vmatpush.bf16.msra.mxu0 %v10545_v56  ;;  %v2457_v19 = vmul.f32 %v2455_v26, %v2432_v5  ;;  %vm2449_vm6 = vcmp.eq.f32.partialorder %v2448_v49, 8.507059e+37  ;;  %v13708_v5 = vld [vmem:[#allocation21_spill] sm:$0xff]  ;;  %v13709_v26 = vld [vmem:[#allocation31_spill] sm:$0xff] }
 0x34d   :  { %v13718_v49 = vld [vmem:[#allocation41_spill] sm:$0xff] }
 0x34e   :  { %v2404_v38 = vadd.f32 %v9618_v15, %v2403_v25  ;;  %v13701_v25 = vld [vmem:[#allocation22_spill] sm:$0xff] }
 0x34f   :  { %2733 = vmatpush.bf16.msrb.mxu3 %v10576_v7  ;;  %2746 = vmatpush.bf16.msra.mxu1 %v10582_v28 }
 0x350   :  { %v2408_v13 = vsel %vm2407_vm14, %v9618_v15, %v2404_v38  ;;  %2759 = vmatpush.bf16.msra.mxu2 %v10551_v60  ;;  %2772 = vmatpush.bf16.msra.mxu0 %v10557_v4  ;;  %v2450_v15 = vand.u32 2147483648, %v11170_v62  ;;  %v13706_v38 = vld [vmem:[#allocation29_spill] sm:$0xff] }
 0x351   :  { %v2413_v37 = vsel %vm2410_vm15, %v2412_v11, %v2408_v13  ;;  %v13707_v11 = vld [vmem:[#allocation20_spill] sm:$0xff]  ;;  %v13710_v13 = vld [vmem:[#allocation33_spill] sm:$0xff] }
 0x352   :  { %v2458_v14 = vmul.f32 %v9620_v21, %v2413_v37  ;;  %v2451_v52 = vor.u32 1.1754944e-38, %v2450_v15  ;;  %v13711_v21 = vld [vmem:[#allocation23_spill] sm:$0xff] }
 0x353   :  { %2734 = vmatpush.bf16.msrb.mxu3 %v10588_v35  ;;  %2747 = vmatpush.bf16.msra.mxu1 %v10594_v34  ;;  %v13713_v37 = vld [vmem:[#allocation35_spill] sm:$0xff] }
 0x354   :  { %v11208_v61 = vadd.f32 %v2458_v14, %v2457_v19  ;;  %2760 = vmatpush.bf16.msra.mxu2 %v10563_v9  ;;  %2773 = vmatpush.bf16.msra.mxu0 %v10572_v18  ;;  %v2452_v63 = vsel %vm2449_vm6, %v2451_v52, %v2447_v51  ;;  %v13714_v19 = vld [vmem:[#allocation37_spill] sm:$0xff]  ;;  %v13715_v14 = vld [vmem:[#allocation28_spill] sm:$0xff]  ;;  %v13717_v15 = vld [vmem:[#allocation39_spill] sm:$0xff] }
 0x355   :  { %v13719_v51 = vld [vmem:[#allocation32_spill] sm:$0xff]  ;;  %v13720_v52 = vld [vmem:[#allocation34_spill] sm:$0xff] }
 0x356   :  { %9621 = vtanh.f32 %v11208_v61 }
 0x357   :  { %2735 = vmatpush.bf16.msrb.mxu3 %v10600_v50  ;;  %2748 = vmatpush.bf16.msra.mxu1 %v10608_v2 }
 0x358   :  { %2761 = vmatpush.bf16.msra.mxu2 %v10578_v32  ;;  %2774 = vmatpush.bf16.msra.mxu0 %v10584_v29 }
 0x35b   :  { %2736 = vmatpush.bf16.msrb.mxu3 %v10614_v6  ;;  %2749 = vmatpush.bf16.msra.mxu1 %v10623_v24 }
 0x35c   :  { %v9622_v1 = vpop.eup %9621  ;;  %2762 = vmatpush.bf16.msra.mxu2 %v10590_v36  ;;  %2775 = vmatpush.bf16.msra.mxu0 %v10596_v48 }
 0x35d   :  { %v11225_v62 = vmul.f32 %v9622_v1, %v2452_v63  ;;  %v13721_v1 = vld [vmem:[#allocation43_spill] sm:$0xff]  ;;  %v13722_v63 = vld [vmem:[#allocation45_spill] sm:$0xff] }
 0x35f   :  { %13698 = vst [vmem:[#allocation68_spill] sm:$0xff] %v11225_v62  ;;  %v2534_v39 = vpack.c.bf16 %v11225_v62, %v11225_v62  ;;  %2737 = vmatpush.bf16.msrb.mxu3 %v10627_v30  ;;  %2750 = vmatpush.bf16.msra.mxu1 %v13612_v40  ;;  %v13725_v62 = vld [vmem:[#allocation47_spill] sm:$0xff] }
 0x360   :  { %2763 = vmatpush.bf16.msra.mxu2 %v13699_v41  ;;  %2776 = vmatpush.bf16.msra.mxu0 %v13700_v58 }
 0x361   :  { %v2536_v33 = vrot.slane %v2534_v39, 1  ;;  %v13723_v39 = vld [vmem:[#allocation36_spill] sm:$0xff] }
 0x363   :  { %2546 = vmatmul.bf16.vlgmr.msra.gmra.mxu3 %v2536_v33  ;;  %2559 = vmatmul.bf16.vlgmr.msrb.gmra.mxu1 %v2536_v33 }
 0x364   :  { %2572 = vmatmul.bf16.vlgmr.msrb.gmra.mxu2 %v2536_v33  ;;  %2585 = vmatmul.bf16.vlgmr.msrb.gmra.mxu0 %v2536_v33  ;;  %v13724_v33 = vld [vmem:[#allocation38_spill] sm:$0xff] }
 0x365   :  { %2787 = vmatpush.bf16.msra.mxu3 %v13701_v25  ;;  %2800 = vmatpush.bf16.msrb.mxu1 %v13702_v0 }
 0x366   :  { %2813 = vmatpush.bf16.msrb.mxu2 %v13703_v10  ;;  %2826 = vmatpush.bf16.msrb.mxu0 %v13704_v57 }
 0x369   :  { %2788 = vmatpush.bf16.msra.mxu3 %v13705_v42  ;;  %2801 = vmatpush.bf16.msrb.mxu1 %v13706_v38 }
 0x36a   :  { %2814 = vmatpush.bf16.msrb.mxu2 %v13707_v11  ;;  %2827 = vmatpush.bf16.msrb.mxu0 %v13708_v5 }
 0x36d   :  { %2789 = vmatpush.bf16.msra.mxu3 %v13709_v26  ;;  %2802 = vmatpush.bf16.msrb.mxu1 %v13710_v13  ;;  %v13735_v26 = vld [vmem:[#allocation53_spill] sm:$0xff] }
 0x36e   :  { %2815 = vmatpush.bf16.msrb.mxu2 %v13711_v21  ;;  %2828 = vmatpush.bf16.msrb.mxu0 %v13712_v23  ;;  %v13734_v23 = vld [vmem:[#allocation57_spill] sm:$0xff] }
 0x371   :  { %2790 = vmatpush.bf16.msra.mxu3 %v13713_v37  ;;  %2803 = vmatpush.bf16.msrb.mxu1 %v13714_v19  ;;  %v13733_v37 = vld [vmem:[#allocation67_spill] sm:$0xff] }
 0x372   :  { %2816 = vmatpush.bf16.msrb.mxu2 %v13715_v14  ;;  %2829 = vmatpush.bf16.msrb.mxu0 %v13716_v45  ;;  %v13726_v14 = vld [vmem:[#allocation48_spill] sm:$0xff] }
 0x373   :  { %v13727_v45 = vld [vmem:[#allocation40_spill] sm:$0xff] }
 0x375   :  { %2791 = vmatpush.bf16.msra.mxu3 %v13717_v15  ;;  %2804 = vmatpush.bf16.msrb.mxu1 %v13718_v49  ;;  %v13728_v15 = vld [vmem:[#allocation42_spill] sm:$0xff]  ;;  %v13729_v49 = vld [vmem:[#allocation49_spill] sm:$0xff] }
 0x376   :  { %2817 = vmatpush.bf16.msrb.mxu2 %v13719_v51  ;;  %2830 = vmatpush.bf16.msrb.mxu0 %v13720_v52  ;;  %v13730_v51 = vld [vmem:[#allocation50_spill] sm:$0xff]  ;;  %v13731_v52 = vld [vmem:[#allocation44_spill] sm:$0xff] }
 0x379   :  { %2792 = vmatpush.bf16.msra.mxu3 %v13721_v1  ;;  %2805 = vmatpush.bf16.msrb.mxu1 %v13722_v63  ;;  %v13732_v1 = vld [vmem:[#allocation46_spill] sm:$0xff] }
 0x37a   :  { %2818 = vmatpush.bf16.msrb.mxu2 %v13723_v39  ;;  %2831 = vmatpush.bf16.msrb.mxu0 %v13724_v33 }
 0x37d   :  { %2793 = vmatpush.bf16.msra.mxu3 %v13725_v62  ;;  %2806 = vmatpush.bf16.msrb.mxu1 %v13726_v14 }
 0x37e   :  { %2819 = vmatpush.bf16.msrb.mxu2 %v13727_v45  ;;  %2832 = vmatpush.bf16.msrb.mxu0 %v13728_v15 }
 0x381   :  { %2794 = vmatpush.bf16.msra.mxu3 %v13729_v49  ;;  %2807 = vmatpush.bf16.msrb.mxu1 %v13730_v51 }
 0x382   :  { %2820 = vmatpush.bf16.msrb.mxu2 %v13731_v52  ;;  %2833 = vmatpush.bf16.msrb.mxu0 %v13732_v1 }
 0x3be   :  { %v2488_v63 = vpop.f32.mrf.mxu1 }
 0x3bf   :  { %v2523_v39 = vrot.slane %v2488_v63, 2  ;;  %v2514_v19 = vpop.f32.mrf.mxu0 }
 0x3c0   :  { %v2525_v33 = vrot.slane %v2514_v19, 2 }
 0x3c1   :  { %v2531_v62 = vadd.f32 %v2523_v39, %v13733_v37 }
 0x3c2   :  { %v2533_v14 = vadd.f32 %v2525_v33, %v13734_v23 }
 0x3c3   :  { %v8307_v21 = vmul.f32 -1.442695, %v2531_v62 }
 0x3c4   :  { %v8308_v45 = vmul.f32 -1.442695, %v2533_v14  ;;  %v2475_v13 = vpop.f32.mrf.mxu3 }
 0x3c5   :  { %9623 = vpow2.f32 %v8307_v21  ;;  %v2522_v15 = vrot.slane %v2475_v13, 2  ;;  %v2501_v49 = vpop.f32.mrf.mxu2 }
 0x3c6   :  { %9625 = vpow2.f32 %v8308_v45  ;;  %v2490_v51 = vpop.f32.mrf.mxu1  ;;  %v2524_v45 = vrot.slane %v2501_v49, 2 }
 0x3c7   :  { %v2530_v52 = vadd.f32 %v2522_v15, %v13735_v26  ;;  %v2516_v5 = vpop.f32.mrf.mxu0 }
 0x3c9   :  { %v8306_v1 = vmul.f32 -1.442695, %v2530_v52  ;;  %v13736_v52 = vld [vmem:[#allocation60_spill] sm:$0xff] }
 0x3cb   :  { %v9624_v11 = vpop.eup %9623  ;;  %9627 = vpow2.f32 %v8306_v1 }
 0x3cc   :  { %v9626_v63 = vpop.eup %9625  ;;  %v2616_v19 = vadd.f32 1.0, %v9624_v11  ;;  %v2477_v38 = vpop.f32.mrf.mxu3  ;;  %v2532_v11 = vadd.f32 %v2524_v45, %v13736_v52 }
 0x3cd   :  { %v2503_v37 = vpop.f32.mrf.mxu2  ;;  %v11272_v23 = vadd.f32 1.0, %v9626_v63 }
 0x3ce   :  { %9629 = vrcp.f32 %v2616_v19  ;;  %v2628_v39 = vand.u32 2147483648, %v2616_v19  ;;  %vm2622_vm9 = vweird.f32 %v2616_v19  ;;  %v2626_v37 = vand.u32 2147483647, %v2616_v19 }
 0x3cf   :  { %9631 = vrcp.f32 %v11272_v23  ;;  %vm2642_vm4 = vweird.f32 %v11272_v23 }
 0x3d0   :  { %vm2627_vm13 = vcmp.eq.f32.partialorder %v2626_v37, 8.507059e+37 }
 0x3d1   :  { %v9628_v62 = vpop.eup %9627 }
 0x3d2   :  { %v2597_v14 = vadd.f32 1.0, %v9628_v62 }
 0x3d4   :  { %v9630_v13 = vpop.eup %9629  ;;  %9633 = vrcp.f32 %v2597_v14  ;;  %vm2603_vm12 = vweird.f32 %v2597_v14 }
 0x3d5   :  { %v2618_v21 = vmul.f32 %v9630_v13, %v2616_v19  ;;  %v11275_v5 = vpop.eup %9631  ;;  %vm2623_vm8 = vweird.f32 %v9630_v13  ;;  %9635 = vtanh.f32 %v2532_v11 }
 0x3d6   :  { %v2638_v33 = vmul.f32 %v11275_v5, %v11272_v23  ;;  %vm11280_vm10 = vmor %vm2622_vm9, %vm2623_vm8  ;;  %vm2643_vm1 = vweird.f32 %v11275_v5 }
 0x3d7   :  { %v2619_v26 = vsub.f32 1.0, %v2618_v21  ;;  %v2607_v21 = vand.u32 2147483647, %v2597_v14  ;;  %vm2644_vm5 = vmor %vm2642_vm4, %vm2643_vm1 }
 0x3d8   :  { %v2639_v19 = vsub.f32 1.0, %v2638_v33 }
 0x3d9   :  { %v2620_v15 = vmul.f32 %v9630_v13, %v2619_v26  ;;  %v2609_v26 = vand.u32 2147483648, %v2597_v14  ;;  %vm2608_vm15 = vcmp.eq.f32.partialorder %v2607_v21, 8.507059e+37 }
 0x3da   :  { %v9634_v51 = vpop.eup %9633 }
 0x3db   :  { %v2599_v38 = vmul.f32 %v9634_v51, %v2597_v14  ;;  %v2621_v1 = vadd.f32 %v9630_v13, %v2620_v15  ;;  %vm2604_vm11 = vweird.f32 %v9634_v51  ;;  %v2610_v0 = vor.u32 1.1754944e-38, %v2609_v26 }
 0x3dc   :  { %vm2605_vm14 = vmor %vm2603_vm12, %vm2604_vm11 }
 0x3dd   :  { %v2600_v63 = vsub.f32 1.0, %v2599_v38  ;;  %v2625_v15 = vsel %vm11280_vm10, %v9630_v13, %v2621_v1  ;;  %v2629_v38 = vor.u32 1.1754944e-38, %v2628_v39  ;;  %v9636_v13 = vpop.eup %9635 }
 0x3df   :  { %v2601_v42 = vmul.f32 %v9634_v51, %v2600_v63  ;;  %v2630_v11 = vsel %vm2627_vm13, %v2629_v38, %v2625_v15 }
 0x3e0   :  { %v2560_v62 = vpop.f32.mrf.mxu1 }
 0x3e1   :  { %v2591_v45 = vadd.f32 %v2560_v62, %v10888_v54  ;;  %v2586_v52 = vpop.f32.mrf.mxu0  ;;  %v2602_v58 = vadd.f32 %v9634_v51, %v2601_v42  ;;  %v2653_v54 = vrot.slane %v11161_v12, 6 }
 0x3e2   :  { %v2593_v57 = vadd.f32 %v2586_v52, %v13653_v53  ;;  %v2640_v53 = vmul.f32 %v11275_v5, %v2639_v19 }
 0x3e3   :  { %v8310_v10 = vmul.f32 -1.442695, %v2591_v45  ;;  %v2606_v63 = vsel %vm2605_vm14, %v9634_v51, %v2602_v58  ;;  %v2655_v14 = vmul.f32 %v2653_v54, %v2630_v11  ;;  %v2648_v58 = vand.u32 2147483648, %v11272_v23 }
 0x3e4   :  { %v8311_v41 = vmul.f32 -1.442695, %v2593_v57  ;;  %v2611_v1 = vsel %vm2608_vm15, %v2610_v0, %v2606_v63  ;;  %v2641_v12 = vadd.f32 %v11275_v5, %v2640_v53  ;;  %v2646_v0 = vand.u32 2147483647, %v11272_v23 }
 0x3e5   :  { %9637 = vpow2.f32 %v8310_v10  ;;  %v2656_v33 = vmul.f32 %v9636_v13, %v2611_v1  ;;  %v2649_v15 = vor.u32 1.1754944e-38, %v2648_v58 }
 0x3e6   :  { %9639 = vpow2.f32 %v8311_v41  ;;  %v2547_v62 = vpop.f32.mrf.mxu3  ;;  %v2645_v52 = vsel %vm2644_vm5, %v11275_v5, %v2641_v12  ;;  %vm2647_vm6 = vcmp.eq.f32.partialorder %v2646_v0, 8.507059e+37 }
 0x3e7   :  { %v2590_v39 = vadd.f32 %v2547_v62, %v10895_v22  ;;  %v2573_v42 = vpop.f32.mrf.mxu2  ;;  %v11291_v26 = vadd.f32 %v2656_v33, %v2655_v14  ;;  %v2650_v54 = vsel %vm2647_vm6, %v2649_v15, %v2645_v52 }
 0x3e8   :  { %v2562_v57 = vpop.f32.mrf.mxu1 }
 0x3e9   :  { %v8309_v37 = vmul.f32 -1.442695, %v2590_v39  ;;  %v2588_v49 = vpop.f32.mrf.mxu0  ;;  %v2592_v57 = vadd.f32 %v2573_v42, %v10922_v20  ;;  %v13747_v42 = vld [vmem:[#allocation19_spill] sm:$0xff] }
 0x3eb   :  { %v9638_v10 = vpop.eup %9637  ;;  %9641 = vpow2.f32 %v8309_v37 }
 0x3ec   :  { %v9640_v41 = vpop.eup %9639  ;;  %9643 = vtanh.f32 %v11291_v26  ;;  %v2682_v22 = vadd.f32 1.0, %v9638_v10 }
 0x3ed   :  { %v11299_v21 = vadd.f32 1.0, %v9640_v41 }
 0x3ee   :  { %9645 = vrcp.f32 %v2682_v22  ;;  %v2549_v51 = vpop.f32.mrf.mxu3  ;;  %vm2688_vm9 = vweird.f32 %v2682_v22  ;;  %v2692_v20 = vand.u32 2147483647, %v2682_v22 }
 0x3ef   :  { %v2575_v45 = vpop.f32.mrf.mxu2  ;;  %9647 = vrcp.f32 %v11299_v21  ;;  %vm2708_vm4 = vweird.f32 %v11299_v21 }
 0x3f0   :  { %vm2693_vm13 = vcmp.eq.f32.partialorder %v2692_v20, 8.507059e+37  ;;  %v13746_v20 = vld [vmem:[#allocation17_spill] sm:$0xff] }
 0x3f1   :  { %v9642_v38 = vpop.eup %9641 }
 0x3f2   :  { %v9644_v19 = vpop.eup %9643  ;;  %v2663_v11 = vadd.f32 1.0, %v9642_v38 }
 0x3f3   :  { %v2659_v63 = vmul.f32 %v9644_v19, %v2650_v54  ;;  %v2719_v54 = vrot.slane %v11208_v61, 2 }
 0x3f4   :  { %v9646_v62 = vpop.eup %9645  ;;  %9649 = vrcp.f32 %v2663_v11  ;;  %v2675_v41 = vand.u32 2147483648, %v2663_v11  ;;  %v2673_v0 = vand.u32 2147483647, %v2663_v11  ;;  %vm2669_vm12 = vweird.f32 %v2663_v11 }
 0x3f5   :  { %v2684_v23 = vmul.f32 %v9646_v62, %v2682_v22  ;;  %v2726_v13 = vpack.c.bf16 %v2659_v63, %v2659_v63  ;;  %v11305_v53 = vsel %vm156_vm0, %v11177_v44, %v2659_v63  ;;  %v11307_v5 = vpop.eup %9647  ;;  %vm2689_vm8 = vweird.f32 %v9646_v62 }
 0x3f6   :  { %13739 = vst [vmem:[#allocation69_spill] sm:$0xff] %v11305_v53  ;;  %v2694_v44 = vand.u32 2147483648, %v2682_v22  ;;  %v2704_v10 = vmul.f32 %v11307_v5, %v11299_v21  ;;  %vm11316_vm10 = vmor %vm2688_vm9, %vm2689_vm8  ;;  %9651 = vtanh.f32 %v2592_v57  ;;  %v2676_v15 = vor.u32 1.1754944e-38, %v2675_v41  ;;  %v13748_v41 = vld [vmem:[#allocation27_spill] sm:$0xff]  ;;  %v13773_v53 = vld [vmem:[#allocation50_spill] sm:$0xff] }
 0x3f7   :  { %v2685_v1 = vsub.f32 1.0, %v2684_v23  ;;  %v2728_v39 = vrot.slane %v2726_v13, 3  ;;  %vm2674_vm15 = vcmp.eq.f32.partialorder %v2673_v0, 8.507059e+37  ;;  %vm2709_vm1 = vweird.f32 %v11307_v5  ;;  %v13750_v0 = vld [vmem:[#allocation20_spill] sm:$0xff] }
 0x3f8   :  { %v2695_v45 = vor.u32 1.1754944e-38, %v2694_v44  ;;  %v2705_v52 = vsub.f32 1.0, %v2704_v10  ;;  %vm2710_vm5 = vmor %vm2708_vm4, %vm2709_vm1  ;;  %v13743_v44 = vld [vmem:[#allocation25_spill] sm:$0xff]  ;;  %v13744_v10 = vld [vmem:[#allocation16_spill] sm:$0xff] }
 0x3f9   :  { %v2686_v14 = vmul.f32 %v9646_v62, %v2685_v1  ;;  %2738 = vmatmul.bf16.vlgmr.msrb.gmra.mxu3 %v2728_v39  ;;  %2751 = vmatmul.bf16.vlgmr.msra.gmra.mxu1 %v2728_v39 }
 0x3fa   :  { %v9650_v33 = vpop.eup %9649  ;;  %2764 = vmatmul.bf16.vlgmr.msra.gmra.mxu2 %v2728_v39  ;;  %2777 = vmatmul.bf16.vlgmr.msra.gmra.mxu0 %v2728_v39  ;;  %v2714_v39 = vand.u32 2147483648, %v11299_v21 }
 0x3fb   :  { %v2665_v37 = vmul.f32 %v9650_v33, %v2663_v11  ;;  %v2687_v49 = vadd.f32 %v9646_v62, %v2686_v14  ;;  %2988 = vmatpush.bf16.msrb.mxu3 %v10535_v46  ;;  %3001 = vmatpush.bf16.msra.mxu1 %v10543_v55  ;;  %vm2670_vm11 = vweird.f32 %v9650_v33  ;;  %v2712_v14 = vand.u32 2147483647, %v11299_v21 }
 0x3fc   :  { %3014 = vmatpush.bf16.msra.mxu2 %v10524_v17  ;;  %3027 = vmatpush.bf16.msra.mxu0 %v10526_v27  ;;  %vm2671_vm14 = vmor %vm2669_vm12, %vm2670_vm11  ;;  %v9652_v63 = vpop.eup %9651  ;;  %v2715_v57 = vor.u32 1.1754944e-38, %v2714_v39  ;;  %v13765_v39 = vld [vmem:[#allocation45_spill] sm:$0xff] }
 0x3fd   :  { %v2666_v12 = vsub.f32 1.0, %v2665_v37  ;;  %v2691_v51 = vsel %vm11316_vm10, %v9646_v62, %v2687_v49  ;;  %v2706_v62 = vmul.f32 %v11307_v5, %v2705_v52  ;;  %vm2713_vm6 = vcmp.eq.f32.partialorder %v2712_v14, 8.507059e+37  ;;  %v13753_v52 = vld [vmem:[#allocation33_spill] sm:$0xff]  ;;  %v13766_v14 = vld [vmem:[#allocation36_spill] sm:$0xff] }
 0x3fe   :  { %v2696_v38 = vsel %vm2693_vm13, %v2695_v45, %v2691_v51  ;;  %v13751_v51 = vld [vmem:[#allocation21_spill] sm:$0xff]  ;;  %v13752_v45 = vld [vmem:[#allocation31_spill] sm:$0xff] }
 0x3ff   :  { %v2667_v58 = vmul.f32 %v9650_v33, %v2666_v12  ;;  %2989 = vmatpush.bf16.msrb.mxu3 %v10549_v59  ;;  %3002 = vmatpush.bf16.msra.mxu1 %v10555_v3  ;;  %v2721_v11 = vmul.f32 %v2719_v54, %v2696_v38  ;;  %v2707_v61 = vadd.f32 %v11307_v5, %v2706_v62  ;;  %v13745_v12 = vld [vmem:[#allocation18_spill] sm:$0xff]  ;;  %v13756_v38 = vld [vmem:[#allocation35_spill] sm:$0xff]  ;;  %v13758_v54 = vld [vmem:[#allocation28_spill] sm:$0xff] }
 0x400   :  { %3015 = vmatpush.bf16.msra.mxu2 %v10529_v31  ;;  %3028 = vmatpush.bf16.msra.mxu0 %v10532_v43  ;;  %v13760_v62 = vld [vmem:[#allocation39_spill] sm:$0xff] }
 0x401   :  { %v2668_v22 = vadd.f32 %v9650_v33, %v2667_v58  ;;  %v13749_v58 = vld [vmem:[#allocation29_spill] sm:$0xff] }
 0x403   :  { %v2672_v19 = vsel %vm2671_vm14, %v9650_v33, %v2668_v22  ;;  %2990 = vmatpush.bf16.msrb.mxu3 %v10561_v8  ;;  %3003 = vmatpush.bf16.msra.mxu1 %v10570_v16  ;;  %v2711_v33 = vsel %vm2710_vm5, %v11307_v5, %v2707_v61  ;;  %v13754_v22 = vld [vmem:[#allocation23_spill] sm:$0xff] }
 0x404   :  { %v2677_v23 = vsel %vm2674_vm15, %v2676_v15, %v2672_v19  ;;  %3016 = vmatpush.bf16.msra.mxu2 %v10537_v47  ;;  %3029 = vmatpush.bf16.msra.mxu0 %v10545_v56  ;;  %v2716_v49 = vsel %vm2713_vm6, %v2715_v57, %v2711_v33  ;;  %v13755_v15 = vld [vmem:[#allocation26_spill] sm:$0xff]  ;;  %v13757_v19 = vld [vmem:[#allocation37_spill] sm:$0xff]  ;;  %v13764_v61 = vld [vmem:[#allocation43_spill] sm:$0xff] }
 0x405   :  { %v2722_v13 = vmul.f32 %v9652_v63, %v2677_v23  ;;  %v13759_v63 = vld [vmem:[#allocation30_spill] sm:$0xff]  ;;  %v13761_v23 = vld [vmem:[#allocation41_spill] sm:$0xff]  ;;  %v13768_v57 = vld [vmem:[#allocation47_spill] sm:$0xff] }
 0x406   :  { %v13767_v33 = vld [vmem:[#allocation38_spill] sm:$0xff] }
 0x407   :  { %v11332_v1 = vadd.f32 %v2722_v13, %v2721_v11  ;;  %2991 = vmatpush.bf16.msrb.mxu3 %v10576_v7  ;;  %3004 = vmatpush.bf16.msra.mxu1 %v10582_v28  ;;  %v13762_v11 = vld [vmem:[#allocation32_spill] sm:$0xff]  ;;  %v13763_v13 = vld [vmem:[#allocation34_spill] sm:$0xff] }
 0x408   :  { %3017 = vmatpush.bf16.msra.mxu2 %v10551_v60  ;;  %3030 = vmatpush.bf16.msra.mxu0 %v10557_v4 }
 0x409   :  { %9653 = vtanh.f32 %v11332_v1 }
 0x40b   :  { %2992 = vmatpush.bf16.msrb.mxu3 %v10588_v35  ;;  %3005 = vmatpush.bf16.msra.mxu1 %v10594_v34 }
 0x40c   :  { %3018 = vmatpush.bf16.msra.mxu2 %v10563_v9  ;;  %3031 = vmatpush.bf16.msra.mxu0 %v10572_v18 }
 0x40f   :  { %v9654_v37 = vpop.eup %9653  ;;  %2993 = vmatpush.bf16.msrb.mxu3 %v10600_v50  ;;  %3006 = vmatpush.bf16.msra.mxu1 %v10608_v2 }
 0x410   :  { %v11351_v21 = vmul.f32 %v9654_v37, %v2716_v49  ;;  %3019 = vmatpush.bf16.msra.mxu2 %v10578_v32  ;;  %3032 = vmatpush.bf16.msra.mxu0 %v10584_v29  ;;  %v13769_v37 = vld [vmem:[#allocation48_spill] sm:$0xff] }
 0x411   :  { %v13770_v49 = vld [vmem:[#allocation40_spill] sm:$0xff] }
 0x412   :  { %13742 = vst [vmem:[#allocation67_spill] sm:$0xff] %v11351_v21  ;;  %v2786_v5 = vpack.c.bf16 %v11351_v21, %v11351_v21  ;;  %v13772_v21 = vld [vmem:[#allocation49_spill] sm:$0xff] }
 0x413   :  { %2994 = vmatpush.bf16.msrb.mxu3 %v10614_v6  ;;  %3007 = vmatpush.bf16.msra.mxu1 %v10623_v24 }
 0x414   :  { %2795 = vmatmul.bf16.vlgmr.msra.gmra.mxu3 %v2786_v5  ;;  %2808 = vmatmul.bf16.vlgmr.msrb.gmra.mxu1 %v2786_v5 }
 0x415   :  { %2821 = vmatmul.bf16.vlgmr.msrb.gmra.mxu2 %v2786_v5  ;;  %2834 = vmatmul.bf16.vlgmr.msrb.gmra.mxu0 %v2786_v5  ;;  %v13771_v5 = vld [vmem:[#allocation42_spill] sm:$0xff] }
 0x416   :  { %3020 = vmatpush.bf16.msra.mxu2 %v10590_v36  ;;  %3033 = vmatpush.bf16.msra.mxu0 %v10596_v48 }
 0x417   :  { %2995 = vmatpush.bf16.msrb.mxu3 %v10627_v30  ;;  %3008 = vmatpush.bf16.msra.mxu1 %v13612_v40 }
 0x41a   :  { %3021 = vmatpush.bf16.msra.mxu2 %v13744_v10  ;;  %3034 = vmatpush.bf16.msra.mxu0 %v13745_v12 }
 0x41b   :  { %3060 = vmatpush.bf16.msra.mxu3 %v13701_v25  ;;  %3073 = vmatpush.bf16.msrb.mxu1 %v13743_v44 }
 0x41e   :  { %3086 = vmatpush.bf16.msrb.mxu2 %v13746_v20  ;;  %3099 = vmatpush.bf16.msrb.mxu0 %v13747_v42 }
 0x41f   :  { %3061 = vmatpush.bf16.msra.mxu3 %v13748_v41  ;;  %3074 = vmatpush.bf16.msrb.mxu1 %v13749_v58 }
 0x422   :  { %3087 = vmatpush.bf16.msrb.mxu2 %v13750_v0  ;;  %3100 = vmatpush.bf16.msrb.mxu0 %v13751_v51 }
 0x423   :  { %3062 = vmatpush.bf16.msra.mxu3 %v13752_v45  ;;  %3075 = vmatpush.bf16.msrb.mxu1 %v13753_v52 }
 0x426   :  { %3088 = vmatpush.bf16.msrb.mxu2 %v13754_v22  ;;  %3101 = vmatpush.bf16.msrb.mxu0 %v13755_v15  ;;  %v13787_v15 = vld [vmem:[#allocation55_spill] sm:$0xff] }
 0x427   :  { %3063 = vmatpush.bf16.msra.mxu3 %v13756_v38  ;;  %3076 = vmatpush.bf16.msrb.mxu1 %v13757_v19  ;;  %v13786_v19 = vld [vmem:[#allocation52_spill] sm:$0xff] }
 0x42a   :  { %3089 = vmatpush.bf16.msrb.mxu2 %v13758_v54  ;;  %3102 = vmatpush.bf16.msrb.mxu0 %v13759_v63 }
 0x42b   :  { %3064 = vmatpush.bf16.msra.mxu3 %v13760_v62  ;;  %3077 = vmatpush.bf16.msrb.mxu1 %v13761_v23  ;;  %v13780_v23 = vld [vmem:[#allocation58_spill] sm:$0xff]  ;;  %v13781_v62 = vld [vmem:[#allocation56_spill] sm:$0xff] }
 0x42e   :  { %3090 = vmatpush.bf16.msrb.mxu2 %v13762_v11  ;;  %3103 = vmatpush.bf16.msrb.mxu0 %v13763_v13  ;;  %v13774_v13 = vld [vmem:[#allocation44_spill] sm:$0xff]  ;;  %v13778_v11 = vld [vmem:[#allocation54_spill] sm:$0xff] }
 0x42f   :  { %3065 = vmatpush.bf16.msra.mxu3 %v13764_v61  ;;  %3078 = vmatpush.bf16.msrb.mxu1 %v13765_v39  ;;  %v13775_v61 = vld [vmem:[#allocation46_spill] sm:$0xff]  ;;  %v13776_v39 = vld [vmem:[#allocation51_spill] sm:$0xff] }
 0x430   :  { %v13785_v54 = vperm.slane %v13776_v39, 0 }
 0x432   :  { %3091 = vmatpush.bf16.msrb.mxu2 %v13766_v14  ;;  %3104 = vmatpush.bf16.msrb.mxu0 %v13767_v33  ;;  %v13777_v14 = vperm.slane %v13776_v39, 1 }
 0x433   :  { %3066 = vmatpush.bf16.msra.mxu3 %v13768_v57  ;;  %3079 = vmatpush.bf16.msrb.mxu1 %v13769_v37  ;;  %v13779_v57 = vperm.slane %v13776_v39, 3 }
 0x434   :  { %v1094_v33 = vadd.f32 %v13778_v11, %v13777_v14  ;;  %v1066_v11 = vadd.f32 %v13786_v19, %v13785_v54 }
 0x435   :  { %v1150_v37 = vadd.f32 %v13780_v23, %v13779_v57 }
 0x436   :  { %3092 = vmatpush.bf16.msrb.mxu2 %v13770_v49  ;;  %3105 = vmatpush.bf16.msrb.mxu0 %v13771_v5  ;;  %v11404_v49 = vadd.f32 %v13781_v62, %v1094_v33  ;;  %v13783_v5 = vld [vmem:[#allocation59_spill] sm:$0xff]  ;;  %v11415_v23 = vadd.f32 %v13787_v15, %v1066_v11 }
 0x437   :  { %3067 = vmatpush.bf16.msra.mxu3 %v13772_v21  ;;  %3080 = vmatpush.bf16.msrb.mxu1 %v13773_v53  ;;  %v11407_v63 = vadd.f32 %v13783_v5, %v1150_v37 }
 0x438   :  { %13782 = vst [vmem:[#allocation57_spill] sm:$0xff] %v11404_v49 }
 0x439   :  { %13784 = vst [vmem:[#allocation53_spill] sm:$0xff] %v11407_v63 }
 0x43a   :  { %3093 = vmatpush.bf16.msrb.mxu2 %v13774_v13  ;;  %3106 = vmatpush.bf16.msrb.mxu0 %v13775_v61  ;;  %13788 = vst [vmem:[#allocation60_spill] sm:$0xff] %v11415_v23 }
 0x476   :  { %v2752_v21 = vpop.f32.mrf.mxu1 }
 0x477   :  { %v2783_v53 = vadd.f32 %v2752_v21, %v11404_v49  ;;  %v2778_v13 = vpop.f32.mrf.mxu0 }
 0x478   :  { %v2785_v61 = vadd.f32 %v2778_v13, %v11407_v63 }
 0x479   :  { %v8313_v14 = vmul.f32 -1.442695, %v2783_v53 }
 0x47a   :  { %v8314_v38 = vmul.f32 -1.442695, %v2785_v61 }
 0x47b   :  { %9655 = vpow2.f32 %v8313_v14  ;;  %v13789_v14 = vperm.slane %v13776_v39, 2 }
 0x47c   :  { %9657 = vpow2.f32 %v8314_v38  ;;  %v2739_v62 = vpop.f32.mrf.mxu3 }
 0x47d   :  { %v2782_v33 = vadd.f32 %v2739_v62, %v11415_v23  ;;  %v2765_v57 = vpop.f32.mrf.mxu2  ;;  %v13790_v62 = vld [vmem:[#allocation61_spill] sm:$0xff] }
 0x47e   :  { %v2754_v37 = vpop.f32.mrf.mxu1 }
 0x47f   :  { %v8312_v21 = vmul.f32 -1.442695, %v2782_v33  ;;  %v2780_v5 = vpop.f32.mrf.mxu0  ;;  %v1122_v33 = vadd.f32 %v13790_v62, %v13789_v14 }
 0x481   :  { %v9656_v49 = vpop.eup %9655  ;;  %9659 = vpow2.f32 %v8312_v21  ;;  %v13791_v21 = vld [vmem:[#allocation62_spill] sm:$0xff] }
 0x482   :  { %v9658_v13 = vpop.eup %9657  ;;  %v2877_v63 = vadd.f32 1.0, %v9656_v49  ;;  %v11425_v5 = vadd.f32 %v13791_v21, %v1122_v33 }
 0x483   :  { %v11418_v53 = vadd.f32 1.0, %v9658_v13 }
 0x484   :  { %9661 = vrcp.f32 %v2877_v63  ;;  %v2741_v19 = vpop.f32.mrf.mxu3  ;;  %13792 = vst [vmem:[#allocation16_spill] sm:$0xff] %v11425_v5  ;;  %v2889_v52 = vand.u32 2147483648, %v2877_v63  ;;  %vm2883_vm9 = vweird.f32 %v2877_v63  ;;  %v2887_v62 = vand.u32 2147483647, %v2877_v63 }
 0x485   :  { %v2767_v54 = vpop.f32.mrf.mxu2  ;;  %9663 = vrcp.f32 %v11418_v53  ;;  %vm2903_vm4 = vweird.f32 %v11418_v53 }
 0x486   :  { %v2784_v54 = vadd.f32 %v2765_v57, %v11425_v5  ;;  %v13795_v5 = vld [vmem:[#allocation63_spill] sm:$0xff]  ;;  %v2890_v41 = vor.u32 1.1754944e-38, %v2889_v52  ;;  %vm2888_vm13 = vcmp.eq.f32.partialorder %v2887_v62, 8.507059e+37 }
 0x487   :  { %v9660_v15 = vpop.eup %9659 }
 0x488   :  { %v2858_v61 = vadd.f32 1.0, %v9660_v15 }
 0x48a   :  { %v9662_v38 = vpop.eup %9661  ;;  %9665 = vrcp.f32 %v2858_v61  ;;  %v2870_v57 = vand.u32 2147483648, %v2858_v61  ;;  %vm2864_vm12 = vweird.f32 %v2858_v61 }
 0x48b   :  { %v2879_v11 = vmul.f32 %v9662_v38, %v2877_v63  ;;  %v11427_v49 = vpop.eup %9663  ;;  %vm2884_vm8 = vweird.f32 %v9662_v38  ;;  %9667 = vtanh.f32 %v2784_v54 }
 0x48c   :  { %v2899_v39 = vmul.f32 %v11427_v49, %v11418_v53  ;;  %vm11432_vm10 = vmor %vm2883_vm9, %vm2884_vm8  ;;  %v2871_v44 = vor.u32 1.1754944e-38, %v2870_v57  ;;  %vm2904_vm1 = vweird.f32 %v11427_v49 }
 0x48d   :  { %v2880_v37 = vsub.f32 1.0, %v2879_v11  ;;  %vm2905_vm5 = vmor %vm2903_vm4, %vm2904_vm1 }
 0x48f   :  { %v2881_v13 = vmul.f32 %v9662_v38, %v2880_v37  ;;  %v2868_v37 = vand.u32 2147483647, %v2858_v61 }
 0x490   :  { %v9666_v19 = vpop.eup %9665 }
 0x491   :  { %v2860_v15 = vmul.f32 %v9666_v19, %v2858_v61  ;;  %v2882_v23 = vadd.f32 %v9662_v38, %v2881_v13  ;;  %v2809_v22 = vpop.f32.mrf.mxu1  ;;  %vm2865_vm11 = vweird.f32 %v9666_v19  ;;  %vm2869_vm15 = vcmp.eq.f32.partialorder %v2868_v37, 8.507059e+37  ;;  %v9668_v52 = vpop.eup %9667  ;;  %v13797_v61 = vld [vmem:[#allocation64_spill] sm:$0xff] }
 0x492   :  { %v2844_v45 = vrot.slane %v2809_v22, 2  ;;  %v2835_v14 = vpop.f32.mrf.mxu0  ;;  %v13796_v22 = vld [vmem:[#allocation65_spill] sm:$0xff]  ;;  %vm2866_vm14 = vmor %vm2864_vm12, %vm2865_vm11 }
 0x493   :  { %v2861_v11 = vsub.f32 1.0, %v2860_v15  ;;  %v2846_v33 = vrot.slane %v2835_v14, 2  ;;  %v2886_v0 = vsel %vm11432_vm10, %v9662_v38, %v2882_v23  ;;  %v2900_v15 = vsub.f32 1.0, %v2899_v39 }
 0x494   :  { %v2852_v13 = vadd.f32 %v2844_v45, %v13795_v5  ;;  %v2891_v54 = vsel %vm2888_vm13, %v2890_v41, %v2886_v0  ;;  %v2914_v23 = vrot.slane %v11291_v26, 6 }
 0x495   :  { %v2862_v51 = vmul.f32 %v9666_v19, %v2861_v11  ;;  %v2854_v58 = vadd.f32 %v2846_v33, %v13796_v22  ;;  %v2901_v39 = vmul.f32 %v11427_v49, %v2900_v15 }
 0x496   :  { %v8316_v63 = vmul.f32 -1.442695, %v2852_v13  ;;  %v2916_v33 = vmul.f32 %v2914_v23, %v2891_v54 }
 0x497   :  { %v2863_v14 = vadd.f32 %v9666_v19, %v2862_v51  ;;  %v8317_v42 = vmul.f32 -1.442695, %v2854_v58  ;;  %v2796_v20 = vpop.f32.mrf.mxu3  ;;  %v2902_v0 = vadd.f32 %v11427_v49, %v2901_v39 }
 0x498   :  { %9669 = vpow2.f32 %v8316_v63  ;;  %v2843_v45 = vrot.slane %v2796_v20, 2  ;;  %v2822_v11 = vpop.f32.mrf.mxu2 }
 0x499   :  { %v2867_v5 = vsel %vm2866_vm14, %v9666_v19, %v2863_v14  ;;  %9671 = vpow2.f32 %v8317_v42  ;;  %v2811_v38 = vpop.f32.mrf.mxu1  ;;  %v2909_v42 = vand.u32 2147483648, %v11418_v53  ;;  %v2907_v19 = vand.u32 2147483647, %v11418_v53 }
 0x49a   :  { %v2872_v51 = vsel %vm2869_vm15, %v2871_v44, %v2867_v5  ;;  %v2851_v62 = vadd.f32 %v2843_v45, %v13797_v61  ;;  %v2837_v58 = vpop.f32.mrf.mxu0  ;;  %v2906_v15 = vsel %vm2905_vm5, %v11427_v49, %v2902_v0 }
 0x49b   :  { %v2917_v21 = vmul.f32 %v9668_v52, %v2872_v51  ;;  %v2910_v63 = vor.u32 1.1754944e-38, %v2909_v42  ;;  %vm2908_vm6 = vcmp.eq.f32.partialorder %v2907_v19, 8.507059e+37  ;;  %v2845_v51 = vrot.slane %v2822_v11, 2 }
 0x49c   :  { %v8315_v57 = vmul.f32 -1.442695, %v2851_v62 }
 0x49d   :  { %v11443_v41 = vadd.f32 %v2917_v21, %v2916_v33  ;;  %v2911_v23 = vsel %vm2908_vm6, %v2910_v63, %v2906_v15  ;;  %v13799_v21 = vld [vmem:[#allocation66_spill] sm:$0xff] }
 0x49e   :  { %v9670_v20 = vpop.eup %9669  ;;  %9673 = vpow2.f32 %v8315_v57  ;;  %v2853_v57 = vadd.f32 %v2845_v51, %v13799_v21  ;;  %v2980_v51 = vrot.slane %v11332_v1, 2 }
 0x49f   :  { %v9672_v26 = vpop.eup %9671  ;;  %9675 = vtanh.f32 %v11443_v41  ;;  %v2943_v44 = vadd.f32 1.0, %v9670_v20  ;;  %v2798_v5 = vpop.f32.mrf.mxu3 }
 0x4a0   :  { %v2824_v37 = vpop.f32.mrf.mxu2  ;;  %v11451_v13 = vadd.f32 1.0, %v9672_v26 }
 0x4a1   :  { %9677 = vrcp.f32 %v2943_v44  ;;  %v2955_v0 = vand.u32 2147483648, %v2943_v44  ;;  %vm2949_vm9 = vweird.f32 %v2943_v44  ;;  %v2953_v5 = vand.u32 2147483647, %v2943_v44 }
 0x4a2   :  { %9679 = vrcp.f32 %v11451_v13  ;;  %vm2969_vm4 = vweird.f32 %v11451_v13 }
 0x4a3   :  { %vm2954_vm13 = vcmp.eq.f32.partialorder %v2953_v5, 8.507059e+37 }
 0x4a4   :  { %v9674_v14 = vpop.eup %9673 }
 0x4a5   :  { %v9676_v54 = vpop.eup %9675  ;;  %v2924_v45 = vadd.f32 1.0, %v9674_v14  ;;  %v2956_v14 = vor.u32 1.1754944e-38, %v2955_v0  ;;  %v2973_v0 = vand.u32 2147483647, %v11451_v13 }
 0x4a6   :  { %v11455_v38 = vmul.f32 %v9676_v54, %v2911_v23 }
 0x4a7   :  { %v9678_v52 = vpop.eup %9677  ;;  %9681 = vrcp.f32 %v2924_v45  ;;  %v2936_v37 = vand.u32 2147483648, %v2924_v45  ;;  %v2934_v63 = vand.u32 2147483647, %v2924_v45  ;;  %vm2930_vm12 = vweird.f32 %v2924_v45 }
 0x4a8   :  { %13798 = vst [vmem:[#allocation51_spill] sm:$0xff] %v11455_v38  ;;  %v2945_v53 = vmul.f32 %v9678_v52, %v2943_v44  ;;  %v2987_v39 = vpack.c.bf16 %v11455_v38, %v11455_v38  ;;  %v11459_v49 = vpop.eup %9679  ;;  %vm2950_vm8 = vweird.f32 %v9678_v52  ;;  %9683 = vtanh.f32 %v2853_v57  ;;  %v13828_v38 = vld [vmem:[#allocation40_spill] sm:$0xff] }
 0x4a9   :  { %v2965_v26 = vmul.f32 %v11459_v49, %v11451_v13  ;;  %vm11470_vm10 = vmor %vm2949_vm9, %vm2950_vm8  ;;  %vm2935_vm15 = vcmp.eq.f32.partialorder %v2934_v63, 8.507059e+37  ;;  %vm2970_vm1 = vweird.f32 %v11459_v49  ;;  %vm2974_vm6 = vcmp.eq.f32.partialorder %v2973_v0, 8.507059e+37  ;;  %v13804_v63 = vld [vmem:[#allocation17_spill] sm:$0xff]  ;;  %v13820_v0 = vld [vmem:[#allocation32_spill] sm:$0xff] }
 0x4aa   :  { %v2946_v62 = vsub.f32 1.0, %v2945_v53  ;;  %2996 = vmatmul.bf16.vlgmr.msrb.gmra.mxu3 %v2987_v39  ;;  %3009 = vmatmul.bf16.vlgmr.msra.gmra.mxu1 %v2987_v39  ;;  %v2937_v53 = vor.u32 1.1754944e-38, %v2936_v37  ;;  %vm2971_vm5 = vmor %vm2969_vm4, %vm2970_vm1 }
 0x4ab   :  { %3022 = vmatmul.bf16.vlgmr.msra.gmra.mxu2 %v2987_v39  ;;  %3035 = vmatmul.bf16.vlgmr.msra.gmra.mxu0 %v2987_v39  ;;  %v2966_v54 = vsub.f32 1.0, %v2965_v26 }
 0x4ac   :  { %v2947_v58 = vmul.f32 %v9678_v52, %v2946_v62  ;;  %3264 = vmatpush.bf16.msrb.mxu3 %v10535_v46  ;;  %3277 = vmatpush.bf16.msra.mxu1 %v10543_v55 }
 0x4ad   :  { %v9682_v33 = vpop.eup %9681  ;;  %3290 = vmatpush.bf16.msra.mxu2 %v10524_v17  ;;  %3303 = vmatpush.bf16.msra.mxu0 %v10526_v27 }
 0x4ae   :  { %v2926_v11 = vmul.f32 %v9682_v33, %v2924_v45  ;;  %v2948_v20 = vadd.f32 %v9678_v52, %v2947_v58  ;;  %vm2931_vm11 = vweird.f32 %v9682_v33  ;;  %v2967_v58 = vmul.f32 %v11459_v49, %v2966_v54  ;;  %v13807_v54 = vld [vmem:[#allocation29_spill] sm:$0xff] }
 0x4af   :  { %vm2932_vm14 = vmor %vm2930_vm12, %vm2931_vm11 }
 0x4b0   :  { %v2927_v42 = vsub.f32 1.0, %v2926_v11  ;;  %3265 = vmatpush.bf16.msrb.mxu3 %v10549_v59  ;;  %3278 = vmatpush.bf16.msra.mxu1 %v10555_v3  ;;  %v2952_v44 = vsel %vm11470_vm10, %v9678_v52, %v2948_v20  ;;  %v9684_v52 = vpop.eup %9683  ;;  %v2968_v1 = vadd.f32 %v11459_v49, %v2967_v58  ;;  %v13814_v58 = vld [vmem:[#allocation35_spill] sm:$0xff] }
 0x4b1   :  { %3291 = vmatpush.bf16.msra.mxu2 %v10529_v31  ;;  %3304 = vmatpush.bf16.msra.mxu0 %v10532_v43  ;;  %v2957_v39 = vsel %vm2954_vm13, %v2956_v14, %v2952_v44  ;;  %v13805_v44 = vld [vmem:[#allocation19_spill] sm:$0xff] }
 0x4b2   :  { %v2928_v15 = vmul.f32 %v9682_v33, %v2927_v42  ;;  %v2982_v57 = vmul.f32 %v2980_v51, %v2957_v39  ;;  %v2972_v26 = vsel %vm2971_vm5, %v11459_v49, %v2968_v1  ;;  %v13806_v14 = vld [vmem:[#allocation27_spill] sm:$0xff]  ;;  %v13811_v51 = vld [vmem:[#allocation33_spill] sm:$0xff] }
 0x4b3   :  { %v13810_v39 = vld [vmem:[#allocation31_spill] sm:$0xff] }
 0x4b4   :  { %v2929_v23 = vadd.f32 %v9682_v33, %v2928_v15  ;;  %3266 = vmatpush.bf16.msrb.mxu3 %v10561_v8  ;;  %3279 = vmatpush.bf16.msra.mxu1 %v10570_v16  ;;  %v13803_v15 = vld [vmem:[#allocation25_spill] sm:$0xff]  ;;  %v13818_v1 = vld [vmem:[#allocation39_spill] sm:$0xff] }
 0x4b5   :  { %3292 = vmatpush.bf16.msra.mxu2 %v10537_v47  ;;  %3305 = vmatpush.bf16.msra.mxu0 %v10545_v56 }
 0x4b6   :  { %v2933_v62 = vsel %vm2932_vm14, %v9682_v33, %v2929_v23  ;;  %v2975_v33 = vand.u32 2147483648, %v11451_v13  ;;  %v13808_v23 = vld [vmem:[#allocation20_spill] sm:$0xff] }
 0x4b7   :  { %v2938_v45 = vsel %vm2935_vm15, %v2937_v53, %v2933_v62  ;;  %v13809_v53 = vld [vmem:[#allocation21_spill] sm:$0xff]  ;;  %v13812_v62 = vld [vmem:[#allocation23_spill] sm:$0xff] }
 0x4b8   :  { %v2983_v11 = vmul.f32 %v9684_v52, %v2938_v45  ;;  %3267 = vmatpush.bf16.msrb.mxu3 %v10576_v7  ;;  %3280 = vmatpush.bf16.msra.mxu1 %v10582_v28  ;;  %v2976_v42 = vor.u32 1.1754944e-38, %v2975_v33  ;;  %v13813_v52 = vld [vmem:[#allocation26_spill] sm:$0xff]  ;;  %v13815_v45 = vld [vmem:[#allocation37_spill] sm:$0xff] }
 0x4b9   :  { %3293 = vmatpush.bf16.msra.mxu2 %v10551_v60  ;;  %3306 = vmatpush.bf16.msra.mxu0 %v10557_v4  ;;  %v13819_v33 = vld [vmem:[#allocation41_spill] sm:$0xff] }
 0x4ba   :  { %v11488_v20 = vadd.f32 %v2983_v11, %v2982_v57  ;;  %v2977_v19 = vsel %vm2974_vm6, %v2976_v42, %v2972_v26  ;;  %v13816_v57 = vld [vmem:[#allocation28_spill] sm:$0xff]  ;;  %v13817_v11 = vld [vmem:[#allocation30_spill] sm:$0xff]  ;;  %v13822_v42 = vld [vmem:[#allocation43_spill] sm:$0xff] }
 0x4bb   :  { %v13821_v26 = vld [vmem:[#allocation34_spill] sm:$0xff] }
 0x4bc   :  { %9685 = vtanh.f32 %v11488_v20  ;;  %3268 = vmatpush.bf16.msrb.mxu3 %v10588_v35  ;;  %3281 = vmatpush.bf16.msra.mxu1 %v10594_v34 }
 0x4bd   :  { %3294 = vmatpush.bf16.msra.mxu2 %v10563_v9  ;;  %3307 = vmatpush.bf16.msra.mxu0 %v10572_v18 }
 0x4c0   :  { %3269 = vmatpush.bf16.msrb.mxu3 %v10600_v50  ;;  %3282 = vmatpush.bf16.msra.mxu1 %v10608_v2 }
 0x4c1   :  { %3295 = vmatpush.bf16.msra.mxu2 %v10578_v32  ;;  %3308 = vmatpush.bf16.msra.mxu0 %v10584_v29 }
 0x4c2   :  { %v9686_v5 = vpop.eup %9685 }
 0x4c3   :  { %v11505_v13 = vmul.f32 %v9686_v5, %v2977_v19  ;;  %v13823_v5 = vld [vmem:[#allocation45_spill] sm:$0xff]  ;;  %v13824_v19 = vld [vmem:[#allocation36_spill] sm:$0xff] }
 0x4c4   :  { %3270 = vmatpush.bf16.msrb.mxu3 %v10614_v6  ;;  %3283 = vmatpush.bf16.msra.mxu1 %v10623_v24 }
 0x4c5   :  { %13802 = vst [vmem:[#allocation54_spill] sm:$0xff] %v11505_v13  ;;  %v3056_v49 = vpack.c.bf16 %v11505_v13, %v11505_v13  ;;  %3296 = vmatpush.bf16.msra.mxu2 %v10590_v36  ;;  %3309 = vmatpush.bf16.msra.mxu0 %v10596_v48  ;;  %v13827_v13 = vld [vmem:[#allocation48_spill] sm:$0xff] }
 0x4c7   :  { %v3058_v37 = vrot.slane %v3056_v49, 3  ;;  %v13825_v49 = vld [vmem:[#allocation38_spill] sm:$0xff] }
 0x4c8   :  { %3271 = vmatpush.bf16.msrb.mxu3 %v10627_v30  ;;  %3284 = vmatpush.bf16.msra.mxu1 %v13612_v40 }
 0x4c9   :  { %3068 = vmatmul.bf16.vlgmr.msra.gmra.mxu3 %v3058_v37  ;;  %3081 = vmatmul.bf16.vlgmr.msrb.gmra.mxu1 %v3058_v37 }
 0x4ca   :  { %3094 = vmatmul.bf16.vlgmr.msrb.gmra.mxu2 %v3058_v37  ;;  %3107 = vmatmul.bf16.vlgmr.msrb.gmra.mxu0 %v3058_v37  ;;  %v13826_v37 = vld [vmem:[#allocation47_spill] sm:$0xff] }
 0x4cb   :  { %3297 = vmatpush.bf16.msra.mxu2 %v13744_v10  ;;  %3310 = vmatpush.bf16.msra.mxu0 %v13745_v12 }
 0x4cc   :  { %3336 = vmatpush.bf16.msra.mxu3 %v13701_v25  ;;  %3349 = vmatpush.bf16.msrb.mxu1 %v13803_v15 }
 0x4cf   :  { %3362 = vmatpush.bf16.msrb.mxu2 %v13804_v63  ;;  %3375 = vmatpush.bf16.msrb.mxu0 %v13805_v44 }
 0x4d0   :  { %3337 = vmatpush.bf16.msra.mxu3 %v13806_v14  ;;  %3350 = vmatpush.bf16.msrb.mxu1 %v13807_v54 }
 0x4d3   :  { %3363 = vmatpush.bf16.msrb.mxu2 %v13808_v23  ;;  %3376 = vmatpush.bf16.msrb.mxu0 %v13809_v53 }
 0x4d4   :  { %3338 = vmatpush.bf16.msra.mxu3 %v13810_v39  ;;  %3351 = vmatpush.bf16.msrb.mxu1 %v13811_v51 }
 0x4d7   :  { %3364 = vmatpush.bf16.msrb.mxu2 %v13812_v62  ;;  %3377 = vmatpush.bf16.msrb.mxu0 %v13813_v52  ;;  %v13836_v62 = vld [vmem:[#allocation60_spill] sm:$0xff] }
 0x4d8   :  { %3339 = vmatpush.bf16.msra.mxu3 %v13814_v58  ;;  %3352 = vmatpush.bf16.msrb.mxu1 %v13815_v45  ;;  %v13835_v45 = vld [vmem:[#allocation53_spill] sm:$0xff] }
 0x4db   :  { %3365 = vmatpush.bf16.msrb.mxu2 %v13816_v57  ;;  %3378 = vmatpush.bf16.msrb.mxu0 %v13817_v11  ;;  %v13834_v57 = vld [vmem:[#allocation57_spill] sm:$0xff] }
 0x4dc   :  { %3340 = vmatpush.bf16.msra.mxu3 %v13818_v1  ;;  %3353 = vmatpush.bf16.msrb.mxu1 %v13819_v33  ;;  %v13829_v1 = vld [vmem:[#allocation42_spill] sm:$0xff]  ;;  %v13830_v33 = vld [vmem:[#allocation49_spill] sm:$0xff] }
 0x4df   :  { %3366 = vmatpush.bf16.msrb.mxu2 %v13820_v0  ;;  %3379 = vmatpush.bf16.msrb.mxu0 %v13821_v26  ;;  %v13831_v0 = vld [vmem:[#allocation50_spill] sm:$0xff]  ;;  %v13832_v26 = vld [vmem:[#allocation44_spill] sm:$0xff] }
 0x4e0   :  { %3341 = vmatpush.bf16.msra.mxu3 %v13822_v42  ;;  %3354 = vmatpush.bf16.msrb.mxu1 %v13823_v5  ;;  %v13833_v42 = vld [vmem:[#allocation46_spill] sm:$0xff] }
 0x4e3   :  { %3367 = vmatpush.bf16.msrb.mxu2 %v13824_v19  ;;  %3380 = vmatpush.bf16.msrb.mxu0 %v13825_v49 }
 0x4e4   :  { %3342 = vmatpush.bf16.msra.mxu3 %v13826_v37  ;;  %3355 = vmatpush.bf16.msrb.mxu1 %v13827_v13 }
 0x4e7   :  { %3368 = vmatpush.bf16.msrb.mxu2 %v13828_v38  ;;  %3381 = vmatpush.bf16.msrb.mxu0 %v13829_v1 }
 0x4e8   :  { %3343 = vmatpush.bf16.msra.mxu3 %v13830_v33  ;;  %3356 = vmatpush.bf16.msrb.mxu1 %v13831_v0 }
 0x4eb   :  { %3369 = vmatpush.bf16.msrb.mxu2 %v13832_v26  ;;  %3382 = vmatpush.bf16.msrb.mxu0 %v13833_v42 }
 0x527   :  { %v3010_v5 = vpop.f32.mrf.mxu1 }
 0x528   :  { %v3045_v19 = vrot.slane %v3010_v5, 6  ;;  %v3036_v11 = vpop.f32.mrf.mxu0 }
 0x529   :  { %v3047_v49 = vrot.slane %v3036_v11, 6 }
 0x52a   :  { %v3053_v37 = vadd.f32 %v3045_v19, %v13834_v57 }
 0x52b   :  { %v3055_v13 = vadd.f32 %v3047_v49, %v13835_v45 }
 0x52c   :  { %v8319_v58 = vmul.f32 -1.442695, %v3053_v37 }
 0x52d   :  { %v8320_v38 = vmul.f32 -1.442695, %v3055_v13  ;;  %v2997_v52 = vpop.f32.mrf.mxu3 }
 0x52e   :  { %9687 = vpow2.f32 %v8319_v58  ;;  %v3044_v1 = vrot.slane %v2997_v52, 6  ;;  %v3023_v33 = vpop.f32.mrf.mxu2 }
 0x52f   :  { %9689 = vpow2.f32 %v8320_v38  ;;  %v3012_v0 = vpop.f32.mrf.mxu1  ;;  %v3046_v58 = vrot.slane %v3023_v33, 6 }
 0x530   :  { %v3052_v26 = vadd.f32 %v3044_v1, %v13836_v62  ;;  %v3038_v51 = vpop.f32.mrf.mxu0 }
 0x532   :  { %v8318_v42 = vmul.f32 -1.442695, %v3052_v26 }
 0x534   :  { %v9688_v39 = vpop.eup %9687  ;;  %9691 = vpow2.f32 %v8318_v42  ;;  %v13837_v42 = vld [vmem:[#allocation16_spill] sm:$0xff] }
 0x535   :  { %v9690_v5 = vpop.eup %9689  ;;  %v3150_v11 = vadd.f32 1.0, %v9688_v39  ;;  %v2999_v53 = vpop.f32.mrf.mxu3  ;;  %v3054_v39 = vadd.f32 %v3046_v58, %v13837_v42 }
 0x536   :  { %v3025_v19 = vpop.f32.mrf.mxu2  ;;  %v11552_v49 = vadd.f32 1.0, %v9690_v5 }
 0x537   :  { %9693 = vrcp.f32 %v3150_v11  ;;  %v3162_v5 = vand.u32 2147483648, %v3150_v11  ;;  %vm3156_vm9 = vweird.f32 %v3150_v11  ;;  %v3160_v45 = vand.u32 2147483647, %v3150_v11 }
 0x538   :  { %9695 = vrcp.f32 %v11552_v49  ;;  %vm3176_vm4 = vweird.f32 %v11552_v49 }
 0x539   :  { %v3163_v14 = vor.u32 1.1754944e-38, %v3162_v5  ;;  %vm3161_vm13 = vcmp.eq.f32.partialorder %v3160_v45, 8.507059e+37 }
 0x53a   :  { %v9692_v13 = vpop.eup %9691 }
 0x53b   :  { %v3131_v37 = vadd.f32 1.0, %v9692_v13 }
 0x53d   :  { %v9694_v52 = vpop.eup %9693  ;;  %9697 = vrcp.f32 %v3131_v37  ;;  %vm3137_vm12 = vweird.f32 %v3131_v37 }
 0x53e   :  { %v3152_v38 = vmul.f32 %v9694_v52, %v3150_v11  ;;  %v11555_v51 = vpop.eup %9695  ;;  %vm3157_vm8 = vweird.f32 %v9694_v52  ;;  %9699 = vtanh.f32 %v3054_v39 }
 0x53f   :  { %v3172_v13 = vmul.f32 %v11555_v51, %v11552_v49  ;;  %vm11560_vm10 = vmor %vm3156_vm9, %vm3157_vm8  ;;  %vm3177_vm1 = vweird.f32 %v11555_v51 }
 0x540   :  { %v3153_v1 = vsub.f32 1.0, %v3152_v38  ;;  %v3141_v38 = vand.u32 2147483647, %v3131_v37  ;;  %vm3178_vm5 = vmor %vm3176_vm4, %vm3177_vm1 }
 0x541   :  { %v3173_v44 = vsub.f32 1.0, %v3172_v13 }
 0x542   :  { %v3154_v0 = vmul.f32 %v9694_v52, %v3153_v1  ;;  %v3143_v1 = vand.u32 2147483648, %v3131_v37  ;;  %vm3142_vm15 = vcmp.eq.f32.partialorder %v3141_v38, 8.507059e+37 }
 0x543   :  { %v9698_v26 = vpop.eup %9697  ;;  %v3174_v5 = vmul.f32 %v11555_v51, %v3173_v44 }
 0x544   :  { %v3133_v53 = vmul.f32 %v9698_v26, %v3131_v37  ;;  %v3155_v19 = vadd.f32 %v9694_v52, %v3154_v0  ;;  %vm3138_vm11 = vweird.f32 %v9698_v26  ;;  %v3144_v25 = vor.u32 1.1754944e-38, %v3143_v1 }
 0x545   :  { %vm3139_vm14 = vmor %vm3137_vm12, %vm3138_vm11 }
 0x546   :  { %v3134_v62 = vsub.f32 1.0, %v3133_v53  ;;  %v3082_v57 = vpop.f32.mrf.mxu1  ;;  %v3159_v0 = vsel %vm11560_vm10, %v9694_v52, %v3155_v19  ;;  %v13840_v53 = vld [vmem:[#allocation63_spill] sm:$0xff]  ;;  %v9700_v19 = vpop.eup %9699 }
 0x547   :  { %v3117_v23 = vrot.slane %v3082_v57, 4  ;;  %v3108_v58 = vpop.f32.mrf.mxu0  ;;  %v3164_v39 = vsel %vm3161_vm13, %v3163_v14, %v3159_v0 }
 0x548   :  { %v3135_v42 = vmul.f32 %v9698_v26, %v3134_v62  ;;  %v3119_v54 = vrot.slane %v3108_v58, 4  ;;  %v3187_v62 = vrot.slane %v11443_v41, 6 }
 0x549   :  { %v3125_v11 = vadd.f32 %v3117_v23, %v13840_v53 }
 0x54a   :  { %v3136_v63 = vadd.f32 %v9698_v26, %v3135_v42  ;;  %v3127_v15 = vadd.f32 %v3119_v54, %v13796_v22  ;;  %v3189_v45 = vmul.f32 %v3187_v62, %v3164_v39 }
 0x54b   :  { %v8322_v57 = vmul.f32 -1.442695, %v3125_v11 }
 0x54c   :  { %v3140_v12 = vsel %vm3139_vm14, %v9698_v26, %v3136_v63  ;;  %v8323_v33 = vmul.f32 -1.442695, %v3127_v15  ;;  %v3069_v52 = vpop.f32.mrf.mxu3  ;;  %v3175_v15 = vadd.f32 %v11555_v51, %v3174_v5  ;;  %v3182_v63 = vand.u32 2147483648, %v11552_v49 }
 0x54d   :  { %v3145_v13 = vsel %vm3142_vm15, %v3144_v25, %v3140_v12  ;;  %9701 = vpow2.f32 %v8322_v57  ;;  %v3116_v23 = vrot.slane %v3069_v52, 4  ;;  %v3095_v37 = vpop.f32.mrf.mxu2  ;;  %v3180_v12 = vand.u32 2147483647, %v11552_v49 }
 0x54e   :  { %v3190_v42 = vmul.f32 %v9700_v19, %v3145_v13  ;;  %9703 = vpow2.f32 %v8323_v33  ;;  %v3084_v54 = vpop.f32.mrf.mxu1  ;;  %v3179_v11 = vsel %vm3178_vm5, %v11555_v51, %v3175_v15  ;;  %v3183_v39 = vor.u32 1.1754944e-38, %v3182_v63 }
 0x54f   :  { %v3124_v14 = vadd.f32 %v3116_v23, %v13797_v61  ;;  %v3110_v1 = vpop.f32.mrf.mxu0  ;;  %vm3181_vm6 = vcmp.eq.f32.partialorder %v3180_v12, 8.507059e+37 }
 0x550   :  { %v11571_v58 = vadd.f32 %v3190_v42, %v3189_v45  ;;  %v3184_v33 = vsel %vm3181_vm6, %v3183_v39, %v3179_v11  ;;  %v3118_v45 = vrot.slane %v3095_v37, 4 }
 0x551   :  { %v8321_v41 = vmul.f32 -1.442695, %v3124_v14 }
 0x552   :  { %9705 = vtanh.f32 %v11571_v58 }
 0x553   :  { %v9702_v25 = vpop.eup %9701  ;;  %9707 = vpow2.f32 %v8321_v41  ;;  %v3126_v41 = vadd.f32 %v3118_v45, %v13799_v21  ;;  %v13861_v45 = vld [vmem:[#allocation41_spill] sm:$0xff] }
 0x554   :  { %v9704_v44 = vpop.eup %9703  ;;  %v3216_v26 = vadd.f32 1.0, %v9702_v25  ;;  %v3071_v38 = vpop.f32.mrf.mxu3 }
 0x555   :  { %v3097_v0 = vpop.f32.mrf.mxu2  ;;  %v11580_v57 = vadd.f32 1.0, %v9704_v44 }
 0x556   :  { %9709 = vrcp.f32 %v3216_v26  ;;  %v3228_v63 = vand.u32 2147483648, %v3216_v26  ;;  %vm3222_vm9 = vweird.f32 %v3216_v26  ;;  %v3226_v44 = vand.u32 2147483647, %v3216_v26 }
 0x557   :  { %9711 = vrcp.f32 %v11580_v57  ;;  %vm3242_vm4 = vweird.f32 %v11580_v57 }
 0x558   :  { %v9706_v62 = vpop.eup %9705  ;;  %v3229_v38 = vor.u32 1.1754944e-38, %v3228_v63  ;;  %vm3227_vm13 = vcmp.eq.f32.partialorder %v3226_v44, 8.507059e+37  ;;  %v13869_v63 = vld [vmem:[#allocation48_spill] sm:$0xff]  ;;  %v13872_v44 = vld [vmem:[#allocation49_spill] sm:$0xff] }
 0x559   :  { %v9708_v52 = vpop.eup %9707  ;;  %v11582_v19 = vmul.f32 %v9706_v62, %v3184_v33 }
 0x55a   :  { %v3197_v5 = vadd.f32 1.0, %v9708_v52 }
 0x55b   :  { %v3260_v49 = vpack.c.bf16 %v11582_v19, %v11582_v19 }
 0x55c   :  { %v9710_v13 = vpop.eup %9709  ;;  %9713 = vrcp.f32 %v3197_v5  ;;  %vm3203_vm12 = vweird.f32 %v3197_v5 }
 0x55d   :  { %v3218_v23 = vmul.f32 %v9710_v13, %v3216_v26  ;;  %v3262_v51 = vrot.slane %v3260_v49, 1  ;;  %v11587_v54 = vpop.eup %9711  ;;  %vm3223_vm8 = vweird.f32 %v9710_v13  ;;  %9715 = vtanh.f32 %v3126_v41  ;;  %v13857_v49 = vld [vmem:[#allocation37_spill] sm:$0xff]  ;;  %v13866_v41 = vld [vmem:[#allocation36_spill] sm:$0xff] }
 0x55e   :  { %v3238_v25 = vmul.f32 %v11587_v54, %v11580_v57  ;;  %vm11598_vm10 = vmor %vm3222_vm9, %vm3223_vm8  ;;  %vm3243_vm1 = vweird.f32 %v11587_v54 }
 0x55f   :  { %v3219_v42 = vsub.f32 1.0, %v3218_v23  ;;  %3272 = vmatmul.bf16.vlgmr.msrb.gmra.mxu3 %v3262_v51  ;;  %3285 = vmatmul.bf16.vlgmr.msra.gmra.mxu1 %v3262_v51  ;;  %vm3244_vm5 = vmor %vm3242_vm4, %vm3243_vm1  ;;  %v13859_v23 = vld [vmem:[#allocation30_spill] sm:$0xff] }
 0x560   :  { %3298 = vmatmul.bf16.vlgmr.msra.gmra.mxu2 %v3262_v51  ;;  %3311 = vmatmul.bf16.vlgmr.msra.gmra.mxu0 %v3262_v51  ;;  %v13860_v51 = vld [vmem:[#allocation39_spill] sm:$0xff] }
 0x561   :  { %v3220_v14 = vmul.f32 %v9710_v13, %v3219_v42  ;;  %3540 = vmatpush.bf16.msrb.mxu3 %v10535_v46  ;;  %3553 = vmatpush.bf16.msra.mxu1 %v10543_v55  ;;  %v3207_v55 = vand.u32 2147483647, %v3197_v5  ;;  %v13862_v42 = vld [vmem:[#allocation32_spill] sm:$0xff]  ;;  %v13873_v46 = vld [vmem:[#allocation50_spill] sm:$0xff] }
 0x562   :  { %v9714_v1 = vpop.eup %9713  ;;  %3566 = vmatpush.bf16.msra.mxu2 %v10524_v17  ;;  %3579 = vmatpush.bf16.msra.mxu0 %v10526_v27  ;;  %v3209_v17 = vand.u32 2147483648, %v3197_v5 }
 0x563   :  { %v3199_v37 = vmul.f32 %v9714_v1, %v3197_v5  ;;  %v3221_v15 = vadd.f32 %v9710_v13, %v3220_v14  ;;  %vm3204_vm11 = vweird.f32 %v9714_v1  ;;  %vm3208_vm15 = vcmp.eq.f32.partialorder %v3207_v55, 8.507059e+37  ;;  %v9716_v39 = vpop.eup %9715  ;;  %v13864_v14 = vld [vmem:[#allocation43_spill] sm:$0xff] }
 0x564   :  { %vm3205_vm14 = vmor %vm3203_vm12, %vm3204_vm11 }
 0x565   :  { %v3200_v12 = vsub.f32 1.0, %v3199_v37  ;;  %3541 = vmatpush.bf16.msrb.mxu3 %v10549_v59  ;;  %3554 = vmatpush.bf16.msra.mxu1 %v10555_v3  ;;  %v3225_v26 = vsel %vm11598_vm10, %v9710_v13, %v3221_v15  ;;  %v3239_v59 = vsub.f32 1.0, %v3238_v25  ;;  %v3210_v3 = vor.u32 1.1754944e-38, %v3209_v17  ;;  %v13858_v13 = vld [vmem:[#allocation28_spill] sm:$0xff]  ;;  %v13867_v37 = vld [vmem:[#allocation38_spill] sm:$0xff]  ;;  %v13868_v15 = vld [vmem:[#allocation47_spill] sm:$0xff] }
 0x566   :  { %3567 = vmatpush.bf16.msra.mxu2 %v10529_v31  ;;  %3580 = vmatpush.bf16.msra.mxu0 %v10532_v43  ;;  %v3230_v31 = vsel %vm3227_vm13, %v3229_v38, %v3225_v26  ;;  %v3253_v43 = vrot.slane %v11488_v20, 2  ;;  %v13855_v20 = vld [vmem:[#allocation26_spill] sm:$0xff]  ;;  %v13870_v25 = vld [vmem:[#allocation40_spill] sm:$0xff] }
 0x567   :  { %v3201_v27 = vmul.f32 %v9714_v1, %v3200_v12  ;;  %v3240_v62 = vmul.f32 %v11587_v54, %v3239_v59  ;;  %v13871_v12 = vld [vmem:[#allocation42_spill] sm:$0xff]  ;;  %v13874_v17 = vld [vmem:[#allocation44_spill] sm:$0xff] }
 0x568   :  { %v3255_v52 = vmul.f32 %v3253_v43, %v3230_v31  ;;  %v13877_v31 = vld [vmem:[#allocation53_spill] sm:$0xff] }
 0x569   :  { %v3202_v0 = vadd.f32 %v9714_v1, %v3201_v27  ;;  %3542 = vmatpush.bf16.msrb.mxu3 %v10561_v8  ;;  %3555 = vmatpush.bf16.msra.mxu1 %v10570_v16  ;;  %v3248_v8 = vand.u32 2147483648, %v11580_v57  ;;  %v13875_v27 = vld [vmem:[#allocation46_spill] sm:$0xff] }
 0x56a   :  { %3568 = vmatpush.bf16.msra.mxu2 %v10537_v47  ;;  %3581 = vmatpush.bf16.msra.mxu0 %v10545_v56  ;;  %v3241_v56 = vadd.f32 %v11587_v54, %v3240_v62 }
 0x56b   :  { %v3206_v11 = vsel %vm3205_vm14, %v9714_v1, %v3202_v0  ;;  %v3249_v16 = vor.u32 1.1754944e-38, %v3248_v8  ;;  %v13865_v1 = vld [vmem:[#allocation45_spill] sm:$0xff] }
 0x56c   :  { %v3211_v33 = vsel %vm3208_vm15, %v3210_v3, %v3206_v11  ;;  %v13876_v0 = vld [vmem:[#allocation57_spill] sm:$0xff] }
 0x56d   :  { %v3256_v5 = vmul.f32 %v9716_v39, %v3211_v33  ;;  %3543 = vmatpush.bf16.msrb.mxu3 %v10576_v7  ;;  %3556 = vmatpush.bf16.msra.mxu1 %v10582_v28 }
 0x56e   :  { %3569 = vmatpush.bf16.msra.mxu2 %v10551_v60  ;;  %3582 = vmatpush.bf16.msra.mxu0 %v10557_v4  ;;  %v3246_v60 = vand.u32 2147483647, %v11580_v57  ;;  %v3245_v4 = vsel %vm3244_vm5, %v11587_v54, %v3241_v56  ;;  %v13856_v57 = vld [vmem:[#allocation35_spill] sm:$0xff]  ;;  %v13863_v54 = vld [vmem:[#allocation34_spill] sm:$0xff]  ;;  %v13878_v56 = vld [vmem:[#allocation60_spill] sm:$0xff] }
 0x56f   :  { %v11616_v47 = vadd.f32 %v3256_v5, %v3255_v52 }
 0x570   :  { %vm3247_vm6 = vcmp.eq.f32.partialorder %v3246_v60, 8.507059e+37 }
 0x571   :  { %9717 = vtanh.f32 %v11616_v47  ;;  %3544 = vmatpush.bf16.msrb.mxu3 %v10588_v35  ;;  %3557 = vmatpush.bf16.msra.mxu1 %v10594_v34  ;;  %v3250_v28 = vsel %vm3247_vm6, %v3249_v16, %v3245_v4  ;;  %v13845_v34 = vld [vmem:[#allocation25_spill] sm:$0xff] }
 0x572   :  { %3570 = vmatpush.bf16.msra.mxu2 %v10563_v9  ;;  %3583 = vmatpush.bf16.msra.mxu0 %v10572_v18 }
 0x575   :  { %3545 = vmatpush.bf16.msrb.mxu3 %v10600_v50  ;;  %3558 = vmatpush.bf16.msra.mxu1 %v10608_v2  ;;  %v13848_v50 = vld [vmem:[#allocation27_spill] sm:$0xff]  ;;  %v13849_v2 = vld [vmem:[#allocation29_spill] sm:$0xff] }
 0x576   :  { %3571 = vmatpush.bf16.msra.mxu2 %v10578_v32  ;;  %3584 = vmatpush.bf16.msra.mxu0 %v10584_v29  ;;  %v13843_v32 = vld [vmem:[#allocation18_spill] sm:$0xff] }
 0x577   :  { %v9718_v7 = vpop.eup %9717  ;;  %v13844_v29 = vld [vmem:[#allocation22_spill] sm:$0xff] }
 0x578   :  { %v11633_v35 = vmul.f32 %v9718_v7, %v3250_v28 }
 0x579   :  { %3546 = vmatpush.bf16.msrb.mxu3 %v10614_v6  ;;  %3559 = vmatpush.bf16.msra.mxu1 %v10623_v24  ;;  %v13850_v6 = vld [vmem:[#allocation20_spill] sm:$0xff]  ;;  %v13851_v24 = vld [vmem:[#allocation21_spill] sm:$0xff] }
 0x57a   :  { %v3332_v9 = vpack.c.bf16 %v11633_v35, %v11633_v35  ;;  %3572 = vmatpush.bf16.msra.mxu2 %v10590_v36  ;;  %3585 = vmatpush.bf16.msra.mxu0 %v10596_v48  ;;  %v13846_v36 = vld [vmem:[#allocation17_spill] sm:$0xff]  ;;  %v13847_v48 = vld [vmem:[#allocation19_spill] sm:$0xff] }
 0x57c   :  { %v3334_v18 = vrot.slane %v3332_v9, 2 }
 0x57d   :  { %3547 = vmatpush.bf16.msrb.mxu3 %v10627_v30  ;;  %3560 = vmatpush.bf16.msra.mxu1 %v13612_v40  ;;  %v13852_v30 = vld [vmem:[#allocation31_spill] sm:$0xff]  ;;  %v13853_v40 = vld [vmem:[#allocation33_spill] sm:$0xff] }
 0x57e   :  { %3344 = vmatmul.bf16.vlgmr.msra.gmra.mxu3 %v3334_v18  ;;  %3357 = vmatmul.bf16.vlgmr.msrb.gmra.mxu1 %v3334_v18 }
 0x57f   :  { %3370 = vmatmul.bf16.vlgmr.msrb.gmra.mxu2 %v3334_v18  ;;  %3383 = vmatmul.bf16.vlgmr.msrb.gmra.mxu0 %v3334_v18 }
 0x580   :  { %3573 = vmatpush.bf16.msra.mxu2 %v13744_v10  ;;  %3586 = vmatpush.bf16.msra.mxu0 %v13843_v32  ;;  %v13854_v10 = vld [vmem:[#allocation23_spill] sm:$0xff] }
 0x581   :  { %3612 = vmatpush.bf16.msra.mxu3 %v13844_v29  ;;  %3625 = vmatpush.bf16.msrb.mxu1 %v13845_v34 }
 0x584   :  { %3638 = vmatpush.bf16.msrb.mxu2 %v13846_v36  ;;  %3651 = vmatpush.bf16.msrb.mxu0 %v13847_v48 }
 0x585   :  { %3613 = vmatpush.bf16.msra.mxu3 %v13848_v50  ;;  %3626 = vmatpush.bf16.msrb.mxu1 %v13849_v2 }
 0x588   :  { %3639 = vmatpush.bf16.msrb.mxu2 %v13850_v6  ;;  %3652 = vmatpush.bf16.msrb.mxu0 %v13851_v24 }
 0x589   :  { %3614 = vmatpush.bf16.msra.mxu3 %v13852_v30  ;;  %3627 = vmatpush.bf16.msrb.mxu1 %v13853_v40  ;;  %v13879_v40 = vld [vmem:[#allocation16_spill] sm:$0xff] }
 0x58c   :  { %3640 = vmatpush.bf16.msrb.mxu2 %v13854_v10  ;;  %3653 = vmatpush.bf16.msrb.mxu0 %v13855_v20 }
 0x58d   :  { %3615 = vmatpush.bf16.msra.mxu3 %v13856_v57  ;;  %3628 = vmatpush.bf16.msrb.mxu1 %v13857_v49 }
 0x590   :  { %3641 = vmatpush.bf16.msrb.mxu2 %v13858_v13  ;;  %3654 = vmatpush.bf16.msrb.mxu0 %v13859_v23 }
 0x591   :  { %3616 = vmatpush.bf16.msra.mxu3 %v13860_v51  ;;  %3629 = vmatpush.bf16.msrb.mxu1 %v13861_v45 }
 0x594   :  { %3642 = vmatpush.bf16.msrb.mxu2 %v13862_v42  ;;  %3655 = vmatpush.bf16.msrb.mxu0 %v13863_v54 }
 0x595   :  { %3617 = vmatpush.bf16.msra.mxu3 %v13864_v14  ;;  %3630 = vmatpush.bf16.msrb.mxu1 %v13865_v1 }
 0x598   :  { %3643 = vmatpush.bf16.msrb.mxu2 %v13866_v41  ;;  %3656 = vmatpush.bf16.msrb.mxu0 %v13867_v37 }
 0x599   :  { %3618 = vmatpush.bf16.msra.mxu3 %v13868_v15  ;;  %3631 = vmatpush.bf16.msrb.mxu1 %v13869_v63 }
 0x59c   :  { %3644 = vmatpush.bf16.msrb.mxu2 %v13870_v25  ;;  %3657 = vmatpush.bf16.msrb.mxu0 %v13871_v12 }
 0x59d   :  { %3619 = vmatpush.bf16.msra.mxu3 %v13872_v44  ;;  %3632 = vmatpush.bf16.msrb.mxu1 %v13873_v46 }
 0x5a0   :  { %3645 = vmatpush.bf16.msrb.mxu2 %v13874_v17  ;;  %3658 = vmatpush.bf16.msrb.mxu0 %v13875_v27 }
 0x5dc   :  { %v3286_v55 = vpop.f32.mrf.mxu1 }
 0x5dd   :  { %v3321_v26 = vrot.slane %v3286_v55, 4  ;;  %v3312_v38 = vpop.f32.mrf.mxu0 }
 0x5de   :  { %v3323_v59 = vrot.slane %v3312_v38, 4  ;;  %v3463_v38 = vrot.slane %v11571_v58, 6 }
 0x5df   :  { %v3329_v3 = vadd.f32 %v3321_v26, %v13876_v0 }
 0x5e0   :  { %v3331_v43 = vadd.f32 %v3323_v59, %v13877_v31 }
 0x5e1   :  { %v8325_v11 = vmul.f32 -1.442695, %v3329_v3 }
 0x5e2   :  { %v8326_v39 = vmul.f32 -1.442695, %v3331_v43  ;;  %v3273_v62 = vpop.f32.mrf.mxu3 }
 0x5e3   :  { %9719 = vpow2.f32 %v8325_v11  ;;  %v3320_v33 = vrot.slane %v3273_v62, 4  ;;  %v3299_v52 = vpop.f32.mrf.mxu2 }
 0x5e4   :  { %9721 = vpow2.f32 %v8326_v39  ;;  %v3288_v5 = vpop.f32.mrf.mxu1  ;;  %v3322_v50 = vrot.slane %v3299_v52, 4 }
 0x5e5   :  { %v3328_v8 = vadd.f32 %v3320_v33, %v13878_v56  ;;  %v3314_v60 = vpop.f32.mrf.mxu0 }
 0x5e6   :  { %v3330_v10 = vadd.f32 %v3322_v50, %v13879_v40 }
 0x5e7   :  { %v8324_v4 = vmul.f32 -1.442695, %v3328_v8 }
 0x5e9   :  { %v9720_v16 = vpop.eup %9719  ;;  %9723 = vpow2.f32 %v8324_v4 }
 0x5ea   :  { %v9722_v7 = vpop.eup %9721  ;;  %v3426_v28 = vadd.f32 1.0, %v9720_v16  ;;  %v3275_v9 = vpop.f32.mrf.mxu3 }
 0x5eb   :  { %v3301_v18 = vpop.f32.mrf.mxu2  ;;  %v11680_v32 = vadd.f32 1.0, %v9722_v7 }
 0x5ec   :  { %9725 = vrcp.f32 %v3426_v28  ;;  %v3438_v49 = vand.u32 2147483648, %v3426_v28  ;;  %vm3432_vm9 = vweird.f32 %v3426_v28  ;;  %v3436_v51 = vand.u32 2147483647, %v3426_v28 }
 0x5ed   :  { %9727 = vrcp.f32 %v11680_v32  ;;  %v3458_v9 = vand.u32 2147483648, %v11680_v32  ;;  %vm3452_vm4 = vweird.f32 %v11680_v32 }
 0x5ee   :  { %v3439_v25 = vor.u32 1.1754944e-38, %v3438_v49  ;;  %vm3437_vm13 = vcmp.eq.f32.partialorder %v3436_v51, 8.507059e+37 }
 0x5ef   :  { %v9724_v29 = vpop.eup %9723 }
 0x5f0   :  { %v3407_v34 = vadd.f32 1.0, %v9724_v29  ;;  %v3456_v29 = vand.u32 2147483647, %v11680_v32 }
 0x5f2   :  { %v9726_v36 = vpop.eup %9725  ;;  %9729 = vrcp.f32 %v3407_v34  ;;  %v3417_v54 = vand.u32 2147483647, %v3407_v34  ;;  %v3419_v14 = vand.u32 2147483648, %v3407_v34  ;;  %vm3413_vm12 = vweird.f32 %v3407_v34 }
 0x5f3   :  { %v3428_v48 = vmul.f32 %v9726_v36, %v3426_v28  ;;  %v11683_v6 = vpop.eup %9727  ;;  %vm3433_vm8 = vweird.f32 %v9726_v36  ;;  %9731 = vtanh.f32 %v3330_v10  ;;  %vm3457_vm6 = vcmp.eq.f32.partialorder %v3456_v29, 8.507059e+37 }
 0x5f4   :  { %v3448_v13 = vmul.f32 %v11683_v6, %v11680_v32  ;;  %vm11688_vm10 = vmor %vm3432_vm9, %vm3433_vm8  ;;  %v3420_v27 = vor.u32 1.1754944e-38, %v3419_v14  ;;  %vm3418_vm15 = vcmp.eq.f32.partialorder %v3417_v54, 8.507059e+37  ;;  %vm3453_vm1 = vweird.f32 %v11683_v6 }
 0x5f5   :  { %v3429_v2 = vsub.f32 1.0, %v3428_v48  ;;  %vm3454_vm5 = vmor %vm3452_vm4, %vm3453_vm1 }
 0x5f6   :  { %v3449_v12 = vsub.f32 1.0, %v3448_v13  ;;  %v13882_v13 = vld [vmem:[#allocation51_spill] sm:$0xff] }
 0x5f7   :  { %v3430_v24 = vmul.f32 %v9726_v36, %v3429_v2  ;;  %v3803_v32 = vsel %vm341_vm3, %v13882_v13, %v11582_v19  ;;  %v8530_v13 = vld [vmem:[#allocation7 + $0x180] sm:$0xf] }
 0x5f8   :  { %v9730_v30 = vpop.eup %9729  ;;  %v3450_v39 = vmul.f32 %v11683_v6, %v3449_v12 }
 0x5f9   :  { %v3409_v20 = vmul.f32 %v9730_v30, %v3407_v34  ;;  %v3431_v57 = vadd.f32 %v9726_v36, %v3430_v24  ;;  %vm3414_vm11 = vweird.f32 %v9730_v30  ;;  %v9732_v11 = vpop.eup %9731  ;;  %v3459_v24 = vor.u32 1.1754944e-38, %v3458_v9 }
 0x5fa   :  { %vm3415_vm14 = vmor %vm3413_vm12, %vm3414_vm11  ;;  %v3451_v28 = vadd.f32 %v11683_v6, %v3450_v39 }
 0x5fb   :  { %v3410_v23 = vsub.f32 1.0, %v3409_v20  ;;  %v3358_v45 = vpop.f32.mrf.mxu1  ;;  %v3435_v15 = vsel %vm11688_vm10, %v9726_v36, %v3431_v57 }
 0x5fc   :  { %v3393_v1 = vrot.slane %v3358_v45, 6  ;;  %v3384_v41 = vpop.f32.mrf.mxu0  ;;  %v3440_v55 = vsel %vm3437_vm13, %v3439_v25, %v3435_v15  ;;  %v3455_v2 = vsel %vm3454_vm5, %v11683_v6, %v3451_v28  ;;  %v9369_v15 = vld [vmem:[#allocation7 + $0x1c4] sm:$0xf] }
 0x5fd   :  { %v3411_v37 = vmul.f32 %v9730_v30, %v3410_v23  ;;  %v3395_v63 = vrot.slane %v3384_v41, 6  ;;  %v3465_v5 = vmul.f32 %v3463_v38, %v3440_v55  ;;  %v3460_v20 = vsel %vm3457_vm6, %v3459_v24, %v3455_v2  ;;  %v8562_v41 = vld [vmem:[#allocation7 + $0x1c0] sm:$0xf] }
 0x5fe   :  { %v3401_v44 = vadd.f32 %v3393_v1, %v13840_v53 }
 0x5ff   :  { %v3412_v46 = vadd.f32 %v9730_v30, %v3411_v37  ;;  %v3403_v17 = vadd.f32 %v3395_v63, %v13796_v22  ;;  %v9373_v37 = vld [vmem:[#allocation7 + $0x1dc] sm:$0xf0]  ;;  %v8564_v63 = vld [vmem:[#allocation7 + $0x1e0] sm:$0xf0] }
 0x600   :  { %v8328_v26 = vmul.f32 -1.442695, %v3401_v44  ;;  %v8563_v19 = vor.u32 %v9373_v37, %v8562_v41  ;;  %v8567_v44 = vor.u32 %v9369_v15, %v8564_v63  ;;  %v8500_v41 = vld [vmem:[#allocation7 + $0x160] sm:$0xf0]  ;;  %v9349_v15 = vld [vmem:[#allocation7 + $0x11c] sm:$0xf0] }
 0x601   :  { %v3416_v59 = vsel %vm3415_vm14, %v9730_v30, %v3412_v46  ;;  %v8329_v3 = vmul.f32 -1.442695, %v3403_v17  ;;  %v3345_v43 = vpop.f32.mrf.mxu3  ;;  %v9345_v63 = vld [vmem:[#allocation7 + $0x104] sm:$0xf] }
 0x602   :  { %v3421_v62 = vsel %vm3418_vm15, %v3420_v27, %v3416_v59  ;;  %9733 = vpow2.f32 %v8328_v26  ;;  %v3392_v33 = vrot.slane %v3345_v43, 6  ;;  %v3371_v52 = vpop.f32.mrf.mxu2 }
 0x603   :  { %v3466_v8 = vmul.f32 %v9732_v11, %v3421_v62  ;;  %9735 = vpow2.f32 %v8329_v3  ;;  %v3360_v60 = vpop.f32.mrf.mxu1  ;;  %v3394_v14 = vrot.slane %v3371_v52, 6 }
 0x604   :  { %v3400_v4 = vadd.f32 %v3392_v33, %v13797_v61  ;;  %v3386_v16 = vpop.f32.mrf.mxu0 }
 0x605   :  { %v11699_v7 = vadd.f32 %v3466_v8, %v3465_v5  ;;  %v3402_v17 = vadd.f32 %v3394_v14, %v13799_v21  ;;  %v9353_v14 = vld [vmem:[#allocation7 + $0x144] sm:$0xf] }
 0x606   :  { %v8327_v58 = vmul.f32 -1.442695, %v3400_v4  ;;  %v3529_v4 = vrot.slane %v11616_v47, 2  ;;  %v8503_v37 = vor.u32 %v9353_v14, %v8500_v41  ;;  %v8786_v41 = vld [vmem:[#allocation7 + $0x380] sm:$0xf] }
 0x607   :  { %9737 = vtanh.f32 %v11699_v7 }
 0x608   :  { %v9734_v18 = vpop.eup %9733  ;;  %9739 = vpow2.f32 %v8327_v58 }
 0x609   :  { %v9736_v34 = vpop.eup %9735  ;;  %v3492_v36 = vadd.f32 1.0, %v9734_v18  ;;  %v3347_v48 = vpop.f32.mrf.mxu3 }
 0x60a   :  { %v3373_v50 = vpop.f32.mrf.mxu2  ;;  %v11708_v30 = vadd.f32 1.0, %v9736_v34 }
 0x60b   :  { %9741 = vrcp.f32 %v3492_v36  ;;  %v3504_v26 = vand.u32 2147483648, %v3492_v36  ;;  %vm3498_vm9 = vweird.f32 %v3492_v36  ;;  %v3502_v3 = vand.u32 2147483647, %v3492_v36 }
 0x60c   :  { %9743 = vrcp.f32 %v11708_v30  ;;  %v3524_v48 = vand.u32 2147483648, %v11708_v30  ;;  %vm3518_vm4 = vweird.f32 %v11708_v30  ;;  %v3522_v50 = vand.u32 2147483647, %v11708_v30 }
 0x60d   :  { %v9738_v10 = vpop.eup %9737  ;;  %v3505_v33 = vor.u32 1.1754944e-38, %v3504_v26  ;;  %vm3503_vm13 = vcmp.eq.f32.partialorder %v3502_v3, 8.507059e+37  ;;  %v8436_v26 = vld [vmem:[#allocation7 + $0xe0] sm:$0xf0]  ;;  %v9333_v3 = vld [vmem:[#allocation7 + $0x9c] sm:$0xf0] }
 0x60e   :  { %v9740_v57 = vpop.eup %9739  ;;  %v3469_v49 = vmul.f32 %v9738_v10, %v3460_v20  ;;  %v3525_v2 = vor.u32 1.1754944e-38, %v3524_v48  ;;  %vm3523_vm6 = vcmp.eq.f32.partialorder %v3522_v50, 8.507059e+37 }
 0x60f   :  { %v3473_v23 = vadd.f32 1.0, %v9740_v57 }
 0x610   :  { %v3536_v51 = vpack.c.bf16 %v3469_v49, %v3469_v49  ;;  %v11715_v45 = vsel %vm272_vm2, %v3803_v32, %v3469_v49  ;;  %v9365_v32 = vld [vmem:[#allocation7 + $0x19c] sm:$0xf0] }
 0x611   :  { %v9742_v6 = vpop.eup %9741  ;;  %9745 = vrcp.f32 %v3473_v23  ;;  %v3485_v43 = vand.u32 2147483648, %v3473_v23  ;;  %v3483_v39 = vand.u32 2147483647, %v3473_v23  ;;  %vm3479_vm12 = vweird.f32 %v3473_v23 }
 0x612   :  { %v3494_v42 = vmul.f32 %v9742_v6, %v3492_v36  ;;  %v3538_v54 = vrot.slane %v3536_v51, 2  ;;  %v9744_v25 = vpop.eup %9743  ;;  %vm3499_vm8 = vweird.f32 %v9742_v6  ;;  %9747 = vtanh.f32 %v3402_v17  ;;  %v8532_v51 = vld [vmem:[#allocation7 + $0x1a0] sm:$0xf0]  ;;  %v9341_v17 = vld [vmem:[#allocation7 + $0xdc] sm:$0xf0] }
 0x613   :  { %v3514_v38 = vmul.f32 %v9744_v25, %v11708_v30  ;;  %vm3500_vm10 = vmor %vm3498_vm9, %vm3499_vm8  ;;  %v3486_v8 = vor.u32 1.1754944e-38, %v3485_v43  ;;  %vm3484_vm15 = vcmp.eq.f32.partialorder %v3483_v39, 8.507059e+37  ;;  %vm3519_vm1 = vweird.f32 %v9744_v25  ;;  %v9329_v43 = vld [vmem:[#allocation7 + $0x84] sm:$0xf] }
 0x614   :  { %v3495_v1 = vsub.f32 1.0, %v3494_v42  ;;  %3548 = vmatmul.bf16.vlgmr.msrb.gmra.mxu3 %v3538_v54  ;;  %3561 = vmatmul.bf16.vlgmr.msra.gmra.mxu1 %v3538_v54  ;;  %vm3520_vm5 = vmor %vm3518_vm4, %vm3519_vm1  ;;  %v8531_v30 = vor.u32 %v9365_v32, %v8530_v13  ;;  %v8498_v42 = vld [vmem:[#allocation7 + $0x140] sm:$0xf]  ;;  %v8404_v39 = vld [vmem:[#allocation7 + $0xa0] sm:$0xf0] }
 0x615   :  { %3574 = vmatmul.bf16.vlgmr.msra.gmra.mxu2 %v3538_v54  ;;  %3587 = vmatmul.bf16.vlgmr.msra.gmra.mxu0 %v3538_v54  ;;  %v3515_v52 = vsub.f32 1.0, %v3514_v38  ;;  %v9357_v54 = vld [vmem:[#allocation7 + $0x15c] sm:$0xf0]  ;;  %v8820_v32 = vld [vmem:[#allocation7 + $0x3e0] sm:$0xf0] }
 0x616   :  { %v3496_v12 = vmul.f32 %v9742_v6, %v3495_v1  ;;  %4600 = vmatpush.bf16.msrb.mxu3 %v8563_v19  ;;  %4628 = vmatpush.bf16.msra.mxu2 %v8567_v44  ;;  %v8499_v1 = vor.u32 %v9357_v54, %v8498_v42  ;;  %v8466_v19 = vld [vmem:[#allocation7 + $0x100] sm:$0xf]  ;;  %v9362_v42 = vld [vmem:[#allocation7 + $0x18c] sm:$0xf] }
 0x617   :  { %v9746_v46 = vpop.eup %9745  ;;  %v3516_v28 = vmul.f32 %v9744_v25, %v3515_v52  ;;  %v9325_v52 = vld [vmem:[#allocation7 + $0x5c] sm:$0xf0]  ;;  %v8540_v54 = vld [vmem:[#allocation7 + $0x1a8] sm:$0xf0] }
 0x618   :  { %v3475_v27 = vmul.f32 %v9746_v46, %v3473_v23  ;;  %v3497_v55 = vadd.f32 %v9742_v6, %v3496_v12  ;;  %vm3480_vm11 = vweird.f32 %v9746_v46  ;;  %v9748_v58 = vpop.eup %9747  ;;  %v9361_v23 = vld [vmem:[#allocation7 + $0x184] sm:$0xf]  ;;  %v8543_v14 = vor.u32 %v9362_v42, %v8540_v54  ;;  %v8690_v54 = vld [vmem:[#allocation7 + $0x2c0] sm:$0xf] }
 0x619   :  { %vm3481_vm14 = vmor %vm3479_vm12, %vm3480_vm11  ;;  %v3517_v36 = vadd.f32 %v9744_v25, %v3516_v28  ;;  %v8468_v12 = vld [vmem:[#allocation7 + $0x120] sm:$0xf0] }
 0x61a   :  { %v3476_v59 = vsub.f32 1.0, %v3475_v27  ;;  %v3501_v62 = vsel %vm3500_vm10, %v9742_v6, %v3497_v55  ;;  %v8535_v6 = vor.u32 %v9361_v23, %v8532_v51  ;;  %4601 = vmatpush.bf16.msrb.mxu3 %v8531_v30  ;;  %v8471_v44 = vor.u32 %v9345_v63, %v8468_v12  ;;  %v9337_v27 = vld [vmem:[#allocation7 + $0xc4] sm:$0xf]  ;;  %v8538_v23 = vld [vmem:[#allocation7 + $0x188] sm:$0xf] }
 0x61b   :  { %v3506_v60 = vsel %vm3503_vm13, %v3505_v33, %v3501_v62  ;;  %v3521_v47 = vsel %vm3520_vm5, %v9744_v25, %v3517_v36  ;;  %v8467_v25 = vor.u32 %v9349_v15, %v8466_v19  ;;  %v8439_v38 = vor.u32 %v9337_v27, %v8436_v26  ;;  %v8370_v33 = vld [vmem:[#allocation7 + $0x40] sm:$0xf]  ;;  %v9313_v28 = vld [vmem:[#allocation7 + $0x4] sm:$0xf]  ;;  %v9374_v36 = vld [vmem:[#allocation7 + $0x1e4] sm:$0xf0] }
 0x61c   :  { %v3477_v11 = vmul.f32 %v9746_v46, %v3476_v59  ;;  %v3531_v18 = vmul.f32 %v3529_v4, %v3506_v60  ;;  %v3526_v10 = vsel %vm3523_vm6, %v3525_v2, %v3521_v47  ;;  %4629 = vmatpush.bf16.msra.mxu2 %v8535_v6  ;;  %v8402_v59 = vld [vmem:[#allocation7 + $0x80] sm:$0xf]  ;;  %v8407_v62 = vor.u32 %v9329_v43, %v8404_v39  ;;  %v8372_v60 = vld [vmem:[#allocation7 + $0x60] sm:$0xf0]  ;;  %v9370_v47 = vld [vmem:[#allocation7 + $0x1cc] sm:$0xf] }
 0x61d   :  { %v8572_v2 = vld [vmem:[#allocation7 + $0x1e8] sm:$0xf0]  ;;  %v9366_v30 = vld [vmem:[#allocation7 + $0x1a4] sm:$0xf0]  ;;  %v9425_v19 = vld [vmem:[#allocation7 + $0x384] sm:$0xf] }
 0x61e   :  { %v3478_v5 = vadd.f32 %v9746_v46, %v3477_v11  ;;  %4602 = vmatpush.bf16.msrb.mxu3 %v8499_v1  ;;  %v8403_v11 = vor.u32 %v9333_v3, %v8402_v59  ;;  %v8539_v6 = vor.u32 %v9366_v30, %v8538_v23  ;;  %v8788_v12 = vld [vmem:[#allocation7 + $0x3a0] sm:$0xf0]  ;;  %v9358_v27 = vld [vmem:[#allocation7 + $0x164] sm:$0xf0]  ;;  %v8508_v59 = vld [vmem:[#allocation7 + $0x168] sm:$0xf0] }
 0x61f   :  { %v9421_v39 = vld [vmem:[#allocation7 + $0x35c] sm:$0xf0]  ;;  %v9338_v23 = vld [vmem:[#allocation7 + $0xcc] sm:$0xf] }
 0x620   :  { %v3482_v16 = vsel %vm3481_vm14, %v9746_v46, %v3478_v5  ;;  %4630 = vmatpush.bf16.msra.mxu2 %v8503_v37  ;;  %v8434_v46 = vld [vmem:[#allocation7 + $0xc0] sm:$0xf]  ;;  %v9321_v5 = vld [vmem:[#allocation7 + $0x44] sm:$0xf]  ;;  %v8444_v30 = vld [vmem:[#allocation7 + $0xe8] sm:$0xf0] }
 0x621   :  { %v3487_v9 = vsel %vm3484_vm15, %v3486_v8, %v3482_v16  ;;  %v8435_v55 = vor.u32 %v9341_v17, %v8434_v46  ;;  %v8371_v8 = vor.u32 %v9325_v52, %v8370_v33  ;;  %v8375_v4 = vor.u32 %v9321_v5, %v8372_v60  ;;  %v8338_v16 = vld [vmem:[#allocation7] sm:$0xf]  ;;  %v8756_v5 = vld [vmem:[#allocation7 + $0x360] sm:$0xf0] }
 0x622   :  { %v3532_v29 = vmul.f32 %v9748_v58, %v3487_v9  ;;  %4603 = vmatpush.bf16.msrb.mxu3 %v8467_v25  ;;  %v9317_v58 = vld [vmem:[#allocation7 + $0x1c] sm:$0xf0]  ;;  %v8791_v17 = vor.u32 %v9425_v19, %v8788_v12  ;;  %v8447_v42 = vor.u32 %v9338_v23, %v8444_v30  ;;  %v8410_v19 = vld [vmem:[#allocation7 + $0x88] sm:$0xf] }
 0x623   :  { %v8339_v9 = vor.u32 %v9317_v58, %v8338_v16  ;;  %v9429_v37 = vld [vmem:[#allocation7 + $0x39c] sm:$0xf0]  ;;  %v9346_v58 = vld [vmem:[#allocation7 + $0x10c] sm:$0xf] }
 0x624   :  { %v11720_v34 = vadd.f32 %v3532_v29, %v3531_v18  ;;  %4631 = vmatpush.bf16.msra.mxu2 %v8471_v44  ;;  %v8340_v18 = vld [vmem:[#allocation7 + $0x20] sm:$0xf0]  ;;  %v8570_v29 = vld [vmem:[#allocation7 + $0x1c8] sm:$0xf]  ;;  %v8787_v25 = vor.u32 %v9429_v37, %v8786_v41 }
 0x625   :  { %v8343_v48 = vor.u32 %v9313_v28, %v8340_v18  ;;  %v8571_v50 = vor.u32 %v9374_v36, %v8570_v29  ;;  %v8506_v44 = vld [vmem:[#allocation7 + $0x148] sm:$0xf]  ;;  %v8476_v18 = vld [vmem:[#allocation7 + $0x128] sm:$0xf0]  ;;  %v8692_v37 = vld [vmem:[#allocation7 + $0x2e0] sm:$0xf0] }
 0x626   :  { %9749 = vtanh.f32 %v11720_v34  ;;  %4604 = vmatpush.bf16.msrb.mxu3 %v8435_v55  ;;  %v9354_v55 = vld [vmem:[#allocation7 + $0x14c] sm:$0xf]  ;;  %v8479_v36 = vor.u32 %v9346_v58, %v8476_v18  ;;  %v8626_v58 = vld [vmem:[#allocation7 + $0x240] sm:$0xf] }
 0x627   :  { %v8511_v43 = vor.u32 %v9354_v55, %v8508_v59  ;;  %v8658_v59 = vld [vmem:[#allocation7 + $0x280] sm:$0xf] }
 0x628   :  { %4632 = vmatpush.bf16.msra.mxu2 %v8439_v38  ;;  %v8507_v38 = vor.u32 %v9358_v27, %v8506_v44  ;;  %v8412_v27 = vld [vmem:[#allocation7 + $0xa8] sm:$0xf0] }
 0x62a   :  { %4605 = vmatpush.bf16.msrb.mxu3 %v8403_v11  ;;  %v8754_v11 = vld [vmem:[#allocation7 + $0x340] sm:$0xf] }
 0x62b   :  { %v8755_v52 = vor.u32 %v9421_v39, %v8754_v11  ;;  %v9393_v11 = vld [vmem:[#allocation7 + $0x284] sm:$0xf] }
 0x62c   :  { %v9750_v24 = vpop.eup %9749  ;;  %4633 = vmatpush.bf16.msra.mxu2 %v8407_v62  ;;  %v9417_v62 = vld [vmem:[#allocation7 + $0x344] sm:$0xf] }
 0x62d   :  { %v11726_v20 = vmul.f32 %v9750_v24, %v3526_v10  ;;  %v8575_v24 = vor.u32 %v9370_v47, %v8572_v2  ;;  %v8818_v10 = vld [vmem:[#allocation7 + $0x3c0] sm:$0xf]  ;;  %v8759_v16 = vor.u32 %v9417_v62, %v8756_v5  ;;  %v8660_v39 = vld [vmem:[#allocation7 + $0x2a0] sm:$0xf0]  ;;  %v9326_v5 = vld [vmem:[#allocation7 + $0x64] sm:$0xf0] }
 0x62e   :  { %4606 = vmatpush.bf16.msrb.mxu3 %v8371_v8  ;;  %v8474_v8 = vld [vmem:[#allocation7 + $0x108] sm:$0xf] }
 0x62f   :  { %v3608_v57 = vpack.c.bf16 %v11726_v20, %v11726_v20 }
 0x630   :  { %4634 = vmatpush.bf16.msra.mxu2 %v8375_v4 }
 0x631   :  { %v3610_v49 = vrot.slane %v3608_v57, 1  ;;  %v9437_v57 = vld [vmem:[#allocation7 + $0x3dc] sm:$0xf0] }
 0x632   :  { %4607 = vmatpush.bf16.msrb.mxu3 %v8339_v9  ;;  %v8819_v13 = vor.u32 %v9437_v57, %v8818_v10  ;;  %v9409_v10 = vld [vmem:[#allocation7 + $0x304] sm:$0xf] }
 0x633   :  { %3620 = vmatmul.bf16.vlgmr.msra.gmra.mxu3 %v3610_v49  ;;  %3633 = vmatmul.bf16.vlgmr.msrb.gmra.mxu1 %v3610_v49  ;;  %v8724_v57 = vld [vmem:[#allocation7 + $0x320] sm:$0xf0] }
 0x634   :  { %3646 = vmatmul.bf16.vlgmr.msrb.gmra.mxu2 %v3610_v49  ;;  %3659 = vmatmul.bf16.vlgmr.msrb.gmra.mxu0 %v3610_v49  ;;  %v9433_v49 = vld [vmem:[#allocation7 + $0x3c4] sm:$0xf] }
 0x635   :  { %4635 = vmatpush.bf16.msra.mxu2 %v8343_v48  ;;  %v8823_v51 = vor.u32 %v9433_v49, %v8820_v32  ;;  %4614 = vmatpush.bf16.msra.mxu1 %v8819_v13  ;;  %v8722_v48 = vld [vmem:[#allocation7 + $0x300] sm:$0xf]  ;;  %v8442_v49 = vld [vmem:[#allocation7 + $0xc8] sm:$0xf]  ;;  %v8727_v13 = vor.u32 %v9409_v10, %v8724_v57  ;;  %v9314_v10 = vld [vmem:[#allocation7 + $0xc] sm:$0xf] }
 0x636   :  { %4656 = vmatpush.bf16.msra.mxu3 %v8571_v50  ;;  %v9413_v50 = vld [vmem:[#allocation7 + $0x31c] sm:$0xf0]  ;;  %v9342_v32 = vld [vmem:[#allocation7 + $0xe4] sm:$0xf0]  ;;  %v8348_v57 = vld [vmem:[#allocation7 + $0x28] sm:$0xf0] }
 0x637   :  { %4642 = vmatpush.bf16.msra.mxu0 %v8823_v51  ;;  %v8351_v23 = vor.u32 %v9314_v10, %v8348_v57 }
 0x639   :  { %4684 = vmatpush.bf16.msrb.mxu2 %v8575_v24  ;;  %4615 = vmatpush.bf16.msra.mxu1 %v8787_v25  ;;  %v8723_v24 = vor.u32 %v9413_v50, %v8722_v48 }
 0x63a   :  { %4657 = vmatpush.bf16.msra.mxu3 %v8539_v6  ;;  %v8443_v6 = vor.u32 %v9342_v32, %v8442_v49 }
 0x63b   :  { %4643 = vmatpush.bf16.msra.mxu0 %v8791_v17  ;;  %v9330_v17 = vld [vmem:[#allocation7 + $0x8c] sm:$0xf] }
 0x63d   :  { %4685 = vmatpush.bf16.msrb.mxu2 %v8543_v14  ;;  %4616 = vmatpush.bf16.msra.mxu1 %v8755_v52  ;;  %v9405_v14 = vld [vmem:[#allocation7 + $0x2dc] sm:$0xf0]  ;;  %v8378_v52 = vld [vmem:[#allocation7 + $0x48] sm:$0xf] }
 0x63e   :  { %4658 = vmatpush.bf16.msra.mxu3 %v8507_v38  ;;  %v8691_v41 = vor.u32 %v9405_v14, %v8690_v54  ;;  %v8415_v38 = vor.u32 %v9330_v17, %v8412_v27  ;;  %v9381_v54 = vld [vmem:[#allocation7 + $0x21c] sm:$0xf0]  ;;  %v9377_v14 = vld [vmem:[#allocation7 + $0x204] sm:$0xf]  ;;  %v8828_v17 = vld [vmem:[#allocation7 + $0x3e8] sm:$0xf0] }
 0x63f   :  { %4644 = vmatpush.bf16.msra.mxu0 %v8759_v16  ;;  %v8380_v16 = vld [vmem:[#allocation7 + $0x68] sm:$0xf0] }
 0x641   :  { %4686 = vmatpush.bf16.msrb.mxu2 %v8511_v43  ;;  %4617 = vmatpush.bf16.msra.mxu1 %v8723_v24  ;;  %v9318_v24 = vld [vmem:[#allocation7 + $0x24] sm:$0xf0] }
 0x643   :  { %4645 = vmatpush.bf16.msra.mxu0 %v8727_v13 }
 0x645   :  { %4687 = vmatpush.bf16.msrb.mxu2 %v8479_v36  ;;  %4618 = vmatpush.bf16.msra.mxu1 %v8691_v41  ;;  %v8628_v36 = vld [vmem:[#allocation7 + $0x260] sm:$0xf0] }
 0x649   :  { %4688 = vmatpush.bf16.msrb.mxu2 %v8447_v42 }
 0x64d   :  { %4689 = vmatpush.bf16.msrb.mxu2 %v8415_v38 }
 0x691   :  { %v3562_v1 = vpop.f32.mrf.mxu1 }
 0x692   :  { %v3597_v15 = vrot.slane %v3562_v1, 2  ;;  %v3588_v63 = vpop.f32.mrf.mxu0  ;;  %v9401_v1 = vld [vmem:[#allocation7 + $0x2c4] sm:$0xf] }
 0x693   :  { %v3599_v46 = vrot.slane %v3588_v63, 2  ;;  %v8695_v44 = vor.u32 %v9401_v1, %v8692_v37  ;;  %v8596_v1 = vld [vmem:[#allocation7 + $0x220] sm:$0xf0] }
 0x694   :  { %v3605_v26 = vadd.f32 %v3597_v15, %v13876_v0  ;;  %v9350_v0 = vld [vmem:[#allocation7 + $0x124] sm:$0xf0] }
 0x695   :  { %v3607_v3 = vadd.f32 %v3599_v46, %v13877_v31  ;;  %v8475_v31 = vor.u32 %v9350_v0, %v8474_v8  ;;  %v9334_v15 = vld [vmem:[#allocation7 + $0xa4] sm:$0xf0]  ;;  %4646 = vmatpush.bf16.msra.mxu0 %v8695_v44 }
 0x696   :  { %v8331_v33 = vmul.f32 -1.442695, %v3605_v26  ;;  %v8411_v46 = vor.u32 %v9334_v15, %v8410_v19  ;;  %v8599_v19 = vor.u32 %v9377_v14, %v8596_v1  ;;  %v8826_v15 = vld [vmem:[#allocation7 + $0x3c8] sm:$0xf]  ;;  %v9410_v14 = vld [vmem:[#allocation7 + $0x30c] sm:$0xf] }
 0x697   :  { %v8332_v60 = vmul.f32 -1.442695, %v3607_v3  ;;  %v3549_v4 = vpop.f32.mrf.mxu3  ;;  %4659 = vmatpush.bf16.msra.mxu3 %v8475_v31  ;;  %v9397_v3 = vld [vmem:[#allocation7 + $0x29c] sm:$0xf0]  ;;  %v9385_v31 = vld [vmem:[#allocation7 + $0x244] sm:$0xf] }
 0x698   :  { %9751 = vpow2.f32 %v8331_v33  ;;  %v3596_v28 = vrot.slane %v3549_v4, 2  ;;  %v11732_v9 = vpop.f32.mrf.mxu2  ;;  %v8659_v43 = vor.u32 %v9397_v3, %v8658_v59  ;;  %v8663_v33 = vor.u32 %v9393_v11, %v8660_v39  ;;  %v9322_v4 = vld [vmem:[#allocation7 + $0x4c] sm:$0xf]  ;;  %v8794_v11 = vld [vmem:[#allocation7 + $0x388] sm:$0xf] }
 0x699   :  { %9753 = vpow2.f32 %v8332_v60  ;;  %v3564_v29 = vpop.f32.mrf.mxu1  ;;  %v8379_v60 = vor.u32 %v9326_v5, %v8378_v52  ;;  %v8383_v0 = vor.u32 %v9322_v4, %v8380_v16  ;;  %v9430_v39 = vld [vmem:[#allocation7 + $0x3a4] sm:$0xf0]  ;;  %v9426_v4 = vld [vmem:[#allocation7 + $0x38c] sm:$0xf] }
 0x69a   :  { %v3604_v47 = vadd.f32 %v3596_v28, %v13878_v56  ;;  %v3590_v2 = vpop.f32.mrf.mxu0  ;;  %4619 = vmatpush.bf16.msra.mxu1 %v8659_v43  ;;  %4647 = vmatpush.bf16.msra.mxu0 %v8663_v33  ;;  %v9389_v28 = vld [vmem:[#allocation7 + $0x25c] sm:$0xf0]  ;;  %v3598_v29 = vrot.slane %v11732_v9, 2  ;;  %v8796_v16 = vld [vmem:[#allocation7 + $0x3a8] sm:$0xf0] }
 0x69b   :  { %4660 = vmatpush.bf16.msra.mxu3 %v8443_v6  ;;  %4690 = vmatpush.bf16.msrb.mxu2 %v8383_v0  ;;  %v8627_v50 = vor.u32 %v9389_v28, %v8626_v58  ;;  %v8346_v2 = vld [vmem:[#allocation7 + $0x8] sm:$0xf]  ;;  %v8732_v1 = vld [vmem:[#allocation7 + $0x328] sm:$0xf0] }
 0x69c   :  { %v8330_v51 = vmul.f32 -1.442695, %v3604_v47  ;;  %v8631_v47 = vor.u32 %v9385_v31, %v8628_v36  ;;  %v8347_v32 = vor.u32 %v9318_v24, %v8346_v2  ;;  %v3606_v42 = vadd.f32 %v3598_v29, %v13879_v40  ;;  %v8762_v36 = vld [vmem:[#allocation7 + $0x348] sm:$0xf]  ;;  %v9418_v2 = vld [vmem:[#allocation7 + $0x34c] sm:$0xf] }
 0x69d   :  { %v8799_v29 = vor.u32 %v9426_v4, %v8796_v16  ;;  %v8764_v24 = vld [vmem:[#allocation7 + $0x368] sm:$0xf0] }
 0x69e   :  { %v9752_v56 = vpop.eup %9751  ;;  %9755 = vpow2.f32 %v8330_v51  ;;  %4620 = vmatpush.bf16.msra.mxu1 %v8627_v50  ;;  %4648 = vmatpush.bf16.msra.mxu0 %v8631_v47  ;;  %v8594_v51 = vld [vmem:[#allocation7 + $0x200] sm:$0xf]  ;;  %v8767_v57 = vor.u32 %v9418_v2, %v8764_v24  ;;  %v9394_v16 = vld [vmem:[#allocation7 + $0x28c] sm:$0xf]  ;;  %v8634_v2 = vld [vmem:[#allocation7 + $0x248] sm:$0xf] }
 0x69f   :  { %v9754_v63 = vpop.eup %9753  ;;  %v11735_v25 = vadd.f32 1.0, %v9752_v56  ;;  %v3551_v12 = vpop.f32.mrf.mxu3  ;;  %4661 = vmatpush.bf16.msra.mxu3 %v8411_v46  ;;  %4691 = vmatpush.bf16.msrb.mxu2 %v8351_v23  ;;  %v8595_v37 = vor.u32 %v9381_v54, %v8594_v51  ;;  %v9390_v24 = vld [vmem:[#allocation7 + $0x264] sm:$0xf0] }
 0x6a0   :  { %v11737_v55 = vadd.f32 1.0, %v9754_v63  ;;  %v3577_v26 = vpop.f32.mrf.mxu2  ;;  %v9438_v63 = vld [vmem:[#allocation7 + $0x3e4] sm:$0xf0]  ;;  %v9434_v12 = vld [vmem:[#allocation7 + $0x3cc] sm:$0xf] }
 0x6a1   :  { %9757 = vrcp.f32 %v11735_v25  ;;  %v3702_v9 = vand.u32 2147483648, %v11735_v25  ;;  %v3700_v30 = vand.u32 2147483647, %v11735_v25  ;;  %v8827_v46 = vor.u32 %v9438_v63, %v8826_v15 }
 0x6a2   :  { %9759 = vrcp.f32 %v11737_v55  ;;  %4621 = vmatpush.bf16.msra.mxu1 %v8595_v37  ;;  %4649 = vmatpush.bf16.msra.mxu0 %v8599_v19  ;;  %v8831_v38 = vor.u32 %v9434_v12, %v8828_v17  ;;  %vm3696_vm9 = vweird.f32 %v11735_v25  ;;  %v8735_v63 = vor.u32 %v9410_v14, %v8732_v1 }
 0x6a3   :  { %4662 = vmatpush.bf16.msra.mxu3 %v8379_v60  ;;  %v3703_v27 = vor.u32 1.1754944e-38, %v3702_v9  ;;  %vm11767_vm10 = vcmp.eq.f32.partialorder %v3700_v30, 8.507059e+37  ;;  %v8795_v60 = vor.u32 %v9430_v39, %v8794_v11  ;;  %v8730_v9 = vld [vmem:[#allocation7 + $0x308] sm:$0xf]  ;;  %vm3716_vm4 = vweird.f32 %v11737_v55 }
 0x6a4   :  { %v9756_v62 = vpop.eup %9755  ;;  %v9414_v30 = vld [vmem:[#allocation7 + $0x324] sm:$0xf0]  ;;  %v8635_v14 = vor.u32 %v9390_v24, %v8634_v2  ;;  %v9339_v24 = vld [vmem:[#allocation7 + $0xd4] sm:$0xf] }
 0x6a5   :  { %v11741_v8 = vadd.f32 1.0, %v9756_v62  ;;  %v8731_v19 = vor.u32 %v9414_v30, %v8730_v9  ;;  %v13891_v9 = vld [vmem:[#allocation69_spill] sm:$0xff] }
 0x6a6   :  { %4670 = vmatpush.bf16.msrb.mxu1 %v8827_v46  ;;  %4698 = vmatpush.bf16.msrb.mxu0 %v8831_v38  ;;  %v9402_v46 = vld [vmem:[#allocation7 + $0x2cc] sm:$0xf]  ;;  %v3722_v38 = vand.u32 2147483648, %v11737_v55 }
 0x6a7   :  { %v11743_v18 = vpop.eup %9757  ;;  %9761 = vrcp.f32 %v11741_v8  ;;  %4663 = vmatpush.bf16.msra.mxu3 %v8347_v32  ;;  %v3681_v26 = vand.u32 2147483647, %v11741_v8  ;;  %vm3677_vm13 = vweird.f32 %v11741_v8  ;;  %v3727_v32 = vrot.slane %v11699_v7, 6 }
 0x6a8   :  { %v3692_v48 = vmul.f32 %v11743_v18, %v11735_v25  ;;  %v11749_v49 = vpop.eup %9759  ;;  %vm3697_vm8 = vweird.f32 %v11743_v18  ;;  %9763 = vtanh.f32 %v3606_v42  ;;  %v3683_v25 = vand.u32 2147483648, %v11741_v8 }
 0x6a9   :  { %v11759_v41 = vmul.f32 %v11749_v49, %v11737_v55  ;;  %vm11773_vm11 = vmor %vm3696_vm9, %vm3697_vm8  ;;  %vm3682_vm15 = vcmp.eq.f32.partialorder %v3681_v26, 8.507059e+37  ;;  %vm3717_vm1 = vweird.f32 %v11749_v49  ;;  %v3723_v4 = vor.u32 1.1754944e-38, %v3722_v38 }
 0x6aa   :  { %v3693_v13 = vsub.f32 1.0, %v3692_v48  ;;  %v9422_v48 = vld [vmem:[#allocation7 + $0x364] sm:$0xf0]  ;;  %4671 = vmatpush.bf16.msrb.mxu1 %v8795_v60  ;;  %4699 = vmatpush.bf16.msrb.mxu0 %v8799_v29  ;;  %vm11809_vm5 = vmor %vm3716_vm4, %vm3717_vm1 }
 0x6ab   :  { %v3713_v33 = vsub.f32 1.0, %v11759_v41  ;;  %v8763_v47 = vor.u32 %v9422_v48, %v8762_v36  ;;  %v9398_v60 = vld [vmem:[#allocation7 + $0x2a4] sm:$0xf0] }
 0x6ac   :  { %v3694_v6 = vmul.f32 %v11743_v18, %v3693_v13 }
 0x6ad   :  { %v11755_v56 = vpop.eup %9761  ;;  %v3714_v51 = vmul.f32 %v11749_v49, %v3713_v33  ;;  %v8666_v33 = vld [vmem:[#allocation7 + $0x288] sm:$0xf] }
 0x6ae   :  { %v3673_v40 = vmul.f32 %v11755_v56, %v11741_v8  ;;  %v3695_v44 = vadd.f32 %v11743_v18, %v3694_v6  ;;  %vm3678_vm12 = vweird.f32 %v11755_v56  ;;  %v9764_v13 = vpop.eup %9763  ;;  %4672 = vmatpush.bf16.msrb.mxu1 %v8763_v47  ;;  %4700 = vmatpush.bf16.msrb.mxu0 %v8767_v57 }
 0x6af   :  { %vm11788_vm14 = vmor %vm3677_vm13, %vm3678_vm12 }
 0x6b0   :  { %v3674_v59 = vsub.f32 1.0, %v3673_v40  ;;  %v3634_v43 = vpop.f32.mrf.mxu1  ;;  %v3699_v58 = vsel %vm11773_vm11, %v11743_v18, %v3695_v44  ;;  %v3684_v18 = vor.u32 1.1754944e-38, %v3683_v25  ;;  %v8698_v40 = vld [vmem:[#allocation7 + $0x2c8] sm:$0xf] }
 0x6b1   :  { %v3665_v52 = vadd.f32 %v3634_v43, %v13840_v53  ;;  %v3660_v5 = vpop.f32.mrf.mxu0  ;;  %v9406_v44 = vld [vmem:[#allocation7 + $0x2e4] sm:$0xf0]  ;;  %v3720_v43 = vand.u32 2147483647, %v11737_v55  ;;  %v8667_v55 = vor.u32 %v9398_v60, %v8666_v33  ;;  %v8482_v33 = vld [vmem:[#allocation7 + $0x110] sm:$0xf] }
 0x6b2   :  { %v3675_v0 = vmul.f32 %v11755_v56, %v3674_v59  ;;  %v3667_v28 = vadd.f32 %v3660_v5, %v13796_v22  ;;  %v3704_v22 = vsel %vm11767_vm10, %v3703_v27, %v3699_v58  ;;  %v8700_v27 = vld [vmem:[#allocation7 + $0x2e8] sm:$0xf0]  ;;  %4673 = vmatpush.bf16.msrb.mxu1 %v8731_v19  ;;  %v8699_v3 = vor.u32 %v9406_v44, %v8698_v40 }
 0x6b3   :  { %v8334_v31 = vmul.f32 -1.442695, %v3665_v52  ;;  %v3729_v41 = vmul.f32 %v3727_v32, %v3704_v22  ;;  %4701 = vmatpush.bf16.msrb.mxu0 %v8735_v63  ;;  %v8703_v11 = vor.u32 %v9402_v46, %v8700_v27  ;;  %vm3721_vm6 = vcmp.eq.f32.partialorder %v3720_v43, 8.507059e+37  ;;  %v8636_v22 = vld [vmem:[#allocation7 + $0x268] sm:$0xf0] }
 0x6b4   :  { %v3676_v53 = vadd.f32 %v11755_v56, %v3675_v0  ;;  %v8335_v50 = vmul.f32 -1.442695, %v3667_v28  ;;  %v8668_v0 = vld [vmem:[#allocation7 + $0x2a8] sm:$0xf0]  ;;  %v8578_v28 = vld [vmem:[#allocation7 + $0x1d0] sm:$0xf] }
 0x6b5   :  { %9765 = vpow2.f32 %v8334_v31  ;;  %v9375_v31 = vld [vmem:[#allocation7 + $0x1ec] sm:$0xf0]  ;;  %v8671_v29 = vor.u32 %v9394_v16, %v8668_v0  ;;  %v9378_v40 = vld [vmem:[#allocation7 + $0x20c] sm:$0xf]  ;;  %v8516_v27 = vld [vmem:[#allocation7 + $0x170] sm:$0xf0] }
 0x6b6   :  { %v3680_v8 = vsel %vm11788_vm14, %v11755_v56, %v3676_v53  ;;  %9767 = vpow2.f32 %v8335_v50  ;;  %v3621_v23 = vpop.f32.mrf.mxu3  ;;  %4674 = vmatpush.bf16.msrb.mxu1 %v8699_v3  ;;  %v8580_v50 = vld [vmem:[#allocation7 + $0x1f0] sm:$0xf0]  ;;  %v8579_v32 = vor.u32 %v9375_v31, %v8578_v28  ;;  %v8604_v44 = vld [vmem:[#allocation7 + $0x228] sm:$0xf0] }
 0x6b7   :  { %v3685_v6 = vsel %vm3682_vm15, %v3684_v18, %v3680_v8  ;;  %v3664_v42 = vadd.f32 %v3621_v23, %v13797_v61  ;;  %v11800_v54 = vpop.f32.mrf.mxu2  ;;  %v3715_v61 = vadd.f32 %v11749_v49, %v3714_v51  ;;  %4702 = vmatpush.bf16.msrb.mxu0 %v8703_v11  ;;  %v9386_v18 = vld [vmem:[#allocation7 + $0x24c] sm:$0xf]  ;;  %v8546_v23 = vld [vmem:[#allocation7 + $0x190] sm:$0xf]  ;;  %v8607_v38 = vor.u32 %v9378_v40, %v8604_v44  ;;  %v8484_v16 = vld [vmem:[#allocation7 + $0x130] sm:$0xf0] }
 0x6b8   :  { %v3730_v7 = vmul.f32 %v9764_v13, %v3685_v6  ;;  %v3636_v37 = vpop.f32.mrf.mxu1  ;;  %v9367_v51 = vld [vmem:[#allocation7 + $0x1ac] sm:$0xf0]  ;;  %v9363_v6 = vld [vmem:[#allocation7 + $0x194] sm:$0xf]  ;;  %v8492_v40 = vld [vmem:[#allocation7 + $0x138] sm:$0xf0] }
 0x6b9   :  { %v8333_v56 = vmul.f32 -1.442695, %v3664_v42  ;;  %v3662_v15 = vpop.f32.mrf.mxu0  ;;  %v3719_v25 = vsel %vm11809_vm5, %v11749_v49, %v3715_v61  ;;  %v9371_v49 = vld [vmem:[#allocation7 + $0x1d4] sm:$0xf]  ;;  %v8602_v37 = vld [vmem:[#allocation7 + $0x208] sm:$0xf] }
 0x6ba   :  { %v3731_v12 = vadd.f32 %v3730_v7, %v3729_v41  ;;  %v3724_v48 = vsel %vm3721_vm6, %v3723_v4, %v3719_v25  ;;  %4675 = vmatpush.bf16.msrb.mxu1 %v8667_v55  ;;  %v8583_v8 = vor.u32 %v9371_v49, %v8580_v50  ;;  %v8548_v42 = vld [vmem:[#allocation7 + $0x1b0] sm:$0xf0]  ;;  %v8639_v41 = vor.u32 %v9386_v18, %v8636_v22  ;;  %v9359_v7 = vld [vmem:[#allocation7 + $0x16c] sm:$0xf0] }
 0x6bb   :  { %v9766_v17 = vpop.eup %9765  ;;  %9769 = vpow2.f32 %v8333_v56  ;;  %4703 = vmatpush.bf16.msrb.mxu0 %v8671_v29  ;;  %v8547_v15 = vor.u32 %v9367_v51, %v8546_v23  ;;  %v8551_v63 = vor.u32 %v9363_v6, %v8548_v42  ;;  %v9355_v61 = vld [vmem:[#allocation7 + $0x154] sm:$0xf]  ;;  %v8450_v49 = vld [vmem:[#allocation7 + $0xd0] sm:$0xf] }
 0x6bc   :  { %v9768_v26 = vpop.eup %9767  ;;  %9771 = vtanh.f32 %v3731_v12  ;;  %v11805_v59 = vadd.f32 1.0, %v9766_v17  ;;  %v9382_v12 = vld [vmem:[#allocation7 + $0x224] sm:$0xf0]  ;;  %v3666_v17 = vadd.f32 %v11800_v54, %v13799_v21  ;;  %v8519_v25 = vor.u32 %v9355_v61, %v8516_v27  ;;  %v9347_v55 = vld [vmem:[#allocation7 + $0x114] sm:$0xf] }
 0x6bd   :  { %v11817_v52 = vadd.f32 1.0, %v9768_v26  ;;  %v8603_v26 = vor.u32 %v9382_v12, %v8602_v37  ;;  %v9343_v50 = vld [vmem:[#allocation7 + $0xec] sm:$0xf0]  ;;  %v8452_v18 = vld [vmem:[#allocation7 + $0xf0] sm:$0xf0] }
 0x6be   :  { %9773 = vrcp.f32 %v11805_v59  ;;  %v3623_v62 = vpop.f32.mrf.mxu3  ;;  %4676 = vmatpush.bf16.msrb.mxu1 %v8635_v14  ;;  %v3768_v11 = vand.u32 2147483648, %v11805_v59  ;;  %vm3762_vm9 = vweird.f32 %v11805_v59  ;;  %v3766_v54 = vand.u32 2147483647, %v11805_v59  ;;  %v8418_v51 = vld [vmem:[#allocation7 + $0x90] sm:$0xf] }
 0x6bf   :  { %v3649_v5 = vpop.f32.mrf.mxu2  ;;  %9775 = vrcp.f32 %v11817_v52  ;;  %4704 = vmatpush.bf16.msrb.mxu0 %v8639_v41  ;;  %v9335_v6 = vld [vmem:[#allocation7 + $0xac] sm:$0xf0]  ;;  %v9331_v42 = vld [vmem:[#allocation7 + $0x94] sm:$0xf]  ;;  %vm3782_vm4 = vweird.f32 %v11817_v52 }
 0x6c0   :  { %v9351_v5 = vld [vmem:[#allocation7 + $0x12c] sm:$0xf0]  ;;  %v3769_v28 = vor.u32 1.1754944e-38, %v3768_v11  ;;  %vm3767_vm13 = vcmp.eq.f32.partialorder %v3766_v54, 8.507059e+37  ;;  %v8420_v14 = vld [vmem:[#allocation7 + $0xb0] sm:$0xf0] }
 0x6c1   :  { %v9770_v58 = vpop.eup %9769  ;;  %v8483_v29 = vor.u32 %v9351_v5, %v8482_v33  ;;  %v8423_v37 = vor.u32 %v9331_v42, %v8420_v14  ;;  %v8388_v12 = vld [vmem:[#allocation7 + $0x70] sm:$0xf0]  ;;  %v9319_v27 = vld [vmem:[#allocation7 + $0x2c] sm:$0xf0]  ;;  %v9372_v54 = vld [vmem:[#allocation7 + $0x1dc] sm:$0xf] }
 0x6c2   :  { %v9772_v36 = vpop.eup %9771  ;;  %v11819_v53 = vadd.f32 1.0, %v9770_v58  ;;  %4677 = vmatpush.bf16.msrb.mxu1 %v8603_v26  ;;  %v13896_v26 = vld [vmem:[#allocation68_spill] sm:$0xff]  ;;  %v8356_v11 = vld [vmem:[#allocation7 + $0x30] sm:$0xf0]  ;;  %v8524_v42 = vld [vmem:[#allocation7 + $0x178] sm:$0xf0] }
 0x6c3   :  { %v3733_v47 = vmul.f32 %v9772_v36, %v3724_v48  ;;  %4705 = vmatpush.bf16.msrb.mxu0 %v8607_v38  ;;  %v8487_v48 = vor.u32 %v9347_v55, %v8484_v16  ;;  %v13897_v38 = vld [vmem:[#allocation67_spill] sm:$0xff]  ;;  %v13898_v5 = vld [vmem:[#allocation24_spill] sm:$0xff]  ;;  %v8834_v16 = vld [vmem:[#allocation7 + $0x3d0] sm:$0xf] }
 0x6c4   :  { %v11822_v10 = vpop.eup %9773  ;;  %9777 = vrcp.f32 %v11819_v53  ;;  %v3749_v4 = vand.u32 2147483648, %v11819_v53  ;;  %v3747_v58 = vand.u32 2147483647, %v11819_v53  ;;  %vm3743_vm12 = vweird.f32 %v11819_v53 }
 0x6c5   :  { %v3805_v57 = vsel %vm156_vm0, %v11715_v45, %v3733_v47  ;;  %v3758_v13 = vmul.f32 %v11822_v10, %v11805_v59  ;;  %v8514_v45 = vld [vmem:[#allocation7 + $0x150] sm:$0xf]  ;;  %v11834_v19 = vpop.eup %9775  ;;  %vm3763_vm8 = vweird.f32 %v11822_v10  ;;  %9779 = vtanh.f32 %v3666_v17 }
 0x6c6   :  { %v11830_v30 = vpack.c.bf16 %v3805_v57, %v13891_v9  ;;  %v3778_v39 = vmul.f32 %v11834_v19, %v11817_v52  ;;  %v8515_v62 = vor.u32 %v9359_v7, %v8514_v45  ;;  %vm11847_vm10 = vmor %vm3762_vm9, %vm3763_vm8  ;;  %v3750_v47 = vor.u32 1.1754944e-38, %v3749_v4 }
 0x6c7   :  { %v3759_v1 = vsub.f32 1.0, %v3758_v13  ;;  %vm3748_vm15 = vcmp.eq.f32.partialorder %v3747_v58, 8.507059e+37  ;;  %v8455_v9 = vor.u32 %v9339_v24, %v8452_v18  ;;  %vm3783_vm1 = vweird.f32 %v11834_v19  ;;  %v13900_v18 = vld [vmem:[#allocation54_spill] sm:$0xff] }
 0x6c8   :  { %4608 = vmatmul.bf16.vlgmr.msrb.gmra.mxu3 %v11830_v30  ;;  %4636 = vmatmul.bf16.vlgmr.msra.gmra.mxu2 %v11830_v30  ;;  %v3779_v31 = vsub.f32 1.0, %v3778_v39  ;;  %v3786_v45 = vand.u32 2147483647, %v11817_v52  ;;  %v3788_v7 = vand.u32 2147483648, %v11817_v52  ;;  %vm11868_vm5 = vmor %vm3782_vm4, %vm3783_vm1  ;;  %v8354_v52 = vld [vmem:[#allocation7 + $0x10] sm:$0xf] }
 0x6c9   :  { %v3760_v56 = vmul.f32 %v11822_v10, %v3759_v1  ;;  %4712 = vmatpush.bf16.msrb.mxu3 %v8579_v32  ;;  %4740 = vmatpush.bf16.msra.mxu2 %v8583_v8  ;;  %v8586_v39 = vld [vmem:[#allocation7 + $0x1d8] sm:$0xf]  ;;  %v8355_v4 = vor.u32 %v9319_v27, %v8354_v52 }
 0x6ca   :  { %v9778_v46 = vpop.eup %9777  ;;  %v3780_v13 = vmul.f32 %v11834_v19, %v3779_v31  ;;  %vm3787_vm6 = vcmp.eq.f32.partialorder %v3786_v45, 8.507059e+37  ;;  %v9435_v31 = vld [vmem:[#allocation7 + $0x3d4] sm:$0xf] }
 0x6cb   :  { %v3739_v3 = vmul.f32 %v9778_v46, %v11819_v53  ;;  %v3761_v43 = vadd.f32 %v11822_v10, %v3760_v56  ;;  %vm3744_vm11 = vweird.f32 %v9778_v46  ;;  %v9780_v57 = vpop.eup %9779  ;;  %v8451_v53 = vor.u32 %v9343_v50, %v8450_v49  ;;  %v8386_v56 = vld [vmem:[#allocation7 + $0x50] sm:$0xf]  ;;  %v9368_v49 = vld [vmem:[#allocation7 + $0x1b4] sm:$0xf0]  ;;  %v9364_v50 = vld [vmem:[#allocation7 + $0x19c] sm:$0xf] }
 0x6cc   :  { %vm3745_vm14 = vmor %vm3743_vm12, %vm3744_vm11  ;;  %v3781_v41 = vadd.f32 %v11834_v19, %v3780_v13  ;;  %v8802_v13 = vld [vmem:[#allocation7 + $0x390] sm:$0xf] }
 0x6cd   :  { %v3740_v21 = vsub.f32 1.0, %v3739_v3  ;;  %4713 = vmatpush.bf16.msrb.mxu3 %v8547_v15  ;;  %4741 = vmatpush.bf16.msra.mxu2 %v8551_v63  ;;  %v3765_v59 = vsel %vm11847_vm10, %v11822_v10, %v3761_v43  ;;  %v3793_v10 = vrot.slane %v11720_v34, 2  ;;  %v8419_v34 = vor.u32 %v9335_v6, %v8418_v51  ;;  %v9327_v15 = vld [vmem:[#allocation7 + $0x6c] sm:$0xf0]  ;;  %v9323_v63 = vld [vmem:[#allocation7 + $0x54] sm:$0xf] }
 0x6ce   :  { %v3770_v2 = vsel %vm3767_vm13, %v3769_v28, %v3765_v59  ;;  %v3785_v44 = vsel %vm11868_vm5, %v11834_v19, %v3781_v41  ;;  %v8387_v17 = vor.u32 %v9327_v15, %v8386_v56  ;;  %v8391_v61 = vor.u32 %v9323_v63, %v8388_v12  ;;  %v9315_v43 = vld [vmem:[#allocation7 + $0x14] sm:$0xf]  ;;  %v8588_v19 = vld [vmem:[#allocation7 + $0x1f8] sm:$0xf0]  ;;  %v9360_v51 = vld [vmem:[#allocation7 + $0x174] sm:$0xf0] }
 0x6cf   :  { %v3741_v0 = vmul.f32 %v9778_v46, %v3740_v21  ;;  %v3795_v8 = vmul.f32 %v3793_v10, %v3770_v2  ;;  %v3809_v3 = vsel %vm341_vm3, %v13897_v38, %v13896_v26  ;;  %v9376_v21 = vld [vmem:[#allocation7 + $0x1f4] sm:$0xf0]  ;;  %v8359_v55 = vor.u32 %v9315_v43, %v8356_v11  ;;  %v9356_v6 = vld [vmem:[#allocation7 + $0x15c] sm:$0xf]  ;;  %v8770_v41 = vld [vmem:[#allocation7 + $0x350] sm:$0xf] }
 0x6d0   :  { %v3810_v60 = vsel %vm272_vm2, %v3809_v3, %v13898_v5  ;;  %v8587_v59 = vor.u32 %v9376_v21, %v8586_v39  ;;  %v8591_v28 = vor.u32 %v9372_v54, %v8588_v19  ;;  %v13899_v2 = vld [vmem:[#allocation70_spill] sm:$0xff]  ;;  %v9348_v12 = vld [vmem:[#allocation7 + $0x11c] sm:$0xf] }
 0x6d1   :  { %v3742_v36 = vadd.f32 %v9778_v46, %v3741_v0  ;;  %4714 = vmatpush.bf16.msrb.mxu3 %v8515_v62  ;;  %4742 = vmatpush.bf16.msra.mxu2 %v8519_v25  ;;  %v9439_v0 = vld [vmem:[#allocation7 + $0x3ec] sm:$0xf0]  ;;  %v3811_v24 = vsel %vm156_vm0, %v3810_v60, %v13899_v2  ;;  %v8772_v56 = vld [vmem:[#allocation7 + $0x370] sm:$0xf0]  ;;  %v8490_v15 = vld [vmem:[#allocation7 + $0x118] sm:$0xf]  ;;  %v8495_v27 = vor.u32 %v9348_v12, %v8492_v40 }
 0x6d2   :  { %v9352_v63 = vld [vmem:[#allocation7 + $0x134] sm:$0xf0]  ;;  %v9411_v26 = vld [vmem:[#allocation7 + $0x314] sm:$0xf]  ;;  %v9340_v11 = vld [vmem:[#allocation7 + $0xdc] sm:$0xf] }
 0x6d3   :  { %v3746_v22 = vsel %vm3745_vm14, %v9778_v46, %v3742_v36  ;;  %v3789_v46 = vor.u32 1.1754944e-38, %v3788_v7  ;;  %v8554_v36 = vld [vmem:[#allocation7 + $0x198] sm:$0xf]  ;;  %v8527_v7 = vor.u32 %v9356_v6, %v8524_v42  ;;  %v8491_v52 = vor.u32 %v9352_v63, %v8490_v15  ;;  %v8740_v38 = vld [vmem:[#allocation7 + $0x330] sm:$0xf0] }
 0x6d4   :  { %v3751_v32 = vsel %vm3748_vm15, %v3750_v47, %v3746_v22  ;;  %v8556_v47 = vld [vmem:[#allocation7 + $0x1b8] sm:$0xf0]  ;;  %v8458_v3 = vld [vmem:[#allocation7 + $0xd8] sm:$0xf]  ;;  %v8706_v21 = vld [vmem:[#allocation7 + $0x2d0] sm:$0xf] }
 0x6d5   :  { %v3796_v23 = vmul.f32 %v9780_v57, %v3751_v32  ;;  %4715 = vmatpush.bf16.msrb.mxu3 %v8483_v29  ;;  %4743 = vmatpush.bf16.msra.mxu2 %v8487_v48  ;;  %v3790_v33 = vsel %vm3787_vm6, %v3789_v46, %v3785_v44  ;;  %v8836_v29 = vld [vmem:[#allocation7 + $0x3f0] sm:$0xf0]  ;;  %v9431_v32 = vld [vmem:[#allocation7 + $0x3ac] sm:$0xf0]  ;;  %v9344_v43 = vld [vmem:[#allocation7 + $0xf4] sm:$0xf0] }
 0x6d6   :  { %v8839_v57 = vor.u32 %v9435_v31, %v8836_v29  ;;  %v8803_v14 = vor.u32 %v9431_v32, %v8802_v13  ;;  %v8460_v39 = vld [vmem:[#allocation7 + $0xf8] sm:$0xf0]  ;;  %v9407_v54 = vld [vmem:[#allocation7 + $0x2ec] sm:$0xf0]  ;;  %v8459_v19 = vor.u32 %v9344_v43, %v8458_v3  ;;  %v9403_v5 = vld [vmem:[#allocation7 + $0x2d4] sm:$0xf] }
 0x6d7   :  { %v3797_v1 = vadd.f32 %v3796_v23, %v3795_v8  ;;  %v9427_v8 = vld [vmem:[#allocation7 + $0x394] sm:$0xf]  ;;  %v9399_v31 = vld [vmem:[#allocation7 + $0x2ac] sm:$0xf0]  ;;  %v9324_v2 = vld [vmem:[#allocation7 + $0x5c] sm:$0xf] }
 0x6d8   :  { %4664 = vmatmul.bf16.vlgmr.msra.gmra.mxu3 %v11830_v30  ;;  %4692 = vmatmul.bf16.vlgmr.msrb.gmra.mxu2 %v11830_v30  ;;  %v8804_v23 = vld [vmem:[#allocation7 + $0x3b0] sm:$0xf0]  ;;  %v8962_v6 = vld [vmem:[#allocation8 + $0xe0] sm:$0xf]  ;;  %v9471_v42 = vld [vmem:[#allocation8 + $0xec] sm:$0xf0] }
 0x6d9   :  { %9781 = vtanh.f32 %v3797_v1  ;;  %4716 = vmatpush.bf16.msrb.mxu3 %v8451_v53  ;;  %4744 = vmatpush.bf16.msra.mxu2 %v8455_v9  ;;  %v8559_v53 = vor.u32 %v9364_v50, %v8556_v47  ;;  %v8522_v9 = vld [vmem:[#allocation7 + $0x158] sm:$0xf]  ;;  %v8807_v1 = vor.u32 %v9427_v8, %v8804_v23  ;;  %v8708_v60 = vld [vmem:[#allocation7 + $0x2f0] sm:$0xf0]  ;;  %v11896_v63 = vor.u32 %v9471_v42, %v8962_v6 }
 0x6da   :  { %v8523_v45 = vor.u32 %v9360_v51, %v8522_v9  ;;  %v8394_v50 = vld [vmem:[#allocation7 + $0x58] sm:$0xf]  ;;  %v9387_v13 = vld [vmem:[#allocation7 + $0x254] sm:$0xf]  ;;  %v9316_v9 = vld [vmem:[#allocation7 + $0x1c] sm:$0xf] }
 0x6db   :  { %v9328_v47 = vld [vmem:[#allocation7 + $0x74] sm:$0xf0]  ;;  %v8364_v51 = vld [vmem:[#allocation7 + $0x38] sm:$0xf0]  ;;  %v9379_v15 = vld [vmem:[#allocation7 + $0x214] sm:$0xf] }
 0x6dc   :  { %v8395_v32 = vor.u32 %v9328_v47, %v8394_v50  ;;  %v8362_v8 = vld [vmem:[#allocation7 + $0x18] sm:$0xf]  ;;  %13901 = vst [vmem:[#allocation58_spill] sm:$0xff] %v11896_v63  ;;  %v8612_v40 = vld [vmem:[#allocation7 + $0x230] sm:$0xf0] }
 0x6dd   :  { %4717 = vmatpush.bf16.msrb.mxu3 %v8419_v34  ;;  %4745 = vmatpush.bf16.msra.mxu2 %v8423_v37  ;;  %v9423_v34 = vld [vmem:[#allocation7 + $0x36c] sm:$0xf0]  ;;  %v9419_v37 = vld [vmem:[#allocation7 + $0x354] sm:$0xf]  ;;  %v9320_v23 = vld [vmem:[#allocation7 + $0x34] sm:$0xf0]  ;;  %v8615_v43 = vor.u32 %v9379_v15, %v8612_v40 }
 0x6de   :  { %v8771_v44 = vor.u32 %v9423_v34, %v8770_v41  ;;  %v8775_v46 = vor.u32 %v9419_v37, %v8772_v56  ;;  %v8610_v37 = vld [vmem:[#allocation7 + $0x210] sm:$0xf]  ;;  %v9460_v50 = vld [vmem:[#allocation8 + $0x94] sm:$0xf0] }
 0x6df   :  { %v9782_v62 = vpop.eup %9781  ;;  %v9383_v56 = vld [vmem:[#allocation7 + $0x22c] sm:$0xf0]  ;;  %v9408_v6 = vld [vmem:[#allocation7 + $0x2f4] sm:$0xf0] }
 0x6e0   :  { %v3799_v25 = vmul.f32 %v9782_v62, %v3790_v33  ;;  %v8743_v33 = vor.u32 %v9411_v26, %v8740_v38  ;;  %v8954_v26 = vld [vmem:[#allocation8 + $0xc8] sm:$0xf]  ;;  %v9468_v38 = vld [vmem:[#allocation8 + $0xd4] sm:$0xf0]  ;;  %v8611_v3 = vor.u32 %v9383_v56, %v8610_v37 }
 0x6e1   :  { %4718 = vmatpush.bf16.msrb.mxu3 %v8387_v17  ;;  %4746 = vmatpush.bf16.msra.mxu2 %v8391_v61  ;;  %v8738_v17 = vld [vmem:[#allocation7 + $0x310] sm:$0xf]  ;;  %v9452_v37 = vld [vmem:[#allocation8 + $0x54] sm:$0xf0] }
 0x6e2   :  { %v3806_v58 = vsel %vm341_vm3, %v3799_v25, %v11726_v20  ;;  %v8835_v20 = vor.u32 %v9439_v0, %v8834_v16  ;;  %v9415_v61 = vld [vmem:[#allocation7 + $0x32c] sm:$0xf0]  ;;  %v8463_v25 = vor.u32 %v9340_v11, %v8460_v39  ;;  %v9332_v16 = vld [vmem:[#allocation7 + $0x9c] sm:$0xf]  ;;  %v8682_v40 = vld [vmem:[#allocation7 + $0x298] sm:$0xf] }
 0x6e3   :  { %v3807_v48 = vsel %vm272_vm2, %v3806_v58, %v11633_v35  ;;  %v8555_v35 = vor.u32 %v9368_v49, %v8554_v36  ;;  %v8739_v62 = vor.u32 %v9415_v61, %v8738_v17  ;;  %v8428_v0 = vld [vmem:[#allocation7 + $0xb8] sm:$0xf0]  ;;  %v8707_v58 = vor.u32 %v9407_v54, %v8706_v21  ;;  %v8676_v49 = vld [vmem:[#allocation7 + $0x2b0] sm:$0xf0] }
 0x6e4   :  { %v3808_v22 = vsel %vm156_vm0, %v3807_v48, %v13900_v18  ;;  %v8431_v36 = vor.u32 %v9332_v16, %v8428_v0  ;;  %v9395_v48 = vld [vmem:[#allocation7 + $0x294] sm:$0xf]  ;;  %v9436_v17 = vld [vmem:[#allocation7 + $0x3dc] sm:$0xf]  ;;  %v11904_v54 = vor.u32 %v9468_v38, %v8954_v26  ;;  %v9447_v26 = vld [vmem:[#allocation8 + $0x2c] sm:$0xf0] }
 0x6e5   :  { %v11888_v10 = vpack.c.bf16 %v3811_v24, %v3808_v22  ;;  %4719 = vmatpush.bf16.msrb.mxu3 %v8355_v4  ;;  %4747 = vmatpush.bf16.msra.mxu2 %v8359_v55  ;;  %v8426_v4 = vld [vmem:[#allocation7 + $0x98] sm:$0xf]  ;;  %v8396_v24 = vld [vmem:[#allocation7 + $0x78] sm:$0xf0]  ;;  %v8679_v22 = vor.u32 %v9395_v48, %v8676_v49  ;;  %v9459_v48 = vld [vmem:[#allocation8 + $0x8c] sm:$0xf0] }
 0x6e6   :  { %v9336_v55 = vld [vmem:[#allocation7 + $0xb4] sm:$0xf0]  ;;  %v8844_v61 = vld [vmem:[#allocation7 + $0x3f8] sm:$0xf0]  ;;  %13904 = vst [vmem:[#allocation52_spill] sm:$0xff] %v11904_v54 }
 0x6e7   :  { %4622 = vmatmul.bf16.vlgmr.msra.gmra.mxu1 %v11888_v10  ;;  %4650 = vmatmul.bf16.vlgmr.msra.gmra.mxu0 %v11888_v10  ;;  %v8427_v29 = vor.u32 %v9336_v55, %v8426_v4  ;;  %v8847_v39 = vor.u32 %v9436_v17, %v8844_v61  ;;  %v8938_v4 = vld [vmem:[#allocation8 + $0xa8] sm:$0xf]  ;;  %v9464_v55 = vld [vmem:[#allocation8 + $0xb4] sm:$0xf0]  ;;  %v9396_v61 = vld [vmem:[#allocation7 + $0x29c] sm:$0xf] }
 0x6e8   :  { %4720 = vmatmul.bf16.vlgmr.msrb.gmra.mxu3 %v11830_v30  ;;  %4748 = vmatmul.bf16.vlgmr.msra.gmra.mxu2 %v11830_v30  ;;  %v8922_v49 = vld [vmem:[#allocation8 + $0x88] sm:$0xf] }
 0x6e9   :  { %4768 = vmatpush.bf16.msra.mxu3 %v8587_v59  ;;  %4796 = vmatpush.bf16.msrb.mxu2 %v8591_v28  ;;  %v8711_v59 = vor.u32 %v9403_v5, %v8708_v60  ;;  %v8674_v28 = vld [vmem:[#allocation7 + $0x290] sm:$0xf]  ;;  %v8930_v5 = vld [vmem:[#allocation8 + $0xa0] sm:$0xf]  ;;  %v8874_v38 = vld [vmem:[#allocation8 + $0x28] sm:$0xf] }
 0x6ea   :  { %4726 = vmatpush.bf16.msra.mxu1 %v8835_v20  ;;  %4754 = vmatpush.bf16.msra.mxu0 %v8839_v57  ;;  %v8675_v18 = vor.u32 %v9399_v31, %v8674_v28  ;;  %v8642_v20 = vld [vmem:[#allocation7 + $0x250] sm:$0xf]  ;;  %v11912_v31 = vor.u32 %v9464_v55, %v8938_v4  ;;  %v8858_v55 = vld [vmem:[#allocation8 + $0x8] sm:$0xf] }
 0x6eb   :  { %v9391_v57 = vld [vmem:[#allocation7 + $0x26c] sm:$0xf0] }
 0x6ec   :  { %v8643_v41 = vor.u32 %v9391_v57, %v8642_v20  ;;  %v9463_v60 = vld [vmem:[#allocation8 + $0xac] sm:$0xf0]  ;;  %13906 = vst [vmem:[#allocation61_spill] sm:$0xff] %v11912_v31  ;;  %v11920_v20 = vor.u32 %v9460_v50, %v8922_v49  ;;  %v9412_v57 = vld [vmem:[#allocation7 + $0x31c] sm:$0xf] }
 0x6ed   :  { %4769 = vmatpush.bf16.msra.mxu3 %v8555_v35  ;;  %4797 = vmatpush.bf16.msrb.mxu2 %v8559_v53  ;;  %v8399_v35 = vor.u32 %v9324_v2, %v8396_v24  ;;  %v8644_v53 = vld [vmem:[#allocation7 + $0x270] sm:$0xf0]  ;;  %v11910_v28 = vor.u32 %v9463_v60, %v8930_v5  ;;  %v8746_v24 = vld [vmem:[#allocation7 + $0x318] sm:$0xf]  ;;  %v8652_v5 = vld [vmem:[#allocation7 + $0x278] sm:$0xf0] }
 0x6ee   :  { %4727 = vmatpush.bf16.msra.mxu1 %v8803_v14  ;;  %4755 = vmatpush.bf16.msra.mxu0 %v8807_v1  ;;  %v8970_v14 = vld [vmem:[#allocation8 + $0xe8] sm:$0xf]  ;;  %v9472_v1 = vld [vmem:[#allocation8 + $0xf4] sm:$0xf0]  ;;  %v8647_v34 = vor.u32 %v9387_v13, %v8644_v53  ;;  %13908 = vst [vmem:[#allocation65_spill] sm:$0xff] %v11920_v20 }
 0x6ef   :  { %v11898_v12 = vor.u32 %v9472_v1, %v8970_v14  ;;  %13905 = vst [vmem:[#allocation55_spill] sm:$0xff] %v11910_v28  ;;  %v8748_v13 = vld [vmem:[#allocation7 + $0x338] sm:$0xf0]  ;;  %v8906_v53 = vld [vmem:[#allocation8 + $0x68] sm:$0xf] }
 0x6f0   :  { %v9404_v1 = vld [vmem:[#allocation7 + $0x2dc] sm:$0xf]  ;;  %v8850_v60 = vld [vmem:[#allocation8] sm:$0xf]  ;;  %v9443_v4 = vld [vmem:[#allocation8 + $0xc] sm:$0xf0] }
 0x6f1   :  { %4770 = vmatpush.bf16.msra.mxu3 %v8523_v45  ;;  %4798 = vmatpush.bf16.msrb.mxu2 %v8527_v7  ;;  %v8363_v45 = vor.u32 %v9320_v23, %v8362_v8  ;;  %v8367_v7 = vor.u32 %v9316_v9, %v8364_v51  ;;  %13902 = vst [vmem:[#allocation56_spill] sm:$0xff] %v11898_v12  ;;  %v9456_v8 = vld [vmem:[#allocation8 + $0x74] sm:$0xf0] }
 0x6f2   :  { %4728 = vmatpush.bf16.msra.mxu1 %v8771_v44  ;;  %4756 = vmatpush.bf16.msra.mxu0 %v8775_v46  ;;  %v8842_v44 = vld [vmem:[#allocation7 + $0x3d8] sm:$0xf]  ;;  %v8751_v9 = vor.u32 %v9412_v57, %v8748_v13  ;;  %v11926_v14 = vor.u32 %v9456_v8, %v8906_v53  ;;  %v8620_v57 = vld [vmem:[#allocation7 + $0x238] sm:$0xf0]  ;;  %v9469_v13 = vld [vmem:[#allocation8 + $0xe4] sm:$0xf] }
 0x6f3   :  { %v9440_v46 = vld [vmem:[#allocation7 + $0x3f4] sm:$0xf0]  ;;  %v8972_v53 = vld [vmem:[#allocation8 + $0xf8] sm:$0xf0]  ;;  %v9074_v8 = vld [vmem:[#allocation8 + $0x1c0] sm:$0xf] }
 0x6f4   :  { %v8843_v11 = vor.u32 %v9440_v46, %v8842_v44  ;;  %v8714_v51 = vld [vmem:[#allocation7 + $0x2d8] sm:$0xf]  ;;  %13909 = vst [vmem:[#allocation64_spill] sm:$0xff] %v11926_v14 }
 0x6f5   :  { %4771 = vmatpush.bf16.msra.mxu3 %v8491_v52  ;;  %4799 = vmatpush.bf16.msrb.mxu2 %v8495_v27  ;;  %v8946_v52 = vld [vmem:[#allocation8 + $0xc0] sm:$0xf]  ;;  %v9467_v27 = vld [vmem:[#allocation8 + $0xcc] sm:$0xf0]  ;;  %v8715_v56 = vor.u32 %v9408_v6, %v8714_v51  ;;  %v9400_v44 = vld [vmem:[#allocation7 + $0x2b4] sm:$0xf0] }
 0x6f6   :  { %4729 = vmatpush.bf16.msra.mxu1 %v8739_v62  ;;  %4757 = vmatpush.bf16.msra.mxu0 %v8743_v33  ;;  %v8810_v62 = vld [vmem:[#allocation7 + $0x398] sm:$0xf]  ;;  %v11902_v21 = vor.u32 %v9467_v27, %v8946_v52  ;;  %v8684_v52 = vld [vmem:[#allocation7 + $0x2b8] sm:$0xf0]  ;;  %v8866_v27 = vld [vmem:[#allocation8 + $0x20] sm:$0xf] }
 0x6f7   :  { %4678 = vmatmul.bf16.vlgmr.msrb.gmra.mxu1 %v11888_v10  ;;  %4706 = vmatmul.bf16.vlgmr.msrb.gmra.mxu0 %v11888_v10  ;;  %v9432_v33 = vld [vmem:[#allocation7 + $0x3b4] sm:$0xf0] }
 0x6f8   :  { %13903 = vst [vmem:[#allocation59_spill] sm:$0xff] %v11902_v21  ;;  %v8811_v16 = vor.u32 %v9432_v33, %v8810_v62  ;;  %v9392_v62 = vld [vmem:[#allocation7 + $0x274] sm:$0xf0]  ;;  %v9388_v33 = vld [vmem:[#allocation7 + $0x25c] sm:$0xf] }
 0x6f9   :  { %4772 = vmatpush.bf16.msra.mxu3 %v8459_v19  ;;  %4800 = vmatpush.bf16.msrb.mxu2 %v8463_v25  ;;  %v9428_v19 = vld [vmem:[#allocation7 + $0x39c] sm:$0xf]  ;;  %v8618_v50 = vld [vmem:[#allocation7 + $0x218] sm:$0xf] }
 0x6fa   :  { %4730 = vmatpush.bf16.msra.mxu1 %v8707_v58  ;;  %4758 = vmatpush.bf16.msra.mxu0 %v8711_v59  ;;  %v8812_v25 = vld [vmem:[#allocation7 + $0x3b8] sm:$0xf0]  ;;  %v8778_v58 = vld [vmem:[#allocation7 + $0x358] sm:$0xf] }
 0x6fb   :  { %v8815_v0 = vor.u32 %v9428_v19, %v8812_v25  ;;  %v9424_v59 = vld [vmem:[#allocation7 + $0x374] sm:$0xf0]  ;;  %v11936_v19 = vor.u32 %v9447_v26, %v8866_v27  ;;  %v9066_v27 = vld [vmem:[#allocation8 + $0x1a8] sm:$0xf] }
 0x6fc   :  { %v8779_v47 = vor.u32 %v9424_v59, %v8778_v58  ;;  %v9503_v58 = vld [vmem:[#allocation8 + $0x1ec] sm:$0xf0]  ;;  %v9098_v59 = vld [vmem:[#allocation8 + $0x1e8] sm:$0xf]  ;;  %v9500_v51 = vld [vmem:[#allocation8 + $0x1d4] sm:$0xf0] }
 0x6fd   :  { %4773 = vmatpush.bf16.msra.mxu3 %v8427_v29  ;;  %4801 = vmatpush.bf16.msrb.mxu2 %v8431_v36  ;;  %v8780_v29 = vld [vmem:[#allocation7 + $0x378] sm:$0xf0]  ;;  %v8914_v36 = vld [vmem:[#allocation8 + $0x80] sm:$0xf]  ;;  %v9496_v26 = vld [vmem:[#allocation8 + $0x1b4] sm:$0xf0] }
 0x6fe   :  { %4731 = vmatpush.bf16.msra.mxu1 %v8675_v18  ;;  %4759 = vmatpush.bf16.msra.mxu0 %v8679_v22  ;;  %v9416_v18 = vld [vmem:[#allocation7 + $0x334] sm:$0xf0]  ;;  %v11918_v22 = vor.u32 %v9459_v48, %v8914_v36  ;;  %v8655_v36 = vor.u32 %v9388_v33, %v8652_v5  ;;  %v11942_v48 = vor.u32 %v9443_v4, %v8850_v60  ;;  %v9462_v33 = vld [vmem:[#allocation8 + $0xac] sm:$0xf]  ;;  %v8940_v5 = vld [vmem:[#allocation8 + $0xb8] sm:$0xf0] }
 0x6ff   :  { %v8747_v23 = vor.u32 %v9416_v18, %v8746_v24  ;;  %v9042_v60 = vld [vmem:[#allocation8 + $0x180] sm:$0xf]  ;;  %v9491_v4 = vld [vmem:[#allocation8 + $0x18c] sm:$0xf0] }
 0x700   :  { %13907 = vst [vmem:[#allocation62_spill] sm:$0xff] %v11918_v22 }
 0x701   :  { %4774 = vmatpush.bf16.msra.mxu3 %v8395_v32  ;;  %4802 = vmatpush.bf16.msrb.mxu2 %v8399_v35  ;;  %v8898_v32 = vld [vmem:[#allocation8 + $0x60] sm:$0xf]  ;;  %v9455_v35 = vld [vmem:[#allocation8 + $0x6c] sm:$0xf0]  ;;  %13912 = vst [vmem:[#allocation18_spill] sm:$0xff] %v11942_v48 }
 0x702   :  { %4732 = vmatpush.bf16.msra.mxu1 %v8643_v41  ;;  %4760 = vmatpush.bf16.msra.mxu0 %v8647_v34  ;;  %v11924_v42 = vor.u32 %v9455_v35, %v8898_v32  ;;  %v8716_v41 = vld [vmem:[#allocation7 + $0x2f8] sm:$0xf0]  ;;  %v8882_v34 = vld [vmem:[#allocation8 + $0x40] sm:$0xf]  ;;  %v8964_v32 = vld [vmem:[#allocation8 + $0xf0] sm:$0xf0] }
 0x703   :  { %v8719_v15 = vor.u32 %v9404_v1, %v8716_v41  ;;  %v9470_v35 = vld [vmem:[#allocation8 + $0xec] sm:$0xf]  ;;  %v11954_v41 = vor.u32 %v9469_v13, %v8964_v32  ;;  %v9488_v13 = vld [vmem:[#allocation8 + $0x174] sm:$0xf0] }
 0x705   :  { %4775 = vmatpush.bf16.msra.mxu3 %v8363_v45  ;;  %4803 = vmatpush.bf16.msrb.mxu2 %v8367_v7  ;;  %v9451_v45 = vld [vmem:[#allocation8 + $0x4c] sm:$0xf0]  ;;  %v8890_v7 = vld [vmem:[#allocation8 + $0x48] sm:$0xf] }
 0x706   :  { %4733 = vmatpush.bf16.msra.mxu1 %v8611_v3  ;;  %4761 = vmatpush.bf16.msra.mxu0 %v8615_v43  ;;  %v11930_v46 = vor.u32 %v9451_v45, %v8882_v34  ;;  %v11932_v17 = vor.u32 %v9452_v37, %v8890_v7  ;;  %v9448_v3 = vld [vmem:[#allocation8 + $0x34] sm:$0xf0]  ;;  %v8683_v43 = vor.u32 %v9400_v44, %v8682_v40  ;;  %v9465_v45 = vld [vmem:[#allocation8 + $0xc4] sm:$0xf]  ;;  %v8948_v7 = vld [vmem:[#allocation8 + $0xd0] sm:$0xf0] }
 0x707   :  { %v11938_v25 = vor.u32 %v9448_v3, %v8874_v38  ;;  %v11956_v34 = vor.u32 %v9470_v35, %v8972_v53  ;;  %v8956_v40 = vld [vmem:[#allocation8 + $0xd8] sm:$0xf0]  ;;  %v9058_v44 = vld [vmem:[#allocation8 + $0x1a0] sm:$0xf]  ;;  %v11966_v38 = vor.u32 %v9465_v45, %v8948_v7  ;;  %v9453_v53 = vld [vmem:[#allocation8 + $0x64] sm:$0xf] }
 0x708   :  { %4776 = vmatmul.bf16.vlgmr.msra.gmra.mxu3 %v11830_v30  ;;  %4804 = vmatmul.bf16.vlgmr.msrb.gmra.mxu2 %v11830_v30  ;;  %v9420_v30 = vld [vmem:[#allocation7 + $0x35c] sm:$0xf]  ;;  %13910 = vst [vmem:[#allocation66_spill] sm:$0xff] %v11930_v46  ;;  %v9483_v45 = vld [vmem:[#allocation8 + $0x14c] sm:$0xf0] }
 0x709   :  { %5049 = vmatpush.bf16.msrb.mxu3 %v11896_v63  ;;  %5075 = vmatpush.bf16.msra.mxu2 %v11898_v12  ;;  %v8783_v2 = vor.u32 %v9420_v30, %v8780_v29  ;;  %13911 = vst [vmem:[#allocation63_spill] sm:$0xff] %v11932_v17  ;;  %v9504_v30 = vld [vmem:[#allocation8 + $0x1f4] sm:$0xf0]  ;;  %v9018_v7 = vld [vmem:[#allocation8 + $0x148] sm:$0xf] }
 0x70a   :  { %4782 = vmatpush.bf16.msrb.mxu1 %v8843_v11  ;;  %4810 = vmatpush.bf16.msrb.mxu0 %v8847_v39  ;;  %v8687_v11 = vor.u32 %v9396_v61, %v8684_v52  ;;  %v8650_v39 = vld [vmem:[#allocation7 + $0x258] sm:$0xf]  ;;  %v11948_v18 = vor.u32 %v9504_v30, %v9098_v59  ;;  %v13918_v61 = vmov 0   ;;  %v9495_v52 = vld [vmem:[#allocation8 + $0x1ac] sm:$0xf0] }
 0x70b   :  { %4734 = vmatmul.bf16.vlgmr.msra.gmra.mxu1 %v11888_v10  ;;  %4762 = vmatmul.bf16.vlgmr.msra.gmra.mxu0 %v11888_v10  ;;  %v8651_v29 = vor.u32 %v9392_v62, %v8650_v39  ;;  %v11972_v39 = vor.u32 %v9495_v52, %v9058_v44  ;;  %v11974_v62 = vor.u32 %v9496_v26, %v9066_v27  ;;  %v9457_v59 = vld [vmem:[#allocation8 + $0x84] sm:$0xf]  ;;  %v8916_v30 = vld [vmem:[#allocation8 + $0x90] sm:$0xf0] }
 0x70c   :  { %13915 = vst [vmem:[#allocation17_spill] sm:$0xff] %v11948_v18  ;;  %v11992_v32 = vor.u32 %v9457_v59, %v8916_v30  ;;  %v9449_v52 = vld [vmem:[#allocation8 + $0x44] sm:$0xf]  ;;  %v8884_v27 = vld [vmem:[#allocation8 + $0x50] sm:$0xf0] }
 0x70d   :  { %5050 = vmatpush.bf16.msrb.mxu3 %v11902_v21  ;;  %5076 = vmatpush.bf16.msra.mxu2 %v11904_v54  ;;  %13919 = vst [vmem:[#allocation29_spill] sm:$0xff] %v11972_v39  ;;  %v9445_v30 = vld [vmem:[#allocation8 + $0x24] sm:$0xf] }
 0x70e   :  { %4783 = vmatpush.bf16.msrb.mxu1 %v8811_v16  ;;  %4811 = vmatpush.bf16.msrb.mxu0 %v8815_v0  ;;  %v9444_v16 = vld [vmem:[#allocation8 + $0x14] sm:$0xf0]  ;;  %v9090_v0 = vld [vmem:[#allocation8 + $0x1e0] sm:$0xf]  ;;  %13920 = vst [vmem:[#allocation20_spill] sm:$0xff] %v11974_v62 }
 0x70f   :  { %v11944_v49 = vor.u32 %v9444_v16, %v8858_v55  ;;  %v11946_v24 = vor.u32 %v9503_v58, %v9090_v0  ;;  %v9050_v55 = vld [vmem:[#allocation8 + $0x188] sm:$0xf]  ;;  %v9492_v16 = vld [vmem:[#allocation8 + $0x194] sm:$0xf0]  ;;  %v11982_v58 = vor.u32 %v9462_v33, %v8940_v5  ;;  %v8892_v33 = vld [vmem:[#allocation8 + $0x58] sm:$0xf0] }
 0x710   :  { %v8994_v5 = vld [vmem:[#allocation8 + $0x120] sm:$0xf] }
 0x711   :  { %5051 = vmatpush.bf16.msrb.mxu3 %v11910_v28  ;;  %5077 = vmatpush.bf16.msra.mxu2 %v11912_v31  ;;  %13913 = vst [vmem:[#allocation22_spill] sm:$0xff] %v11944_v49 }
 0x712   :  { %4784 = vmatpush.bf16.msrb.mxu1 %v8779_v47  ;;  %4812 = vmatpush.bf16.msrb.mxu0 %v8783_v2  ;;  %v9384_v47 = vld [vmem:[#allocation7 + $0x234] sm:$0xf0]  ;;  %v9380_v2 = vld [vmem:[#allocation7 + $0x21c] sm:$0xf]  ;;  %13914 = vst [vmem:[#allocation25_spill] sm:$0xff] %v11946_v24 }
 0x713   :  { %v8619_v6 = vor.u32 %v9384_v47, %v8618_v50  ;;  %v8623_v1 = vor.u32 %v9380_v2, %v8620_v57  ;;  %v8924_v50 = vld [vmem:[#allocation8 + $0x98] sm:$0xf0]  ;;  %v9026_v47 = vld [vmem:[#allocation8 + $0x160] sm:$0xf]  ;;  %v9487_v2 = vld [vmem:[#allocation8 + $0x16c] sm:$0xf0] }
 0x714   :  { %v9034_v57 = vld [vmem:[#allocation8 + $0x168] sm:$0xf] }
 0x715   :  { %5052 = vmatpush.bf16.msrb.mxu3 %v11918_v22  ;;  %5078 = vmatpush.bf16.msra.mxu2 %v11920_v20 }
 0x716   :  { %4785 = vmatpush.bf16.msrb.mxu1 %v8747_v23  ;;  %4813 = vmatpush.bf16.msrb.mxu0 %v8751_v9  ;;  %v9499_v23 = vld [vmem:[#allocation8 + $0x1cc] sm:$0xf0]  ;;  %v9082_v9 = vld [vmem:[#allocation8 + $0x1c8] sm:$0xf] }
 0x717   :  { %v11958_v37 = vor.u32 %v9499_v23, %v9074_v8  ;;  %v8900_v8 = vld [vmem:[#allocation8 + $0x70] sm:$0xf0]  ;;  %v11998_v23 = vor.u32 %v9487_v2, %v9026_v47  ;;  %v9446_v2 = vld [vmem:[#allocation8 + $0x2c] sm:$0xf] }
 0x719   :  { %5053 = vmatpush.bf16.msrb.mxu3 %v11924_v42  ;;  %5079 = vmatpush.bf16.msra.mxu2 %v11926_v14  ;;  %13916 = vst [vmem:[#allocation19_spill] sm:$0xff] %v11958_v37 }
 0x71a   :  { %4786 = vmatpush.bf16.msrb.mxu1 %v8715_v56  ;;  %4814 = vmatpush.bf16.msrb.mxu0 %v8719_v15  ;;  %v11960_v56 = vor.u32 %v9500_v51, %v9082_v9  ;;  %v9466_v15 = vld [vmem:[#allocation8 + $0xcc] sm:$0xf]  ;;  %13923 = vst [vmem:[#allocation33_spill] sm:$0xff] %v11998_v23  ;;  %v12000_v9 = vor.u32 %v9488_v13, %v9034_v57  ;;  %v8876_v57 = vld [vmem:[#allocation8 + $0x38] sm:$0xf0] }
 0x71b   :  { %v11968_v3 = vor.u32 %v9466_v15, %v8956_v40  ;;  %v9454_v51 = vld [vmem:[#allocation8 + $0x6c] sm:$0xf]  ;;  %v9484_v15 = vld [vmem:[#allocation8 + $0x154] sm:$0xf0]  ;;  %v12004_v40 = vor.u32 %v9453_v53, %v8900_v8  ;;  %v8978_v13 = vld [vmem:[#allocation8 + $0x100] sm:$0xf] }
 0x71c   :  { %13917 = vst [vmem:[#allocation27_spill] sm:$0xff] %v11960_v56  ;;  %v9475_v53 = vld [vmem:[#allocation8 + $0x10c] sm:$0xf0]  ;;  %v8986_v8 = vld [vmem:[#allocation8 + $0x108] sm:$0xf] }
 0x71d   :  { %5054 = vmatpush.bf16.msrb.mxu3 %v11930_v46  ;;  %5080 = vmatpush.bf16.msra.mxu2 %v11932_v17  ;;  %13924 = vst [vmem:[#allocation23_spill] sm:$0xff] %v12000_v9 }
 0x71e   :  { %4787 = vmatpush.bf16.msrb.mxu1 %v8683_v43  ;;  %4815 = vmatpush.bf16.msrb.mxu0 %v8687_v11  ;;  %v9461_v43 = vld [vmem:[#allocation8 + $0xa4] sm:$0xf]  ;;  %v8932_v11 = vld [vmem:[#allocation8 + $0xb0] sm:$0xf0] }
 0x71f   :  { %v11980_v0 = vor.u32 %v9461_v43, %v8932_v11  ;;  %v12012_v43 = vor.u32 %v9484_v15, %v9018_v7  ;;  %v9450_v11 = vld [vmem:[#allocation8 + $0x4c] sm:$0xf]  ;;  %v9441_v15 = vld [vmem:[#allocation8 + $0x4] sm:$0xf] }
 0x720   :  { %v12018_v59 = vor.u32 %v9450_v11, %v8892_v33  ;;  %v8860_v11 = vld [vmem:[#allocation8 + $0x18] sm:$0xf0]  ;;  %v9501_v33 = vld [vmem:[#allocation8 + $0x1e4] sm:$0xf] }
 0x721   :  { %5055 = vmatpush.bf16.msrb.mxu3 %v11936_v19  ;;  %5081 = vmatpush.bf16.msra.mxu2 %v11938_v25  ;;  %13926 = vst [vmem:[#allocation35_spill] sm:$0xff] %v12012_v43 }
 0x722   :  { %4788 = vmatpush.bf16.msrb.mxu1 %v8651_v29  ;;  %4816 = vmatpush.bf16.msrb.mxu0 %v8655_v36  ;;  %v11986_v29 = vor.u32 %v9491_v4, %v9042_v60  ;;  %v9458_v36 = vld [vmem:[#allocation8 + $0x8c] sm:$0xf]  ;;  %v9479_v60 = vld [vmem:[#allocation8 + $0x12c] sm:$0xf0]  ;;  %v9002_v4 = vld [vmem:[#allocation8 + $0x128] sm:$0xf] }
 0x723   :  { %v11994_v35 = vor.u32 %v9458_v36, %v8924_v50  ;;  %v8868_v36 = vld [vmem:[#allocation8 + $0x30] sm:$0xf0]  ;;  %v12022_v50 = vor.u32 %v9479_v60, %v8994_v5  ;;  %v9502_v60 = vld [vmem:[#allocation8 + $0x1ec] sm:$0xf] }
 0x724   :  { %13921 = vst [vmem:[#allocation21_spill] sm:$0xff] %v11986_v29  ;;  %v9092_v5 = vld [vmem:[#allocation8 + $0x1f0] sm:$0xf0] }
 0x725   :  { %5056 = vmatpush.bf16.msrb.mxu3 %v11942_v48  ;;  %5082 = vmatpush.bf16.msra.mxu2 %v11944_v49  ;;  %13927 = vst [vmem:[#allocation37_spill] sm:$0xff] %v12022_v50 }
 0x726   :  { %4789 = vmatpush.bf16.msrb.mxu1 %v8619_v6  ;;  %4817 = vmatpush.bf16.msrb.mxu0 %v8623_v1  ;;  %v8908_v6 = vld [vmem:[#allocation8 + $0x78] sm:$0xf0]  ;;  %v9010_v1 = vld [vmem:[#allocation8 + $0x140] sm:$0xf] }
 0x727   :  { %v12006_v44 = vor.u32 %v9454_v51, %v8908_v6  ;;  %v12010_v26 = vor.u32 %v9483_v45, %v9010_v1  ;;  %v9476_v51 = vld [vmem:[#allocation8 + $0x114] sm:$0xf0]  ;;  %v12028_v6 = vor.u32 %v9445_v30, %v8868_v36  ;;  %v12030_v1 = vor.u32 %v9446_v2, %v8876_v57  ;;  %v9497_v57 = vld [vmem:[#allocation8 + $0x1c4] sm:$0xf] }
 0x728   :  { %5057 = vmatmul.bf16.vlgmr.msrb.gmra.mxu3 %v13918_v61  ;;  %5083 = vmatmul.bf16.vlgmr.msra.gmra.mxu2 %v13918_v61  ;;  %v12034_v45 = vor.u32 %v9475_v53, %v8978_v13  ;;  %v12036_v7 = vor.u32 %v9476_v51, %v8986_v8  ;;  %v12046_v36 = vor.u32 %v9501_v33, %v9092_v5  ;;  %v9076_v13 = vld [vmem:[#allocation8 + $0x1d0] sm:$0xf0]  ;;  %v9498_v53 = vld [vmem:[#allocation8 + $0x1cc] sm:$0xf]  ;;  %v9084_v8 = vld [vmem:[#allocation8 + $0x1d8] sm:$0xf0] }
 0x729   :  { %5265 = vmatpush.bf16.msra.mxu3 %v11946_v24  ;;  %5291 = vmatpush.bf16.msrb.mxu2 %v11948_v18  ;;  %13925 = vst [vmem:[#allocation26_spill] sm:$0xff] %v12010_v26  ;;  %v12058_v51 = vor.u32 %v9497_v57, %v9076_v13  ;;  %v9068_v33 = vld [vmem:[#allocation8 + $0x1b8] sm:$0xf0]  ;;  %v9044_v57 = vld [vmem:[#allocation8 + $0x190] sm:$0xf0] }
 0x72a   :  { %5062 = vmatpush.bf16.msra.mxu1 %v11954_v41  ;;  %5088 = vmatpush.bf16.msra.mxu0 %v11956_v34  ;;  %13929 = vst [vmem:[#allocation30_spill] sm:$0xff] %v12034_v45  ;;  %v9490_v13 = vld [vmem:[#allocation8 + $0x18c] sm:$0xf] }
 0x72b   :  { %4790 = vmatmul.bf16.vlgmr.msrb.gmra.mxu1 %v11888_v10  ;;  %4818 = vmatmul.bf16.vlgmr.msrb.gmra.mxu0 %v11888_v10  ;;  %v11988_v10 = vor.u32 %v9492_v16, %v9050_v55  ;;  %v9480_v55 = vld [vmem:[#allocation8 + $0x134] sm:$0xf0]  ;;  %v12016_v16 = vor.u32 %v9449_v52, %v8884_v27  ;;  %13930 = vst [vmem:[#allocation39_spill] sm:$0xff] %v12036_v7  ;;  %v8852_v52 = vld [vmem:[#allocation8 + $0x10] sm:$0xf0] }
 0x72c   :  { %v12024_v47 = vor.u32 %v9480_v55, %v9002_v4  ;;  %v9442_v27 = vld [vmem:[#allocation8 + $0xc] sm:$0xf]  ;;  %v9100_v4 = vld [vmem:[#allocation8 + $0x1f8] sm:$0xf0]  ;;  %v12042_v55 = vor.u32 %v9441_v15, %v8852_v52  ;;  %13933 = vst [vmem:[#allocation34_spill] sm:$0xff] %v12046_v36  ;;  %v12060_v15 = vor.u32 %v9498_v53, %v9084_v8 }
 0x72d   :  { %5266 = vmatpush.bf16.msra.mxu3 %v11958_v37  ;;  %5292 = vmatpush.bf16.msrb.mxu2 %v11960_v56  ;;  %13922 = vst [vmem:[#allocation31_spill] sm:$0xff] %v11988_v10  ;;  %v12044_v30 = vor.u32 %v9442_v27, %v8860_v11  ;;  %v12048_v2 = vor.u32 %v9502_v60, %v9100_v4  ;;  %v9493_v52 = vld [vmem:[#allocation8 + $0x1a4] sm:$0xf]  ;;  %v9060_v27 = vld [vmem:[#allocation8 + $0x1b0] sm:$0xf0] }
 0x72e   :  { %5063 = vmatpush.bf16.msra.mxu1 %v11966_v38  ;;  %5089 = vmatpush.bf16.msra.mxu0 %v11968_v3  ;;  %13928 = vst [vmem:[#allocation28_spill] sm:$0xff] %v12024_v47  ;;  %v9494_v11 = vld [vmem:[#allocation8 + $0x1ac] sm:$0xf]  ;;  %v12068_v5 = vor.u32 %v9493_v52, %v9060_v27  ;;  %v9489_v4 = vld [vmem:[#allocation8 + $0x184] sm:$0xf] }
 0x72f   :  { %13931 = vst [vmem:[#allocation41_spill] sm:$0xff] %v12042_v55  ;;  %v12070_v60 = vor.u32 %v9494_v11, %v9068_v33  ;;  %v9052_v53 = vld [vmem:[#allocation8 + $0x198] sm:$0xf0]  ;;  %v12080_v52 = vor.u32 %v9489_v4, %v9044_v57  ;;  %v9485_v11 = vld [vmem:[#allocation8 + $0x164] sm:$0xf] }
 0x730   :  { %13932 = vst [vmem:[#allocation32_spill] sm:$0xff] %v12044_v30  ;;  %v12082_v27 = vor.u32 %v9490_v13, %v9052_v53  ;;  %v9028_v33 = vld [vmem:[#allocation8 + $0x170] sm:$0xf0]  ;;  %v9481_v4 = vld [vmem:[#allocation8 + $0x144] sm:$0xf] }
 0x731   :  { %5267 = vmatpush.bf16.msra.mxu3 %v11972_v39  ;;  %5293 = vmatpush.bf16.msrb.mxu2 %v11974_v62  ;;  %13934 = vst [vmem:[#allocation43_spill] sm:$0xff] %v12048_v2  ;;  %v9012_v57 = vld [vmem:[#allocation8 + $0x150] sm:$0xf0]  ;;  %v9482_v13 = vld [vmem:[#allocation8 + $0x14c] sm:$0xf] }
 0x732   :  { %5064 = vmatpush.bf16.msra.mxu1 %v11980_v0  ;;  %5090 = vmatpush.bf16.msra.mxu0 %v11982_v58  ;;  %13935 = vst [vmem:[#allocation45_spill] sm:$0xff] %v12058_v51  ;;  %v9020_v53 = vld [vmem:[#allocation8 + $0x158] sm:$0xf0] }
 0x733   :  { %13936 = vst [vmem:[#allocation36_spill] sm:$0xff] %v12060_v15 }
 0x734   :  { %13937 = vst [vmem:[#allocation38_spill] sm:$0xff] %v12068_v5 }
 0x735   :  { %5268 = vmatpush.bf16.msra.mxu3 %v11986_v29  ;;  %5294 = vmatpush.bf16.msrb.mxu2 %v11988_v10  ;;  %13938 = vst [vmem:[#allocation47_spill] sm:$0xff] %v12070_v60 }
 0x736   :  { %5065 = vmatpush.bf16.msra.mxu1 %v11992_v32  ;;  %5091 = vmatpush.bf16.msra.mxu0 %v11994_v35  ;;  %13940 = vst [vmem:[#allocation40_spill] sm:$0xff] %v12080_v52 }
 0x737   :  { %13941 = vst [vmem:[#allocation42_spill] sm:$0xff] %v12082_v27 }
 0x739   :  { %5269 = vmatpush.bf16.msra.mxu3 %v11998_v23  ;;  %5295 = vmatpush.bf16.msrb.mxu2 %v12000_v9 }
 0x73a   :  { %5066 = vmatpush.bf16.msra.mxu1 %v12004_v40  ;;  %5092 = vmatpush.bf16.msra.mxu0 %v12006_v44 }
 0x73d   :  { %5270 = vmatpush.bf16.msra.mxu3 %v12010_v26  ;;  %5296 = vmatpush.bf16.msrb.mxu2 %v12012_v43 }
 0x73e   :  { %5067 = vmatpush.bf16.msra.mxu1 %v12016_v16  ;;  %5093 = vmatpush.bf16.msra.mxu0 %v12018_v59 }
 0x741   :  { %5271 = vmatpush.bf16.msra.mxu3 %v12022_v50  ;;  %5297 = vmatpush.bf16.msrb.mxu2 %v12024_v47 }
 0x742   :  { %5068 = vmatpush.bf16.msra.mxu1 %v12028_v6  ;;  %5094 = vmatpush.bf16.msra.mxu0 %v12030_v1 }
 0x745   :  { %5272 = vmatpush.bf16.msra.mxu3 %v12034_v45  ;;  %5298 = vmatpush.bf16.msrb.mxu2 %v12036_v7 }
 0x746   :  { %5069 = vmatpush.bf16.msra.mxu1 %v12042_v55  ;;  %5095 = vmatpush.bf16.msra.mxu0 %v12044_v30 }
 0x748   :  { %5273 = vmatmul.bf16.vlgmr.msra.gmra.mxu3 %v13918_v61  ;;  %5299 = vmatmul.bf16.vlgmr.msrb.gmra.mxu2 %v13918_v61 }
 0x749   :  { %5460 = vmatpush.bf16.msrb.mxu3 %v11896_v63  ;;  %5486 = vmatpush.bf16.msra.mxu2 %v11898_v12  ;;  %v9036_v12 = vld [vmem:[#allocation8 + $0x178] sm:$0xf0]  ;;  %v9478_v63 = vld [vmem:[#allocation8 + $0x12c] sm:$0xf] }
 0x74a   :  { %5278 = vmatpush.bf16.msrb.mxu1 %v12046_v36  ;;  %5304 = vmatpush.bf16.msrb.mxu0 %v12048_v2 }
 0x74b   :  { %5070 = vmatmul.bf16.vlgmr.msra.gmra.mxu1 %v13918_v61  ;;  %5096 = vmatmul.bf16.vlgmr.msra.gmra.mxu0 %v13918_v61  ;;  %v12076_v8 = vpop.f32.mrf.mxu3 }
 0x74d   :  { %5461 = vmatpush.bf16.msrb.mxu3 %v11902_v21  ;;  %5487 = vmatpush.bf16.msra.mxu2 %v11904_v54  ;;  %v12078_v54 = vpop.f32.mrf.mxu2  ;;  %v9486_v21 = vld [vmem:[#allocation8 + $0x16c] sm:$0xf] }
 0x74e   :  { %5279 = vmatpush.bf16.msrb.mxu1 %v12058_v51  ;;  %5305 = vmatpush.bf16.msrb.mxu0 %v12060_v15  ;;  %13939 = vst [vmem:[#allocation48_spill] sm:$0xff] %v12078_v54  ;;  %v9004_v54 = vld [vmem:[#allocation8 + $0x138] sm:$0xf0] }
 0x751   :  { %5462 = vmatpush.bf16.msrb.mxu3 %v11910_v28  ;;  %5488 = vmatpush.bf16.msra.mxu2 %v11912_v31  ;;  %v12088_v31 = vor.u32 %v9485_v11, %v9028_v33  ;;  %v12090_v28 = vor.u32 %v9486_v21, %v9036_v12  ;;  %v12100_v11 = vor.u32 %v9481_v4, %v9012_v57  ;;  %v9477_v21 = vld [vmem:[#allocation8 + $0x124] sm:$0xf]  ;;  %v8996_v33 = vld [vmem:[#allocation8 + $0x130] sm:$0xf0] }
 0x752   :  { %5280 = vmatpush.bf16.msrb.mxu1 %v12068_v5  ;;  %5306 = vmatpush.bf16.msrb.mxu0 %v12070_v60  ;;  %v12102_v12 = vor.u32 %v9482_v13, %v9020_v53  ;;  %v9473_v4 = vld [vmem:[#allocation8 + $0x104] sm:$0xf]  ;;  %v8980_v57 = vld [vmem:[#allocation8 + $0x110] sm:$0xf0]  ;;  %v9474_v13 = vld [vmem:[#allocation8 + $0x10c] sm:$0xf] }
 0x753   :  { %13942 = vst [vmem:[#allocation49_spill] sm:$0xff] %v12088_v31  ;;  %v8988_v53 = vld [vmem:[#allocation8 + $0x118] sm:$0xf0] }
 0x754   :  { %13943 = vst [vmem:[#allocation50_spill] sm:$0xff] %v12090_v28 }
 0x755   :  { %5463 = vmatpush.bf16.msrb.mxu3 %v11918_v22  ;;  %5489 = vmatpush.bf16.msra.mxu2 %v11920_v20  ;;  %v12096_v20 = vpop.f32.mrf.mxu3  ;;  %v12098_v22 = vpop.f32.mrf.mxu2  ;;  %13946 = vst [vmem:[#allocation57_spill] sm:$0xff] %v12100_v11 }
 0x756   :  { %5281 = vmatpush.bf16.msrb.mxu1 %v12080_v52  ;;  %5307 = vmatpush.bf16.msrb.mxu0 %v12082_v27  ;;  %13944 = vst [vmem:[#allocation44_spill] sm:$0xff] %v12096_v20  ;;  %v12110_v20 = vor.u32 %v9478_v63, %v9004_v54 }
 0x757   :  { %13945 = vst [vmem:[#allocation46_spill] sm:$0xff] %v12098_v22 }
 0x758   :  { %13947 = vst [vmem:[#allocation53_spill] sm:$0xff] %v12102_v12 }
 0x759   :  { %5464 = vmatpush.bf16.msrb.mxu3 %v11924_v42  ;;  %5490 = vmatpush.bf16.msra.mxu2 %v11926_v14  ;;  %v12108_v14 = vor.u32 %v9477_v21, %v8996_v33  ;;  %13949 = vst [vmem:[#allocation16_spill] sm:$0xff] %v12110_v20  ;;  %v12120_v21 = vor.u32 %v9474_v13, %v8988_v53 }
 0x75a   :  { %5282 = vmatpush.bf16.msrb.mxu1 %v12088_v31  ;;  %5308 = vmatpush.bf16.msrb.mxu0 %v12090_v28 }
 0x75b   :  { %13948 = vst [vmem:[#allocation60_spill] sm:$0xff] %v12108_v14 }
 0x75c   :  { %13951 = vst [vmem:[#allocation69_spill] sm:$0xff] %v12120_v21 }
 0x75d   :  { %5465 = vmatpush.bf16.msrb.mxu3 %v11930_v46  ;;  %5491 = vmatpush.bf16.msra.mxu2 %v11932_v17  ;;  %v4665_v22 = vpop.f32.mrf.mxu3  ;;  %v12116_v17 = vpop.f32.mrf.mxu2  ;;  %v12118_v46 = vor.u32 %v9473_v4, %v8980_v57 }
 0x75e   :  { %5283 = vmatpush.bf16.msrb.mxu1 %v12100_v11  ;;  %5309 = vmatpush.bf16.msrb.mxu0 %v12102_v12 }
 0x75f   :  { %13950 = vst [vmem:[#allocation51_spill] sm:$0xff] %v12118_v46 }
 0x761   :  { %5466 = vmatpush.bf16.msrb.mxu3 %v11936_v19  ;;  %5492 = vmatpush.bf16.msra.mxu2 %v11938_v25 }
 0x762   :  { %5284 = vmatpush.bf16.msrb.mxu1 %v12108_v14  ;;  %5310 = vmatpush.bf16.msrb.mxu0 %v12110_v20 }
 0x764   :  { %v12138_v33 = vpop.f32.mrf.mxu1  ;;  %v12140_v4 = vpop.f32.mrf.mxu0 }
 0x765   :  { %5467 = vmatpush.bf16.msrb.mxu3 %v11942_v48  ;;  %5493 = vmatpush.bf16.msra.mxu2 %v11944_v49  ;;  %v12134_v63 = vpop.f32.mrf.mxu3  ;;  %v12136_v54 = vpop.f32.mrf.mxu2 }
 0x766   :  { %5285 = vmatpush.bf16.msrb.mxu1 %v12118_v46  ;;  %5311 = vmatpush.bf16.msrb.mxu0 %v12120_v21  ;;  %13952 = vst [vmem:[#allocation68_spill] sm:$0xff] %v12134_v63 }
 0x767   :  { %13953 = vst [vmem:[#allocation67_spill] sm:$0xff] %v12136_v54 }
 0x769   :  { %5532 = vmatpush.bf16.msra.mxu3 %v11946_v24  ;;  %5558 = vmatpush.bf16.msrb.mxu2 %v11948_v18 }
 0x76a   :  { %5473 = vmatpush.bf16.msra.mxu1 %v11954_v41  ;;  %5499 = vmatpush.bf16.msra.mxu0 %v11956_v34 }
 0x76b   :  { %5286 = vmatmul.bf16.vlgmr.msrb.gmra.mxu1 %v13918_v61  ;;  %5312 = vmatmul.bf16.vlgmr.msrb.gmra.mxu0 %v13918_v61  ;;  %v12149_v61 = vld [vmem:[%s13284_s9] sm:$0xff] }
 0x76c   :  { %13954 = vst [vmem:[#allocation24_spill] sm:$0xff] %v12149_v61  ;;  %v13439_v57 = vperm.slane %v12149_v61, 4  ;;  %v13438_v13 = vperm.slane %v12149_v61, 5 }
 0x76d   :  { %5533 = vmatpush.bf16.msra.mxu3 %v11958_v37  ;;  %5559 = vmatpush.bf16.msrb.mxu2 %v11960_v56  ;;  %v4721_v53 = vpop.f32.mrf.mxu3  ;;  %v4749_v63 = vpop.f32.mrf.mxu2 }
 0x76e   :  { %5474 = vmatpush.bf16.msra.mxu1 %v11966_v38  ;;  %5500 = vmatpush.bf16.msra.mxu0 %v11968_v3  ;;  %v4722_v54 = vadd.f32 %v4721_v53, %v13439_v57  ;;  %v12163_v56 = vpop.f32.mrf.mxu0 }
 0x76f   :  { %13956 = vst [vmem:[#allocation54_spill] sm:$0xff] %v12163_v56 }
 0x771   :  { %5534 = vmatpush.bf16.msra.mxu3 %v11972_v39  ;;  %5560 = vmatpush.bf16.msrb.mxu2 %v11974_v62  ;;  %v4750_v62 = vadd.f32 %v4749_v63, %v13438_v13  ;;  %v12161_v39 = vpop.f32.mrf.mxu1 }
 0x772   :  { %5475 = vmatpush.bf16.msra.mxu1 %v11980_v0  ;;  %5501 = vmatpush.bf16.msra.mxu0 %v11982_v58  ;;  %13955 = vst [vmem:[#allocation70_spill] sm:$0xff] %v12161_v39  ;;  %v13454_v39 = vperm.slane %v12149_v61, 7 }
 0x775   :  { %5535 = vmatpush.bf16.msra.mxu3 %v11986_v29  ;;  %5561 = vmatpush.bf16.msrb.mxu2 %v11988_v10  ;;  %v13440_v10 = vperm.slane %v12149_v61, 2 }
 0x776   :  { %5476 = vmatpush.bf16.msra.mxu1 %v11992_v32  ;;  %5502 = vmatpush.bf16.msra.mxu0 %v11994_v35  ;;  %v12176_v13 = vpop.f32.mrf.mxu0 }
 0x777   :  { %v4666_v63 = vadd.f32 %v4665_v22, %v13440_v10 }
 0x779   :  { %5536 = vmatpush.bf16.msra.mxu3 %v11998_v23  ;;  %5562 = vmatpush.bf16.msrb.mxu2 %v12000_v9  ;;  %v4679_v53 = vpop.f32.mrf.mxu1 }
 0x77a   :  { %5477 = vmatpush.bf16.msra.mxu1 %v12004_v40  ;;  %5503 = vmatpush.bf16.msra.mxu0 %v12006_v44  ;;  %v12180_v57 = vadd.f32 %v4679_v53, %v4666_v63  ;;  %v12196_v63 = vpop.f32.mrf.mxu3  ;;  %v12198_v53 = vpop.f32.mrf.mxu2 }
 0x77c   :  { %13957 = vst [vmem:[#allocation71_spill] sm:$0xff] %v12180_v57 }
 0x77d   :  { %5537 = vmatpush.bf16.msra.mxu3 %v12010_v26  ;;  %5563 = vmatpush.bf16.msrb.mxu2 %v12012_v43 }
 0x77e   :  { %5478 = vmatpush.bf16.msra.mxu1 %v12016_v16  ;;  %5504 = vmatpush.bf16.msra.mxu0 %v12018_v59  ;;  %v12190_v10 = vpop.f32.mrf.mxu0 }
 0x77f   :  { %13959 = vst [vmem:[#allocation73_spill] sm:$0xff] %v12190_v10 }
 0x781   :  { %5538 = vmatpush.bf16.msra.mxu3 %v12022_v50  ;;  %5564 = vmatpush.bf16.msrb.mxu2 %v12024_v47  ;;  %v12188_v22 = vpop.f32.mrf.mxu1 }
 0x782   :  { %5479 = vmatpush.bf16.msra.mxu1 %v12028_v6  ;;  %5505 = vmatpush.bf16.msra.mxu0 %v12030_v1  ;;  %13958 = vst [vmem:[#allocation72_spill] sm:$0xff] %v12188_v22  ;;  %v13453_v22 = vperm.slane %v12149_v61, 6 }
 0x785   :  { %5539 = vmatpush.bf16.msra.mxu3 %v12034_v45  ;;  %5565 = vmatpush.bf16.msrb.mxu2 %v12036_v7 }
 0x786   :  { %5480 = vmatpush.bf16.msra.mxu1 %v12042_v55  ;;  %5506 = vmatpush.bf16.msra.mxu0 %v12044_v30 }
 0x788   :  { %v4763_v56 = vpop.f32.mrf.mxu0 }
 0x789   :  { %v4735_v10 = vpop.f32.mrf.mxu1  ;;  %v12208_v45 = vadd.f32 %v4763_v56, %v4750_v62 }
 0x78a   :  { %5545 = vmatpush.bf16.msrb.mxu1 %v12046_v36  ;;  %5571 = vmatpush.bf16.msrb.mxu0 %v12048_v2  ;;  %v12206_v7 = vadd.f32 %v4735_v10, %v4722_v54 }
 0x78b   :  { %13961 = vst [vmem:[#allocation75_spill] sm:$0xff] %v12208_v45  ;;  %v4777_v47 = vpop.f32.mrf.mxu3  ;;  %v4805_v50 = vpop.f32.mrf.mxu2 }
 0x78c   :  { %13960 = vst [vmem:[#allocation74_spill] sm:$0xff] %v12206_v7  ;;  %v4778_v43 = vadd.f32 %v4777_v47, %v13453_v22  ;;  %v4806_v26 = vadd.f32 %v4805_v50, %v13454_v39  ;;  %v13474_v22 = vperm.slane %v12149_v61, 0 }
 0x78e   :  { %5546 = vmatpush.bf16.msrb.mxu1 %v12058_v51  ;;  %5572 = vmatpush.bf16.msrb.mxu0 %v12060_v15 }
 0x790   :  { %v12224_v62 = vpop.f32.mrf.mxu0 }
 0x791   :  { %v4737_v56 = vpop.f32.mrf.mxu1 }
 0x792   :  { %5547 = vmatpush.bf16.msrb.mxu1 %v12068_v5  ;;  %5573 = vmatpush.bf16.msrb.mxu0 %v12070_v60 }
 0x793   :  { %v12226_v10 = vpop.f32.mrf.mxu3  ;;  %v12228_v50 = vpop.f32.mrf.mxu2 }
 0x796   :  { %5548 = vmatpush.bf16.msrb.mxu1 %v12080_v52  ;;  %5574 = vmatpush.bf16.msrb.mxu0 %v12082_v27 }
 0x79a   :  { %5549 = vmatpush.bf16.msrb.mxu1 %v12088_v31  ;;  %5575 = vmatpush.bf16.msrb.mxu0 %v12090_v28 }
 0x79e   :  { %5550 = vmatpush.bf16.msrb.mxu1 %v12100_v11  ;;  %5576 = vmatpush.bf16.msrb.mxu0 %v12102_v12 }
 0x7a2   :  { %5551 = vmatpush.bf16.msrb.mxu1 %v12108_v14  ;;  %5577 = vmatpush.bf16.msrb.mxu0 %v12110_v20 }
 0x7a6   :  { %5552 = vmatpush.bf16.msrb.mxu1 %v12118_v46  ;;  %5578 = vmatpush.bf16.msrb.mxu0 %v12120_v21  ;;  %v4610_v21 = vadd.f32 %v12076_v8, %v13474_v22  ;;  %v13965_v8 = vld [vmem:[#allocation48_spill] sm:$0xff] }
 0x7a8   :  { %v4791_v47 = vpop.f32.mrf.mxu1  ;;  %v4819_v54 = vpop.f32.mrf.mxu0  ;;  %v12239_v46 = vadd.f32 %v12138_v33, %v4610_v21 }
 0x7a9   :  { %v12231_v39 = vadd.f32 %v4791_v47, %v4778_v43  ;;  %v12233_v7 = vadd.f32 %v4819_v54, %v4806_v26  ;;  %v13476_v47 = vperm.slane %v12149_v61, 1  ;;  %v13477_v54 = vperm.slane %v12149_v61, 3 }
 0x7aa   :  { %13964 = vst [vmem:[#allocation78_spill] sm:$0xff] %v12239_v46 }
 0x7ab   :  { %13962 = vst [vmem:[#allocation76_spill] sm:$0xff] %v12231_v39  ;;  %v5058_v45 = vpop.f32.mrf.mxu3  ;;  %v5084_v20 = vpop.f32.mrf.mxu2  ;;  %v4638_v21 = vadd.f32 %v13965_v8, %v13476_v47 }
 0x7ac   :  { %13963 = vst [vmem:[#allocation77_spill] sm:$0xff] %v12233_v7  ;;  %v5101_v14 = vadd.f32 %v5058_v45, %v12239_v46  ;;  %v4694_v45 = vadd.f32 %v12116_v17, %v13477_v54 }
 0x7ae   :  { %v9104_v28 = vmul.f32 -1.442695, %v5101_v14  ;;  %v12258_v14 = vadd.f32 %v12176_v13, %v4694_v45 }
 0x7b0   :  { %9783 = vpow2.f32 %v9104_v28  ;;  %v12242_v9 = vpop.f32.mrf.mxu1  ;;  %v12244_v43 = vpop.f32.mrf.mxu0  ;;  %v12255_v28 = vadd.f32 %v12140_v4, %v4638_v21  ;;  %13967 = vst [vmem:[#allocation79_spill] sm:$0xff] %v12258_v14  ;;  %v13968_v4 = vperm.slane %v12149_v61, 4 }
 0x7b2   :  { %13966 = vst [vmem:[#allocation48_spill] sm:$0xff] %v12255_v28  ;;  %v4724_v21 = vadd.f32 %v12196_v63, %v13968_v4 }
 0x7b3   :  { %v5060_v12 = vpop.f32.mrf.mxu3  ;;  %v5086_v11 = vpop.f32.mrf.mxu2 }
 0x7b4   :  { %v12267_v45 = vadd.f32 %v4737_v56, %v4724_v21 }
 0x7b6   :  { %v9784_v26 = vpop.eup %9783  ;;  %13969 = vst [vmem:[#allocation80_spill] sm:$0xff] %v12267_v45 }
 0x7b7   :  { %v5336_v39 = vadd.f32 1.0, %v9784_v26 }
 0x7b9   :  { %9785 = vrcp.f32 %v5336_v39  ;;  %vm5342_vm2 = vweird.f32 %v5336_v39 }
 0x7bf   :  { %v9786_v17 = vpop.eup %9785 }
 0x7c0   :  { %vm5343_vm0 = vweird.f32 %v9786_v17 }
 0x7c1   :  { %vm12278_vm3 = vmor %vm5342_vm2, %vm5343_vm0 }
 0x7c8   :  { %v5071_v11 = vpop.f32.mrf.mxu1  ;;  %v5097_v12 = vpop.f32.mrf.mxu0 }
 0x7c9   :  { %v5102_v33 = vadd.f32 %v5071_v11, %v12255_v28  ;;  %v5104_v26 = vadd.f32 %v5097_v12, %v12258_v14  ;;  %v5338_v11 = vmul.f32 %v9786_v17, %v5336_v39 }
 0x7cb   :  { %v5274_v22 = vpop.f32.mrf.mxu3  ;;  %v12262_v7 = vpop.f32.mrf.mxu2  ;;  %v9105_v8 = vmul.f32 -1.442695, %v5102_v33  ;;  %v9106_v47 = vmul.f32 -1.442695, %v5104_v26 }
 0x7cc   :  { %v5321_v13 = vrot.slane %v5274_v22, 2 }
 0x7cd   :  { %9787 = vpow2.f32 %v9105_v8  ;;  %v5339_v8 = vsub.f32 1.0, %v5338_v11 }
 0x7ce   :  { %9789 = vpow2.f32 %v9106_v47  ;;  %v5329_v12 = vadd.f32 %v5321_v13, %v12267_v45 }
 0x7cf   :  { %v5340_v22 = vmul.f32 %v9786_v17, %v5339_v8 }
 0x7d0   :  { %v5073_v54 = vpop.f32.mrf.mxu1  ;;  %v5099_v46 = vpop.f32.mrf.mxu0  ;;  %v9107_v27 = vmul.f32 -1.442695, %v5329_v12 }
 0x7d1   :  { %v5103_v46 = vadd.f32 %v5084_v20, %v12180_v57  ;;  %v5341_v47 = vadd.f32 %v9786_v17, %v5340_v22 }
 0x7d3   :  { %v5276_v14 = vpop.f32.mrf.mxu3  ;;  %v5302_v28 = vpop.f32.mrf.mxu2  ;;  %v5345_v20 = vsel %vm12278_vm3, %v9786_v17, %v5341_v47 }
 0x7d4   :  { %v9788_v31 = vpop.eup %9787  ;;  %v5348_v28 = vand.u32 2147483648, %v5336_v39  ;;  %v5346_v14 = vand.u32 2147483647, %v5336_v39  ;;  %v13973_v39 = vperm.slane %v12149_v61, 7 }
 0x7d5   :  { %v9790_v33 = vpop.eup %9789  ;;  %v5355_v26 = vadd.f32 1.0, %v9788_v31 }
 0x7d6   :  { %v12270_v23 = vadd.f32 1.0, %v9790_v33  ;;  %v13972_v33 = vperm.slane %v12149_v61, 5  ;;  %v4808_v22 = vadd.f32 %v12228_v50, %v13973_v39  ;;  %vm5347_vm9 = vcmp.eq.f32.partialorder %v5346_v14, 8.507059e+37 }
 0x7d7   :  { %9791 = vrcp.f32 %v5355_v26  ;;  %v5365_v12 = vand.u32 2147483647, %v5355_v26  ;;  %vm5361_vm10 = vweird.f32 %v5355_v26 }
 0x7d8   :  { %9793 = vrcp.f32 %v12270_v23  ;;  %v4752_v8 = vadd.f32 %v12198_v53, %v13972_v33  ;;  %vm5381_vm14 = vweird.f32 %v12270_v23 }
 0x7d9   :  { %9795 = vpow2.f32 %v9107_v27  ;;  %v5367_v27 = vand.u32 2147483648, %v5355_v26  ;;  %vm5366_vm12 = vcmp.eq.f32.partialorder %v5365_v12, 8.507059e+37 }
 0x7da   :  { %9797 = vtanh.f32 %v5103_v46  ;;  %v12293_v47 = vadd.f32 %v12224_v62, %v4752_v8  ;;  %v5385_v8 = vand.u32 2147483647, %v12270_v23 }
 0x7db   :  { %v5368_v17 = vor.u32 1.1754944e-38, %v5367_v27 }
 0x7dc   :  { %vm5386_vm1 = vcmp.eq.f32.partialorder %v5385_v8, 8.507059e+37 }
 0x7dd   :  { %v9792_v63 = vpop.eup %9791 }
 0x7de   :  { %v12274_v56 = vpop.eup %9793  ;;  %v5357_v54 = vmul.f32 %v9792_v63, %v5355_v26  ;;  %vm5362_vm8 = vweird.f32 %v9792_v63 }
 0x7df   :  { %v5377_v31 = vmul.f32 %v12274_v56, %v12270_v23  ;;  %v9796_v21 = vpop.eup %9795  ;;  %vm5363_vm11 = vmor %vm5361_vm10, %vm5362_vm8  ;;  %vm5382_vm13 = vweird.f32 %v12274_v56 }
 0x7e0   :  { %v5358_v4 = vsub.f32 1.0, %v5357_v54  ;;  %v5349_v54 = vor.u32 1.1754944e-38, %v5348_v28  ;;  %v12290_v46 = vadd.f32 1.0, %v9796_v21  ;;  %v9798_v28 = vpop.eup %9797  ;;  %vm5383_vm15 = vmor %vm5381_vm14, %vm5382_vm13 }
 0x7e1   :  { %v5378_v45 = vsub.f32 1.0, %v5377_v31 }
 0x7e2   :  { %v5359_v11 = vmul.f32 %v9792_v63, %v5358_v4  ;;  %v5350_v13 = vsel %vm5347_vm9, %v5349_v54, %v5345_v20  ;;  %v12296_v4 = vadd.f32 %v12244_v43, %v4808_v22  ;;  %9799 = vrcp.f32 %v12290_v46 }
 0x7e3   :  { %v5379_v14 = vmul.f32 %v12274_v56, %v5378_v45  ;;  %v5387_v45 = vand.u32 2147483648, %v12270_v23  ;;  %vm5405_vm5 = vweird.f32 %v12290_v46 }
 0x7e4   :  { %v5360_v57 = vadd.f32 %v9792_v63, %v5359_v11  ;;  %v5392_v11 = vmul.f32 %v9798_v28, %v5350_v13 }
 0x7e6   :  { %v5364_v53 = vsel %vm5363_vm11, %v9792_v63, %v5360_v57  ;;  %v5380_v57 = vadd.f32 %v12274_v56, %v5379_v14 }
 0x7e7   :  { %v5369_v31 = vsel %vm5366_vm12, %v5368_v17, %v5364_v53  ;;  %v5388_v17 = vor.u32 1.1754944e-38, %v5387_v45 }
 0x7e8   :  { %v5287_v33 = vpop.f32.mrf.mxu1  ;;  %v5313_v50 = vpop.f32.mrf.mxu0  ;;  %v5391_v20 = vmul.f32 0.0, %v5369_v31  ;;  %v5384_v13 = vsel %vm5383_vm15, %v12274_v56, %v5380_v57  ;;  %v13975_v56 = vperm.slane %v12149_v61, 6  ;;  %v13976_v57 = vld [vmem:[#allocation58_spill] sm:$0xff]  ;;  %v14003_v61 = vld [vmem:[#allocation37_spill] sm:$0xff] }
 0x7e9   :  { %v5322_v26 = vrot.slane %v5287_v33, 2  ;;  %v5324_v21 = vrot.slane %v5313_v50, 2  ;;  %v12310_v39 = vpop.eup %9799  ;;  %v5389_v50 = vsel %vm5386_vm1, %v5388_v17, %v5384_v13  ;;  %v13979_v17 = vld [vmem:[#allocation52_spill] sm:$0xff] }
 0x7ea   :  { %v12302_v43 = vadd.f32 %v5392_v11, %v5391_v20  ;;  %v5401_v53 = vmul.f32 %v12310_v39, %v12290_v46  ;;  %v4780_v20 = vadd.f32 %v12226_v10, %v13975_v56  ;;  %vm5406_vm4 = vweird.f32 %v12310_v39  ;;  %v13982_v56 = vld [vmem:[#allocation55_spill] sm:$0xff] }
 0x7eb   :  { %v5330_v62 = vadd.f32 %v5322_v26, %v12293_v47  ;;  %v5332_v27 = vadd.f32 %v5324_v21, %v12296_v4  ;;  %vm12348_vm6 = vmor %vm5405_vm5, %vm5406_vm4 }
 0x7ec   :  { %9801 = vtanh.f32 %v12302_v43  ;;  %v5402_v26 = vsub.f32 1.0, %v5401_v53  ;;  %v5409_v53 = vand.u32 2147483647, %v12290_v46 }
 0x7ed   :  { %v9108_v63 = vmul.f32 -1.442695, %v5330_v62  ;;  %v9109_v12 = vmul.f32 -1.442695, %v5332_v27  ;;  %v5323_v62 = vrot.slane %v12262_v7, 2 }
 0x7ee   :  { %v5403_v27 = vmul.f32 %v12310_v39, %v5402_v26  ;;  %vm5410_vm2 = vcmp.eq.f32.partialorder %v5409_v53, 8.507059e+37 }
 0x7ef   :  { %9803 = vpow2.f32 %v9108_v63  ;;  %v12330_v63 = vadd.f32 %v12242_v9, %v4780_v20  ;;  %v5411_v9 = vand.u32 2147483648, %v12290_v46 }
 0x7f0   :  { %9805 = vpow2.f32 %v9109_v12  ;;  %v5289_v22 = vpop.f32.mrf.mxu1  ;;  %v5315_v54 = vpop.f32.mrf.mxu0  ;;  %v13977_v12 = vld [vmem:[#allocation56_spill] sm:$0xff]  ;;  %v5404_v7 = vadd.f32 %v12310_v39, %v5403_v27 }
 0x7f1   :  { %v5331_v10 = vadd.f32 %v5323_v62, %v12330_v63  ;;  %v13978_v54 = vld [vmem:[#allocation59_spill] sm:$0xff]  ;;  %v5412_v20 = vor.u32 1.1754944e-38, %v5411_v9  ;;  %v13983_v62 = vld [vmem:[#allocation61_spill] sm:$0xff] }
 0x7f2   :  { %v9802_v33 = vpop.eup %9801 }
 0x7f3   :  { %v12315_v31 = vmul.f32 %v9802_v33, %v5389_v50 }
 0x7f5   :  { %v9804_v28 = vpop.eup %9803  ;;  %13974 = vst [vmem:[#allocation81_spill] sm:$0xff] %v12315_v31  ;;  %v5459_v11 = vpack.c.bf16 %v12315_v31, %v12315_v31  ;;  %v14005_v31 = vld [vmem:[#allocation28_spill] sm:$0xff] }
 0x7f6   :  { %v9806_v23 = vpop.eup %9805  ;;  %v5418_v14 = vadd.f32 1.0, %v9804_v28 }
 0x7f7   :  { %v12317_v21 = vadd.f32 1.0, %v9806_v23  ;;  %5468 = vmatmul.bf16.vlgmr.msrb.gmra.mxu3 %v5459_v11  ;;  %5481 = vmatmul.bf16.vlgmr.msra.gmra.mxu1 %v5459_v11  ;;  %v5408_v23 = vsel %vm12348_vm6, %v12310_v39, %v5404_v7  ;;  %v13984_v7 = vld [vmem:[#allocation62_spill] sm:$0xff] }
 0x7f8   :  { %9807 = vrcp.f32 %v5418_v14  ;;  %5494 = vmatmul.bf16.vlgmr.msra.gmra.mxu2 %v5459_v11  ;;  %5507 = vmatmul.bf16.vlgmr.msra.gmra.mxu0 %v5459_v11  ;;  %v5430_v28 = vand.u32 2147483648, %v5418_v14  ;;  %v5428_v11 = vand.u32 2147483647, %v5418_v14  ;;  %vm5424_vm3 = vweird.f32 %v5418_v14 }
 0x7f9   :  { %9809 = vrcp.f32 %v12317_v21  ;;  %5744 = vmatpush.bf16.msrb.mxu3 %v13976_v57  ;;  %5757 = vmatpush.bf16.msra.mxu1 %v11954_v41  ;;  %vm5444_vm11 = vweird.f32 %v12317_v21 }
 0x7fa   :  { %5770 = vmatpush.bf16.msra.mxu2 %v13977_v12  ;;  %5783 = vmatpush.bf16.msra.mxu0 %v11956_v34  ;;  %9811 = vtanh.f32 %v5331_v10  ;;  %v5413_v10 = vsel %vm5410_vm2, %v5412_v20, %v5408_v23  ;;  %vm5429_vm9 = vcmp.eq.f32.partialorder %v5428_v11, 8.507059e+37  ;;  %v5450_v23 = vand.u32 2147483648, %v12317_v21  ;;  %v13987_v20 = vld [vmem:[#allocation66_spill] sm:$0xff] }
 0x7fb   :  { %v5448_v11 = vand.u32 2147483647, %v12317_v21 }
 0x7fd   :  { %5745 = vmatpush.bf16.msrb.mxu3 %v13978_v54  ;;  %5758 = vmatpush.bf16.msra.mxu1 %v11966_v38  ;;  %vm5449_vm13 = vcmp.eq.f32.partialorder %v5448_v11, 8.507059e+37  ;;  %v13996_v11 = vld [vmem:[#allocation49_spill] sm:$0xff] }
 0x7fe   :  { %v9808_v45 = vpop.eup %9807  ;;  %5771 = vmatpush.bf16.msra.mxu2 %v13979_v17  ;;  %5784 = vmatpush.bf16.msra.mxu0 %v11968_v3 }
 0x7ff   :  { %v12335_v8 = vpop.eup %9809  ;;  %v5420_v22 = vmul.f32 %v9808_v45, %v5418_v14  ;;  %vm5425_vm0 = vweird.f32 %v9808_v45 }
 0x800   :  { %v5440_v13 = vmul.f32 %v12335_v8, %v12317_v21  ;;  %vm5426_vm8 = vmor %vm5424_vm3, %vm5425_vm0  ;;  %vm5445_vm10 = vweird.f32 %v12335_v8 }
 0x801   :  { %v5421_v33 = vsub.f32 1.0, %v5420_v22  ;;  %5746 = vmatpush.bf16.msrb.mxu3 %v13982_v56  ;;  %5759 = vmatpush.bf16.msra.mxu1 %v11980_v0  ;;  %v5431_v22 = vor.u32 1.1754944e-38, %v5430_v28  ;;  %v13986_v28 = vld [vmem:[#allocation64_spill] sm:$0xff]  ;;  %vm5446_vm12 = vmor %vm5444_vm11, %vm5445_vm10 }
 0x802   :  { %v5441_v46 = vsub.f32 1.0, %v5440_v13  ;;  %5772 = vmatpush.bf16.msra.mxu2 %v13983_v62  ;;  %5785 = vmatpush.bf16.msra.mxu0 %v11982_v58  ;;  %v13985_v13 = vld [vmem:[#allocation65_spill] sm:$0xff] }
 0x803   :  { %v5422_v26 = vmul.f32 %v9808_v45, %v5421_v33  ;;  %v9812_v33 = vpop.eup %9811 }
 0x804   :  { %v5442_v9 = vmul.f32 %v12335_v8, %v5441_v46  ;;  %v5455_v53 = vmul.f32 %v9812_v33, %v5413_v10  ;;  %v5451_v10 = vor.u32 1.1754944e-38, %v5450_v23  ;;  %v13995_v23 = vld [vmem:[#allocation33_spill] sm:$0xff] }
 0x805   :  { %v5423_v27 = vadd.f32 %v9808_v45, %v5422_v26  ;;  %5747 = vmatpush.bf16.msrb.mxu3 %v13984_v7  ;;  %5760 = vmatpush.bf16.msra.mxu1 %v11992_v32 }
 0x806   :  { %5773 = vmatpush.bf16.msra.mxu2 %v13985_v13  ;;  %5786 = vmatpush.bf16.msra.mxu0 %v11994_v35 }
 0x807   :  { %v5427_v39 = vsel %vm5426_vm8, %v9808_v45, %v5423_v27  ;;  %v5443_v45 = vadd.f32 %v12335_v8, %v5442_v9  ;;  %v13988_v27 = vld [vmem:[#allocation63_spill] sm:$0xff]  ;;  %v13991_v9 = vld [vmem:[#allocation29_spill] sm:$0xff] }
 0x808   :  { %v5432_v50 = vsel %vm5429_vm9, %v5431_v22, %v5427_v39 }
 0x809   :  { %v5454_v26 = vmul.f32 0.0, %v5432_v50  ;;  %5748 = vmatpush.bf16.msrb.mxu3 %v11924_v42  ;;  %5761 = vmatpush.bf16.msra.mxu1 %v12004_v40  ;;  %v5447_v46 = vsel %vm5446_vm12, %v12335_v8, %v5443_v45  ;;  %v13990_v50 = vld [vmem:[#allocation27_spill] sm:$0xff]  ;;  %v13994_v45 = vld [vmem:[#allocation42_spill] sm:$0xff] }
 0x80a   :  { %5774 = vmatpush.bf16.msra.mxu2 %v13986_v28  ;;  %5787 = vmatpush.bf16.msra.mxu0 %v12006_v44  ;;  %v5452_v39 = vsel %vm5449_vm13, %v5451_v10, %v5447_v46  ;;  %v13997_v46 = vld [vmem:[#allocation23_spill] sm:$0xff]  ;;  %v13998_v10 = vld [vmem:[#allocation50_spill] sm:$0xff] }
 0x80b   :  { %v12364_v14 = vadd.f32 %v5455_v53, %v5454_v26  ;;  %v13992_v53 = vld [vmem:[#allocation20_spill] sm:$0xff]  ;;  %v13993_v26 = vld [vmem:[#allocation31_spill] sm:$0xff] }
 0x80d   :  { %9813 = vtanh.f32 %v12364_v14  ;;  %5749 = vmatpush.bf16.msrb.mxu3 %v13987_v20  ;;  %5762 = vmatpush.bf16.msra.mxu1 %v12016_v16 }
 0x80e   :  { %5775 = vmatpush.bf16.msra.mxu2 %v13988_v27  ;;  %5788 = vmatpush.bf16.msra.mxu0 %v12018_v59 }
 0x811   :  { %5750 = vmatpush.bf16.msrb.mxu3 %v11936_v19  ;;  %5763 = vmatpush.bf16.msra.mxu1 %v12028_v6 }
 0x812   :  { %5776 = vmatpush.bf16.msra.mxu2 %v11938_v25  ;;  %5789 = vmatpush.bf16.msra.mxu0 %v12030_v1 }
 0x813   :  { %v9814_v22 = vpop.eup %9813 }
 0x814   :  { %v12383_v21 = vmul.f32 %v9814_v22, %v5452_v39  ;;  %v13999_v22 = vld [vmem:[#allocation26_spill] sm:$0xff]  ;;  %v14000_v39 = vld [vmem:[#allocation57_spill] sm:$0xff] }
 0x815   :  { %5751 = vmatpush.bf16.msrb.mxu3 %v11942_v48  ;;  %5764 = vmatpush.bf16.msra.mxu1 %v12042_v55 }
 0x816   :  { %13989 = vst [vmem:[#allocation58_spill] sm:$0xff] %v12383_v21  ;;  %v5528_v8 = vpack.c.bf16 %v12383_v21, %v12383_v21  ;;  %5777 = vmatpush.bf16.msra.mxu2 %v11944_v49  ;;  %5790 = vmatpush.bf16.msra.mxu0 %v12044_v30  ;;  %v14004_v21 = vld [vmem:[#allocation60_spill] sm:$0xff] }
 0x818   :  { %v5530_v33 = vrot.slane %v5528_v8, 3  ;;  %v14001_v8 = vld [vmem:[#allocation35_spill] sm:$0xff] }
 0x81a   :  { %5540 = vmatmul.bf16.vlgmr.msra.gmra.mxu3 %v5530_v33  ;;  %5553 = vmatmul.bf16.vlgmr.msrb.gmra.mxu1 %v5530_v33 }
 0x81b   :  { %5566 = vmatmul.bf16.vlgmr.msrb.gmra.mxu2 %v5530_v33  ;;  %5579 = vmatmul.bf16.vlgmr.msrb.gmra.mxu0 %v5530_v33  ;;  %v14002_v33 = vld [vmem:[#allocation53_spill] sm:$0xff] }
 0x81c   :  { %5816 = vmatpush.bf16.msra.mxu3 %v11946_v24  ;;  %5829 = vmatpush.bf16.msrb.mxu1 %v12046_v36  ;;  %v5659_v36 = vrot.slane %v12302_v43, 6 }
 0x81d   :  { %5842 = vmatpush.bf16.msrb.mxu2 %v11948_v18  ;;  %5855 = vmatpush.bf16.msrb.mxu0 %v12048_v2 }
 0x820   :  { %5817 = vmatpush.bf16.msra.mxu3 %v11958_v37  ;;  %5830 = vmatpush.bf16.msrb.mxu1 %v12058_v51 }
 0x821   :  { %5843 = vmatpush.bf16.msrb.mxu2 %v13990_v50  ;;  %5856 = vmatpush.bf16.msrb.mxu0 %v12060_v15 }
 0x824   :  { %5818 = vmatpush.bf16.msra.mxu3 %v13991_v9  ;;  %5831 = vmatpush.bf16.msrb.mxu1 %v12068_v5 }
 0x825   :  { %5844 = vmatpush.bf16.msrb.mxu2 %v13992_v53  ;;  %5857 = vmatpush.bf16.msrb.mxu0 %v12070_v60  ;;  %v14013_v53 = vld [vmem:[#allocation78_spill] sm:$0xff] }
 0x828   :  { %5819 = vmatpush.bf16.msra.mxu3 %v11986_v29  ;;  %5832 = vmatpush.bf16.msrb.mxu1 %v12080_v52  ;;  %v14012_v52 = vld [vmem:[#allocation79_spill] sm:$0xff] }
 0x829   :  { %5845 = vmatpush.bf16.msrb.mxu2 %v13993_v26  ;;  %5858 = vmatpush.bf16.msrb.mxu0 %v13994_v45  ;;  %v14011_v26 = vld [vmem:[#allocation48_spill] sm:$0xff] }
 0x82c   :  { %5820 = vmatpush.bf16.msra.mxu3 %v13995_v23  ;;  %5833 = vmatpush.bf16.msrb.mxu1 %v13996_v11  ;;  %v14006_v23 = vld [vmem:[#allocation16_spill] sm:$0xff]  ;;  %v14007_v11 = vld [vmem:[#allocation30_spill] sm:$0xff] }
 0x82d   :  { %5846 = vmatpush.bf16.msrb.mxu2 %v13997_v46  ;;  %5859 = vmatpush.bf16.msrb.mxu0 %v13998_v10  ;;  %v14008_v46 = vld [vmem:[#allocation51_spill] sm:$0xff] }
 0x82e   :  { %v14009_v10 = vld [vmem:[#allocation39_spill] sm:$0xff] }
 0x830   :  { %5821 = vmatpush.bf16.msra.mxu3 %v13999_v22  ;;  %5834 = vmatpush.bf16.msrb.mxu1 %v14000_v39  ;;  %v14010_v22 = vld [vmem:[#allocation69_spill] sm:$0xff] }
 0x831   :  { %5847 = vmatpush.bf16.msrb.mxu2 %v14001_v8  ;;  %5860 = vmatpush.bf16.msrb.mxu0 %v14002_v33 }
 0x834   :  { %5822 = vmatpush.bf16.msra.mxu3 %v14003_v61  ;;  %5835 = vmatpush.bf16.msrb.mxu1 %v14004_v21 }
 0x835   :  { %5848 = vmatpush.bf16.msrb.mxu2 %v14005_v31  ;;  %5861 = vmatpush.bf16.msrb.mxu0 %v14006_v23 }
 0x838   :  { %5823 = vmatpush.bf16.msra.mxu3 %v14007_v11  ;;  %5836 = vmatpush.bf16.msrb.mxu1 %v14008_v46 }
 0x839   :  { %5849 = vmatpush.bf16.msrb.mxu2 %v14009_v10  ;;  %5862 = vmatpush.bf16.msrb.mxu0 %v14010_v22 }
 0x874   :  { %v5482_v39 = vpop.f32.mrf.mxu1 }
 0x875   :  { %v5517_v8 = vrot.slane %v5482_v39, 6  ;;  %v5508_v45 = vpop.f32.mrf.mxu0 }
 0x876   :  { %v5519_v33 = vrot.slane %v5508_v45, 6 }
 0x877   :  { %v5525_v61 = vadd.f32 %v5517_v8, %v14011_v26 }
 0x878   :  { %v5527_v21 = vadd.f32 %v5519_v33, %v14012_v52 }
 0x879   :  { %v9111_v29 = vmul.f32 -1.442695, %v5525_v61 }
 0x87a   :  { %v9112_v31 = vmul.f32 -1.442695, %v5527_v21  ;;  %v5469_v60 = vpop.f32.mrf.mxu3 }
 0x87b   :  { %9815 = vpow2.f32 %v9111_v29  ;;  %v5516_v23 = vrot.slane %v5469_v60, 6  ;;  %v5495_v11 = vpop.f32.mrf.mxu2 }
 0x87c   :  { %9817 = vpow2.f32 %v9112_v31  ;;  %v5484_v46 = vpop.f32.mrf.mxu1  ;;  %v5518_v31 = vrot.slane %v5495_v11, 6 }
 0x87d   :  { %v5524_v10 = vadd.f32 %v5516_v23, %v14013_v53  ;;  %v5510_v5 = vpop.f32.mrf.mxu0 }
 0x87f   :  { %v9110_v22 = vmul.f32 -1.442695, %v5524_v10 }
 0x881   :  { %v9816_v9 = vpop.eup %9815  ;;  %9819 = vpow2.f32 %v9110_v22  ;;  %v14014_v22 = vld [vmem:[#allocation71_spill] sm:$0xff] }
 0x882   :  { %v9818_v39 = vpop.eup %9817  ;;  %v5622_v45 = vadd.f32 1.0, %v9816_v9  ;;  %v5471_v15 = vpop.f32.mrf.mxu3  ;;  %v5526_v9 = vadd.f32 %v5518_v31, %v14014_v22 }
 0x883   :  { %v5497_v8 = vpop.f32.mrf.mxu2  ;;  %v12428_v33 = vadd.f32 1.0, %v9818_v39 }
 0x884   :  { %9821 = vrcp.f32 %v5622_v45  ;;  %v5634_v39 = vand.u32 2147483648, %v5622_v45  ;;  %v5632_v53 = vand.u32 2147483647, %v5622_v45  ;;  %vm5628_vm15 = vweird.f32 %v5622_v45 }
 0x885   :  { %9823 = vrcp.f32 %v12428_v33  ;;  %vm5648_vm8 = vweird.f32 %v12428_v33 }
 0x886   :  { %v5635_v22 = vor.u32 1.1754944e-38, %v5634_v39  ;;  %vm5633_vm5 = vcmp.eq.f32.partialorder %v5632_v53, 8.507059e+37 }
 0x887   :  { %v9820_v61 = vpop.eup %9819 }
 0x888   :  { %v5603_v21 = vadd.f32 1.0, %v9820_v61 }
 0x88a   :  { %v9822_v29 = vpop.eup %9821  ;;  %9825 = vrcp.f32 %v5603_v21  ;;  %v5615_v11 = vand.u32 2147483648, %v5603_v21  ;;  %vm5609_vm6 = vweird.f32 %v5603_v21 }
 0x88b   :  { %v5624_v60 = vmul.f32 %v9822_v29, %v5622_v45  ;;  %v12431_v5 = vpop.eup %9823  ;;  %vm5629_vm14 = vweird.f32 %v9822_v29  ;;  %9827 = vtanh.f32 %v5526_v9 }
 0x88c   :  { %v5644_v61 = vmul.f32 %v12431_v5, %v12428_v33  ;;  %vm12436_vm1 = vmor %vm5628_vm15, %vm5629_vm14  ;;  %v5616_v2 = vor.u32 1.1754944e-38, %v5615_v11  ;;  %vm5649_vm3 = vweird.f32 %v12431_v5 }
 0x88d   :  { %v5625_v23 = vsub.f32 1.0, %v5624_v60  ;;  %vm5650_vm9 = vmor %vm5648_vm8, %vm5649_vm3 }
 0x88e   :  { %v5645_v51 = vsub.f32 1.0, %v5644_v61 }
 0x88f   :  { %v5626_v46 = vmul.f32 %v9822_v29, %v5625_v23  ;;  %v5613_v23 = vand.u32 2147483647, %v5603_v21 }
 0x890   :  { %v9826_v10 = vpop.eup %9825  ;;  %v5646_v39 = vmul.f32 %v12431_v5, %v5645_v51  ;;  %v5652_v51 = vand.u32 2147483647, %v12428_v33 }
 0x891   :  { %v5605_v15 = vmul.f32 %v9826_v10, %v5603_v21  ;;  %v5627_v8 = vadd.f32 %v9822_v29, %v5626_v46  ;;  %vm5610_vm4 = vweird.f32 %v9826_v10  ;;  %vm5614_vm2 = vcmp.eq.f32.partialorder %v5613_v23, 8.507059e+37 }
 0x892   :  { %vm5611_vm0 = vmor %vm5609_vm6, %vm5610_vm4  ;;  %vm5653_vm10 = vcmp.eq.f32.partialorder %v5652_v51, 8.507059e+37 }
 0x893   :  { %v5606_v52 = vsub.f32 1.0, %v5605_v15  ;;  %v5631_v31 = vsel %vm12436_vm1, %v9822_v29, %v5627_v8  ;;  %v9828_v29 = vpop.eup %9827 }
 0x894   :  { %v5636_v18 = vsel %vm5633_vm5, %v5635_v22, %v5631_v31 }
 0x895   :  { %v5607_v60 = vmul.f32 %v9826_v10, %v5606_v52  ;;  %v5661_v61 = vmul.f32 %v5659_v36, %v5636_v18  ;;  %v5654_v18 = vand.u32 2147483648, %v12428_v33 }
 0x897   :  { %v5554_v46 = vpop.f32.mrf.mxu1  ;;  %v5608_v37 = vadd.f32 %v9826_v10, %v5607_v60 }
 0x898   :  { %v5589_v45 = vrot.slane %v5554_v46, 4  ;;  %v5580_v50 = vpop.f32.mrf.mxu0 }
 0x899   :  { %v5591_v15 = vrot.slane %v5580_v50, 4  ;;  %v5612_v52 = vsel %vm5611_vm0, %v9826_v10, %v5608_v37  ;;  %v14017_v10 = vld [vmem:[#allocation80_spill] sm:$0xff] }
 0x89a   :  { %v5597_v9 = vadd.f32 %v5589_v45, %v12293_v47  ;;  %v5617_v8 = vsel %vm5614_vm2, %v5616_v2, %v5612_v52  ;;  %v5647_v2 = vadd.f32 %v12431_v5, %v5646_v39 }
 0x89b   :  { %v5599_v26 = vadd.f32 %v5591_v15, %v12296_v4  ;;  %v5662_v60 = vmul.f32 %v9828_v29, %v5617_v8 }
 0x89c   :  { %v9114_v53 = vmul.f32 -1.442695, %v5597_v9  ;;  %v5651_v52 = vsel %vm5650_vm9, %v12431_v5, %v5647_v2 }
 0x89d   :  { %v9115_v21 = vmul.f32 -1.442695, %v5599_v26  ;;  %v5541_v50 = vpop.f32.mrf.mxu3  ;;  %v12446_v31 = vadd.f32 %v5662_v60, %v5661_v61  ;;  %v5655_v26 = vor.u32 1.1754944e-38, %v5654_v18 }
 0x89e   :  { %9829 = vpow2.f32 %v9114_v53  ;;  %v5588_v11 = vrot.slane %v5541_v50, 4  ;;  %v5567_v22 = vpop.f32.mrf.mxu2 }
 0x89f   :  { %9831 = vpow2.f32 %v9115_v21  ;;  %v5556_v37 = vpop.f32.mrf.mxu1  ;;  %v5656_v39 = vsel %vm5653_vm10, %v5655_v26, %v5651_v52 }
 0x8a0   :  { %v5596_v43 = vadd.f32 %v5588_v11, %v14017_v10  ;;  %v5582_v23 = vpop.f32.mrf.mxu0  ;;  %9833 = vtanh.f32 %v12446_v31  ;;  %v5590_v37 = vrot.slane %v5567_v22, 4 }
 0x8a2   :  { %v9113_v36 = vmul.f32 -1.442695, %v5596_v43 }
 0x8a4   :  { %v9830_v46 = vpop.eup %9829  ;;  %9835 = vpow2.f32 %v9113_v36  ;;  %v5598_v36 = vadd.f32 %v5590_v37, %v12330_v63 }
 0x8a5   :  { %v9832_v45 = vpop.eup %9831  ;;  %v5688_v15 = vadd.f32 1.0, %v9830_v46  ;;  %v5543_v9 = vpop.f32.mrf.mxu3 }
 0x8a6   :  { %v5569_v29 = vpop.f32.mrf.mxu2  ;;  %v9834_v8 = vpop.eup %9833  ;;  %v12456_v53 = vadd.f32 1.0, %v9832_v45 }
 0x8a7   :  { %9837 = vrcp.f32 %v5688_v15  ;;  %v12458_v61 = vmul.f32 %v9834_v8, %v5656_v39  ;;  %v5700_v46 = vand.u32 2147483648, %v5688_v15  ;;  %vm5694_vm12 = vweird.f32 %v5688_v15 }
 0x8a8   :  { %9839 = vrcp.f32 %v12456_v53  ;;  %v5698_v52 = vand.u32 2147483647, %v5688_v15  ;;  %vm5714_vm0 = vweird.f32 %v12456_v53 }
 0x8a9   :  { %v5740_v21 = vpack.c.bf16 %v12458_v61, %v12458_v61 }
 0x8aa   :  { %v9836_v60 = vpop.eup %9835  ;;  %vm5699_vm1 = vcmp.eq.f32.partialorder %v5698_v52, 8.507059e+37 }
 0x8ab   :  { %v5669_v33 = vadd.f32 1.0, %v9836_v60  ;;  %v5742_v11 = vrot.slane %v5740_v21, 1  ;;  %v5701_v60 = vor.u32 1.1754944e-38, %v5700_v46 }
 0x8ad   :  { %v9838_v50 = vpop.eup %9837  ;;  %9841 = vrcp.f32 %v5669_v33  ;;  %5752 = vmatmul.bf16.vlgmr.msrb.gmra.mxu3 %v5742_v11  ;;  %5765 = vmatmul.bf16.vlgmr.msra.gmra.mxu1 %v5742_v11  ;;  %v5681_v29 = vand.u32 2147483648, %v5669_v33  ;;  %v5679_v39 = vand.u32 2147483647, %v5669_v33  ;;  %vm5675_vm15 = vweird.f32 %v5669_v33 }
 0x8ae   :  { %v5690_v5 = vmul.f32 %v9838_v50, %v5688_v15  ;;  %5778 = vmatmul.bf16.vlgmr.msra.gmra.mxu2 %v5742_v11  ;;  %5791 = vmatmul.bf16.vlgmr.msra.gmra.mxu0 %v5742_v11  ;;  %v12463_v23 = vpop.eup %9839  ;;  %vm5695_vm11 = vweird.f32 %v9838_v50  ;;  %9843 = vtanh.f32 %v5598_v36 }
 0x8af   :  { %6028 = vmatpush.bf16.msrb.mxu3 %v13976_v57  ;;  %6041 = vmatpush.bf16.msra.mxu1 %v11954_v41  ;;  %v5710_v45 = vmul.f32 %v12463_v23, %v12456_v53  ;;  %vm12474_vm13 = vmor %vm5694_vm12, %vm5695_vm11  ;;  %v5682_v11 = vor.u32 1.1754944e-38, %v5681_v29  ;;  %vm5680_vm5 = vcmp.eq.f32.partialorder %v5679_v39, 8.507059e+37  ;;  %vm5715_vm6 = vweird.f32 %v12463_v23  ;;  %v14020_v39 = vld [vmem:[#allocation34_spill] sm:$0xff] }
 0x8b0   :  { %v5691_v43 = vsub.f32 1.0, %v5690_v5  ;;  %6054 = vmatpush.bf16.msra.mxu2 %v13977_v12  ;;  %6067 = vmatpush.bf16.msra.mxu0 %v11956_v34  ;;  %vm5716_vm2 = vmor %vm5714_vm0, %vm5715_vm6 }
 0x8b1   :  { %v5711_v21 = vsub.f32 1.0, %v5710_v45  ;;  %v5718_v45 = vand.u32 2147483647, %v12456_v53 }
 0x8b2   :  { %v5692_v2 = vmul.f32 %v9838_v50, %v5691_v43 }
 0x8b3   :  { %v9842_v18 = vpop.eup %9841  ;;  %6029 = vmatpush.bf16.msrb.mxu3 %v13978_v54  ;;  %6042 = vmatpush.bf16.msra.mxu1 %v11966_v38  ;;  %v5712_v36 = vmul.f32 %v12463_v23, %v5711_v21  ;;  %vm5719_vm3 = vcmp.eq.f32.partialorder %v5718_v45, 8.507059e+37  ;;  %v14023_v21 = vld [vmem:[#allocation19_spill] sm:$0xff]  ;;  %v14036_v45 = vld [vmem:[#allocation49_spill] sm:$0xff] }
 0x8b4   :  { %v5671_v22 = vmul.f32 %v9842_v18, %v5669_v33  ;;  %v5693_v51 = vadd.f32 %v9838_v50, %v5692_v2  ;;  %6055 = vmatpush.bf16.msra.mxu2 %v13979_v17  ;;  %6068 = vmatpush.bf16.msra.mxu0 %v11968_v3  ;;  %vm5676_vm14 = vweird.f32 %v9842_v18  ;;  %v9844_v2 = vpop.eup %9843 }
 0x8b5   :  { %vm5677_vm4 = vmor %vm5675_vm15, %vm5676_vm14 }
 0x8b6   :  { %v5672_v9 = vsub.f32 1.0, %v5671_v22  ;;  %v5697_v15 = vsel %vm12474_vm13, %v9838_v50, %v5693_v51  ;;  %v5725_v50 = vrot.slane %v12364_v14, 2  ;;  %v5713_v14 = vadd.f32 %v12463_v23, %v5712_v36  ;;  %v14030_v36 = vld [vmem:[#allocation47_spill] sm:$0xff] }
 0x8b7   :  { %6030 = vmatpush.bf16.msrb.mxu3 %v13982_v56  ;;  %6043 = vmatpush.bf16.msra.mxu1 %v11980_v0  ;;  %v5702_v37 = vsel %vm5699_vm1, %v5701_v60, %v5697_v15  ;;  %v14021_v15 = vld [vmem:[#allocation17_spill] sm:$0xff]  ;;  %v14022_v60 = vld [vmem:[#allocation43_spill] sm:$0xff] }
 0x8b8   :  { %v5673_v8 = vmul.f32 %v9842_v18, %v5672_v9  ;;  %6056 = vmatpush.bf16.msra.mxu2 %v13983_v62  ;;  %6069 = vmatpush.bf16.msra.mxu0 %v11982_v58  ;;  %v5727_v22 = vmul.f32 %v5725_v50, %v5702_v37  ;;  %v5717_v9 = vsel %vm5716_vm2, %v12463_v23, %v5713_v14  ;;  %v14026_v37 = vld [vmem:[#allocation36_spill] sm:$0xff]  ;;  %v14028_v50 = vld [vmem:[#allocation38_spill] sm:$0xff] }
 0x8b9   :  { %v14034_v14 = vld [vmem:[#allocation42_spill] sm:$0xff] }
 0x8ba   :  { %v5674_v5 = vadd.f32 %v9842_v18, %v5673_v8 }
 0x8bb   :  { %6031 = vmatpush.bf16.msrb.mxu3 %v13984_v7  ;;  %6044 = vmatpush.bf16.msra.mxu1 %v11992_v32 }
 0x8bc   :  { %v5678_v43 = vsel %vm5677_vm4, %v9842_v18, %v5674_v5  ;;  %6057 = vmatpush.bf16.msra.mxu2 %v13985_v13  ;;  %6070 = vmatpush.bf16.msra.mxu0 %v11994_v35  ;;  %v5720_v18 = vand.u32 2147483648, %v12456_v53  ;;  %v14024_v5 = vld [vmem:[#allocation45_spill] sm:$0xff] }
 0x8bd   :  { %v5683_v33 = vsel %vm5680_vm5, %v5682_v11, %v5678_v43  ;;  %v14025_v11 = vld [vmem:[#allocation27_spill] sm:$0xff]  ;;  %v14027_v43 = vld [vmem:[#allocation29_spill] sm:$0xff] }
 0x8be   :  { %v5728_v51 = vmul.f32 %v9844_v2, %v5683_v33  ;;  %v5721_v52 = vor.u32 1.1754944e-38, %v5720_v18  ;;  %v14029_v2 = vld [vmem:[#allocation20_spill] sm:$0xff]  ;;  %v14031_v33 = vld [vmem:[#allocation21_spill] sm:$0xff] }
 0x8bf   :  { %6032 = vmatpush.bf16.msrb.mxu3 %v11924_v42  ;;  %6045 = vmatpush.bf16.msra.mxu1 %v12004_v40  ;;  %v14035_v18 = vld [vmem:[#allocation33_spill] sm:$0xff] }
 0x8c0   :  { %v12492_v46 = vadd.f32 %v5728_v51, %v5727_v22  ;;  %6058 = vmatpush.bf16.msra.mxu2 %v13986_v28  ;;  %6071 = vmatpush.bf16.msra.mxu0 %v12006_v44  ;;  %v5722_v29 = vsel %vm5719_vm3, %v5721_v52, %v5717_v9  ;;  %v14032_v22 = vld [vmem:[#allocation40_spill] sm:$0xff]  ;;  %v14033_v51 = vld [vmem:[#allocation31_spill] sm:$0xff]  ;;  %v14038_v52 = vld [vmem:[#allocation50_spill] sm:$0xff] }
 0x8c1   :  { %v14037_v9 = vld [vmem:[#allocation23_spill] sm:$0xff] }
 0x8c2   :  { %9845 = vtanh.f32 %v12492_v46 }
 0x8c3   :  { %6033 = vmatpush.bf16.msrb.mxu3 %v13987_v20  ;;  %6046 = vmatpush.bf16.msra.mxu1 %v12016_v16 }
 0x8c4   :  { %6059 = vmatpush.bf16.msra.mxu2 %v13988_v27  ;;  %6072 = vmatpush.bf16.msra.mxu0 %v12018_v59 }
 0x8c7   :  { %6034 = vmatpush.bf16.msrb.mxu3 %v11936_v19  ;;  %6047 = vmatpush.bf16.msra.mxu1 %v12028_v6 }
 0x8c8   :  { %v9846_v26 = vpop.eup %9845  ;;  %6060 = vmatpush.bf16.msra.mxu2 %v11938_v25  ;;  %6073 = vmatpush.bf16.msra.mxu0 %v12030_v1 }
 0x8c9   :  { %v12509_v53 = vmul.f32 %v9846_v26, %v5722_v29  ;;  %v14039_v26 = vld [vmem:[#allocation26_spill] sm:$0xff]  ;;  %v14040_v29 = vld [vmem:[#allocation57_spill] sm:$0xff] }
 0x8cb   :  { %v5812_v23 = vpack.c.bf16 %v12509_v53, %v12509_v53  ;;  %6035 = vmatpush.bf16.msrb.mxu3 %v11942_v48  ;;  %6048 = vmatpush.bf16.msra.mxu1 %v12042_v55 }
 0x8cc   :  { %6061 = vmatpush.bf16.msra.mxu2 %v11944_v49  ;;  %6074 = vmatpush.bf16.msra.mxu0 %v12044_v30 }
 0x8cd   :  { %v5814_v8 = vrot.slane %v5812_v23, 2  ;;  %v14041_v23 = vld [vmem:[#allocation35_spill] sm:$0xff] }
 0x8cf   :  { %5824 = vmatmul.bf16.vlgmr.msra.gmra.mxu3 %v5814_v8  ;;  %5837 = vmatmul.bf16.vlgmr.msrb.gmra.mxu1 %v5814_v8 }
 0x8d0   :  { %5850 = vmatmul.bf16.vlgmr.msrb.gmra.mxu2 %v5814_v8  ;;  %5863 = vmatmul.bf16.vlgmr.msrb.gmra.mxu0 %v5814_v8  ;;  %v14042_v8 = vld [vmem:[#allocation53_spill] sm:$0xff] }
 0x8d1   :  { %6100 = vmatpush.bf16.msra.mxu3 %v11946_v24  ;;  %6113 = vmatpush.bf16.msrb.mxu1 %v14020_v39 }
 0x8d2   :  { %6126 = vmatpush.bf16.msrb.mxu2 %v14021_v15  ;;  %6139 = vmatpush.bf16.msrb.mxu0 %v14022_v60 }
 0x8d5   :  { %6101 = vmatpush.bf16.msra.mxu3 %v14023_v21  ;;  %6114 = vmatpush.bf16.msrb.mxu1 %v14024_v5 }
 0x8d6   :  { %6127 = vmatpush.bf16.msrb.mxu2 %v14025_v11  ;;  %6140 = vmatpush.bf16.msrb.mxu0 %v14026_v37  ;;  %v14053_v37 = vld [vmem:[#allocation78_spill] sm:$0xff] }
 0x8d9   :  { %6102 = vmatpush.bf16.msra.mxu3 %v14027_v43  ;;  %6115 = vmatpush.bf16.msrb.mxu1 %v14028_v50 }
 0x8da   :  { %6128 = vmatpush.bf16.msrb.mxu2 %v14029_v2  ;;  %6141 = vmatpush.bf16.msrb.mxu0 %v14030_v36  ;;  %v14051_v36 = vld [vmem:[#allocation48_spill] sm:$0xff]  ;;  %v14052_v2 = vld [vmem:[#allocation79_spill] sm:$0xff] }
 0x8dd   :  { %6103 = vmatpush.bf16.msra.mxu3 %v14031_v33  ;;  %6116 = vmatpush.bf16.msrb.mxu1 %v14032_v22  ;;  %v14043_v22 = vld [vmem:[#allocation37_spill] sm:$0xff] }
 0x8de   :  { %6129 = vmatpush.bf16.msrb.mxu2 %v14033_v51  ;;  %6142 = vmatpush.bf16.msrb.mxu0 %v14034_v14  ;;  %v14044_v51 = vld [vmem:[#allocation60_spill] sm:$0xff] }
 0x8df   :  { %v14045_v14 = vld [vmem:[#allocation28_spill] sm:$0xff] }
 0x8e1   :  { %6104 = vmatpush.bf16.msra.mxu3 %v14035_v18  ;;  %6117 = vmatpush.bf16.msrb.mxu1 %v14036_v45  ;;  %v14046_v18 = vld [vmem:[#allocation16_spill] sm:$0xff]  ;;  %v14047_v45 = vld [vmem:[#allocation30_spill] sm:$0xff] }
 0x8e2   :  { %6130 = vmatpush.bf16.msrb.mxu2 %v14037_v9  ;;  %6143 = vmatpush.bf16.msrb.mxu0 %v14038_v52  ;;  %v14048_v9 = vld [vmem:[#allocation51_spill] sm:$0xff] }
 0x8e3   :  { %v14049_v52 = vld [vmem:[#allocation39_spill] sm:$0xff] }
 0x8e5   :  { %6105 = vmatpush.bf16.msra.mxu3 %v14039_v26  ;;  %6118 = vmatpush.bf16.msrb.mxu1 %v14040_v29  ;;  %v14050_v26 = vld [vmem:[#allocation69_spill] sm:$0xff] }
 0x8e6   :  { %6131 = vmatpush.bf16.msrb.mxu2 %v14041_v23  ;;  %6144 = vmatpush.bf16.msrb.mxu0 %v14042_v8 }
 0x8e9   :  { %6106 = vmatpush.bf16.msra.mxu3 %v14043_v22  ;;  %6119 = vmatpush.bf16.msrb.mxu1 %v14044_v51 }
 0x8ea   :  { %6132 = vmatpush.bf16.msrb.mxu2 %v14045_v14  ;;  %6145 = vmatpush.bf16.msrb.mxu0 %v14046_v18 }
 0x8ed   :  { %6107 = vmatpush.bf16.msra.mxu3 %v14047_v45  ;;  %6120 = vmatpush.bf16.msrb.mxu1 %v14048_v9 }
 0x8ee   :  { %6133 = vmatpush.bf16.msrb.mxu2 %v14049_v52  ;;  %6146 = vmatpush.bf16.msrb.mxu0 %v14050_v26 }
 0x92a   :  { %v5766_v29 = vpop.f32.mrf.mxu1 }
 0x92b   :  { %v5801_v23 = vrot.slane %v5766_v29, 4  ;;  %v5792_v33 = vpop.f32.mrf.mxu0 }
 0x92c   :  { %v5803_v8 = vrot.slane %v5792_v33, 4 }
 0x92d   :  { %v5809_v22 = vadd.f32 %v5801_v23, %v14051_v36 }
 0x92e   :  { %v5811_v51 = vadd.f32 %v5803_v8, %v14052_v2 }
 0x92f   :  { %v9117_v50 = vmul.f32 -1.442695, %v5809_v22 }
 0x930   :  { %v9118_v14 = vmul.f32 -1.442695, %v5811_v51  ;;  %v5753_v43 = vpop.f32.mrf.mxu3 }
 0x931   :  { %9847 = vpow2.f32 %v9117_v50  ;;  %v5800_v18 = vrot.slane %v5753_v43, 4  ;;  %v5779_v45 = vpop.f32.mrf.mxu2 }
 0x932   :  { %9849 = vpow2.f32 %v9118_v14  ;;  %v5768_v9 = vpop.f32.mrf.mxu1  ;;  %v5802_v14 = vrot.slane %v5779_v45, 4 }
 0x933   :  { %v5808_v52 = vadd.f32 %v5800_v18, %v14053_v37  ;;  %v5794_v11 = vpop.f32.mrf.mxu0 }
 0x935   :  { %v9116_v26 = vmul.f32 -1.442695, %v5808_v52 }
 0x937   :  { %v9848_v5 = vpop.eup %9847  ;;  %9851 = vpow2.f32 %v9116_v26  ;;  %v14054_v26 = vld [vmem:[#allocation71_spill] sm:$0xff] }
 0x938   :  { %v9850_v29 = vpop.eup %9849  ;;  %v5906_v33 = vadd.f32 1.0, %v9848_v5  ;;  %v5755_v21 = vpop.f32.mrf.mxu3  ;;  %v5810_v5 = vadd.f32 %v5802_v14, %v14054_v26 }
 0x939   :  { %v5781_v23 = vpop.f32.mrf.mxu2  ;;  %v12556_v8 = vadd.f32 1.0, %v9850_v29 }
 0x93a   :  { %9853 = vrcp.f32 %v5906_v33  ;;  %v5918_v29 = vand.u32 2147483648, %v5906_v33  ;;  %vm5912_vm9 = vweird.f32 %v5906_v33  ;;  %v5916_v2 = vand.u32 2147483647, %v5906_v33 }
 0x93b   :  { %9855 = vrcp.f32 %v12556_v8  ;;  %vm5932_vm4 = vweird.f32 %v12556_v8 }
 0x93c   :  { %v5919_v39 = vor.u32 1.1754944e-38, %v5918_v29  ;;  %vm5917_vm13 = vcmp.eq.f32.partialorder %v5916_v2, 8.507059e+37 }
 0x93d   :  { %v9852_v22 = vpop.eup %9851 }
 0x93e   :  { %v5887_v51 = vadd.f32 1.0, %v9852_v22 }
 0x940   :  { %v9854_v43 = vpop.eup %9853  ;;  %9857 = vrcp.f32 %v5887_v51  ;;  %vm5893_vm12 = vweird.f32 %v5887_v51 }
 0x941   :  { %v5908_v50 = vmul.f32 %v9854_v43, %v5906_v33  ;;  %v12559_v11 = vpop.eup %9855  ;;  %vm5913_vm8 = vweird.f32 %v9854_v43  ;;  %9859 = vtanh.f32 %v5810_v5 }
 0x942   :  { %v5928_v22 = vmul.f32 %v12559_v11, %v12556_v8  ;;  %vm12564_vm10 = vmor %vm5912_vm9, %vm5913_vm8  ;;  %vm5933_vm1 = vweird.f32 %v12559_v11 }
 0x943   :  { %v5909_v18 = vsub.f32 1.0, %v5908_v50  ;;  %v5897_v50 = vand.u32 2147483647, %v5887_v51  ;;  %vm5934_vm5 = vmor %vm5932_vm4, %vm5933_vm1 }
 0x944   :  { %v5929_v24 = vsub.f32 1.0, %v5928_v22 }
 0x945   :  { %v5910_v9 = vmul.f32 %v9854_v43, %v5909_v18  ;;  %v5899_v18 = vand.u32 2147483648, %v5887_v51  ;;  %vm5898_vm15 = vcmp.eq.f32.partialorder %v5897_v50, 8.507059e+37 }
 0x946   :  { %v9858_v52 = vpop.eup %9857  ;;  %v5930_v29 = vmul.f32 %v12559_v11, %v5929_v24  ;;  %v5938_v24 = vand.u32 2147483648, %v12556_v8 }
 0x947   :  { %v5889_v21 = vmul.f32 %v9858_v52, %v5887_v51  ;;  %v5911_v23 = vadd.f32 %v9854_v43, %v5910_v9  ;;  %vm5894_vm11 = vweird.f32 %v9858_v52  ;;  %v5900_v49 = vor.u32 1.1754944e-38, %v5899_v18 }
 0x948   :  { %vm5895_vm14 = vmor %vm5893_vm12, %vm5894_vm11 }
 0x949   :  { %v5890_v37 = vsub.f32 1.0, %v5889_v21  ;;  %v5915_v9 = vsel %vm12564_vm10, %v9854_v43, %v5911_v23  ;;  %v9860_v23 = vpop.eup %9859 }
 0x94a   :  { %v5920_v5 = vsel %vm5917_vm13, %v5919_v39, %v5915_v9 }
 0x94b   :  { %v5891_v26 = vmul.f32 %v9858_v52, %v5890_v37  ;;  %v5943_v37 = vrot.slane %v12446_v31, 6 }
 0x94c   :  { %v5838_v36 = vpop.f32.mrf.mxu1 }
 0x94d   :  { %v5873_v60 = vrot.slane %v5838_v36, 6  ;;  %v5864_v14 = vpop.f32.mrf.mxu0  ;;  %v5892_v21 = vadd.f32 %v9858_v52, %v5891_v26  ;;  %v5945_v2 = vmul.f32 %v5943_v37, %v5920_v5  ;;  %v5939_v5 = vor.u32 1.1754944e-38, %v5938_v24 }
 0x94e   :  { %v5875_v15 = vrot.slane %v5864_v14, 6 }
 0x94f   :  { %v5881_v33 = vadd.f32 %v5873_v60, %v12293_v47  ;;  %v5896_v55 = vsel %vm5895_vm14, %v9858_v52, %v5892_v21 }
 0x950   :  { %v5883_v30 = vadd.f32 %v5875_v15, %v12296_v4  ;;  %v5901_v22 = vsel %vm5898_vm15, %v5900_v49, %v5896_v55  ;;  %v5936_v55 = vand.u32 2147483647, %v12556_v8  ;;  %v14057_v8 = vld [vmem:[#allocation81_spill] sm:$0xff] }
 0x951   :  { %v9120_v36 = vmul.f32 -1.442695, %v5881_v33  ;;  %v5946_v26 = vmul.f32 %v9860_v23, %v5901_v22 }
 0x952   :  { %v9121_v45 = vmul.f32 -1.442695, %v5883_v30  ;;  %v5825_v43 = vpop.f32.mrf.mxu3  ;;  %v5931_v30 = vadd.f32 %v12559_v11, %v5930_v29  ;;  %vm5937_vm6 = vcmp.eq.f32.partialorder %v5936_v55, 8.507059e+37 }
 0x953   :  { %9861 = vpow2.f32 %v9120_v36  ;;  %v5872_v60 = vrot.slane %v5825_v43, 6  ;;  %v5851_v51 = vpop.f32.mrf.mxu2  ;;  %v12575_v14 = vadd.f32 %v5946_v26, %v5945_v2  ;;  %v5733_v36 = vrot.slane %v12458_v61, 2 }
 0x954   :  { %9863 = vpow2.f32 %v9121_v45  ;;  %v5840_v15 = vpop.f32.mrf.mxu1  ;;  %v5935_v21 = vsel %vm5934_vm5, %v12559_v11, %v5931_v30 }
 0x955   :  { %v5880_v39 = vadd.f32 %v5872_v60, %v14017_v10  ;;  %v5866_v18 = vpop.f32.mrf.mxu0  ;;  %9865 = vtanh.f32 %v12575_v14  ;;  %v5940_v43 = vsel %vm5937_vm6, %v5939_v5, %v5935_v21  ;;  %v5735_v60 = vmax.f32 %v14057_v8, %v5733_v36 }
 0x956   :  { %v5874_v18 = vrot.slane %v5851_v51, 6 }
 0x957   :  { %v9119_v31 = vmul.f32 -1.442695, %v5880_v39 }
 0x958   :  { %v5882_v55 = vadd.f32 %v5874_v18, %v12330_v63 }
 0x959   :  { %v9862_v49 = vpop.eup %9861  ;;  %9867 = vpow2.f32 %v9119_v31 }
 0x95a   :  { %v9864_v52 = vpop.eup %9863  ;;  %v5972_v50 = vadd.f32 1.0, %v9862_v49  ;;  %v5827_v9 = vpop.f32.mrf.mxu3 }
 0x95b   :  { %v5853_v33 = vpop.f32.mrf.mxu2  ;;  %v12585_v37 = vadd.f32 1.0, %v9864_v52  ;;  %v9866_v45 = vpop.eup %9865 }
 0x95c   :  { %9869 = vrcp.f32 %v5972_v50  ;;  %v5949_v29 = vmul.f32 %v9866_v45, %v5940_v43  ;;  %v5984_v9 = vand.u32 2147483648, %v5972_v50  ;;  %vm5978_vm2 = vweird.f32 %v5972_v50 }
 0x95d   :  { %9871 = vrcp.f32 %v12585_v37  ;;  %v5982_v5 = vand.u32 2147483647, %v5972_v50  ;;  %vm5998_vm14 = vweird.f32 %v12585_v37 }
 0x95e   :  { %v6017_v2 = vrot.slane %v5949_v29, 4  ;;  %v6024_v26 = vpack.c.bf16 %v5949_v29, %v5949_v29  ;;  %v5985_v29 = vor.u32 1.1754944e-38, %v5984_v9 }
 0x95f   :  { %v9868_v23 = vpop.eup %9867  ;;  %vm5983_vm10 = vcmp.eq.f32.partialorder %v5982_v5, 8.507059e+37 }
 0x960   :  { %v5953_v22 = vadd.f32 1.0, %v9868_v23  ;;  %v12589_v39 = vmax.f32 %v5735_v60, %v6017_v2  ;;  %v6026_v61 = vrot.slane %v6024_v26, 2 }
 0x962   :  { %v9870_v15 = vpop.eup %9869  ;;  %9873 = vrcp.f32 %v5953_v22  ;;  %6036 = vmatmul.bf16.vlgmr.msrb.gmra.mxu3 %v6026_v61  ;;  %6049 = vmatmul.bf16.vlgmr.msra.gmra.mxu1 %v6026_v61  ;;  %v5965_v45 = vand.u32 2147483648, %v5953_v22  ;;  %v5963_v23 = vand.u32 2147483647, %v5953_v22  ;;  %vm5959_vm9 = vweird.f32 %v5953_v22 }
 0x963   :  { %v5974_v11 = vmul.f32 %v9870_v15, %v5972_v50  ;;  %6062 = vmatmul.bf16.vlgmr.msra.gmra.mxu2 %v6026_v61  ;;  %6075 = vmatmul.bf16.vlgmr.msra.gmra.mxu0 %v6026_v61  ;;  %v12591_v30 = vpop.eup %9871  ;;  %vm5979_vm0 = vweird.f32 %v9870_v15  ;;  %9875 = vtanh.f32 %v5882_v55 }
 0x964   :  { %6300 = vmatpush.bf16.msrb.mxu3 %v13976_v57  ;;  %6313 = vmatpush.bf16.msra.mxu1 %v11954_v41  ;;  %v5994_v33 = vmul.f32 %v12591_v30, %v12585_v37  ;;  %vm12602_vm3 = vmor %vm5978_vm2, %vm5979_vm0  ;;  %v5966_v2 = vor.u32 1.1754944e-38, %v5965_v45  ;;  %vm5964_vm12 = vcmp.eq.f32.partialorder %v5963_v23, 8.507059e+37  ;;  %vm5999_vm13 = vweird.f32 %v12591_v30 }
 0x965   :  { %v5975_v31 = vsub.f32 1.0, %v5974_v11  ;;  %6326 = vmatpush.bf16.msra.mxu2 %v13977_v12  ;;  %6339 = vmatpush.bf16.msra.mxu0 %v11956_v34  ;;  %v6009_v11 = vrot.slane %v12492_v46, 2  ;;  %vm6000_vm15 = vmor %vm5998_vm14, %vm5999_vm13 }
 0x966   :  { %v5995_v8 = vsub.f32 1.0, %v5994_v33  ;;  %v5737_v33 = vrot.slane %v12509_v53, 6 }
 0x967   :  { %v5976_v24 = vmul.f32 %v9870_v15, %v5975_v31 }
 0x968   :  { %v9874_v49 = vpop.eup %9873  ;;  %6301 = vmatpush.bf16.msrb.mxu3 %v13978_v54  ;;  %6314 = vmatpush.bf16.msra.mxu1 %v11966_v38  ;;  %v5996_v18 = vmul.f32 %v12591_v30, %v5995_v8  ;;  %v14063_v8 = vld [vmem:[#allocation32_spill] sm:$0xff] }
 0x969   :  { %v5955_v51 = vmul.f32 %v9874_v49, %v5953_v22  ;;  %v5977_v52 = vadd.f32 %v9870_v15, %v5976_v24  ;;  %6327 = vmatpush.bf16.msra.mxu2 %v13979_v17  ;;  %6340 = vmatpush.bf16.msra.mxu0 %v11968_v3  ;;  %vm5960_vm8 = vweird.f32 %v9874_v49 }
 0x96a   :  { %vm5961_vm11 = vmor %vm5959_vm9, %vm5960_vm8  ;;  %v5997_v46 = vadd.f32 %v12591_v30, %v5996_v18  ;;  %v14070_v18 = vld [vmem:[#allocation27_spill] sm:$0xff] }
 0x96b   :  { %v5956_v21 = vsub.f32 1.0, %v5955_v51  ;;  %v5981_v50 = vsel %vm12602_vm3, %v9870_v15, %v5977_v52  ;;  %v9876_v15 = vpop.eup %9875  ;;  %v6002_v51 = vand.u32 2147483647, %v12585_v37 }
 0x96c   :  { %6302 = vmatpush.bf16.msrb.mxu3 %v13982_v56  ;;  %6315 = vmatpush.bf16.msra.mxu1 %v11980_v0  ;;  %v5986_v26 = vsel %vm5983_vm10, %v5985_v29, %v5981_v50  ;;  %v6001_v52 = vsel %vm6000_vm15, %v12591_v30, %v5997_v46  ;;  %v14060_v30 = vld [vmem:[#allocation58_spill] sm:$0xff]  ;;  %v14061_v50 = vld [vmem:[#allocation41_spill] sm:$0xff]  ;;  %v14074_v46 = vld [vmem:[#allocation20_spill] sm:$0xff] }
 0x96d   :  { %v5957_v43 = vmul.f32 %v9874_v49, %v5956_v21  ;;  %6328 = vmatpush.bf16.msra.mxu2 %v13983_v62  ;;  %6341 = vmatpush.bf16.msra.mxu0 %v11982_v58  ;;  %v6011_v31 = vmul.f32 %v6009_v11, %v5986_v26  ;;  %vm6003_vm1 = vcmp.eq.f32.partialorder %v6002_v51, 8.507059e+37  ;;  %v5739_v36 = vmax.f32 %v14060_v30, %v5737_v33  ;;  %v14062_v29 = vld [vmem:[#allocation22_spill] sm:$0xff]  ;;  %v14066_v26 = vld [vmem:[#allocation17_spill] sm:$0xff]  ;;  %v14067_v11 = vld [vmem:[#allocation43_spill] sm:$0xff] }
 0x96e   :  { %v14076_v51 = vld [vmem:[#allocation21_spill] sm:$0xff]  ;;  %v14079_v33 = vld [vmem:[#allocation42_spill] sm:$0xff] }
 0x96f   :  { %v5958_v60 = vadd.f32 %v9874_v49, %v5957_v43  ;;  %v14083_v30 = vld [vmem:[#allocation50_spill] sm:$0xff] }
 0x970   :  { %6303 = vmatpush.bf16.msrb.mxu3 %v13984_v7  ;;  %6316 = vmatpush.bf16.msra.mxu1 %v11992_v32 }
 0x971   :  { %v5962_v61 = vsel %vm5961_vm11, %v9874_v49, %v5958_v60  ;;  %6329 = vmatpush.bf16.msra.mxu2 %v13985_v13  ;;  %6342 = vmatpush.bf16.msra.mxu0 %v11994_v35  ;;  %v6004_v49 = vand.u32 2147483648, %v12585_v37  ;;  %v14064_v60 = vld [vmem:[#allocation25_spill] sm:$0xff] }
 0x972   :  { %v5967_v22 = vsel %vm5964_vm12, %v5966_v2, %v5962_v61  ;;  %v14065_v2 = vld [vmem:[#allocation34_spill] sm:$0xff]  ;;  %v14068_v61 = vld [vmem:[#allocation19_spill] sm:$0xff] }
 0x973   :  { %v6012_v24 = vmul.f32 %v9876_v15, %v5967_v22  ;;  %v6005_v9 = vor.u32 1.1754944e-38, %v6004_v49  ;;  %v14069_v15 = vld [vmem:[#allocation45_spill] sm:$0xff]  ;;  %v14071_v22 = vld [vmem:[#allocation36_spill] sm:$0xff]  ;;  %v14075_v49 = vld [vmem:[#allocation47_spill] sm:$0xff] }
 0x974   :  { %6304 = vmatpush.bf16.msrb.mxu3 %v11924_v42  ;;  %6317 = vmatpush.bf16.msra.mxu1 %v12004_v40 }
 0x975   :  { %v12620_v55 = vadd.f32 %v6012_v24, %v6011_v31  ;;  %6330 = vmatpush.bf16.msra.mxu2 %v13986_v28  ;;  %6343 = vmatpush.bf16.msra.mxu0 %v12006_v44  ;;  %v6006_v21 = vsel %vm6003_vm1, %v6005_v9, %v6001_v52  ;;  %v14072_v31 = vld [vmem:[#allocation29_spill] sm:$0xff]  ;;  %v14073_v24 = vld [vmem:[#allocation38_spill] sm:$0xff]  ;;  %v14077_v52 = vld [vmem:[#allocation40_spill] sm:$0xff] }
 0x976   :  { %v14078_v9 = vld [vmem:[#allocation31_spill] sm:$0xff] }
 0x977   :  { %9877 = vtanh.f32 %v12620_v55 }
 0x978   :  { %6305 = vmatpush.bf16.msrb.mxu3 %v13987_v20  ;;  %6318 = vmatpush.bf16.msra.mxu1 %v12016_v16 }
 0x979   :  { %6331 = vmatpush.bf16.msra.mxu2 %v13988_v27  ;;  %6344 = vmatpush.bf16.msra.mxu0 %v12018_v59 }
 0x97c   :  { %6306 = vmatpush.bf16.msrb.mxu3 %v11936_v19  ;;  %6319 = vmatpush.bf16.msra.mxu1 %v12028_v6 }
 0x97d   :  { %v9878_v37 = vpop.eup %9877  ;;  %6332 = vmatpush.bf16.msra.mxu2 %v11938_v25  ;;  %6345 = vmatpush.bf16.msra.mxu0 %v12030_v1 }
 0x97e   :  { %v6015_v5 = vmul.f32 %v9878_v37, %v6006_v21  ;;  %v14080_v37 = vld [vmem:[#allocation33_spill] sm:$0xff] }
 0x97f   :  { %v14081_v21 = vld [vmem:[#allocation49_spill] sm:$0xff] }
 0x980   :  { %v6021_v45 = vrot.slane %v6015_v5, 4  ;;  %v6096_v43 = vpack.c.bf16 %v6015_v5, %v6015_v5  ;;  %6307 = vmatpush.bf16.msrb.mxu3 %v11942_v48  ;;  %6320 = vmatpush.bf16.msra.mxu1 %v14061_v50  ;;  %v14082_v5 = vld [vmem:[#allocation23_spill] sm:$0xff] }
 0x981   :  { %6333 = vmatpush.bf16.msra.mxu2 %v14062_v29  ;;  %6346 = vmatpush.bf16.msra.mxu0 %v14063_v8 }
 0x982   :  { %v12643_v53 = vmax.f32 %v5739_v36, %v6021_v45  ;;  %v6098_v23 = vrot.slane %v6096_v43, 1  ;;  %v14084_v36 = vld [vmem:[#allocation26_spill] sm:$0xff]  ;;  %v14085_v45 = vld [vmem:[#allocation57_spill] sm:$0xff]  ;;  %v14086_v43 = vld [vmem:[#allocation35_spill] sm:$0xff] }
 0x984   :  { %6108 = vmatmul.bf16.vlgmr.msra.gmra.mxu3 %v6098_v23  ;;  %6121 = vmatmul.bf16.vlgmr.msrb.gmra.mxu1 %v6098_v23 }
 0x985   :  { %6134 = vmatmul.bf16.vlgmr.msrb.gmra.mxu2 %v6098_v23  ;;  %6147 = vmatmul.bf16.vlgmr.msrb.gmra.mxu0 %v6098_v23  ;;  %v14087_v23 = vld [vmem:[#allocation53_spill] sm:$0xff] }
 0x986   :  { %6357 = vmatpush.bf16.msra.mxu3 %v14064_v60  ;;  %6370 = vmatpush.bf16.msrb.mxu1 %v14065_v2 }
 0x987   :  { %6383 = vmatpush.bf16.msrb.mxu2 %v14066_v26  ;;  %6396 = vmatpush.bf16.msrb.mxu0 %v14067_v11 }
 0x98a   :  { %6358 = vmatpush.bf16.msra.mxu3 %v14068_v61  ;;  %6371 = vmatpush.bf16.msrb.mxu1 %v14069_v15 }
 0x98b   :  { %6384 = vmatpush.bf16.msrb.mxu2 %v14070_v18  ;;  %6397 = vmatpush.bf16.msrb.mxu0 %v14071_v22  ;;  %v14098_v22 = vld [vmem:[#allocation78_spill] sm:$0xff] }
 0x98e   :  { %6359 = vmatpush.bf16.msra.mxu3 %v14072_v31  ;;  %6372 = vmatpush.bf16.msrb.mxu1 %v14073_v24 }
 0x98f   :  { %6385 = vmatpush.bf16.msrb.mxu2 %v14074_v46  ;;  %6398 = vmatpush.bf16.msrb.mxu0 %v14075_v49  ;;  %v14096_v49 = vld [vmem:[#allocation48_spill] sm:$0xff]  ;;  %v14097_v46 = vld [vmem:[#allocation79_spill] sm:$0xff] }
 0x992   :  { %6360 = vmatpush.bf16.msra.mxu3 %v14076_v51  ;;  %6373 = vmatpush.bf16.msrb.mxu1 %v14077_v52  ;;  %v14088_v52 = vld [vmem:[#allocation37_spill] sm:$0xff] }
 0x993   :  { %6386 = vmatpush.bf16.msrb.mxu2 %v14078_v9  ;;  %6399 = vmatpush.bf16.msrb.mxu0 %v14079_v33  ;;  %v14089_v9 = vld [vmem:[#allocation60_spill] sm:$0xff] }
 0x994   :  { %v14090_v33 = vld [vmem:[#allocation28_spill] sm:$0xff] }
 0x996   :  { %6361 = vmatpush.bf16.msra.mxu3 %v14080_v37  ;;  %6374 = vmatpush.bf16.msrb.mxu1 %v14081_v21  ;;  %v14091_v37 = vld [vmem:[#allocation16_spill] sm:$0xff]  ;;  %v14092_v21 = vld [vmem:[#allocation30_spill] sm:$0xff] }
 0x997   :  { %6387 = vmatpush.bf16.msrb.mxu2 %v14082_v5  ;;  %6400 = vmatpush.bf16.msrb.mxu0 %v14083_v30  ;;  %v14093_v5 = vld [vmem:[#allocation51_spill] sm:$0xff] }
 0x998   :  { %v14094_v30 = vld [vmem:[#allocation39_spill] sm:$0xff] }
 0x99a   :  { %6362 = vmatpush.bf16.msra.mxu3 %v14084_v36  ;;  %6375 = vmatpush.bf16.msrb.mxu1 %v14085_v45  ;;  %v14095_v36 = vld [vmem:[#allocation69_spill] sm:$0xff] }
 0x99b   :  { %6388 = vmatpush.bf16.msrb.mxu2 %v14086_v43  ;;  %6401 = vmatpush.bf16.msrb.mxu0 %v14087_v23 }
 0x99e   :  { %6363 = vmatpush.bf16.msra.mxu3 %v14088_v52  ;;  %6376 = vmatpush.bf16.msrb.mxu1 %v14089_v9 }
 0x99f   :  { %6389 = vmatpush.bf16.msrb.mxu2 %v14090_v33  ;;  %6402 = vmatpush.bf16.msrb.mxu0 %v14091_v37 }
 0x9a2   :  { %6364 = vmatpush.bf16.msra.mxu3 %v14092_v21  ;;  %6377 = vmatpush.bf16.msrb.mxu1 %v14093_v5 }
 0x9a3   :  { %6390 = vmatpush.bf16.msrb.mxu2 %v14094_v30  ;;  %6403 = vmatpush.bf16.msrb.mxu0 %v14095_v36 }
 0x9df   :  { %v6050_v45 = vpop.f32.mrf.mxu1 }
 0x9e0   :  { %v6085_v43 = vrot.slane %v6050_v45, 2  ;;  %v6076_v51 = vpop.f32.mrf.mxu0 }
 0x9e1   :  { %v6087_v23 = vrot.slane %v6076_v51, 2 }
 0x9e2   :  { %v6093_v52 = vadd.f32 %v6085_v43, %v14096_v49 }
 0x9e3   :  { %v6095_v9 = vadd.f32 %v6087_v23, %v14097_v46 }
 0x9e4   :  { %v9123_v24 = vmul.f32 -1.442695, %v6093_v52 }
 0x9e5   :  { %v9124_v33 = vmul.f32 -1.442695, %v6095_v9  ;;  %v6037_v31 = vpop.f32.mrf.mxu3 }
 0x9e6   :  { %9879 = vpow2.f32 %v9123_v24  ;;  %v6084_v37 = vrot.slane %v6037_v31, 2  ;;  %v6063_v21 = vpop.f32.mrf.mxu2 }
 0x9e7   :  { %9881 = vpow2.f32 %v9124_v33  ;;  %v6052_v5 = vpop.f32.mrf.mxu1  ;;  %v6086_v33 = vrot.slane %v6063_v21, 2 }
 0x9e8   :  { %v6092_v30 = vadd.f32 %v6084_v37, %v14098_v22  ;;  %v6078_v18 = vpop.f32.mrf.mxu0 }
 0x9ea   :  { %v9122_v36 = vmul.f32 -1.442695, %v6092_v30  ;;  %v14099_v30 = vld [vmem:[#allocation71_spill] sm:$0xff] }
 0x9ec   :  { %v9880_v15 = vpop.eup %9879  ;;  %9883 = vpow2.f32 %v9122_v36 }
 0x9ed   :  { %v9882_v45 = vpop.eup %9881  ;;  %v6178_v51 = vadd.f32 1.0, %v9880_v15  ;;  %v6039_v61 = vpop.f32.mrf.mxu3  ;;  %v6094_v15 = vadd.f32 %v6086_v33, %v14099_v30 }
 0x9ee   :  { %v6065_v49 = vpop.f32.mrf.mxu2  ;;  %v12684_v46 = vadd.f32 1.0, %v9882_v45 }
 0x9ef   :  { %9885 = vrcp.f32 %v6178_v51  ;;  %v6190_v43 = vand.u32 2147483648, %v6178_v51  ;;  %vm6184_vm5 = vweird.f32 %v6178_v51  ;;  %v6188_v49 = vand.u32 2147483647, %v6178_v51 }
 0x9f0   :  { %9887 = vrcp.f32 %v12684_v46  ;;  %vm6204_vm11 = vweird.f32 %v12684_v46 }
 0x9f1   :  { %vm6189_vm3 = vcmp.eq.f32.partialorder %v6188_v49, 8.507059e+37 }
 0x9f2   :  { %v9884_v52 = vpop.eup %9883 }
 0x9f3   :  { %v6159_v9 = vadd.f32 1.0, %v9884_v52 }
 0x9f5   :  { %v9886_v31 = vpop.eup %9885  ;;  %9889 = vrcp.f32 %v6159_v9  ;;  %vm6165_vm2 = vweird.f32 %v6159_v9 }
 0x9f6   :  { %v6180_v24 = vmul.f32 %v9886_v31, %v6178_v51  ;;  %v12687_v18 = vpop.eup %9887  ;;  %vm6185_vm4 = vweird.f32 %v9886_v31  ;;  %9891 = vtanh.f32 %v6094_v15 }
 0x9f7   :  { %v6200_v23 = vmul.f32 %v12687_v18, %v12684_v46  ;;  %vm12692_vm6 = vmor %vm6184_vm5, %vm6185_vm4  ;;  %vm6205_vm10 = vweird.f32 %v12687_v18 }
 0x9f8   :  { %v6181_v22 = vsub.f32 1.0, %v6180_v24  ;;  %v6169_v24 = vand.u32 2147483647, %v6159_v9  ;;  %vm6206_vm12 = vmor %vm6204_vm11, %vm6205_vm10 }
 0x9f9   :  { %v6201_v51 = vsub.f32 1.0, %v6200_v23 }
 0x9fa   :  { %v6182_v37 = vmul.f32 %v9886_v31, %v6181_v22  ;;  %v6171_v22 = vand.u32 2147483648, %v6159_v9  ;;  %vm6170_vm9 = vcmp.eq.f32.partialorder %v6169_v24, 8.507059e+37 }
 0x9fb   :  { %v9890_v5 = vpop.eup %9889 }
 0x9fc   :  { %v6161_v61 = vmul.f32 %v9890_v5, %v6159_v9  ;;  %v6183_v36 = vadd.f32 %v9886_v31, %v6182_v37  ;;  %vm6166_vm0 = vweird.f32 %v9890_v5  ;;  %v6172_v60 = vor.u32 1.1754944e-38, %v6171_v22 }
 0x9fd   :  { %vm6167_vm8 = vmor %vm6165_vm2, %vm6166_vm0 }
 0x9fe   :  { %v6162_v45 = vsub.f32 1.0, %v6161_v61  ;;  %v6187_v37 = vsel %vm12692_vm6, %v9886_v31, %v6183_v36  ;;  %v6191_v61 = vor.u32 1.1754944e-38, %v6190_v43  ;;  %v9892_v31 = vpop.eup %9891 }
 0xa00   :  { %v6163_v11 = vmul.f32 %v9890_v5, %v6162_v45  ;;  %v6192_v15 = vsel %vm6189_vm3, %v6191_v61, %v6187_v37 }
 0xa01   :  { %v6122_v52 = vpop.f32.mrf.mxu1 }
 0xa02   :  { %v6153_v33 = vadd.f32 %v6122_v52, %v12293_v47  ;;  %v6148_v30 = vpop.f32.mrf.mxu0  ;;  %v6164_v29 = vadd.f32 %v9890_v5, %v6163_v11  ;;  %v6215_v47 = vrot.slane %v12575_v14, 6 }
 0xa03   :  { %v6155_v26 = vadd.f32 %v6148_v30, %v12296_v4  ;;  %v6202_v4 = vmul.f32 %v12687_v18, %v6201_v51 }
 0xa04   :  { %v9126_v8 = vmul.f32 -1.442695, %v6153_v33  ;;  %v6168_v45 = vsel %vm6167_vm8, %v9890_v5, %v6164_v29  ;;  %v6217_v9 = vmul.f32 %v6215_v47, %v6192_v15 }
 0xa05   :  { %v9127_v2 = vmul.f32 -1.442695, %v6155_v26  ;;  %v6173_v36 = vsel %vm6170_vm9, %v6172_v60, %v6168_v45  ;;  %v6203_v14 = vadd.f32 %v12687_v18, %v6202_v4  ;;  %v6208_v60 = vand.u32 2147483647, %v12684_v46 }
 0xa06   :  { %9893 = vpow2.f32 %v9126_v8  ;;  %v6218_v23 = vmul.f32 %v9892_v31, %v6173_v36 }
 0xa07   :  { %9895 = vpow2.f32 %v9127_v2  ;;  %v6109_v52 = vpop.f32.mrf.mxu3  ;;  %v6210_v2 = vand.u32 2147483648, %v12684_v46  ;;  %v6207_v30 = vsel %vm6206_vm12, %v12687_v18, %v6203_v14  ;;  %vm6209_vm13 = vcmp.eq.f32.partialorder %v6208_v60, 8.507059e+37 }
 0xa08   :  { %v6152_v43 = vadd.f32 %v6109_v52, %v14017_v10  ;;  %v6135_v11 = vpop.f32.mrf.mxu2  ;;  %v12703_v22 = vadd.f32 %v6218_v23, %v6217_v9 }
 0xa09   :  { %v6124_v26 = vpop.f32.mrf.mxu1  ;;  %v6211_v37 = vor.u32 1.1754944e-38, %v6210_v2 }
 0xa0a   :  { %v9125_v49 = vmul.f32 -1.442695, %v6152_v43  ;;  %v6150_v21 = vpop.f32.mrf.mxu0 }
 0xa0b   :  { %v6212_v47 = vsel %vm6209_vm13, %v6211_v37, %v6207_v30 }
 0xa0c   :  { %v9894_v8 = vpop.eup %9893  ;;  %9897 = vpow2.f32 %v9125_v49  ;;  %v6154_v49 = vadd.f32 %v6135_v11, %v12330_v63  ;;  %v14106_v11 = vld [vmem:[#allocation22_spill] sm:$0xff] }
 0xa0d   :  { %v9896_v29 = vpop.eup %9895  ;;  %9899 = vtanh.f32 %v12703_v22  ;;  %v6244_v10 = vadd.f32 1.0, %v9894_v8 }
 0xa0e   :  { %v12711_v24 = vadd.f32 1.0, %v9896_v29 }
 0xa0f   :  { %9901 = vrcp.f32 %v6244_v10  ;;  %v6111_v5 = vpop.f32.mrf.mxu3  ;;  %v6256_v14 = vand.u32 2147483648, %v6244_v10  ;;  %vm6250_vm15 = vweird.f32 %v6244_v10  ;;  %v6254_v63 = vand.u32 2147483647, %v6244_v10 }
 0xa10   :  { %v6137_v33 = vpop.f32.mrf.mxu2  ;;  %9903 = vrcp.f32 %v12711_v24  ;;  %vm6270_vm8 = vweird.f32 %v12711_v24 }
 0xa11   :  { %v6257_v30 = vor.u32 1.1754944e-38, %v6256_v14  ;;  %vm6255_vm6 = vcmp.eq.f32.partialorder %v6254_v63, 8.507059e+37  ;;  %v14105_v63 = vld [vmem:[#allocation34_spill] sm:$0xff] }
 0xa12   :  { %v9898_v61 = vpop.eup %9897 }
 0xa13   :  { %v9900_v51 = vpop.eup %9899  ;;  %v6225_v15 = vadd.f32 1.0, %v9898_v61 }
 0xa14   :  { %v6221_v45 = vmul.f32 %v9900_v51, %v6212_v47 }
 0xa15   :  { %v9902_v52 = vpop.eup %9901  ;;  %9905 = vrcp.f32 %v6225_v15  ;;  %v6237_v2 = vand.u32 2147483648, %v6225_v15  ;;  %v6235_v5 = vand.u32 2147483647, %v6225_v15  ;;  %vm6231_vm5 = vweird.f32 %v6225_v15 }
 0xa16   :  { %v6246_v46 = vmul.f32 %v9902_v52, %v6244_v10  ;;  %v6289_v31 = vrot.slane %v6221_v45, 6  ;;  %v6296_v4 = vpack.c.bf16 %v6221_v45, %v6221_v45  ;;  %v12718_v18 = vpop.eup %9903  ;;  %vm6251_vm14 = vweird.f32 %v9902_v52 }
 0xa17   :  { %vm12727_vm1 = vmor %vm6250_vm15, %vm6251_vm14  ;;  %9907 = vtanh.f32 %v6154_v49  ;;  %v6238_v61 = vor.u32 1.1754944e-38, %v6237_v2  ;;  %vm6236_vm2 = vcmp.eq.f32.partialorder %v6235_v5, 8.507059e+37  ;;  %v6281_v45 = vrot.slane %v12620_v55, 2  ;;  %v14108_v2 = vld [vmem:[#allocation17_spill] sm:$0xff]  ;;  %v14110_v5 = vld [vmem:[#allocation19_spill] sm:$0xff] }
 0xa18   :  { %v6247_v36 = vsub.f32 1.0, %v6246_v46  ;;  %v6298_v43 = vrot.slane %v6296_v4, 3  ;;  %v12716_v9 = vmax.f32 %v12589_v39, %v6289_v31  ;;  %v6266_v39 = vmul.f32 %v12718_v18, %v12711_v24 }
 0xa19   :  { %vm6271_vm3 = vweird.f32 %v12718_v18 }
 0xa1a   :  { %v6248_v23 = vmul.f32 %v9902_v52, %v6247_v36  ;;  %6308 = vmatmul.bf16.vlgmr.msrb.gmra.mxu3 %v6298_v43  ;;  %6321 = vmatmul.bf16.vlgmr.msra.gmra.mxu1 %v6298_v43  ;;  %v6267_v37 = vsub.f32 1.0, %v6266_v39  ;;  %vm6272_vm9 = vmor %vm6270_vm8, %vm6271_vm3 }
 0xa1b   :  { %v9906_v26 = vpop.eup %9905  ;;  %6334 = vmatmul.bf16.vlgmr.msra.gmra.mxu2 %v6298_v43  ;;  %6347 = vmatmul.bf16.vlgmr.msra.gmra.mxu0 %v6298_v43  ;;  %v6276_v43 = vand.u32 2147483648, %v12711_v24 }
 0xa1c   :  { %v6227_v21 = vmul.f32 %v9906_v26, %v6225_v15  ;;  %v6249_v8 = vadd.f32 %v9902_v52, %v6248_v23  ;;  %6560 = vmatpush.bf16.msrb.mxu3 %v13976_v57  ;;  %6573 = vmatpush.bf16.msra.mxu1 %v11954_v41  ;;  %vm6232_vm4 = vweird.f32 %v9906_v26  ;;  %v6268_v46 = vmul.f32 %v12718_v18, %v6267_v37  ;;  %v14113_v37 = vld [vmem:[#allocation36_spill] sm:$0xff] }
 0xa1d   :  { %6586 = vmatpush.bf16.msra.mxu2 %v13977_v12  ;;  %6599 = vmatpush.bf16.msra.mxu0 %v11956_v34  ;;  %vm6233_vm0 = vmor %vm6231_vm5, %vm6232_vm4  ;;  %v6274_v23 = vand.u32 2147483647, %v12711_v24  ;;  %v6277_v49 = vor.u32 1.1754944e-38, %v6276_v43  ;;  %v14125_v43 = vld [vmem:[#allocation50_spill] sm:$0xff] }
 0xa1e   :  { %v6228_v29 = vsub.f32 1.0, %v6227_v21  ;;  %v6253_v33 = vsel %vm12727_vm1, %v9902_v52, %v6249_v8  ;;  %v9908_v52 = vpop.eup %9907  ;;  %v6269_v55 = vadd.f32 %v12718_v18, %v6268_v46  ;;  %v14120_v46 = vld [vmem:[#allocation31_spill] sm:$0xff] }
 0xa1f   :  { %v6258_v51 = vsel %vm6255_vm6, %v6257_v30, %v6253_v33  ;;  %vm6275_vm10 = vcmp.eq.f32.partialorder %v6274_v23, 8.507059e+37  ;;  %v14111_v33 = vld [vmem:[#allocation45_spill] sm:$0xff]  ;;  %v14112_v30 = vld [vmem:[#allocation27_spill] sm:$0xff]  ;;  %v14126_v23 = vld [vmem:[#allocation26_spill] sm:$0xff] }
 0xa20   :  { %v6229_v60 = vmul.f32 %v9906_v26, %v6228_v29  ;;  %6561 = vmatpush.bf16.msrb.mxu3 %v13978_v54  ;;  %6574 = vmatpush.bf16.msra.mxu1 %v11966_v38  ;;  %v6283_v15 = vmul.f32 %v6281_v45, %v6258_v51  ;;  %v14104_v29 = vld [vmem:[#allocation25_spill] sm:$0xff]  ;;  %v14116_v51 = vld [vmem:[#allocation20_spill] sm:$0xff] }
 0xa21   :  { %6587 = vmatpush.bf16.msra.mxu2 %v13979_v17  ;;  %6600 = vmatpush.bf16.msra.mxu0 %v11968_v3  ;;  %v14118_v45 = vld [vmem:[#allocation21_spill] sm:$0xff] }
 0xa22   :  { %v6230_v10 = vadd.f32 %v9906_v26, %v6229_v60  ;;  %v14109_v60 = vld [vmem:[#allocation43_spill] sm:$0xff] }
 0xa24   :  { %v6234_v47 = vsel %vm6233_vm0, %v9906_v26, %v6230_v10  ;;  %6562 = vmatpush.bf16.msrb.mxu3 %v13982_v56  ;;  %6575 = vmatpush.bf16.msra.mxu1 %v11980_v0  ;;  %v6273_v26 = vsel %vm6272_vm9, %v12718_v18, %v6269_v55  ;;  %v14114_v10 = vld [vmem:[#allocation29_spill] sm:$0xff]  ;;  %v14124_v55 = vld [vmem:[#allocation23_spill] sm:$0xff] }
 0xa25   :  { %v6239_v31 = vsel %vm6236_vm2, %v6238_v61, %v6234_v47  ;;  %6588 = vmatpush.bf16.msra.mxu2 %v13983_v62  ;;  %6601 = vmatpush.bf16.msra.mxu0 %v11982_v58  ;;  %v6278_v8 = vsel %vm6275_vm10, %v6277_v49, %v6273_v26  ;;  %v14115_v61 = vld [vmem:[#allocation38_spill] sm:$0xff]  ;;  %v14117_v47 = vld [vmem:[#allocation47_spill] sm:$0xff]  ;;  %v14127_v26 = vld [vmem:[#allocation57_spill] sm:$0xff] }
 0xa26   :  { %v6284_v4 = vmul.f32 %v9908_v52, %v6239_v31  ;;  %v14119_v52 = vld [vmem:[#allocation40_spill] sm:$0xff]  ;;  %v14121_v31 = vld [vmem:[#allocation42_spill] sm:$0xff]  ;;  %v14128_v49 = vld [vmem:[#allocation35_spill] sm:$0xff] }
 0xa28   :  { %v12743_v36 = vadd.f32 %v6284_v4, %v6283_v15  ;;  %6563 = vmatpush.bf16.msrb.mxu3 %v13984_v7  ;;  %6576 = vmatpush.bf16.msra.mxu1 %v11992_v32  ;;  %v14122_v15 = vld [vmem:[#allocation33_spill] sm:$0xff] }
 0xa29   :  { %6589 = vmatpush.bf16.msra.mxu2 %v13985_v13  ;;  %6602 = vmatpush.bf16.msra.mxu0 %v11994_v35  ;;  %v14123_v4 = vld [vmem:[#allocation49_spill] sm:$0xff] }
 0xa2a   :  { %9909 = vtanh.f32 %v12743_v36 }
 0xa2c   :  { %6564 = vmatpush.bf16.msrb.mxu3 %v11924_v42  ;;  %6577 = vmatpush.bf16.msra.mxu1 %v12004_v40 }
 0xa2d   :  { %6590 = vmatpush.bf16.msra.mxu2 %v13986_v28  ;;  %6603 = vmatpush.bf16.msra.mxu0 %v12006_v44 }
 0xa30   :  { %v9910_v21 = vpop.eup %9909  ;;  %6565 = vmatpush.bf16.msrb.mxu3 %v13987_v20  ;;  %6578 = vmatpush.bf16.msra.mxu1 %v12016_v16 }
 0xa31   :  { %v6287_v24 = vmul.f32 %v9910_v21, %v6278_v8  ;;  %6591 = vmatpush.bf16.msra.mxu2 %v13988_v27  ;;  %6604 = vmatpush.bf16.msra.mxu0 %v12018_v59  ;;  %v14129_v21 = vld [vmem:[#allocation53_spill] sm:$0xff] }
 0xa32   :  { %v14130_v8 = vld [vmem:[#allocation37_spill] sm:$0xff] }
 0xa33   :  { %v6293_v14 = vrot.slane %v6287_v24, 2  ;;  %v6356_v39 = vpack.c.bf16 %v6287_v24, %v6287_v24  ;;  %v14131_v24 = vld [vmem:[#allocation60_spill] sm:$0xff] }
 0xa34   :  { %6566 = vmatpush.bf16.msrb.mxu3 %v11936_v19  ;;  %6579 = vmatpush.bf16.msra.mxu1 %v12028_v6 }
 0xa35   :  { %v12767_v18 = vmax.f32 %v12643_v53, %v6293_v14  ;;  %6365 = vmatmul.bf16.vlgmr.msra.gmra.mxu3 %v6356_v39  ;;  %6378 = vmatmul.bf16.vlgmr.msrb.gmra.mxu1 %v6356_v39  ;;  %v14107_v53 = vld [vmem:[#allocation32_spill] sm:$0xff] }
 0xa36   :  { %6391 = vmatmul.bf16.vlgmr.msrb.gmra.mxu2 %v6356_v39  ;;  %6404 = vmatmul.bf16.vlgmr.msrb.gmra.mxu0 %v6356_v39  ;;  %v14132_v14 = vld [vmem:[#allocation28_spill] sm:$0xff] }
 0xa37   :  { %6592 = vmatpush.bf16.msra.mxu2 %v11938_v25  ;;  %6605 = vmatpush.bf16.msra.mxu0 %v12030_v1  ;;  %v14133_v39 = vld [vmem:[#allocation16_spill] sm:$0xff] }
 0xa38   :  { %6567 = vmatpush.bf16.msrb.mxu3 %v11942_v48  ;;  %6580 = vmatpush.bf16.msra.mxu1 %v14061_v50 }
 0xa3b   :  { %6593 = vmatpush.bf16.msra.mxu2 %v14106_v11  ;;  %6606 = vmatpush.bf16.msra.mxu0 %v14107_v53 }
 0xa3c   :  { %6632 = vmatpush.bf16.msra.mxu3 %v14104_v29  ;;  %6645 = vmatpush.bf16.msrb.mxu1 %v14105_v63 }
 0xa3f   :  { %6658 = vmatpush.bf16.msrb.mxu2 %v14108_v2  ;;  %6671 = vmatpush.bf16.msrb.mxu0 %v14109_v60 }
 0xa40   :  { %6633 = vmatpush.bf16.msra.mxu3 %v14110_v5  ;;  %6646 = vmatpush.bf16.msrb.mxu1 %v14111_v33 }
 0xa43   :  { %6659 = vmatpush.bf16.msrb.mxu2 %v14112_v30  ;;  %6672 = vmatpush.bf16.msrb.mxu0 %v14113_v37 }
 0xa44   :  { %6634 = vmatpush.bf16.msra.mxu3 %v14114_v10  ;;  %6647 = vmatpush.bf16.msrb.mxu1 %v14115_v61  ;;  %v14149_v61 = vld [vmem:[#allocation70_spill] sm:$0xff] }
 0xa47   :  { %6660 = vmatpush.bf16.msrb.mxu2 %v14116_v51  ;;  %6673 = vmatpush.bf16.msrb.mxu0 %v14117_v47  ;;  %v14148_v47 = vld [vmem:[#allocation44_spill] sm:$0xff] }
 0xa48   :  { %6635 = vmatpush.bf16.msra.mxu3 %v14118_v45  ;;  %6648 = vmatpush.bf16.msrb.mxu1 %v14119_v52 }
 0xa4b   :  { %6661 = vmatpush.bf16.msrb.mxu2 %v14120_v46  ;;  %6674 = vmatpush.bf16.msrb.mxu0 %v14121_v31  ;;  %v14142_v31 = vld [vmem:[#allocation67_spill] sm:$0xff]  ;;  %v14143_v46 = vld [vmem:[#allocation54_spill] sm:$0xff] }
 0xa4c   :  { %6636 = vmatpush.bf16.msra.mxu3 %v14122_v15  ;;  %6649 = vmatpush.bf16.msrb.mxu1 %v14123_v4  ;;  %v14134_v4 = vld [vmem:[#allocation30_spill] sm:$0xff] }
 0xa4d   :  { %v14140_v15 = vld [vmem:[#allocation46_spill] sm:$0xff] }
 0xa4f   :  { %6662 = vmatpush.bf16.msrb.mxu2 %v14124_v55  ;;  %6675 = vmatpush.bf16.msrb.mxu0 %v14125_v43  ;;  %v14135_v55 = vld [vmem:[#allocation51_spill] sm:$0xff] }
 0xa50   :  { %6637 = vmatpush.bf16.msra.mxu3 %v14126_v23  ;;  %6650 = vmatpush.bf16.msrb.mxu1 %v14127_v26  ;;  %v14136_v43 = vld [vmem:[#allocation39_spill] sm:$0xff]  ;;  %v14137_v23 = vld [vmem:[#allocation69_spill] sm:$0xff]  ;;  %v14138_v26 = vld [vmem:[#allocation24_spill] sm:$0xff] }
 0xa51   :  { %v14147_v45 = vperm.slane %v14138_v26, 0 }
 0xa53   :  { %6663 = vmatpush.bf16.msrb.mxu2 %v14128_v49  ;;  %6676 = vmatpush.bf16.msrb.mxu0 %v14129_v21  ;;  %v14139_v49 = vperm.slane %v14138_v26, 1 }
 0xa54   :  { %6638 = vmatpush.bf16.msra.mxu3 %v14130_v8  ;;  %6651 = vmatpush.bf16.msrb.mxu1 %v14131_v24  ;;  %v14141_v8 = vperm.slane %v14138_v26, 3 }
 0xa55   :  { %v4640_v21 = vadd.f32 %v14140_v15, %v14139_v49  ;;  %v4612_v15 = vadd.f32 %v14148_v47, %v14147_v45 }
 0xa56   :  { %v4696_v24 = vadd.f32 %v14142_v31, %v14141_v8 }
 0xa57   :  { %6664 = vmatpush.bf16.msrb.mxu2 %v14132_v14  ;;  %6677 = vmatpush.bf16.msrb.mxu0 %v14133_v39  ;;  %v12814_v14 = vadd.f32 %v14143_v46, %v4640_v21  ;;  %v14145_v39 = vld [vmem:[#allocation73_spill] sm:$0xff]  ;;  %v12825_v31 = vadd.f32 %v14149_v61, %v4612_v15 }
 0xa58   :  { %6639 = vmatpush.bf16.msra.mxu3 %v14134_v4  ;;  %6652 = vmatpush.bf16.msrb.mxu1 %v14135_v55  ;;  %v12817_v52 = vadd.f32 %v14145_v39, %v4696_v24 }
 0xa59   :  { %14144 = vst [vmem:[#allocation56_spill] sm:$0xff] %v12814_v14 }
 0xa5a   :  { %14146 = vst [vmem:[#allocation59_spill] sm:$0xff] %v12817_v52 }
 0xa5b   :  { %6665 = vmatpush.bf16.msrb.mxu2 %v14136_v43  ;;  %6678 = vmatpush.bf16.msrb.mxu0 %v14137_v23  ;;  %14150 = vst [vmem:[#allocation52_spill] sm:$0xff] %v12825_v31 }
 0xa97   :  { %v6322_v4 = vpop.f32.mrf.mxu1 }
 0xa98   :  { %v6353_v55 = vadd.f32 %v6322_v4, %v12814_v14  ;;  %v6348_v43 = vpop.f32.mrf.mxu0 }
 0xa99   :  { %v6355_v23 = vadd.f32 %v6348_v43, %v12817_v52 }
 0xa9a   :  { %v9129_v49 = vmul.f32 -1.442695, %v6353_v55 }
 0xa9b   :  { %v9130_v51 = vmul.f32 -1.442695, %v6355_v23 }
 0xa9c   :  { %9911 = vpow2.f32 %v9129_v49  ;;  %v14151_v49 = vperm.slane %v14138_v26, 2 }
 0xa9d   :  { %9913 = vpow2.f32 %v9130_v51  ;;  %v6309_v46 = vpop.f32.mrf.mxu3 }
 0xa9e   :  { %v6352_v21 = vadd.f32 %v6309_v46, %v12825_v31  ;;  %v6335_v8 = vpop.f32.mrf.mxu2  ;;  %v14152_v46 = vld [vmem:[#allocation68_spill] sm:$0xff] }
 0xa9f   :  { %v6324_v24 = vpop.f32.mrf.mxu1 }
 0xaa0   :  { %v9128_v4 = vmul.f32 -1.442695, %v6352_v21  ;;  %v6350_v39 = vpop.f32.mrf.mxu0  ;;  %v4668_v21 = vadd.f32 %v14152_v46, %v14151_v49 }
 0xaa2   :  { %v9912_v14 = vpop.eup %9911  ;;  %9915 = vpow2.f32 %v9128_v4  ;;  %v14153_v4 = vld [vmem:[#allocation72_spill] sm:$0xff] }
 0xaa3   :  { %v9914_v43 = vpop.eup %9913  ;;  %v6447_v52 = vadd.f32 1.0, %v9912_v14  ;;  %v12835_v39 = vadd.f32 %v14153_v4, %v4668_v21 }
 0xaa4   :  { %v12828_v45 = vadd.f32 1.0, %v9914_v43 }
 0xaa5   :  { %9917 = vrcp.f32 %v6447_v52  ;;  %v6311_v47 = vpop.f32.mrf.mxu3  ;;  %14154 = vst [vmem:[#allocation55_spill] sm:$0xff] %v12835_v39  ;;  %v6459_v37 = vand.u32 2147483648, %v6447_v52  ;;  %vm6453_vm12 = vweird.f32 %v6447_v52  ;;  %v6457_v46 = vand.u32 2147483647, %v6447_v52 }
 0xaa6   :  { %v6337_v55 = vpop.f32.mrf.mxu2  ;;  %9919 = vrcp.f32 %v12828_v45  ;;  %vm6473_vm0 = vweird.f32 %v12828_v45 }
 0xaa7   :  { %v6354_v55 = vadd.f32 %v6335_v8, %v12835_v39  ;;  %v14157_v39 = vld [vmem:[#allocation75_spill] sm:$0xff]  ;;  %v6460_v2 = vor.u32 1.1754944e-38, %v6459_v37  ;;  %vm6458_vm1 = vcmp.eq.f32.partialorder %v6457_v46, 8.507059e+37 }
 0xaa8   :  { %v9916_v61 = vpop.eup %9915 }
 0xaa9   :  { %v6428_v23 = vadd.f32 1.0, %v9916_v61 }
 0xaab   :  { %v9918_v51 = vpop.eup %9917  ;;  %9921 = vrcp.f32 %v6428_v23  ;;  %v6440_v8 = vand.u32 2147483648, %v6428_v23  ;;  %vm6434_vm15 = vweird.f32 %v6428_v23 }
 0xaac   :  { %v6449_v15 = vmul.f32 %v9918_v51, %v6447_v52  ;;  %v12837_v14 = vpop.eup %9919  ;;  %vm6454_vm11 = vweird.f32 %v9918_v51  ;;  %9923 = vtanh.f32 %v6354_v55 }
 0xaad   :  { %v6469_v26 = vmul.f32 %v12837_v14, %v12828_v45  ;;  %vm12842_vm13 = vmor %vm6453_vm12, %vm6454_vm11  ;;  %v6441_v53 = vor.u32 1.1754944e-38, %v6440_v8  ;;  %vm6474_vm6 = vweird.f32 %v12837_v14 }
 0xaae   :  { %v6450_v24 = vsub.f32 1.0, %v6449_v15  ;;  %vm6475_vm2 = vmor %vm6473_vm0, %vm6474_vm6 }
 0xab0   :  { %v6451_v43 = vmul.f32 %v9918_v51, %v6450_v24  ;;  %v6438_v24 = vand.u32 2147483647, %v6428_v23 }
 0xab1   :  { %v9922_v47 = vpop.eup %9921 }
 0xab2   :  { %v6430_v61 = vmul.f32 %v9922_v47, %v6428_v23  ;;  %v6452_v31 = vadd.f32 %v9918_v51, %v6451_v43  ;;  %v6379_v10 = vpop.f32.mrf.mxu1  ;;  %vm6435_vm14 = vweird.f32 %v9922_v47  ;;  %vm6439_vm5 = vcmp.eq.f32.partialorder %v6438_v24, 8.507059e+37  ;;  %v9924_v37 = vpop.eup %9923  ;;  %v14159_v23 = vld [vmem:[#allocation74_spill] sm:$0xff] }
 0xab3   :  { %v6414_v30 = vrot.slane %v6379_v10, 2  ;;  %v6405_v49 = vpop.f32.mrf.mxu0  ;;  %v14158_v10 = vld [vmem:[#allocation77_spill] sm:$0xff]  ;;  %vm6436_vm4 = vmor %vm6434_vm15, %vm6435_vm14 }
 0xab4   :  { %v6431_v15 = vsub.f32 1.0, %v6430_v61  ;;  %v6416_v21 = vrot.slane %v6405_v49, 2  ;;  %v6456_v5 = vsel %vm12842_vm13, %v9918_v51, %v6452_v31  ;;  %v6470_v61 = vsub.f32 1.0, %v6469_v26 }
 0xab5   :  { %v6422_v43 = vadd.f32 %v6414_v30, %v14157_v39  ;;  %v6461_v55 = vsel %vm6458_vm1, %v6460_v2, %v6456_v5  ;;  %v6484_v31 = vrot.slane %v12703_v22, 6 }
 0xab6   :  { %v6432_v33 = vmul.f32 %v9922_v47, %v6431_v15  ;;  %v6424_v60 = vadd.f32 %v6416_v21, %v14158_v10  ;;  %v6471_v26 = vmul.f32 %v12837_v14, %v6470_v61 }
 0xab7   :  { %v9132_v52 = vmul.f32 -1.442695, %v6422_v43  ;;  %v6486_v21 = vmul.f32 %v6484_v31, %v6461_v55 }
 0xab8   :  { %v6433_v49 = vadd.f32 %v9922_v47, %v6432_v33  ;;  %v9133_v63 = vmul.f32 -1.442695, %v6424_v60  ;;  %v6366_v29 = vpop.f32.mrf.mxu3  ;;  %v6472_v5 = vadd.f32 %v12837_v14, %v6471_v26  ;;  %v14187_v26 = vld [vmem:[#allocation35_spill] sm:$0xff] }
 0xab9   :  { %9925 = vpow2.f32 %v9132_v52  ;;  %v6413_v30 = vrot.slane %v6366_v29, 2  ;;  %v6392_v15 = vpop.f32.mrf.mxu2 }
 0xaba   :  { %v6437_v39 = vsel %vm6436_vm4, %v9922_v47, %v6433_v49  ;;  %9927 = vpow2.f32 %v9133_v63  ;;  %v6381_v51 = vpop.f32.mrf.mxu1  ;;  %v6479_v63 = vand.u32 2147483648, %v12828_v45  ;;  %v6477_v47 = vand.u32 2147483647, %v12828_v45 }
 0xabb   :  { %v6442_v33 = vsel %vm6439_vm5, %v6441_v53, %v6437_v39  ;;  %v6421_v46 = vadd.f32 %v6413_v30, %v14159_v23  ;;  %v6407_v60 = vpop.f32.mrf.mxu0  ;;  %v6476_v61 = vsel %vm6475_vm2, %v12837_v14, %v6472_v5  ;;  %v6415_v14 = vrot.slane %v6392_v15, 2 }
 0xabc   :  { %v6487_v4 = vmul.f32 %v9924_v37, %v6442_v33  ;;  %v6480_v52 = vor.u32 1.1754944e-38, %v6479_v63  ;;  %vm6478_vm3 = vcmp.eq.f32.partialorder %v6477_v47, 8.507059e+37 }
 0xabd   :  { %v9131_v8 = vmul.f32 -1.442695, %v6421_v46 }
 0xabe   :  { %v12853_v2 = vadd.f32 %v6487_v4, %v6486_v21  ;;  %v6481_v31 = vsel %vm6478_vm3, %v6480_v52, %v6476_v61 }
 0xabf   :  { %v9926_v29 = vpop.eup %9925  ;;  %9929 = vpow2.f32 %v9131_v8  ;;  %v14160_v8 = vld [vmem:[#allocation76_spill] sm:$0xff] }
 0xac0   :  { %v9928_v22 = vpop.eup %9927  ;;  %9931 = vtanh.f32 %v12853_v2  ;;  %v6513_v53 = vadd.f32 1.0, %v9926_v29  ;;  %v6368_v39 = vpop.f32.mrf.mxu3  ;;  %v6423_v29 = vadd.f32 %v6415_v14, %v14160_v8 }
 0xac1   :  { %v6394_v24 = vpop.f32.mrf.mxu2  ;;  %v12861_v43 = vadd.f32 1.0, %v9928_v22 }
 0xac2   :  { %9933 = vrcp.f32 %v6513_v53  ;;  %v6525_v22 = vand.u32 2147483648, %v6513_v53  ;;  %vm6519_vm9 = vweird.f32 %v6513_v53  ;;  %v6523_v47 = vand.u32 2147483647, %v6513_v53 }
 0xac3   :  { %9935 = vrcp.f32 %v12861_v43  ;;  %vm6539_vm4 = vweird.f32 %v12861_v43 }
 0xac4   :  { %vm6524_vm13 = vcmp.eq.f32.partialorder %v6523_v47, 8.507059e+37 }
 0xac5   :  { %v9930_v49 = vpop.eup %9929 }
 0xac6   :  { %v9932_v55 = vpop.eup %9931  ;;  %v6494_v30 = vadd.f32 1.0, %v9930_v49 }
 0xac7   :  { %v12865_v51 = vmul.f32 %v9932_v55, %v6481_v31  ;;  %v6526_v55 = vor.u32 1.1754944e-38, %v6525_v22 }
 0xac8   :  { %v9934_v37 = vpop.eup %9933  ;;  %9937 = vrcp.f32 %v6494_v30  ;;  %v6506_v61 = vand.u32 2147483648, %v6494_v30  ;;  %v6504_v49 = vand.u32 2147483647, %v6494_v30  ;;  %vm6500_vm12 = vweird.f32 %v6494_v30 }
 0xac9   :  { %v6515_v45 = vmul.f32 %v9934_v37, %v6513_v53  ;;  %v6559_v33 = vpack.c.bf16 %v12865_v51, %v12865_v51  ;;  %v12871_v60 = vpop.eup %9935  ;;  %vm6520_vm8 = vweird.f32 %v9934_v37  ;;  %9939 = vtanh.f32 %v6423_v29 }
 0xaca   :  { %v6535_v63 = vmul.f32 %v12871_v60, %v12861_v43  ;;  %vm12882_vm10 = vmor %vm6519_vm9, %vm6520_vm8  ;;  %vm6505_vm15 = vcmp.eq.f32.partialorder %v6504_v49, 8.507059e+37  ;;  %vm6540_vm1 = vweird.f32 %v12871_v60 }
 0xacb   :  { %v6516_v46 = vsub.f32 1.0, %v6515_v45  ;;  %6568 = vmatmul.bf16.vlgmr.msrb.gmra.mxu3 %v6559_v33  ;;  %6581 = vmatmul.bf16.vlgmr.msra.gmra.mxu1 %v6559_v33  ;;  %vm6541_vm5 = vmor %vm6539_vm4, %vm6540_vm1 }
 0xacc   :  { %6594 = vmatmul.bf16.vlgmr.msra.gmra.mxu2 %v6559_v33  ;;  %6607 = vmatmul.bf16.vlgmr.msra.gmra.mxu0 %v6559_v33  ;;  %v6536_v31 = vsub.f32 1.0, %v6535_v63  ;;  %v6507_v33 = vor.u32 1.1754944e-38, %v6506_v61  ;;  %v6543_v63 = vand.u32 2147483647, %v12861_v43 }
 0xacd   :  { %v6517_v21 = vmul.f32 %v9934_v37, %v6516_v46  ;;  %6844 = vmatpush.bf16.msrb.mxu3 %v13976_v57  ;;  %6857 = vmatpush.bf16.msra.mxu1 %v11954_v41  ;;  %v6550_v46 = vrot.slane %v12743_v36, 2 }
 0xace   :  { %v9938_v4 = vpop.eup %9937  ;;  %6870 = vmatpush.bf16.msra.mxu2 %v13977_v12  ;;  %6883 = vmatpush.bf16.msra.mxu0 %v11956_v34  ;;  %v6537_v29 = vmul.f32 %v12871_v60, %v6536_v31  ;;  %vm6544_vm6 = vcmp.eq.f32.partialorder %v6543_v63, 8.507059e+37  ;;  %v14166_v31 = vld [vmem:[#allocation34_spill] sm:$0xff]  ;;  %v14179_v63 = vld [vmem:[#allocation31_spill] sm:$0xff] }
 0xacf   :  { %v6496_v15 = vmul.f32 %v9938_v4, %v6494_v30  ;;  %v6518_v5 = vadd.f32 %v9934_v37, %v6517_v21  ;;  %vm6501_vm11 = vweird.f32 %v9938_v4 }
 0xad0   :  { %vm6502_vm14 = vmor %vm6500_vm12, %vm6501_vm11  ;;  %v6538_v36 = vadd.f32 %v12871_v60, %v6537_v29  ;;  %v14173_v29 = vld [vmem:[#allocation29_spill] sm:$0xff] }
 0xad1   :  { %v6497_v39 = vsub.f32 1.0, %v6496_v15  ;;  %6845 = vmatpush.bf16.msrb.mxu3 %v13978_v54  ;;  %6858 = vmatpush.bf16.msra.mxu1 %v11966_v38  ;;  %v6522_v53 = vsel %vm12882_vm10, %v9934_v37, %v6518_v5  ;;  %v9940_v37 = vpop.eup %9939 }
 0xad2   :  { %6871 = vmatpush.bf16.msra.mxu2 %v13979_v17  ;;  %6884 = vmatpush.bf16.msra.mxu0 %v11968_v3  ;;  %v6527_v14 = vsel %vm6524_vm13, %v6526_v55, %v6522_v53  ;;  %v14164_v53 = vld [vmem:[#allocation32_spill] sm:$0xff]  ;;  %v14165_v55 = vld [vmem:[#allocation25_spill] sm:$0xff] }
 0xad3   :  { %v6498_v52 = vmul.f32 %v9938_v4, %v6497_v39  ;;  %v6552_v15 = vmul.f32 %v6550_v46, %v6527_v14  ;;  %v6542_v39 = vsel %vm6541_vm5, %v12871_v60, %v6538_v36  ;;  %v14169_v14 = vld [vmem:[#allocation19_spill] sm:$0xff]  ;;  %v14170_v46 = vld [vmem:[#allocation45_spill] sm:$0xff] }
 0xad4   :  { %v14177_v36 = vld [vmem:[#allocation21_spill] sm:$0xff] }
 0xad5   :  { %v6499_v45 = vadd.f32 %v9938_v4, %v6498_v52  ;;  %6846 = vmatpush.bf16.msrb.mxu3 %v13982_v56  ;;  %6859 = vmatpush.bf16.msra.mxu1 %v11980_v0  ;;  %v14186_v60 = vld [vmem:[#allocation57_spill] sm:$0xff] }
 0xad6   :  { %6872 = vmatpush.bf16.msra.mxu2 %v13983_v62  ;;  %6885 = vmatpush.bf16.msra.mxu0 %v11982_v58 }
 0xad7   :  { %v6503_v21 = vsel %vm6502_vm14, %v9938_v4, %v6499_v45  ;;  %v6545_v4 = vand.u32 2147483648, %v12861_v43  ;;  %v14167_v45 = vld [vmem:[#allocation17_spill] sm:$0xff] }
 0xad8   :  { %v6508_v30 = vsel %vm6505_vm15, %v6507_v33, %v6503_v21  ;;  %v14168_v33 = vld [vmem:[#allocation43_spill] sm:$0xff] }
 0xad9   :  { %v6553_v5 = vmul.f32 %v9940_v37, %v6508_v30  ;;  %6847 = vmatpush.bf16.msrb.mxu3 %v13984_v7  ;;  %6860 = vmatpush.bf16.msra.mxu1 %v11992_v32  ;;  %v6546_v47 = vor.u32 1.1754944e-38, %v6545_v4  ;;  %v14171_v21 = vld [vmem:[#allocation27_spill] sm:$0xff]  ;;  %v14172_v37 = vld [vmem:[#allocation36_spill] sm:$0xff]  ;;  %v14174_v30 = vld [vmem:[#allocation38_spill] sm:$0xff] }
 0xada   :  { %6873 = vmatpush.bf16.msra.mxu2 %v13985_v13  ;;  %6886 = vmatpush.bf16.msra.mxu0 %v11994_v35  ;;  %v14178_v4 = vld [vmem:[#allocation40_spill] sm:$0xff] }
 0xadb   :  { %v12900_v22 = vadd.f32 %v6553_v5, %v6552_v15  ;;  %v6547_v61 = vsel %vm6544_vm6, %v6546_v47, %v6542_v39  ;;  %v14175_v15 = vld [vmem:[#allocation20_spill] sm:$0xff]  ;;  %v14176_v5 = vld [vmem:[#allocation47_spill] sm:$0xff]  ;;  %v14180_v39 = vld [vmem:[#allocation42_spill] sm:$0xff] }
 0xadc   :  { %v14181_v47 = vld [vmem:[#allocation33_spill] sm:$0xff] }
 0xadd   :  { %9941 = vtanh.f32 %v12900_v22  ;;  %6848 = vmatpush.bf16.msrb.mxu3 %v11924_v42  ;;  %6861 = vmatpush.bf16.msra.mxu1 %v12004_v40 }
 0xade   :  { %6874 = vmatpush.bf16.msra.mxu2 %v13986_v28  ;;  %6887 = vmatpush.bf16.msra.mxu0 %v12006_v44 }
 0xae1   :  { %6849 = vmatpush.bf16.msrb.mxu3 %v13987_v20  ;;  %6862 = vmatpush.bf16.msra.mxu1 %v12016_v16 }
 0xae2   :  { %6875 = vmatpush.bf16.msra.mxu2 %v13988_v27  ;;  %6888 = vmatpush.bf16.msra.mxu0 %v12018_v59 }
 0xae3   :  { %v9942_v24 = vpop.eup %9941 }
 0xae4   :  { %v12917_v43 = vmul.f32 %v9942_v24, %v6547_v61  ;;  %v14182_v24 = vld [vmem:[#allocation49_spill] sm:$0xff]  ;;  %v14183_v61 = vld [vmem:[#allocation23_spill] sm:$0xff] }
 0xae5   :  { %6850 = vmatpush.bf16.msrb.mxu3 %v11936_v19  ;;  %6863 = vmatpush.bf16.msra.mxu1 %v12028_v6 }
 0xae6   :  { %14163 = vst [vmem:[#allocation61_spill] sm:$0xff] %v12917_v43  ;;  %v6628_v52 = vpack.c.bf16 %v12917_v43, %v12917_v43  ;;  %6876 = vmatpush.bf16.msra.mxu2 %v11938_v25  ;;  %6889 = vmatpush.bf16.msra.mxu0 %v12030_v1 }
 0xae8   :  { %v6630_v49 = vrot.slane %v6628_v52, 3  ;;  %v14184_v52 = vld [vmem:[#allocation50_spill] sm:$0xff] }
 0xae9   :  { %6851 = vmatpush.bf16.msrb.mxu3 %v11942_v48  ;;  %6864 = vmatpush.bf16.msra.mxu1 %v14061_v50 }
 0xaea   :  { %6640 = vmatmul.bf16.vlgmr.msra.gmra.mxu3 %v6630_v49  ;;  %6653 = vmatmul.bf16.vlgmr.msrb.gmra.mxu1 %v6630_v49 }
 0xaeb   :  { %6666 = vmatmul.bf16.vlgmr.msrb.gmra.mxu2 %v6630_v49  ;;  %6679 = vmatmul.bf16.vlgmr.msrb.gmra.mxu0 %v6630_v49  ;;  %v14185_v49 = vld [vmem:[#allocation26_spill] sm:$0xff] }
 0xaec   :  { %6877 = vmatpush.bf16.msra.mxu2 %v14106_v11  ;;  %6890 = vmatpush.bf16.msra.mxu0 %v14164_v53 }
 0xaed   :  { %6916 = vmatpush.bf16.msra.mxu3 %v14165_v55  ;;  %6929 = vmatpush.bf16.msrb.mxu1 %v14166_v31 }
 0xaf0   :  { %6942 = vmatpush.bf16.msrb.mxu2 %v14167_v45  ;;  %6955 = vmatpush.bf16.msrb.mxu0 %v14168_v33 }
 0xaf1   :  { %6917 = vmatpush.bf16.msra.mxu3 %v14169_v14  ;;  %6930 = vmatpush.bf16.msrb.mxu1 %v14170_v46 }
 0xaf4   :  { %6943 = vmatpush.bf16.msrb.mxu2 %v14171_v21  ;;  %6956 = vmatpush.bf16.msrb.mxu0 %v14172_v37  ;;  %v14199_v21 = vld [vmem:[#allocation52_spill] sm:$0xff] }
 0xaf5   :  { %6918 = vmatpush.bf16.msra.mxu3 %v14173_v29  ;;  %6931 = vmatpush.bf16.msrb.mxu1 %v14174_v30  ;;  %v14198_v30 = vld [vmem:[#allocation59_spill] sm:$0xff] }
 0xaf8   :  { %6944 = vmatpush.bf16.msrb.mxu2 %v14175_v15  ;;  %6957 = vmatpush.bf16.msrb.mxu0 %v14176_v5  ;;  %v14197_v15 = vld [vmem:[#allocation56_spill] sm:$0xff] }
 0xaf9   :  { %6919 = vmatpush.bf16.msra.mxu3 %v14177_v36  ;;  %6932 = vmatpush.bf16.msrb.mxu1 %v14178_v4  ;;  %v14188_v36 = vld [vmem:[#allocation53_spill] sm:$0xff] }
 0xafa   :  { %v14189_v4 = vld [vmem:[#allocation37_spill] sm:$0xff] }
 0xafc   :  { %6945 = vmatpush.bf16.msrb.mxu2 %v14179_v63  ;;  %6958 = vmatpush.bf16.msrb.mxu0 %v14180_v39  ;;  %v14190_v63 = vld [vmem:[#allocation60_spill] sm:$0xff] }
 0xafd   :  { %6920 = vmatpush.bf16.msra.mxu3 %v14181_v47  ;;  %6933 = vmatpush.bf16.msrb.mxu1 %v14182_v24  ;;  %v14191_v39 = vld [vmem:[#allocation28_spill] sm:$0xff]  ;;  %v14193_v24 = vld [vmem:[#allocation30_spill] sm:$0xff] }
 0xafe   :  { %v14192_v47 = vld [vmem:[#allocation16_spill] sm:$0xff] }
 0xb00   :  { %6946 = vmatpush.bf16.msrb.mxu2 %v14183_v61  ;;  %6959 = vmatpush.bf16.msrb.mxu0 %v14184_v52  ;;  %v14194_v61 = vld [vmem:[#allocation51_spill] sm:$0xff] }
 0xb01   :  { %6921 = vmatpush.bf16.msra.mxu3 %v14185_v49  ;;  %6934 = vmatpush.bf16.msrb.mxu1 %v14186_v60  ;;  %v14195_v52 = vld [vmem:[#allocation39_spill] sm:$0xff]  ;;  %v14196_v49 = vld [vmem:[#allocation69_spill] sm:$0xff] }
 0xb04   :  { %6947 = vmatpush.bf16.msrb.mxu2 %v14187_v26  ;;  %6960 = vmatpush.bf16.msrb.mxu0 %v14188_v36 }
 0xb05   :  { %6922 = vmatpush.bf16.msra.mxu3 %v14189_v4  ;;  %6935 = vmatpush.bf16.msrb.mxu1 %v14190_v63 }
 0xb08   :  { %6948 = vmatpush.bf16.msrb.mxu2 %v14191_v39  ;;  %6961 = vmatpush.bf16.msrb.mxu0 %v14192_v47 }
 0xb09   :  { %6923 = vmatpush.bf16.msra.mxu3 %v14193_v24  ;;  %6936 = vmatpush.bf16.msrb.mxu1 %v14194_v61 }
 0xb0c   :  { %6949 = vmatpush.bf16.msrb.mxu2 %v14195_v52  ;;  %6962 = vmatpush.bf16.msrb.mxu0 %v14196_v49 }
 0xb48   :  { %v6582_v60 = vpop.f32.mrf.mxu1 }
 0xb49   :  { %v6617_v26 = vrot.slane %v6582_v60, 6  ;;  %v6608_v5 = vpop.f32.mrf.mxu0 }
 0xb4a   :  { %v6619_v36 = vrot.slane %v6608_v5, 6 }
 0xb4b   :  { %v6625_v4 = vadd.f32 %v6617_v26, %v14197_v15 }
 0xb4c   :  { %v6627_v63 = vadd.f32 %v6619_v36, %v14198_v30 }
 0xb4d   :  { %v9135_v29 = vmul.f32 -1.442695, %v6625_v4 }
 0xb4e   :  { %v9136_v39 = vmul.f32 -1.442695, %v6627_v63  ;;  %v6569_v37 = vpop.f32.mrf.mxu3 }
 0xb4f   :  { %9943 = vpow2.f32 %v9135_v29  ;;  %v6616_v47 = vrot.slane %v6569_v37, 6  ;;  %v6595_v24 = vpop.f32.mrf.mxu2 }
 0xb50   :  { %9945 = vpow2.f32 %v9136_v39  ;;  %v6584_v61 = vpop.f32.mrf.mxu1  ;;  %v6618_v39 = vrot.slane %v6595_v24, 6 }
 0xb51   :  { %v6624_v52 = vadd.f32 %v6616_v47, %v14199_v21  ;;  %v6610_v46 = vpop.f32.mrf.mxu0 }
 0xb53   :  { %v9134_v49 = vmul.f32 -1.442695, %v6624_v52 }
 0xb55   :  { %v9944_v14 = vpop.eup %9943  ;;  %9947 = vpow2.f32 %v9134_v49  ;;  %v14200_v49 = vld [vmem:[#allocation55_spill] sm:$0xff] }
 0xb56   :  { %v9946_v60 = vpop.eup %9945  ;;  %v6722_v5 = vadd.f32 1.0, %v9944_v14  ;;  %v6571_v33 = vpop.f32.mrf.mxu3  ;;  %v6626_v14 = vadd.f32 %v6618_v39, %v14200_v49 }
 0xb57   :  { %v6597_v26 = vpop.f32.mrf.mxu2  ;;  %v12966_v36 = vadd.f32 1.0, %v9946_v60 }
 0xb58   :  { %9949 = vrcp.f32 %v6722_v5  ;;  %v6734_v60 = vand.u32 2147483648, %v6722_v5  ;;  %vm6728_vm2 = vweird.f32 %v6722_v5  ;;  %v6732_v30 = vand.u32 2147483647, %v6722_v5 }
 0xb59   :  { %9951 = vrcp.f32 %v12966_v36  ;;  %vm6748_vm14 = vweird.f32 %v12966_v36 }
 0xb5a   :  { %v6735_v55 = vor.u32 1.1754944e-38, %v6734_v60  ;;  %vm6733_vm10 = vcmp.eq.f32.partialorder %v6732_v30, 8.507059e+37 }
 0xb5b   :  { %v9948_v4 = vpop.eup %9947 }
 0xb5c   :  { %v6703_v63 = vadd.f32 1.0, %v9948_v4 }
 0xb5e   :  { %v9950_v37 = vpop.eup %9949  ;;  %9953 = vrcp.f32 %v6703_v63  ;;  %vm6709_vm9 = vweird.f32 %v6703_v63 }
 0xb5f   :  { %v6724_v29 = vmul.f32 %v9950_v37, %v6722_v5  ;;  %v12969_v46 = vpop.eup %9951  ;;  %vm6729_vm0 = vweird.f32 %v9950_v37  ;;  %9955 = vtanh.f32 %v6626_v14 }
 0xb60   :  { %v6744_v4 = vmul.f32 %v12969_v46, %v12966_v36  ;;  %vm12974_vm3 = vmor %vm6728_vm2, %vm6729_vm0  ;;  %vm6749_vm13 = vweird.f32 %v12969_v46 }
 0xb61   :  { %v6725_v47 = vsub.f32 1.0, %v6724_v29  ;;  %v6713_v29 = vand.u32 2147483647, %v6703_v63  ;;  %vm6750_vm15 = vmor %vm6748_vm14, %vm6749_vm13 }
 0xb62   :  { %v6745_v53 = vsub.f32 1.0, %v6744_v4 }
 0xb63   :  { %v6726_v61 = vmul.f32 %v9950_v37, %v6725_v47  ;;  %v6715_v47 = vand.u32 2147483648, %v6703_v63  ;;  %vm6714_vm12 = vcmp.eq.f32.partialorder %v6713_v29, 8.507059e+37 }
 0xb64   :  { %v9954_v52 = vpop.eup %9953  ;;  %v6746_v60 = vmul.f32 %v12969_v46, %v6745_v53 }
 0xb65   :  { %v6705_v33 = vmul.f32 %v9954_v52, %v6703_v63  ;;  %v6727_v26 = vadd.f32 %v9950_v37, %v6726_v61  ;;  %vm6710_vm8 = vweird.f32 %v9954_v52  ;;  %v6716_v48 = vor.u32 1.1754944e-38, %v6715_v47 }
 0xb66   :  { %vm6711_vm11 = vmor %vm6709_vm9, %vm6710_vm8 }
 0xb67   :  { %v6706_v21 = vsub.f32 1.0, %v6705_v33  ;;  %v6654_v15 = vpop.f32.mrf.mxu1  ;;  %v6731_v61 = vsel %vm12974_vm3, %v9950_v37, %v6727_v26  ;;  %v14203_v33 = vld [vmem:[#allocation75_spill] sm:$0xff]  ;;  %v9956_v26 = vpop.eup %9955 }
 0xb68   :  { %v6689_v45 = vrot.slane %v6654_v15, 4  ;;  %v6680_v39 = vpop.f32.mrf.mxu0  ;;  %v6736_v14 = vsel %vm6733_vm10, %v6735_v55, %v6731_v61 }
 0xb69   :  { %v6707_v49 = vmul.f32 %v9954_v52, %v6706_v21  ;;  %v6691_v31 = vrot.slane %v6680_v39, 4  ;;  %v6759_v21 = vrot.slane %v12853_v2, 6  ;;  %v6754_v2 = vand.u32 2147483648, %v12966_v36 }
 0xb6a   :  { %v6697_v5 = vadd.f32 %v6689_v45, %v14203_v33 }
 0xb6b   :  { %v6708_v11 = vadd.f32 %v9954_v52, %v6707_v49  ;;  %v6699_v50 = vadd.f32 %v6691_v31, %v14158_v10  ;;  %v6761_v30 = vmul.f32 %v6759_v21, %v6736_v14  ;;  %v6755_v14 = vor.u32 1.1754944e-38, %v6754_v2 }
 0xb6c   :  { %v9138_v15 = vmul.f32 -1.442695, %v6697_v5 }
 0xb6d   :  { %v6712_v43 = vsel %vm6711_vm11, %v9954_v52, %v6708_v11  ;;  %v9139_v24 = vmul.f32 -1.442695, %v6699_v50  ;;  %v6641_v37 = vpop.f32.mrf.mxu3  ;;  %v6747_v11 = vadd.f32 %v12969_v46, %v6746_v60 }
 0xb6e   :  { %v6717_v4 = vsel %vm6714_vm12, %v6716_v48, %v6712_v43  ;;  %9957 = vpow2.f32 %v9138_v15  ;;  %v6688_v45 = vrot.slane %v6641_v37, 4  ;;  %v6667_v63 = vpop.f32.mrf.mxu2  ;;  %v6752_v43 = vand.u32 2147483647, %v12966_v36 }
 0xb6f   :  { %v6762_v49 = vmul.f32 %v9956_v26, %v6717_v4  ;;  %9959 = vpow2.f32 %v9139_v24  ;;  %v6656_v31 = vpop.f32.mrf.mxu1  ;;  %v6751_v5 = vsel %vm6750_vm15, %v12969_v46, %v6747_v11  ;;  %v14204_v46 = vmax.f32 %v12716_v9, %v12865_v51 }
 0xb70   :  { %v6696_v55 = vadd.f32 %v6688_v45, %v14159_v23  ;;  %v6682_v47 = vpop.f32.mrf.mxu0  ;;  %vm6753_vm1 = vcmp.eq.f32.partialorder %v6752_v43, 8.507059e+37 }
 0xb71   :  { %v12985_v39 = vadd.f32 %v6762_v49, %v6761_v30  ;;  %v6756_v24 = vsel %vm6753_vm1, %v6755_v14, %v6751_v5 }
 0xb72   :  { %v9137_v50 = vmul.f32 -1.442695, %v6696_v55  ;;  %v6690_v55 = vrot.slane %v6667_v63, 4 }
 0xb73   :  { %9961 = vtanh.f32 %v12985_v39 }
 0xb74   :  { %v9958_v48 = vpop.eup %9957  ;;  %9963 = vpow2.f32 %v9137_v50 }
 0xb75   :  { %v9960_v53 = vpop.eup %9959  ;;  %v6788_v52 = vadd.f32 1.0, %v9958_v48  ;;  %v6643_v29 = vpop.f32.mrf.mxu3  ;;  %v6698_v48 = vadd.f32 %v6690_v55, %v14160_v8  ;;  %v14223_v55 = vld [vmem:[#allocation20_spill] sm:$0xff] }
 0xb76   :  { %v6669_v61 = vpop.f32.mrf.mxu2  ;;  %v12994_v15 = vadd.f32 1.0, %v9960_v53 }
 0xb77   :  { %9965 = vrcp.f32 %v6788_v52  ;;  %v6800_v63 = vand.u32 2147483648, %v6788_v52  ;;  %vm6794_vm5 = vweird.f32 %v6788_v52  ;;  %v6798_v29 = vand.u32 2147483647, %v6788_v52 }
 0xb78   :  { %9967 = vrcp.f32 %v12994_v15  ;;  %vm6814_vm11 = vweird.f32 %v12994_v15 }
 0xb79   :  { %v9962_v21 = vpop.eup %9961  ;;  %v6801_v61 = vor.u32 1.1754944e-38, %v6800_v63  ;;  %vm6799_vm3 = vcmp.eq.f32.partialorder %v6798_v29, 8.507059e+37  ;;  %v14231_v63 = vld [vmem:[#allocation23_spill] sm:$0xff]  ;;  %v14234_v29 = vld [vmem:[#allocation57_spill] sm:$0xff] }
 0xb7a   :  { %v9964_v37 = vpop.eup %9963  ;;  %v6765_v26 = vmul.f32 %v9962_v21, %v6756_v24 }
 0xb7b   :  { %v6769_v60 = vadd.f32 1.0, %v9964_v37 }
 0xb7c   :  { %v6833_v36 = vrot.slane %v6765_v26, 2  ;;  %v6840_v4 = vpack.c.bf16 %v6765_v26, %v6765_v26 }
 0xb7d   :  { %v9966_v45 = vpop.eup %9965  ;;  %9969 = vrcp.f32 %v6769_v60  ;;  %vm6775_vm2 = vweird.f32 %v6769_v60 }
 0xb7e   :  { %v6790_v30 = vmul.f32 %v9966_v45, %v6788_v52  ;;  %v6842_v49 = vrot.slane %v6840_v4, 1  ;;  %v13000_v31 = vmax.f32 %v14204_v46, %v6833_v36  ;;  %v13002_v50 = vpop.eup %9967  ;;  %vm6795_vm4 = vweird.f32 %v9966_v45  ;;  %v14217_v36 = vld [vmem:[#allocation19_spill] sm:$0xff]  ;;  %v14218_v4 = vld [vmem:[#allocation45_spill] sm:$0xff]  ;;  %v14222_v46 = vld [vmem:[#allocation38_spill] sm:$0xff] }
 0xb7f   :  { %v6810_v43 = vmul.f32 %v13002_v50, %v12994_v15  ;;  %vm13013_vm6 = vmor %vm6794_vm5, %vm6795_vm4  ;;  %9971 = vtanh.f32 %v6698_v48  ;;  %vm6815_vm10 = vweird.f32 %v13002_v50  ;;  %v14228_v48 = vld [vmem:[#allocation42_spill] sm:$0xff] }
 0xb80   :  { %v6791_v47 = vsub.f32 1.0, %v6790_v30  ;;  %6852 = vmatmul.bf16.vlgmr.msrb.gmra.mxu3 %v6842_v49  ;;  %6865 = vmatmul.bf16.vlgmr.msra.gmra.mxu1 %v6842_v49  ;;  %vm6816_vm12 = vmor %vm6814_vm11, %vm6815_vm10  ;;  %v14220_v30 = vld [vmem:[#allocation36_spill] sm:$0xff] }
 0xb81   :  { %6878 = vmatmul.bf16.vlgmr.msra.gmra.mxu2 %v6842_v49  ;;  %6891 = vmatmul.bf16.vlgmr.msra.gmra.mxu0 %v6842_v49  ;;  %v14221_v49 = vld [vmem:[#allocation29_spill] sm:$0xff] }
 0xb82   :  { %v6792_v11 = vmul.f32 %v9966_v45, %v6791_v47  ;;  %7128 = vmatpush.bf16.msrb.mxu3 %v13976_v57  ;;  %7141 = vmatpush.bf16.msra.mxu1 %v11954_v41  ;;  %v6781_v57 = vand.u32 2147483648, %v6769_v60  ;;  %v14224_v47 = vld [vmem:[#allocation47_spill] sm:$0xff] }
 0xb83   :  { %v9970_v2 = vpop.eup %9969  ;;  %7154 = vmatpush.bf16.msra.mxu2 %v13977_v12  ;;  %7167 = vmatpush.bf16.msra.mxu0 %v11956_v34  ;;  %v6779_v12 = vand.u32 2147483647, %v6769_v60  ;;  %v14235_v41 = vld [vmem:[#allocation35_spill] sm:$0xff] }
 0xb84   :  { %v6771_v9 = vmul.f32 %v9970_v2, %v6769_v60  ;;  %v6793_v51 = vadd.f32 %v9966_v45, %v6792_v11  ;;  %vm6776_vm0 = vweird.f32 %v9970_v2  ;;  %v14226_v11 = vld [vmem:[#allocation40_spill] sm:$0xff] }
 0xb85   :  { %vm6777_vm8 = vmor %vm6775_vm2, %vm6776_vm0  ;;  %vm6780_vm9 = vcmp.eq.f32.partialorder %v6779_v12, 8.507059e+37  ;;  %v9972_v21 = vpop.eup %9971  ;;  %v14238_v12 = vld [vmem:[#allocation60_spill] sm:$0xff] }
 0xb86   :  { %v6772_v53 = vsub.f32 1.0, %v6771_v9  ;;  %7129 = vmatpush.bf16.msrb.mxu3 %v13978_v54  ;;  %7142 = vmatpush.bf16.msra.mxu1 %v11966_v38  ;;  %v6797_v52 = vsel %vm13013_vm6, %v9966_v45, %v6793_v51  ;;  %v6811_v54 = vsub.f32 1.0, %v6810_v43  ;;  %v6782_v38 = vor.u32 1.1754944e-38, %v6781_v57  ;;  %v14219_v45 = vld [vmem:[#allocation27_spill] sm:$0xff]  ;;  %v14229_v9 = vld [vmem:[#allocation33_spill] sm:$0xff]  ;;  %v14232_v43 = vld [vmem:[#allocation50_spill] sm:$0xff] }
 0xb87   :  { %7155 = vmatpush.bf16.msra.mxu2 %v13979_v17  ;;  %7168 = vmatpush.bf16.msra.mxu0 %v11968_v3  ;;  %v6802_v17 = vsel %vm6799_vm3, %v6801_v61, %v6797_v52  ;;  %v6825_v3 = vrot.slane %v12900_v22, 2  ;;  %v14210_v22 = vld [vmem:[#allocation41_spill] sm:$0xff]  ;;  %v14239_v52 = vld [vmem:[#allocation28_spill] sm:$0xff] }
 0xb88   :  { %v6773_v34 = vmul.f32 %v9970_v2, %v6772_v53  ;;  %v6812_v24 = vmul.f32 %v13002_v50, %v6811_v54  ;;  %v14230_v51 = vld [vmem:[#allocation49_spill] sm:$0xff]  ;;  %v14233_v53 = vld [vmem:[#allocation26_spill] sm:$0xff]  ;;  %v14240_v61 = vld [vmem:[#allocation16_spill] sm:$0xff] }
 0xb89   :  { %v6827_v26 = vmul.f32 %v6825_v3, %v6802_v17  ;;  %v14236_v57 = vld [vmem:[#allocation53_spill] sm:$0xff]  ;;  %v14241_v54 = vld [vmem:[#allocation30_spill] sm:$0xff] }
 0xb8a   :  { %v6774_v5 = vadd.f32 %v9970_v2, %v6773_v34  ;;  %7130 = vmatpush.bf16.msrb.mxu3 %v13982_v56  ;;  %7143 = vmatpush.bf16.msra.mxu1 %v11980_v0  ;;  %v6820_v56 = vand.u32 2147483648, %v12994_v15  ;;  %v14237_v34 = vld [vmem:[#allocation37_spill] sm:$0xff] }
 0xb8b   :  { %7156 = vmatpush.bf16.msra.mxu2 %v13983_v62  ;;  %7169 = vmatpush.bf16.msra.mxu0 %v11982_v58  ;;  %v6813_v58 = vadd.f32 %v13002_v50, %v6812_v24  ;;  %v14244_v17 = vld [vmem:[#allocation69_spill] sm:$0xff] }
 0xb8c   :  { %v6778_v14 = vsel %vm6777_vm8, %v9970_v2, %v6774_v5  ;;  %v6821_v62 = vor.u32 1.1754944e-38, %v6820_v56  ;;  %v14227_v2 = vld [vmem:[#allocation31_spill] sm:$0xff] }
 0xb8d   :  { %v6783_v37 = vsel %vm6780_vm9, %v6782_v38, %v6778_v14  ;;  %v14242_v5 = vld [vmem:[#allocation51_spill] sm:$0xff] }
 0xb8e   :  { %v6828_v60 = vmul.f32 %v9972_v21, %v6783_v37  ;;  %7131 = vmatpush.bf16.msrb.mxu3 %v13984_v7  ;;  %7144 = vmatpush.bf16.msra.mxu1 %v11992_v32  ;;  %v6818_v32 = vand.u32 2147483647, %v12994_v15  ;;  %v14215_v15 = vld [vmem:[#allocation17_spill] sm:$0xff]  ;;  %v14243_v38 = vld [vmem:[#allocation39_spill] sm:$0xff]  ;;  %v14245_v37 = vld [vmem:[#allocation56_spill] sm:$0xff] }
 0xb8f   :  { %7157 = vmatpush.bf16.msra.mxu2 %v13985_v13  ;;  %7170 = vmatpush.bf16.msra.mxu0 %v11994_v35  ;;  %v6817_v35 = vsel %vm6816_vm12, %v13002_v50, %v6813_v58  ;;  %v14225_v50 = vld [vmem:[#allocation21_spill] sm:$0xff] }
 0xb90   :  { %v13031_v0 = vadd.f32 %v6828_v60, %v6827_v26  ;;  %vm6819_vm13 = vcmp.eq.f32.partialorder %v6818_v32, 8.507059e+37  ;;  %v14246_v60 = vld [vmem:[#allocation59_spill] sm:$0xff] }
 0xb92   :  { %9973 = vtanh.f32 %v13031_v0  ;;  %7132 = vmatpush.bf16.msrb.mxu3 %v11924_v42  ;;  %7145 = vmatpush.bf16.msra.mxu1 %v12004_v40  ;;  %v6822_v40 = vsel %vm6819_vm13, %v6821_v62, %v6817_v35 }
 0xb93   :  { %7158 = vmatpush.bf16.msra.mxu2 %v13986_v28  ;;  %7171 = vmatpush.bf16.msra.mxu0 %v12006_v44 }
 0xb96   :  { %7133 = vmatpush.bf16.msrb.mxu3 %v13987_v20  ;;  %7146 = vmatpush.bf16.msra.mxu1 %v12016_v16  ;;  %v14207_v16 = vld [vmem:[#allocation61_spill] sm:$0xff] }
 0xb97   :  { %7159 = vmatpush.bf16.msra.mxu2 %v13988_v27  ;;  %7172 = vmatpush.bf16.msra.mxu0 %v12018_v59  ;;  %v14208_v20 = vmax.f32 %v12767_v18, %v14207_v16  ;;  %v14209_v59 = vld [vmem:[#allocation18_spill] sm:$0xff]  ;;  %v14216_v18 = vld [vmem:[#allocation43_spill] sm:$0xff] }
 0xb98   :  { %v9974_v42 = vpop.eup %9973 }
 0xb99   :  { %v6831_v7 = vmul.f32 %v9974_v42, %v6822_v40 }
 0xb9a   :  { %7134 = vmatpush.bf16.msrb.mxu3 %v11936_v19  ;;  %7147 = vmatpush.bf16.msra.mxu1 %v12028_v6  ;;  %v14211_v19 = vld [vmem:[#allocation22_spill] sm:$0xff]  ;;  %v14212_v6 = vld [vmem:[#allocation32_spill] sm:$0xff] }
 0xb9b   :  { %v6837_v44 = vrot.slane %v6831_v7, 6  ;;  %v6912_v13 = vpack.c.bf16 %v6831_v7, %v6831_v7  ;;  %7160 = vmatpush.bf16.msra.mxu2 %v11938_v25  ;;  %7173 = vmatpush.bf16.msra.mxu0 %v12030_v1  ;;  %v14213_v25 = vld [vmem:[#allocation25_spill] sm:$0xff]  ;;  %v14214_v1 = vld [vmem:[#allocation34_spill] sm:$0xff]  ;;  %v14247_v7 = vld [vmem:[#allocation52_spill] sm:$0xff] }
 0xb9d   :  { %v6914_v28 = vrot.slane %v6912_v13, 2  ;;  %v13055_v27 = vmax.f32 %v14208_v20, %v6837_v44 }
 0xb9e   :  { %7135 = vmatpush.bf16.msrb.mxu3 %v14209_v59  ;;  %7148 = vmatpush.bf16.msra.mxu1 %v14210_v22 }
 0xb9f   :  { %6924 = vmatmul.bf16.vlgmr.msra.gmra.mxu3 %v6914_v28  ;;  %6937 = vmatmul.bf16.vlgmr.msrb.gmra.mxu1 %v6914_v28 }
 0xba0   :  { %6950 = vmatmul.bf16.vlgmr.msrb.gmra.mxu2 %v6914_v28  ;;  %6963 = vmatmul.bf16.vlgmr.msrb.gmra.mxu0 %v6914_v28 }
 0xba1   :  { %7161 = vmatpush.bf16.msra.mxu2 %v14211_v19  ;;  %7174 = vmatpush.bf16.msra.mxu0 %v14212_v6 }
 0xba2   :  { %7200 = vmatpush.bf16.msra.mxu3 %v14213_v25  ;;  %7213 = vmatpush.bf16.msrb.mxu1 %v14214_v1 }
 0xba5   :  { %7226 = vmatpush.bf16.msrb.mxu2 %v14215_v15  ;;  %7239 = vmatpush.bf16.msrb.mxu0 %v14216_v18 }
 0xba6   :  { %7201 = vmatpush.bf16.msra.mxu3 %v14217_v36  ;;  %7214 = vmatpush.bf16.msrb.mxu1 %v14218_v4 }
 0xba9   :  { %7227 = vmatpush.bf16.msrb.mxu2 %v14219_v45  ;;  %7240 = vmatpush.bf16.msrb.mxu0 %v14220_v30 }
 0xbaa   :  { %7202 = vmatpush.bf16.msra.mxu3 %v14221_v49  ;;  %7215 = vmatpush.bf16.msrb.mxu1 %v14222_v46  ;;  %v14248_v46 = vld [vmem:[#allocation55_spill] sm:$0xff] }
 0xbad   :  { %7228 = vmatpush.bf16.msrb.mxu2 %v14223_v55  ;;  %7241 = vmatpush.bf16.msrb.mxu0 %v14224_v47 }
 0xbae   :  { %7203 = vmatpush.bf16.msra.mxu3 %v14225_v50  ;;  %7216 = vmatpush.bf16.msrb.mxu1 %v14226_v11 }
 0xbb1   :  { %7229 = vmatpush.bf16.msrb.mxu2 %v14227_v2  ;;  %7242 = vmatpush.bf16.msrb.mxu0 %v14228_v48 }
 0xbb2   :  { %7204 = vmatpush.bf16.msra.mxu3 %v14229_v9  ;;  %7217 = vmatpush.bf16.msrb.mxu1 %v14230_v51 }
 0xbb5   :  { %7230 = vmatpush.bf16.msrb.mxu2 %v14231_v63  ;;  %7243 = vmatpush.bf16.msrb.mxu0 %v14232_v43 }
 0xbb6   :  { %7205 = vmatpush.bf16.msra.mxu3 %v14233_v53  ;;  %7218 = vmatpush.bf16.msrb.mxu1 %v14234_v29 }
 0xbb9   :  { %7231 = vmatpush.bf16.msrb.mxu2 %v14235_v41  ;;  %7244 = vmatpush.bf16.msrb.mxu0 %v14236_v57 }
 0xbba   :  { %7206 = vmatpush.bf16.msra.mxu3 %v14237_v34  ;;  %7219 = vmatpush.bf16.msrb.mxu1 %v14238_v12 }
 0xbbd   :  { %7232 = vmatpush.bf16.msrb.mxu2 %v14239_v52  ;;  %7245 = vmatpush.bf16.msrb.mxu0 %v14240_v61 }
 0xbbe   :  { %7207 = vmatpush.bf16.msra.mxu3 %v14241_v54  ;;  %7220 = vmatpush.bf16.msrb.mxu1 %v14242_v5 }
 0xbc1   :  { %7233 = vmatpush.bf16.msrb.mxu2 %v14243_v38  ;;  %7246 = vmatpush.bf16.msrb.mxu0 %v14244_v17 }
 0xbfd   :  { %v6866_v3 = vpop.f32.mrf.mxu1 }
 0xbfe   :  { %v6901_v14 = vrot.slane %v6866_v3, 4  ;;  %v6892_v21 = vpop.f32.mrf.mxu0 }
 0xbff   :  { %v6903_v24 = vrot.slane %v6892_v21, 4  ;;  %v7043_v21 = vrot.slane %v12985_v39, 6 }
 0xc00   :  { %v6909_v26 = vadd.f32 %v6901_v14, %v14245_v37 }
 0xc01   :  { %v6911_v58 = vadd.f32 %v6903_v24, %v14246_v60 }
 0xc02   :  { %v9141_v56 = vmul.f32 -1.442695, %v6909_v26 }
 0xc03   :  { %v9142_v32 = vmul.f32 -1.442695, %v6911_v58  ;;  %v6853_v35 = vpop.f32.mrf.mxu3 }
 0xc04   :  { %9975 = vpow2.f32 %v9141_v56  ;;  %v6900_v62 = vrot.slane %v6853_v35, 4  ;;  %v6879_v42 = vpop.f32.mrf.mxu2 }
 0xc05   :  { %9977 = vpow2.f32 %v9142_v32  ;;  %v6868_v40 = vpop.f32.mrf.mxu1  ;;  %v6902_v36 = vrot.slane %v6879_v42, 4 }
 0xc06   :  { %v6908_v44 = vadd.f32 %v6900_v62, %v14247_v7  ;;  %v6894_v13 = vpop.f32.mrf.mxu0 }
 0xc07   :  { %v6910_v55 = vadd.f32 %v6902_v36, %v14248_v46 }
 0xc08   :  { %v9140_v28 = vmul.f32 -1.442695, %v6908_v44 }
 0xc0a   :  { %v9976_v16 = vpop.eup %9975  ;;  %9979 = vpow2.f32 %v9140_v28 }
 0xc0b   :  { %v9978_v20 = vpop.eup %9977  ;;  %v7006_v59 = vadd.f32 1.0, %v9976_v16  ;;  %v6855_v22 = vpop.f32.mrf.mxu3 }
 0xc0c   :  { %v6881_v19 = vpop.f32.mrf.mxu2  ;;  %v13096_v6 = vadd.f32 1.0, %v9978_v20 }
 0xc0d   :  { %9981 = vrcp.f32 %v7006_v59  ;;  %v7018_v11 = vand.u32 2147483648, %v7006_v59  ;;  %vm7012_vm15 = vweird.f32 %v7006_v59  ;;  %v7016_v9 = vand.u32 2147483647, %v7006_v59 }
 0xc0e   :  { %9983 = vrcp.f32 %v13096_v6  ;;  %v7038_v22 = vand.u32 2147483648, %v13096_v6  ;;  %vm7032_vm8 = vweird.f32 %v13096_v6 }
 0xc0f   :  { %v7019_v52 = vor.u32 1.1754944e-38, %v7018_v11  ;;  %vm7017_vm6 = vcmp.eq.f32.partialorder %v7016_v9, 8.507059e+37 }
 0xc10   :  { %v9980_v25 = vpop.eup %9979 }
 0xc11   :  { %v6987_v1 = vadd.f32 1.0, %v9980_v25  ;;  %v7036_v25 = vand.u32 2147483647, %v13096_v6 }
 0xc13   :  { %v9982_v15 = vpop.eup %9981  ;;  %9985 = vrcp.f32 %v6987_v1  ;;  %v6997_v43 = vand.u32 2147483647, %v6987_v1  ;;  %v6999_v53 = vand.u32 2147483648, %v6987_v1  ;;  %vm6993_vm5 = vweird.f32 %v6987_v1 }
 0xc14   :  { %v7008_v18 = vmul.f32 %v9982_v15, %v7006_v59  ;;  %v13099_v45 = vpop.eup %9983  ;;  %vm7013_vm14 = vweird.f32 %v9982_v15  ;;  %9987 = vtanh.f32 %v6910_v55  ;;  %vm7037_vm10 = vcmp.eq.f32.partialorder %v7036_v25, 8.507059e+37 }
 0xc15   :  { %v7028_v2 = vmul.f32 %v13099_v45, %v13096_v6  ;;  %vm13104_vm1 = vmor %vm7012_vm15, %vm7013_vm14  ;;  %v7000_v17 = vor.u32 1.1754944e-38, %v6999_v53  ;;  %vm6998_vm2 = vcmp.eq.f32.partialorder %v6997_v43, 8.507059e+37  ;;  %vm7033_vm3 = vweird.f32 %v13099_v45 }
 0xc16   :  { %v7009_v4 = vsub.f32 1.0, %v7008_v18  ;;  %vm7034_vm9 = vmor %vm7032_vm8, %vm7033_vm3 }
 0xc17   :  { %v7029_v61 = vsub.f32 1.0, %v7028_v2 }
 0xc18   :  { %v7010_v30 = vmul.f32 %v9982_v15, %v7009_v4 }
 0xc19   :  { %v9986_v49 = vpop.eup %9985  ;;  %v7030_v32 = vmul.f32 %v13099_v45, %v7029_v61 }
 0xc1a   :  { %v6989_v47 = vmul.f32 %v9986_v49, %v6987_v1  ;;  %v7011_v50 = vadd.f32 %v9982_v15, %v7010_v30  ;;  %vm6994_vm4 = vweird.f32 %v9986_v49  ;;  %v9988_v56 = vpop.eup %9987  ;;  %v7039_v30 = vor.u32 1.1754944e-38, %v7038_v22 }
 0xc1b   :  { %vm6995_vm0 = vmor %vm6993_vm5, %vm6994_vm4  ;;  %v7031_v59 = vadd.f32 %v13099_v45, %v7030_v32  ;;  %v7109_v32 = vrot.slane %v13031_v0, 2 }
 0xc1c   :  { %v6990_v48 = vsub.f32 1.0, %v6989_v47  ;;  %v6938_v51 = vpop.f32.mrf.mxu1  ;;  %v7015_v34 = vsel %vm13104_vm1, %v9982_v15, %v7011_v50 }
 0xc1d   :  { %v6973_v29 = vrot.slane %v6938_v51, 6  ;;  %v6964_v41 = vpop.f32.mrf.mxu0  ;;  %v7020_v3 = vsel %vm7017_vm6, %v7019_v52, %v7015_v34  ;;  %v7035_v4 = vsel %vm7034_vm9, %v13099_v45, %v7031_v59 }
 0xc1e   :  { %v6991_v57 = vmul.f32 %v9986_v49, %v6990_v48  ;;  %v6975_v12 = vrot.slane %v6964_v41, 6  ;;  %v7045_v40 = vmul.f32 %v7043_v21, %v7020_v3  ;;  %v7040_v47 = vsel %vm7037_vm10, %v7039_v30, %v7035_v4  ;;  %v7414_v30 = vld [vmem:[#allocation10 + $0x78] sm:$0xff] }
 0xc1f   :  { %v6981_v54 = vadd.f32 %v6973_v29, %v14203_v33 }
 0xc20   :  { %v6992_v5 = vadd.f32 %v9986_v49, %v6991_v57  ;;  %v6983_v38 = vadd.f32 %v6975_v12, %v14158_v10 }
 0xc21   :  { %v9144_v14 = vmul.f32 -1.442695, %v6981_v54 }
 0xc22   :  { %v6996_v24 = vsel %vm6995_vm0, %v9986_v49, %v6992_v5  ;;  %v9145_v26 = vmul.f32 -1.442695, %v6983_v38  ;;  %v6925_v58 = vpop.f32.mrf.mxu3 }
 0xc23   :  { %v7001_v35 = vsel %vm6998_vm2, %v7000_v17, %v6996_v24  ;;  %9989 = vpow2.f32 %v9144_v14  ;;  %v6972_v62 = vrot.slane %v6925_v58, 6  ;;  %v6951_v42 = vpop.f32.mrf.mxu2 }
 0xc24   :  { %v7046_v44 = vmul.f32 %v9988_v56, %v7001_v35  ;;  %9991 = vpow2.f32 %v9145_v26  ;;  %v6940_v13 = vpop.f32.mrf.mxu1  ;;  %v6974_v43 = vrot.slane %v6951_v42, 6 }
 0xc25   :  { %v6980_v28 = vadd.f32 %v6972_v62, %v14159_v23  ;;  %v6966_v16 = vpop.f32.mrf.mxu0 }
 0xc26   :  { %v13115_v20 = vadd.f32 %v7046_v44, %v7045_v40  ;;  %v6982_v34 = vadd.f32 %v6974_v43, %v14160_v8  ;;  %v7408_v43 = vld [vmem:[#allocation10 + $0x48] sm:$0xff] }
 0xc27   :  { %v9143_v39 = vmul.f32 -1.442695, %v6980_v28 }
 0xc28   :  { %9993 = vtanh.f32 %v13115_v20 }
 0xc29   :  { %v9990_v19 = vpop.eup %9989  ;;  %9995 = vpow2.f32 %v9143_v39 }
 0xc2a   :  { %v9992_v1 = vpop.eup %9991  ;;  %v7072_v15 = vadd.f32 1.0, %v9990_v19  ;;  %v6927_v18 = vpop.f32.mrf.mxu3 }
 0xc2b   :  { %v6953_v36 = vpop.f32.mrf.mxu2  ;;  %v13124_v49 = vadd.f32 1.0, %v9992_v1 }
 0xc2c   :  { %9997 = vrcp.f32 %v7072_v15  ;;  %v7084_v61 = vand.u32 2147483648, %v7072_v15  ;;  %vm7078_vm12 = vweird.f32 %v7072_v15  ;;  %v7082_v5 = vand.u32 2147483647, %v7072_v15 }
 0xc2d   :  { %9999 = vrcp.f32 %v13124_v49  ;;  %v7104_v39 = vand.u32 2147483648, %v13124_v49  ;;  %vm7098_vm0 = vweird.f32 %v13124_v49  ;;  %v7102_v59 = vand.u32 2147483647, %v13124_v49 }
 0xc2e   :  { %v9994_v55 = vpop.eup %9993  ;;  %v7085_v21 = vor.u32 1.1754944e-38, %v7084_v61  ;;  %vm7083_vm1 = vcmp.eq.f32.partialorder %v7082_v5, 8.507059e+37  ;;  %v7404_v5 = vld [vmem:[#allocation10 + $0x28] sm:$0xff] }
 0xc2f   :  { %v9996_v50 = vpop.eup %9995  ;;  %v7049_v11 = vmul.f32 %v9994_v55, %v7040_v47  ;;  %v7105_v22 = vor.u32 1.1754944e-38, %v7104_v39  ;;  %vm7103_vm3 = vcmp.eq.f32.partialorder %v7102_v59, 8.507059e+37  ;;  %v7412_v55 = vld [vmem:[#allocation10 + $0x68] sm:$0xff]  ;;  %v7411_v47 = vld [vmem:[#allocation10 + $0x60] sm:$0xff] }
 0xc30   :  { %v7053_v2 = vadd.f32 1.0, %v9996_v50 }
 0xc31   :  { %v7124_v6 = vpack.c.bf16 %v7049_v11, %v7049_v11  ;;  %v7117_v48 = vrot.slane %v7049_v11, 4 }
 0xc32   :  { %v9998_v9 = vpop.eup %9997  ;;  %10001 = vrcp.f32 %v7053_v2  ;;  %v7065_v38 = vand.u32 2147483648, %v7053_v2  ;;  %v7063_v3 = vand.u32 2147483647, %v7053_v2  ;;  %vm7059_vm15 = vweird.f32 %v7053_v2 }
 0xc33   :  { %v7074_v51 = vmul.f32 %v9998_v9, %v7072_v15  ;;  %v7126_v63 = vrot.slane %v7124_v6, 2  ;;  %v13128_v45 = vmax.f32 %v13000_v31, %v7117_v48  ;;  %v10000_v29 = vpop.eup %9999  ;;  %vm7079_vm11 = vweird.f32 %v9998_v9  ;;  %v7410_v6 = vld [vmem:[#allocation10 + $0x58] sm:$0xff] }
 0xc34   :  { %v7094_v54 = vmul.f32 %v10000_v29, %v13124_v49  ;;  %vm7080_vm13 = vmor %vm7078_vm12, %vm7079_vm11  ;;  %10003 = vtanh.f32 %v6982_v34  ;;  %v7066_v58 = vor.u32 1.1754944e-38, %v7065_v38  ;;  %vm7064_vm5 = vcmp.eq.f32.partialorder %v7063_v3, 8.507059e+37  ;;  %v7413_v49 = vld [vmem:[#allocation10 + $0x70] sm:$0xff]  ;;  %v7407_v34 = vld [vmem:[#allocation10 + $0x40] sm:$0xff] }
 0xc35   :  { %v7075_v53 = vsub.f32 1.0, %v7074_v51  ;;  %7136 = vmatmul.bf16.vlgmr.msrb.gmra.mxu3 %v7126_v63  ;;  %7149 = vmatmul.bf16.vlgmr.msra.gmra.mxu1 %v7126_v63  ;;  %vm7099_vm6 = vweird.f32 %v10000_v29 }
 0xc36   :  { %7162 = vmatmul.bf16.vlgmr.msra.gmra.mxu2 %v7126_v63  ;;  %7175 = vmatmul.bf16.vlgmr.msra.gmra.mxu0 %v7126_v63  ;;  %v7095_v24 = vsub.f32 1.0, %v7094_v54  ;;  %vm7100_vm2 = vmor %vm7098_vm0, %vm7099_vm6 }
 0xc37   :  { %v7076_v41 = vmul.f32 %v9998_v9, %v7075_v53  ;;  %7435 = vmatpush.msrb.mxu3 %v7414_v30 }
 0xc38   :  { %v10002_v57 = vpop.eup %10001  ;;  %v7096_v42 = vmul.f32 %v10000_v29, %v7095_v24 }
 0xc39   :  { %v7055_v12 = vmul.f32 %v10002_v57, %v7053_v2  ;;  %v7077_v52 = vadd.f32 %v9998_v9, %v7076_v41  ;;  %vm7060_vm14 = vweird.f32 %v10002_v57  ;;  %7436 = vmatpush.msrb.mxu3 %v7413_v49 }
 0xc3a   :  { %vm7061_vm4 = vmor %vm7059_vm15, %vm7060_vm14  ;;  %v10004_v62 = vpop.eup %10003  ;;  %v7097_v16 = vadd.f32 %v10000_v29, %v7096_v42  ;;  %v7399_v42 = vld [vmem:[#allocation10] sm:$0xff] }
 0xc3b   :  { %v7056_v31 = vsub.f32 1.0, %v7055_v12  ;;  %v7081_v14 = vsel %vm7080_vm13, %v9998_v9, %v7077_v52  ;;  %7437 = vmatpush.msrb.mxu3 %v7412_v55  ;;  %v7409_v9 = vld [vmem:[#allocation10 + $0x50] sm:$0xff] }
 0xc3c   :  { %v7086_v56 = vsel %vm7083_vm1, %v7085_v21, %v7081_v14  ;;  %v7101_v0 = vsel %vm7100_vm2, %v10000_v29, %v7097_v16  ;;  %v7403_v21 = vld [vmem:[#allocation10 + $0x20] sm:$0xff] }
 0xc3d   :  { %v7057_v17 = vmul.f32 %v10002_v57, %v7056_v31  ;;  %v7111_v44 = vmul.f32 %v7109_v32, %v7086_v56  ;;  %v7106_v25 = vsel %vm7103_vm3, %v7105_v22, %v7101_v0  ;;  %7438 = vmatpush.msrb.mxu3 %v7411_v47  ;;  %v7400_v32 = vld [vmem:[#allocation10 + $0x8] sm:$0xff]  ;;  %v7429_v22 = vld [vmem:[#allocation10 + $0xf0] sm:$0xff] }
 0xc3f   :  { %v7058_v26 = vadd.f32 %v10002_v57, %v7057_v17  ;;  %7439 = vmatpush.msrb.mxu3 %v7410_v6 }
 0xc41   :  { %v7062_v35 = vsel %vm7061_vm4, %v10002_v57, %v7058_v26  ;;  %7440 = vmatpush.msrb.mxu3 %v7409_v9 }
 0xc42   :  { %v7067_v40 = vsel %vm7064_vm5, %v7066_v58, %v7062_v35  ;;  %v7401_v58 = vld [vmem:[#allocation10 + $0x10] sm:$0xff] }
 0xc43   :  { %v7112_v13 = vmul.f32 %v10004_v62, %v7067_v40  ;;  %7441 = vmatpush.msrb.mxu3 %v7408_v43  ;;  %v7426_v43 = vld [vmem:[#allocation10 + $0xd8] sm:$0xff] }
 0xc45   :  { %v13133_v28 = vadd.f32 %v7112_v13, %v7111_v44  ;;  %7442 = vmatpush.msrb.mxu3 %v7407_v34  ;;  %v7430_v13 = vld [vmem:[#allocation10 + $0xf8] sm:$0xff]  ;;  %v7315_v34 = vrot.slane %v13115_v20, 6  ;;  %v7423_v20 = vld [vmem:[#allocation10 + $0xc0] sm:$0xff] }
 0xc46   :  { %7455 = vmatpush.msra.mxu1 %v7430_v13 }
 0xc47   :  { %10005 = vtanh.f32 %v13133_v28 }
 0xc48   :  { %7456 = vmatpush.msra.mxu1 %v7429_v22 }
 0xc4d   :  { %v10006_v19 = vpop.eup %10005 }
 0xc4e   :  { %v7115_v1 = vmul.f32 %v10006_v19, %v7106_v25 }
 0xc50   :  { %v7196_v15 = vpack.c.bf16 %v7115_v1, %v7115_v1  ;;  %v7121_v18 = vrot.slane %v7115_v1, 4 }
 0xc52   :  { %v7198_v36 = vrot.slane %v7196_v15, 1  ;;  %v13140_v4 = vmax.f32 %v13055_v27, %v7121_v18  ;;  %v7428_v18 = vld [vmem:[#allocation10 + $0xe8] sm:$0xff] }
 0xc53   :  { %7457 = vmatpush.msra.mxu1 %v7428_v18 }
 0xc54   :  { %7208 = vmatmul.bf16.vlgmr.msra.gmra.mxu3 %v7198_v36  ;;  %7221 = vmatmul.bf16.vlgmr.msrb.gmra.mxu1 %v7198_v36 }
 0xc55   :  { %7234 = vmatmul.bf16.vlgmr.msrb.gmra.mxu2 %v7198_v36  ;;  %7247 = vmatmul.bf16.vlgmr.msrb.gmra.mxu0 %v7198_v36 }
 0xcb2   :  { %v7150_v50 = vpop.f32.mrf.mxu1 }
 0xcb3   :  { %v7185_v11 = vrot.slane %v7150_v50, 2  ;;  %v7176_v2 = vpop.f32.mrf.mxu0 }
 0xcb4   :  { %v7187_v48 = vrot.slane %v7176_v2, 2  ;;  %v7427_v2 = vld [vmem:[#allocation10 + $0xe0] sm:$0xff] }
 0xcb5   :  { %v7193_v27 = vadd.f32 %v7185_v11, %v14245_v37  ;;  %v7406_v37 = vld [vmem:[#allocation10 + $0x38] sm:$0xff]  ;;  %7458 = vmatpush.msra.mxu1 %v7427_v2 }
 0xcb6   :  { %v7195_v51 = vadd.f32 %v7187_v48, %v14246_v60  ;;  %7443 = vmatpush.msrb.mxu3 %v7406_v37  ;;  %v7405_v60 = vld [vmem:[#allocation10 + $0x30] sm:$0xff] }
 0xcb7   :  { %v9147_v63 = vmul.f32 -1.442695, %v7193_v27  ;;  %7459 = vmatpush.msra.mxu1 %v7426_v43 }
 0xcb8   :  { %v9148_v53 = vmul.f32 -1.442695, %v7195_v51  ;;  %v7137_v29 = vpop.f32.mrf.mxu3  ;;  %7444 = vmatpush.msrb.mxu3 %v7405_v60 }
 0xcb9   :  { %10007 = vpow2.f32 %v9147_v63  ;;  %v7184_v41 = vrot.slane %v7137_v29, 2  ;;  %v7163_v57 = vpop.f32.mrf.mxu2 }
 0xcba   :  { %10009 = vpow2.f32 %v9148_v53  ;;  %v7152_v12 = vpop.f32.mrf.mxu1  ;;  %7445 = vmatpush.msrb.mxu3 %v7404_v5  ;;  %v7186_v40 = vrot.slane %v7163_v57, 2  ;;  %v7425_v57 = vld [vmem:[#allocation10 + $0xd0] sm:$0xff] }
 0xcbb   :  { %v7192_v52 = vadd.f32 %v7184_v41, %v14247_v7  ;;  %v7178_v61 = vpop.f32.mrf.mxu0  ;;  %v7402_v7 = vld [vmem:[#allocation10 + $0x18] sm:$0xff]  ;;  %7460 = vmatpush.msra.mxu1 %v7425_v57 }
 0xcbc   :  { %7446 = vmatpush.msrb.mxu3 %v7403_v21  ;;  %v7194_v0 = vadd.f32 %v7186_v40, %v14248_v46  ;;  %v7422_v21 = vld [vmem:[#allocation10 + $0xb8] sm:$0xff]  ;;  %v7486_v40 = vld [vmem:[%s13287_s12 + $0x50] sm:$0xff] }
 0xcbd   :  { %v9146_v54 = vmul.f32 -1.442695, %v7192_v52 }
 0xcbe   :  { %7447 = vmatpush.msrb.mxu3 %v7402_v7 }
 0xcbf   :  { %v10008_v31 = vpop.eup %10007  ;;  %10011 = vpow2.f32 %v9146_v54 }
 0xcc0   :  { %v10010_v38 = vpop.eup %10009  ;;  %v7278_v17 = vadd.f32 1.0, %v10008_v31  ;;  %v7139_v3 = vpop.f32.mrf.mxu3  ;;  %7448 = vmatpush.msrb.mxu3 %v7401_v58  ;;  %v7424_v31 = vld [vmem:[#allocation10 + $0xc8] sm:$0xff] }
 0xcc1   :  { %v7165_v14 = vpop.f32.mrf.mxu2  ;;  %v13145_v24 = vadd.f32 1.0, %v10010_v38  ;;  %7461 = vmatpush.msra.mxu1 %v7424_v31 }
 0xcc2   :  { %10013 = vrcp.f32 %v7278_v17  ;;  %7449 = vmatpush.msrb.mxu3 %v7400_v32  ;;  %v7290_v1 = vand.u32 2147483648, %v7278_v17  ;;  %vm7284_vm9 = vweird.f32 %v7278_v17  ;;  %v7288_v30 = vand.u32 2147483647, %v7278_v17 }
 0xcc3   :  { %10015 = vrcp.f32 %v13145_v24  ;;  %7462 = vmatpush.msra.mxu1 %v7423_v20  ;;  %v7310_v32 = vand.u32 2147483648, %v13145_v24  ;;  %vm7304_vm4 = vweird.f32 %v13145_v24 }
 0xcc4   :  { %7450 = vmatpush.msrb.mxu3 %v7399_v42  ;;  %v7291_v9 = vor.u32 1.1754944e-38, %v7290_v1  ;;  %vm7289_vm13 = vcmp.eq.f32.partialorder %v7288_v30, 8.507059e+37  ;;  %v7420_v42 = vld [vmem:[#allocation10 + $0xa8] sm:$0xff] }
 0xcc5   :  { %v10012_v26 = vpop.eup %10011  ;;  %7463 = vmatpush.msra.mxu1 %v7422_v21  ;;  %v7311_v22 = vor.u32 1.1754944e-38, %v7310_v32  ;;  %v7491_v32 = vld [vmem:[%s13287_s12 + $0x78] sm:$0xff] }
 0xcc6   :  { %v7259_v56 = vadd.f32 1.0, %v10012_v26  ;;  %7496 = vmatpush.msra.mxu2 %v7491_v32 }
 0xcc8   :  { %v10014_v35 = vpop.eup %10013  ;;  %10017 = vrcp.f32 %v7259_v56  ;;  %v7269_v46 = vand.u32 2147483647, %v7259_v56  ;;  %v7271_v47 = vand.u32 2147483648, %v7259_v56  ;;  %vm7265_vm12 = vweird.f32 %v7259_v56 }
 0xcc9   :  { %v7280_v62 = vmul.f32 %v10014_v35, %v7278_v17  ;;  %v13148_v16 = vpop.eup %10015  ;;  %vm7285_vm8 = vweird.f32 %v10014_v35  ;;  %10019 = vtanh.f32 %v7194_v0  ;;  %v7419_v0 = vld [vmem:[#allocation10 + $0xa0] sm:$0xff] }
 0xcca   :  { %v7300_v15 = vmul.f32 %v13148_v16, %v13145_v24  ;;  %vm13153_vm10 = vmor %vm7284_vm9, %vm7285_vm8  ;;  %vm7270_vm15 = vcmp.eq.f32.partialorder %v7269_v46, 8.507059e+37  ;;  %vm7305_vm1 = vweird.f32 %v13148_v16 }
 0xccb   :  { %v7281_v44 = vsub.f32 1.0, %v7280_v62  ;;  %v7308_v62 = vand.u32 2147483647, %v13145_v24  ;;  %vm13169_vm5 = vmor %vm7304_vm4, %vm7305_vm1  ;;  %v7418_v24 = vld [vmem:[#allocation10 + $0x98] sm:$0xff]  ;;  %vm7552_vm4 = vcmask 9216  }
 0xccc   :  { %v7301_v51 = vsub.f32 1.0, %v7300_v15 }
 0xccd   :  { %v7282_v39 = vmul.f32 %v10014_v35, %v7281_v44  ;;  %vm7309_vm6 = vcmp.eq.f32.partialorder %v7308_v62, 8.507059e+37  ;;  %v7489_v62 = vld [vmem:[%s13287_s12 + $0x68] sm:$0xff] }
 0xcce   :  { %v10018_v59 = vpop.eup %10017  ;;  %v7302_v61 = vmul.f32 %v13148_v16, %v7301_v51 }
 0xccf   :  { %v7261_v19 = vmul.f32 %v10018_v59, %v7259_v56  ;;  %v7283_v25 = vadd.f32 %v10014_v35, %v7282_v39  ;;  %vm7266_vm11 = vweird.f32 %v10018_v59  ;;  %v10020_v52 = vpop.eup %10019  ;;  %v7421_v56 = vld [vmem:[#allocation10 + $0xb0] sm:$0xff] }
 0xcd0   :  { %vm7267_vm14 = vmor %vm7265_vm12, %vm7266_vm11  ;;  %v7303_v58 = vadd.f32 %v13148_v16, %v7302_v61  ;;  %7464 = vmatpush.msra.mxu1 %v7421_v56  ;;  %v7381_v61 = vrot.slane %v13133_v28, 2 }
 0xcd1   :  { %v7262_v36 = vsub.f32 1.0, %v7261_v19  ;;  %v7222_v49 = vpop.f32.mrf.mxu1  ;;  %v7287_v48 = vsel %vm13153_vm10, %v10014_v35, %v7283_v25 }
 0xcd2   :  { %v7253_v50 = vadd.f32 %v7222_v49, %v14203_v33  ;;  %v7248_v11 = vpop.f32.mrf.mxu0  ;;  %v7272_v33 = vor.u32 1.1754944e-38, %v7271_v47  ;;  %v7292_v41 = vsel %vm7289_vm13, %v7291_v9, %v7287_v48  ;;  %7465 = vmatpush.msra.mxu1 %v7420_v42  ;;  %v7487_v42 = vld [vmem:[%s13287_s12 + $0x58] sm:$0xff] }
 0xcd3   :  { %v7263_v6 = vmul.f32 %v10018_v59, %v7262_v36  ;;  %v7255_v27 = vadd.f32 %v7248_v11, %v14158_v10  ;;  %v7317_v5 = vmul.f32 %v7315_v34, %v7292_v41  ;;  %v7417_v36 = vld [vmem:[#allocation10 + $0x90] sm:$0xff] }
 0xcd4   :  { %v9150_v63 = vmul.f32 -1.442695, %v7253_v50  ;;  %7466 = vmatpush.msra.mxu1 %v7419_v0  ;;  %v7415_v50 = vld [vmem:[#allocation10 + $0x80] sm:$0xff]  ;;  %v7481_v0 = vld [vmem:[%s13287_s12 + $0x28] sm:$0xff] }
 0xcd5   :  { %v7264_v53 = vadd.f32 %v10018_v59, %v7263_v6  ;;  %v9151_v29 = vmul.f32 -1.442695, %v7255_v27 }
 0xcd6   :  { %10021 = vpow2.f32 %v9150_v63  ;;  %7467 = vmatpush.msra.mxu1 %v7418_v24  ;;  %v7478_v24 = vld [vmem:[%s13287_s12 + $0x10] sm:$0xff] }
 0xcd7   :  { %v7268_v12 = vsel %vm7267_vm14, %v10018_v59, %v7264_v53  ;;  %10023 = vpow2.f32 %v9151_v29  ;;  %v7209_v10 = vpop.f32.mrf.mxu3  ;;  %v7307_v59 = vsel %vm13169_vm5, %v13148_v16, %v7303_v58  ;;  %v7416_v16 = vld [vmem:[#allocation10 + $0x88] sm:$0xff] }
 0xcd8   :  { %v7273_v37 = vsel %vm7270_vm15, %v7272_v33, %v7268_v12  ;;  %v7252_v54 = vadd.f32 %v7209_v10, %v14159_v23  ;;  %v7235_v60 = vpop.f32.mrf.mxu2  ;;  %v7312_v15 = vsel %vm7309_vm6, %v7311_v22, %v7307_v59  ;;  %7468 = vmatpush.msra.mxu1 %v7417_v36  ;;  %v7482_v59 = vld [vmem:[%s13287_s12 + $0x30] sm:$0xff]  ;;  %v7480_v22 = vld [vmem:[%s13287_s12 + $0x20] sm:$0xff]  ;;  %v7522_v36 = vld [vmem:[%s13289_s14 + $0x28] sm:$0xff] }
 0xcd9   :  { %v7318_v38 = vmul.f32 %v10020_v52, %v7273_v37  ;;  %v7224_v17 = vpop.f32.mrf.mxu1  ;;  %v7254_v48 = vadd.f32 %v7235_v60, %v14160_v8 }
 0xcda   :  { %v9149_v3 = vmul.f32 -1.442695, %v7252_v54  ;;  %v7250_v14 = vpop.f32.mrf.mxu0  ;;  %7469 = vmatpush.msra.mxu1 %v7416_v16  ;;  %v9522_v16 = vld [vmem:[%s13286_s11] ss:$0 sm:$0xff] }
 0xcdb   :  { %v7319_v7 = vadd.f32 %v7318_v38, %v7317_v5 }
 0xcdc   :  { %v10022_v26 = vpop.eup %10021  ;;  %10025 = vpow2.f32 %v9149_v3  ;;  %7470 = vmatpush.msra.mxu1 %v7415_v50 }
 0xcdd   :  { %v10024_v23 = vpop.eup %10023  ;;  %10027 = vtanh.f32 %v7319_v7  ;;  %v7344_v35 = vadd.f32 1.0, %v10022_v26 }
 0xcde   :  { %v13173_v13 = vadd.f32 1.0, %v10024_v23 }
 0xcdf   :  { %10029 = vrcp.f32 %v7344_v35  ;;  %v7211_v44 = vpop.f32.mrf.mxu3  ;;  %v7356_v51 = vand.u32 2147483648, %v7344_v35  ;;  %vm7350_vm2 = vweird.f32 %v7344_v35  ;;  %v7354_v53 = vand.u32 2147483647, %v7344_v35 }
 0xce0   :  { %v7237_v39 = vpop.f32.mrf.mxu2  ;;  %10031 = vrcp.f32 %v13173_v13  ;;  %v7376_v3 = vand.u32 2147483648, %v13173_v13  ;;  %vm7370_vm14 = vweird.f32 %v13173_v13  ;;  %v7374_v14 = vand.u32 2147483647, %v13173_v13  ;;  %v7485_v44 = vld [vmem:[%s13287_s12 + $0x48] sm:$0xff] }
 0xce1   :  { %v7357_v57 = vor.u32 1.1754944e-38, %v7356_v51  ;;  %vm7355_vm10 = vcmp.eq.f32.partialorder %v7354_v53, 8.507059e+37  ;;  %v7483_v39 = vld [vmem:[%s13287_s12 + $0x38] sm:$0xff] }
 0xce2   :  { %v10026_v19 = vpop.eup %10025  ;;  %v7377_v21 = vor.u32 1.1754944e-38, %v7376_v3  ;;  %vm7375_vm1 = vcmp.eq.f32.partialorder %v7374_v14, 8.507059e+37 }
 0xce3   :  { %v10028_v25 = vpop.eup %10027  ;;  %v7325_v1 = vadd.f32 1.0, %v10026_v19  ;;  %v7479_v19 = vld [vmem:[%s13287_s12 + $0x18] sm:$0xff] }
 0xce4   :  { %v7321_v18 = vmul.f32 %v10028_v25, %v7312_v15  ;;  %v7477_v25 = vld [vmem:[%s13287_s12 + $0x8] sm:$0xff]  ;;  %v7524_v15 = vld [vmem:[%s13289_s14 + $0x38] sm:$0xff] }
 0xce5   :  { %v10030_v30 = vpop.eup %10029  ;;  %10033 = vrcp.f32 %v7325_v1  ;;  %v7335_v33 = vand.u32 2147483647, %v7325_v1  ;;  %vm7331_vm9 = vweird.f32 %v7325_v1  ;;  %7540 = vmatpush.msra.mxu0 %v7524_v15 }
 0xce6   :  { %v7346_v49 = vmul.f32 %v10030_v30, %v7344_v35  ;;  %v7389_v55 = vrot.slane %v7321_v18, 6  ;;  %v10032_v11 = vpop.eup %10031  ;;  %vm7351_vm0 = vweird.f32 %v10030_v30  ;;  %10035 = vtanh.f32 %v7254_v48  ;;  %v7490_v35 = vld [vmem:[%s13287_s12 + $0x70] sm:$0xff]  ;;  %v7517_v48 = vld [vmem:[%s13289_s14] sm:$0xff] }
 0xce7   :  { %v7366_v63 = vmul.f32 %v10032_v11, %v13173_v13  ;;  %vm7352_vm3 = vmor %vm7350_vm2, %vm7351_vm0  ;;  %vm7336_vm12 = vcmp.eq.f32.partialorder %v7335_v33, 8.507059e+37  ;;  %vm7371_vm13 = vweird.f32 %v10032_v11  ;;  %7497 = vmatpush.msra.mxu2 %v7490_v35  ;;  %v7484_v13 = vld [vmem:[%s13287_s12 + $0x40] sm:$0xff]  ;;  %v7523_v18 = vld [vmem:[%s13289_s14 + $0x30] sm:$0xff] }
 0xce8   :  { %v7347_v46 = vsub.f32 1.0, %v7346_v49  ;;  %v7391_v47 = vmax.f32 %v13128_v45, %v7389_v55  ;;  %v7337_v45 = vand.u32 2147483648, %v7325_v1  ;;  %vm7372_vm15 = vmor %vm7370_vm14, %vm7371_vm13  ;;  %7541 = vmatpush.msra.mxu0 %v7523_v18  ;;  %v7520_v49 = vld [vmem:[%s13289_s14 + $0x18] sm:$0xff]  ;;  %v7519_v55 = vld [vmem:[%s13289_s14 + $0x10] sm:$0xff] }
 0xce9   :  { %v7367_v34 = vsub.f32 1.0, %v7366_v63  ;;  %7498 = vmatpush.msra.mxu2 %v7489_v62 }
 0xcea   :  { %v7348_v2 = vmul.f32 %v10030_v30, %v7347_v46  ;;  %7451 = vmatmul.f32.vlgmr.msrb.gmra.mxu3 %v7391_v47  ;;  %v7338_v12 = vor.u32 1.1754944e-38, %v7337_v45  ;;  %7542 = vmatpush.msra.mxu0 %v7522_v36 }
 0xceb   :  { %v10034_v6 = vpop.eup %10033  ;;  %v7368_v54 = vmul.f32 %v10032_v11, %v7367_v34 }
 0xcec   :  { %v7327_v27 = vmul.f32 %v10034_v6, %v7325_v1  ;;  %v7349_v9 = vadd.f32 %v10030_v30, %v7348_v2  ;;  %vm7332_vm8 = vweird.f32 %v10034_v6  ;;  %v10036_v37 = vpop.eup %10035  ;;  %v7476_v1 = vld [vmem:[%s13287_s12] sm:$0xff] }
 0xced   :  { %vm7333_vm11 = vmor %vm7331_vm9, %vm7332_vm8  ;;  %v7369_v17 = vadd.f32 %v10032_v11, %v7368_v54 }
 0xcee   :  { %v7328_v43 = vsub.f32 1.0, %v7327_v27  ;;  %v7353_v41 = vsel %vm7352_vm3, %v10030_v30, %v7349_v9  ;;  %v7521_v30 = vld [vmem:[%s13289_s14 + $0x20] sm:$0xff] }
 0xcef   :  { %v7358_v10 = vsel %vm7355_vm10, %v7357_v57, %v7353_v41  ;;  %v7373_v20 = vsel %vm7372_vm15, %v10032_v11, %v7369_v17  ;;  %7543 = vmatpush.msra.mxu0 %v7521_v30  ;;  %v9523_v27 = vld [vmem:[%s13288_s13] ss:$0 sm:$0xff]  ;;  %s10207_s13 = smov [#allocation11]  }
 0xcf0   :  { %v7329_v29 = vmul.f32 %v10034_v6, %v7328_v43  ;;  %v7383_v31 = vmul.f32 %v7381_v61, %v7358_v10  ;;  %v7378_v7 = vsel %vm7375_vm1, %v7377_v21, %v7373_v20  ;;  %v9524_v43 = vld [vmem:[%s13290_s15] ss:$0 sm:$0xff] }
 0xcf1   :  { %7544 = vmatpush.msra.mxu0 %v7520_v49 }
 0xcf2   :  { %v7330_v8 = vadd.f32 %v10034_v6, %v7329_v29 }
 0xcf3   :  { %7545 = vmatpush.msra.mxu0 %v7519_v55 }
 0xcf4   :  { %v7334_v52 = vsel %vm7333_vm11, %v10034_v6, %v7330_v8  ;;  %v7518_v6 = vld [vmem:[%s13289_s14 + $0x8] sm:$0xff]  ;;  %s7583_s14 = sshll.u32 %s10207_s13, 4  ;;  %s7584_s14 = int_to_ptr.vmem [resolvable:$true] %s7583_s14 }
 0xcf5   :  { %v7339_v60 = vsel %vm7336_vm12, %v7338_v12, %v7334_v52  ;;  %7546 = vmatpush.msra.mxu0 %v7518_v6 }
 0xcf6   :  { %v7384_v5 = vmul.f32 %v10036_v37, %v7339_v60 }
 0xcf7   :  { %7547 = vmatpush.msra.mxu0 %v7517_v48 }
 0xcf8   :  { %v7385_v38 = vadd.f32 %v7384_v5, %v7383_v31 }
 0xcfa   :  { %10037 = vtanh.f32 %v7385_v38 }
 0xd00   :  { %v10038_v28 = vpop.eup %10037 }
 0xd01   :  { %v7387_v26 = vmul.f32 %v10038_v28, %v7378_v7 }
 0xd03   :  { %v7393_v58 = vrot.slane %v7387_v26, 2 }
 0xd05   :  { %v7395_v56 = vmax.f32 %v13140_v4, %v7393_v58  ;;  %v7488_v4 = vld [vmem:[%s13287_s12 + $0x60] sm:$0xff] }
 0xd06   :  { %7499 = vmatpush.msra.mxu2 %v7488_v4 }
 0xd07   :  { %v7397_v23 = vrot.slane %v7395_v56, 6 }
 0xd08   :  { %7500 = vmatpush.msra.mxu2 %v7487_v42 }
 0xd09   :  { %7471 = vmatmul.f32.vlgmr.msra.gmra.mxu1 %v7397_v23 }
 0xd0a   :  { %7501 = vmatpush.msra.mxu2 %v7486_v40 }
 0xd0c   :  { %7502 = vmatpush.msra.mxu2 %v7485_v44 }
 0xd0e   :  { %7503 = vmatpush.msra.mxu2 %v7484_v13 }
 0xd10   :  { %7504 = vmatpush.msra.mxu2 %v7483_v39 }
 0xd12   :  { %7505 = vmatpush.msra.mxu2 %v7482_v59 }
 0xd14   :  { %7506 = vmatpush.msra.mxu2 %v7481_v0 }
 0xd16   :  { %7507 = vmatpush.msra.mxu2 %v7480_v22 }
 0xd18   :  { %7508 = vmatpush.msra.mxu2 %v7479_v19 }
 0xd1a   :  { %7509 = vmatpush.msra.mxu2 %v7478_v24 }
 0xd1c   :  { %7510 = vmatpush.msra.mxu2 %v7477_v25 }
 0xd1e   :  { %7511 = vmatpush.msra.mxu2 %v7476_v1 }
 0xd6d   :  { %v7452_v46 = vpop.f32.mrf.mxu3 }
 0xd6e   :  { %v7453_v47 = vadd.f32 %v9522_v16, %v7452_v46 }
 0xd86   :  { %v7472_v50 = vpop.f32.mrf.mxu1 }
 0xd87   :  { %v7473_v11 = vadd.f32 %v7472_v50, %v7453_v47 }
 0xd89   :  { %v7475_v2 = vmax.f32 %v7473_v11, 0.0 }
 0xd8b   :  { %7512 = vmatmul.f32.vlgmr.msra.gmra.mxu2 %v7475_v2 }
 0xe0e   :  { %v7513_v9 = vpop.f32.mrf.mxu2 }
 0xe0f   :  { %v7514_v51 = vadd.f32 %v9523_v27, %v7513_v9 }
 0xe11   :  { %v7516_v63 = vmax.f32 %v7514_v51, 0.0 }
 0xe13   :  { %9152 = vmatmul.msk.f32.vlgmr.msra.gmra.mxu0 %vm1050_vm7, %v7516_v63 }
 0xe90   :  { %v7549_v53 = vpop.f32.mrf.mxu0 }
 0xe91   :  { %v7550_v45 = vadd.f32 %v9524_v43, %v7549_v53 }
 0xe93   :  { %v7553_v29 = vsel %vm7552_vm4, %v7550_v45, -inf }
 0xe94   :  { %7554 = vmax.xlane.f32.xlu0 %v7553_v29 }
 0xf07   :  { %v7555_v33 = vpop.xlane.xlu0 %7554 }
 0xf08   :  { %v7556_v41 = vsub.f32 %v7550_v45, %v7555_v33 }
 0xf0a   :  { %v7557_v57 = vmul.f32 1.442695, %v7556_v41 }
 0xf0c   :  { %10039 = vpow2.f32 %v7557_v57 }
 0xf12   :  { %v10040_v34 = vpop.eup %10039 }
 0xf13   :  { %v7559_v8 = vsel %vm7552_vm4, %v10040_v34, 0.0 }
 0xf14   :  { %7560 = vadd.xlane.f32.xlu0 %v7559_v8 }
 0xf87   :  { %v7561_v12 = vpop.xlane.xlu0 %7560 }
 0xf88   :  { %10041 = vrcp.f32 %v7561_v12  ;;  %v7573_v37 = vand.u32 2147483648, %v7561_v12  ;;  %v7571_v60 = vand.u32 2147483647, %v7561_v12  ;;  %vm7567_vm5 = vweird.f32 %v7561_v12 }
 0xf8a   :  { %v7574_v5 = vor.u32 1.1754944e-38, %v7573_v37  ;;  %vm7572_vm0 = vcmp.eq.f32.partialorder %v7571_v60, 8.507059e+37 }
 0xf8e   :  { %v10042_v10 = vpop.eup %10041 }
 0xf8f   :  { %v7563_v52 = vmul.f32 %v10042_v10, %v7561_v12  ;;  %vm7568_vm7 = vweird.f32 %v10042_v10 }
 0xf90   :  { %vm7569_vm6 = vmor %vm7567_vm5, %vm7568_vm7 }
 0xf91   :  { %v7564_v61 = vsub.f32 1.0, %v7563_v52 }
 0xf93   :  { %v7565_v54 = vmul.f32 %v10042_v10, %v7564_v61 }
 0xf95   :  { %v7566_v31 = vadd.f32 %v10042_v10, %v7565_v54 }
 0xf97   :  { %v7570_v38 = vsel %vm7569_vm6, %v10042_v10, %v7566_v31 }
 0xf98   :  { %v7575_v17 = vsel %vm7572_vm0, %v7574_v5, %v7570_v38 }
 0xf99   :  { %v7576_v3 = vmul.f32 %v10040_v34, %v7575_v17 }
 0xf9b   :  { %7577 = vst.msk [vmem:[#allocation11] sm:$0x3] %vm7552_vm4, %v7576_v3 }
 0xf9c   :  { %7588 = dma.vmem_to_hbm [thread:$0]  %s7584_s14, 32, %s7586_s30, [#allocation4]  }
 0xf9d   :  { %10193 = dma.done.wait [#allocation4], 32  }
 0xf9e   :  { %10194 = vsyncadd [#allocation4], 4294967264 }
 0xf9f   :  { %7593 = vsyncpa [#allocation3], 1 }
 0xfa0   :  { %7594 = vsyncpa [#allocation6], 1 }
 0xfa1   :  { %7595 = vsyncpa [#allocation9], 1 }
 0xfa2   :  { %7596 = vsyncpa [#allocation4], 1 }

</bundles_post_ra>
